<compile_context>
chip_gen: v5e
topology: v5e:2x2
jax: 0.10.0
libtpu: 0.0.40
codegen_flags: <defaults>
</compile_context>

<pallas_src>
import jax
import jax.numpy as jnp
from jax.experimental import pallas as pl
from jax.experimental.pallas import tpu as pltpu

IN_FEATURES_IMG = 64 * 15 * 15          # 14400
HIDDEN = 256
TK = 7168                                # fc1 main reduction tile (mult. of 128)
K_MAIN = (IN_FEATURES_IMG // TK) * TK    # 14336 = 2 * TK
K_TILES = K_MAIN // TK                   # 2 grid steps


def _critic_kernel(tail_ref, w1t_ref, x_ref, w1_ref,
                   w2_ref, b2_ref, w3_ref, b3_ref, out_ref, acc_ref):
    k = pl.program_id(0)

    @pl.when(k == 0)
    def _():
        # Accumulator init = (zero-padded) tail contribution
        # [x[:, K_MAIN:], action, 1.0] @ [W1_tail; b1]  — the fc1 bias is
        # folded in via the 1.0 column / b1 row, so no separate bias add.
        acc_ref[...] = jnp.dot(tail_ref[...], w1t_ref[...],
                               preferred_element_type=jnp.float32)

    # Main fc1 partial product: activation tile cast to bf16 in-kernel
    # (weights pre-cast at init); f32 accumulation in VMEM scratch.
    acc_ref[...] += jnp.dot(x_ref[...].astype(jnp.bfloat16), w1_ref[...],
                            preferred_element_type=jnp.float32)

    @pl.when(k == pl.num_programs(0) - 1)
    def _():
        h1 = jnp.maximum(acc_ref[...], 0.0)
        # fc2 in bf16 (weights pre-cast), f32 accumulate.
        h2 = jnp.dot(h1.astype(jnp.bfloat16), w2_ref[...],
                     preferred_element_type=jnp.float32)
        h2 = jnp.maximum(h2 + b2_ref[...], 0.0)
        # fc3: a (B,256)@(256,1) matmul has a lane-width-1 MXU output path;
        # do it on the VPU/XLU instead (w3 passed as a (1, 256) row).
        q = jnp.sum(h2 * w3_ref[...], axis=-1, keepdims=True) + b3_ref[...]
        out_ref[...] = q.astype(out_ref.dtype)


def prepare_critic_params(params):
    """One-time parameter preprocessing (call once at init, NOT per forward)."""
    w1, b1, w2, b2, w3, b3 = params          # w1: [d_in, 256]  ([in, out])
    d_in = w1.shape[0]
    action_dim = d_in - IN_FEATURES_IMG
    tail_len = (IN_FEATURES_IMG - K_MAIN) + action_dim       # 64 + action_dim
    # +1 row for the folded fc1 bias (matched by a 1.0 column in `tail`).
    tail_pad = ((tail_len + 1 + 127) // 128) * 128

    w1_main = w1[:K_MAIN].astype(jnp.bfloat16)                # [14336, 256] bf16
    w1_tail = jnp.zeros((tail_pad, HIDDEN), jnp.float32)
    w1_tail = w1_tail.at[:tail_len].set(w1[K_MAIN:])          # tail weight rows
    w1_tail = w1_tail.at[tail_len].set(
        jnp.asarray(b1, jnp.float32).reshape(HIDDEN))         # folded b1 row

    return dict(
        w1_main=w1_main,
        w1_tail=w1_tail,
        w2=jnp.asarray(w2, jnp.bfloat16),
        b2=jnp.asarray(b2, jnp.float32).reshape(1, HIDDEN),
        w3=jnp.asarray(w3, jnp.float32).reshape(1, HIDDEN),
        b3=jnp.asarray(b3, jnp.float32).reshape(1, 1),
    )


@jax.jit
def critic_forward(x, action, prep):
    """x: [B, 14400] f32, action: [B, action_dim] f32 -> [B, 1] f32."""
    B = x.shape[0]
    tail_pad = prep["w1_tail"].shape[0]

    # Tiny per-call glue: last 64 x-features + action + the bias 1.0 column.
    tail = jnp.concatenate(
        [x[:, K_MAIN:], action, jnp.ones((B, 1), x.dtype)], axis=1)
    tail = jnp.pad(tail, ((0, 0), (0, tail_pad - tail.shape[1])))

    grid_spec = pltpu.PrefetchScalarGridSpec(
        num_scalar_prefetch=0,
        grid=(K_TILES,),
        in_specs=[
            pl.BlockSpec((B, tail_pad), lambda k: (0, 0)),       # tail block
            pl.BlockSpec((tail_pad, HIDDEN), lambda k: (0, 0)),  # w1 tail + b1
            pl.BlockSpec((B, TK), lambda k: (0, k)),             # x main tile
            pl.BlockSpec((TK, HIDDEN), lambda k: (k, 0)),        # w1 main (bf16)
            pl.BlockSpec((HIDDEN, HIDDEN), lambda k: (0, 0)),    # w2 (bf16)
            pl.BlockSpec((1, HIDDEN), lambda k: (0, 0)),         # b2
            pl.BlockSpec((1, HIDDEN), lambda k: (0, 0)),         # w3 row
            pl.BlockSpec((1, 1), lambda k: (0, 0)),              # b3
        ],
        out_specs=pl.BlockSpec((B, 1), lambda k: (0, 0)),
        scratch_shapes=[pltpu.VMEM((B, HIDDEN), jnp.float32)],
    )

    return pl.pallas_call(
        _critic_kernel,
        out_shape=jax.ShapeDtypeStruct((B, 1), jnp.float32),
        grid_spec=grid_spec,
        compiler_params=pltpu.CompilerParams(
            dimension_semantics=("arbitrary",)),
    )(tail, prep["w1_tail"], x, prep["w1_main"],
      prep["w2"], prep["b2"], prep["w3"], prep["b3"])


def init_params(key, action_dim):
    """Deterministic synthetic params (shapes match the PyTorch module)."""
    d_in = IN_FEATURES_IMG + action_dim
    k1, k2, k3 = jax.random.split(key, 3)
    # Stored already transposed ([in, out]) so the forward does x @ W.
    w1 = jax.random.normal(k1, (d_in, HIDDEN), jnp.float32) * (1.0 / jnp.sqrt(d_in))
    b1 = jnp.full((1, HIDDEN), 0.01, jnp.float32)
    w2 = jax.random.normal(k2, (HIDDEN, HIDDEN), jnp.float32) * (1.0 / jnp.sqrt(HIDDEN))
    b2 = jnp.full((1, HIDDEN), 0.01, jnp.float32)
    w3 = jax.random.normal(k3, (HIDDEN, 1), jnp.float32) * (1.0 / jnp.sqrt(HIDDEN))
    b3 = jnp.full((1, 1), 0.01, jnp.float32)
    return (w1, b1, w2, b2, w3, b3)


def critic_reference(x, action, params):
    w1, b1, w2, b2, w3, b3 = params
    h = jnp.concatenate([x, action], axis=1)
    h = jnp.maximum(h @ w1 + b1, 0.0)
    h = jnp.maximum(h @ w2 + b2, 0.0)
    return h @ w3 + b3


if __name__ == "__main__":
    key = jax.random.PRNGKey(0)
    k_p, k_x, k_a = jax.random.split(key, 3)

    B = 2
    action_dim = 4
    params = init_params(k_p, action_dim)
    prep = prepare_critic_params(params)      # one-time preprocessing

    x = jax.random.normal(k_x, (B, IN_FEATURES_IMG), jnp.float32)
    action = jax.random.normal(k_a, (B, action_dim), jnp.float32)

    out = critic_forward(x, action, prep)
    out = jax.block_until_ready(out)

    ref = critic_reference(x, action, params)
    assert out.shape == (B, 1)
    # bf16 weights/activations over a ~14k-term reduction (f32 accumulate) +
    # bf16 fc2: loosen tolerance vs. the pure-f32 reference.
    assert jnp.allclose(out, ref, atol=5e-2, rtol=5e-2), (out, ref)
    print("KERNEL_OK")
</pallas_src>

<mosaic_0001>
module attributes {stable_mosaic.version = 11 : i64} {
  func.func @_critic_kernel(%arg0: i32, %arg1: memref<2x128xf32, #tpu.memory_space<vmem>>, %arg2: memref<128x256xf32, #tpu.memory_space<vmem>>, %arg3: memref<2x7168xf32, #tpu.memory_space<vmem>>, %arg4: memref<7168x256xbf16, #tpu.memory_space<vmem>>, %arg5: memref<256x256xbf16, #tpu.memory_space<vmem>>, %arg6: memref<1x256xf32, #tpu.memory_space<vmem>>, %arg7: memref<1x256xf32, #tpu.memory_space<vmem>>, %arg8: memref<1x1xf32, #tpu.memory_space<vmem>>, %arg9: memref<2x1xf32, #tpu.memory_space<vmem>>, %arg10: memref<2x256xf32, #tpu.memory_space<vmem>>) attributes {dimension_semantics = [#tpu.dimension_semantics<arbitrary>], iteration_bounds = array<i64: 2>, scalar_prefetch = 0 : i64, scratch_operands = 1 : i64, tpu.core_type = #tpu.core_type<tc>, window_params = [{pipeline_mode = #tpu.pipeline_mode<synchronous>, transform_indices = @transform_0, window_bounds = array<i64: 2, 128>}, {pipeline_mode = #tpu.pipeline_mode<synchronous>, transform_indices = @transform_1, window_bounds = array<i64: 128, 256>}, {transform_indices = @transform_2, window_bounds = array<i64: 2, 7168>}, {transform_indices = @transform_3, window_bounds = array<i64: 7168, 256>}, {pipeline_mode = #tpu.pipeline_mode<synchronous>, transform_indices = @transform_4, window_bounds = array<i64: 256, 256>}, {pipeline_mode = #tpu.pipeline_mode<synchronous>, transform_indices = @transform_5, window_bounds = array<i64: 1, 256>}, {pipeline_mode = #tpu.pipeline_mode<synchronous>, transform_indices = @transform_6, window_bounds = array<i64: 1, 256>}, {pipeline_mode = #tpu.pipeline_mode<synchronous>, transform_indices = @transform_7, window_bounds = array<i64: 1, 1>}, {pipeline_mode = #tpu.pipeline_mode<synchronous>, transform_indices = @transform_8, window_bounds = array<i64: 2, 1>}]} {
    %c0_i32 = arith.constant 0 : i32
    %0 = arith.cmpi eq, %arg0, %c0_i32 : i32
    %1 = arith.extui %0 : i1 to i32
    %c0_i32_0 = arith.constant 0 : i32
    %2 = arith.cmpi ne, %1, %c0_i32_0 : i32
    scf.if %2 {
      %c0_9 = arith.constant 0 : index
      %c0_10 = arith.constant 0 : index
      %13 = vector.load %arg1[%c0_9, %c0_10] : memref<2x128xf32, #tpu.memory_space<vmem>>, vector<2x128xf32>
      %c0_11 = arith.constant 0 : index
      %c0_12 = arith.constant 0 : index
      %14 = vector.load %arg2[%c0_11, %c0_12] : memref<128x256xf32, #tpu.memory_space<vmem>>, vector<128x256xf32>
      %cst_13 = arith.constant dense<0.000000e+00> : vector<2x256xf32>
      %15 = tpu.matmul %13, %14, %cst_13 {dimension_numbers = #tpu.dot_dimension_numbers<[1], [0], [0], [1], [0, 0, 1, 1], [], []>} : vector<2x128xf32>, vector<128x256xf32>, vector<2x256xf32> -> vector<2x256xf32>
      %c0_14 = arith.constant 0 : index
      %c0_15 = arith.constant 0 : index
      %16 = vector.load %arg10[%c0_14, %c0_15] : memref<2x256xf32, #tpu.memory_space<vmem>>, vector<2x256xf32>
      tpu.vector_store %arg10[%c0_14, %c0_15], %15 {strides = array<i32>} : memref<2x256xf32, #tpu.memory_space<vmem>>, vector<2x256xf32>,
    } else {
    }
    %c0 = arith.constant 0 : index
    %c0_1 = arith.constant 0 : index
    %3 = vector.load %arg10[%c0, %c0_1] : memref<2x256xf32, #tpu.memory_space<vmem>>, vector<2x256xf32>
    %c0_2 = arith.constant 0 : index
    %c0_3 = arith.constant 0 : index
    %4 = vector.load %arg3[%c0_2, %c0_3] : memref<2x7168xf32, #tpu.memory_space<vmem>>, vector<2x7168xf32>
    %5 = arith.truncf %4 : vector<2x7168xf32> to vector<2x7168xbf16>
    %c0_4 = arith.constant 0 : index
    %c0_5 = arith.constant 0 : index
    %6 = vector.load %arg4[%c0_4, %c0_5] : memref<7168x256xbf16, #tpu.memory_space<vmem>>, vector<7168x256xbf16>
    %cst = arith.constant dense<0.000000e+00> : vector<2x256xf32>
    %7 = tpu.matmul %5, %6, %cst {dimension_numbers = #tpu.dot_dimension_numbers<[1], [0], [0], [1], [0, 0, 1, 1], [], []>} : vector<2x7168xbf16>, vector<7168x256xbf16>, vector<2x256xf32> -> vector<2x256xf32>
    %8 = arith.addf %3, %7 : vector<2x256xf32>
    %c0_6 = arith.constant 0 : index
    %c0_7 = arith.constant 0 : index
    %9 = vector.load %arg10[%c0_6, %c0_7] : memref<2x256xf32, #tpu.memory_space<vmem>>, vector<2x256xf32>
    tpu.vector_store %arg10[%c0_6, %c0_7], %8 {strides = array<i32>} : memref<2x256xf32, #tpu.memory_space<vmem>>, vector<2x256xf32>,
    %c1_i32 = arith.constant 1 : i32
    %10 = arith.cmpi eq, %arg0, %c1_i32 : i32
    %11 = arith.extui %10 : i1 to i32
    %c0_i32_8 = arith.constant 0 : i32
    %12 = arith.cmpi ne, %11, %c0_i32_8 : i32
    scf.if %12 {
      %c0_9 = arith.constant 0 : index
      %c0_10 = arith.constant 0 : index
      %13 = vector.load %arg10[%c0_9, %c0_10] : memref<2x256xf32, #tpu.memory_space<vmem>>, vector<2x256xf32>
      %cst_11 = arith.constant 0.000000e+00 : f32
      %14 = vector.broadcast %cst_11 : f32 to vector<2x256xf32>
      %15 = arith.maximumf %13, %14 : vector<2x256xf32>
      %16 = arith.truncf %15 : vector<2x256xf32> to vector<2x256xbf16>
      %c0_12 = arith.constant 0 : index
      %c0_13 = arith.constant 0 : index
      %17 = vector.load %arg5[%c0_12, %c0_13] : memref<256x256xbf16, #tpu.memory_space<vmem>>, vector<256x256xbf16>
      %cst_14 = arith.constant dense<0.000000e+00> : vector<2x256xf32>
      %18 = tpu.matmul %16, %17, %cst_14 {dimension_numbers = #tpu.dot_dimension_numbers<[1], [0], [0], [1], [0, 0, 1, 1], [], []>} : vector<2x256xbf16>, vector<256x256xbf16>, vector<2x256xf32> -> vector<2x256xf32>
      %c0_15 = arith.constant 0 : index
      %c0_16 = arith.constant 0 : index
      %19 = vector.load %arg6[%c0_15, %c0_16] : memref<1x256xf32, #tpu.memory_space<vmem>>, vector<1x256xf32>
      %20 = vector.broadcast %19 : vector<1x256xf32> to vector<2x256xf32>
      %21 = arith.addf %18, %20 : vector<2x256xf32>
      %cst_17 = arith.constant 0.000000e+00 : f32
      %22 = vector.broadcast %cst_17 : f32 to vector<2x256xf32>
      %23 = arith.maximumf %21, %22 : vector<2x256xf32>
      %c0_18 = arith.constant 0 : index
      %c0_19 = arith.constant 0 : index
      %24 = vector.load %arg7[%c0_18, %c0_19] : memref<1x256xf32, #tpu.memory_space<vmem>>, vector<1x256xf32>
      %25 = vector.broadcast %24 : vector<1x256xf32> to vector<2x256xf32>
      %26 = arith.mulf %23, %25 : vector<2x256xf32>
      %cst_20 = arith.constant dense<0.000000e+00> : vector<2xf32>
      %27 = vector.multi_reduction <add>, %26, %cst_20 [1] : vector<2x256xf32> to vector<2xf32>
      %28 = vector.shape_cast %27 : vector<2xf32> to vector<2x1xf32>
      %c0_21 = arith.constant 0 : index
      %c0_22 = arith.constant 0 : index
      %29 = vector.load %arg8[%c0_21, %c0_22] : memref<1x1xf32, #tpu.memory_space<vmem>>, vector<1x1xf32>
      %30 = vector.broadcast %29 : vector<1x1xf32> to vector<2x1xf32>
      %31 = arith.addf %28, %30 : vector<2x1xf32>
      %c0_23 = arith.constant 0 : index
      %c0_24 = arith.constant 0 : index
      %32 = vector.load %arg9[%c0_23, %c0_24] : memref<2x1xf32, #tpu.memory_space<vmem>>, vector<2x1xf32>
      tpu.vector_store %arg9[%c0_23, %c0_24], %31 {strides = array<i32>} : memref<2x1xf32, #tpu.memory_space<vmem>>, vector<2x1xf32>,
    } else {
    }
    return
  }
  func.func @transform_0(%arg0: i32) -> (i32, i32) {
    %c0_i32 = arith.constant 0 : i32
    %c0_i32_0 = arith.constant 0 : i32
    %c0_i32_1 = arith.constant 0 : i32
    return %c0_i32, %c0_i32_0 : i32, i32
  }
  func.func @transform_1(%arg0: i32) -> (i32, i32) {
    %c0_i32 = arith.constant 0 : i32
    %c0_i32_0 = arith.constant 0 : i32
    %c0_i32_1 = arith.constant 0 : i32
    return %c0_i32, %c0_i32_0 : i32, i32
  }
  func.func @transform_2(%arg0: i32) -> (i32, i32) {
    %c0_i32 = arith.constant 0 : i32
    %c0_i32_0 = arith.constant 0 : i32
    return %c0_i32, %arg0 : i32, i32
  }
  func.func @transform_3(%arg0: i32) -> (i32, i32) {
    %c0_i32 = arith.constant 0 : i32
    %c0_i32_0 = arith.constant 0 : i32
    return %arg0, %c0_i32 : i32, i32
  }
  func.func @transform_4(%arg0: i32) -> (i32, i32) {
    %c0_i32 = arith.constant 0 : i32
    %c0_i32_0 = arith.constant 0 : i32
    %c0_i32_1 = arith.constant 0 : i32
    return %c0_i32, %c0_i32_0 : i32, i32
  }
  func.func @transform_5(%arg0: i32) -> (i32, i32) {
    %c0_i32 = arith.constant 0 : i32
    %c0_i32_0 = arith.constant 0 : i32
    %c0_i32_1 = arith.constant 0 : i32
    return %c0_i32, %c0_i32_0 : i32, i32
  }
  func.func @transform_6(%arg0: i32) -> (i32, i32) {
    %c0_i32 = arith.constant 0 : i32
    %c0_i32_0 = arith.constant 0 : i32
    %c0_i32_1 = arith.constant 0 : i32
    return %c0_i32, %c0_i32_0 : i32, i32
  }
  func.func @transform_7(%arg0: i32) -> (i32, i32) {
    %c0_i32 = arith.constant 0 : i32
    %c0_i32_0 = arith.constant 0 : i32
    %c0_i32_1 = arith.constant 0 : i32
    return %c0_i32, %c0_i32_0 : i32, i32
  }
  func.func @transform_8(%arg0: i32) -> (i32, i32) {
    %c0_i32 = arith.constant 0 : i32
    %c0_i32_0 = arith.constant 0 : i32
    %c0_i32_1 = arith.constant 0 : i32
    return %c0_i32, %c0_i32_0 : i32, i32
  }
}

</mosaic_0001>

<bundles_post_ra>
// kernel: critic_forward.1
= control target key start
LH: loop header
LB: loop body
LE: loop exit
PB: predicated region body
PF: predicated region fallthrough
CT: control target
= control target key end

     0   :  { %s15317_s0 = inlined_call_operand.vmem [shape: f32[2,128], index: 0, kind: input, shape index: {}]   ;;  %s15318_s1 = inlined_call_operand.hbm [shape: f32[128,256], index: 1, kind: input, shape index: {}]   ;;  %s15319_s2 = inlined_call_operand.hbm [shape: f32[2,14400], index: 2, kind: input, shape index: {}]   ;;  %s15320_s3 = inlined_call_operand.hbm [shape: bf16[14336,256], index: 3, kind: input, shape index: {}]   ;;  %s15321_s4 = inlined_call_operand.hbm [shape: bf16[256,256], index: 4, kind: input, shape index: {}]   ;;  %s15322_s5 = inlined_call_operand.hbm [shape: f32[1,256], index: 5, kind: input, shape index: {}]   ;;  %s15323_s6 = inlined_call_operand.hbm [shape: f32[1,256], index: 6, kind: input, shape index: {}]   ;;  %s15324_s7 = inlined_call_operand.<no memory space> [shape: f32[1,1], index: 7, kind: input, shape index: {}]   ;;  %s15325_s8 = inlined_call_operand.vmem [shape: f32[2,1], index: 8, kind: output, shape index: {}]  }
   0x1   :  { %15347 = sst [smem:[#allocation39_spill]] %s15318_s1  ;;  %v13_v0 = vstv %s15324_s7 }
   0x2   :  { %15348 = sst [smem:[#allocation40_spill]] %s15321_s4  ;;  %14 = vst [vmem:[#allocation3] sm:$0x1] %v13_v0 }
   0x3   :  { %15 = vsyncpa [#allocation5], 0 }
   0x4   :  { %16 = vsyncpa [#allocation7], 0 }
   0x5   :  { %18 = vsyncpa [#allocation7 + $0x1], 0 }
   0x6   :  { %19 = vsyncpa [#allocation10], 0 }
   0x7   :  { %20 = vsyncpa [#allocation13], 0  ;;  %s12999_s29 = smov 0   ;;  %s13001_s30 = smov 0  }
   0x8   :  { %s13003_s9 = smov 0   ;;  %s13005_s10 = smov 0  }
   0x9 LB: > { %s13018_s7 = sadd.s32 4294967295, %s12938_s10   ;;  %s13021_s11 = sadd.s32 1, %s12938_s10   ;;  %s12938_s10 = sphi %s13005_s10, %s15408_s10   ;;  %s12934_s9 = sphi %s13003_s9, %s15407_s9   ;;  %s12930_s30 = sphi %s13001_s30, %s15406_s30   ;;  %s12926_s29 = sphi %s12999_s29, %s15405_s29  }
   0xa   : > { %s72_s12 = ssub.s32 %s12938_s10, %s13021_s11  ;;  %s75_s13 = sadd.s32 1, %s12934_s9 }
   0xb   : > { %p73_p0 = scmp.eq.s32.totalorder %s72_s12, 0  ;;  %p82_p1 = scmp.ne.s32.totalorder %s12934_s9, %s12930_s30 }
   0xc   : > { %p83_p2 = scmp.eq.s32.totalorder %s12938_s10, 0  ;;  %p88_p3 = scmp.ne.s32.totalorder %s12930_s30, %s12926_s29 }
   0xd   : > { %s13031_s14 = scalar_select %p73_p0, %s12934_s9, %s75_s13  }
   0xe   : > { %p13033_p4 = por %p83_p2, %p82_p1  ;;  %p15326_p5 = scmp.eq.s32.totalorder %s13018_s7, 0 }
   0xf   : > { %15349 = sst [smem:[#allocation18_spill]] %s13031_s14  ;;  %p7952_p6 = scmp.ge.s32.totalorder %s12938_s10, 1 }
  0x10   : > { %p230_p7 = scmp.lt.s32.totalorder %s12938_s10, 3  ;;  %p13042_p8 = por %p15326_p5, %p88_p3 }
  0x11   : > { %s15353_s4 = sld [smem:[#allocation40_spill]]  ;;  %s12940_s21 = smov [#allocation9]  }
  0x12   : > { %p13047_p10 = pnand %p7952_p6, %p230_p7  ;;  %s260_s22 = sshll.u32 %s12940_s21, 4  ;;  %s261_s22 = int_to_ptr.vmem [resolvable:$true] %s260_s22 }
  0x13   : > { %s15355_s1 = sld [smem:[#allocation39_spill]]  ;;  %s12941_s27 = smov 128  }
  0x14   : > { %p12641_p11 = pneg %p13047_p10  ;;  %s12942_s28 = smov 8  }
  0x15   : > { %s12943_s29 = smov [#allocation4]   ;;  %s12944_s13 = smov 256  }
  0x16   : > { %p13058_p12 = pnand %p12641_p11, %p15326_p5  ;;  %s246_s12 = sshll.u32 %s12943_s29, 4  ;;  %s247_s12 = int_to_ptr.vmem [resolvable:$true] %s246_s12 }
  0x17   : > { %s258_s20 = sshll.u32 %s15353_s4, 4  ;;  %s12945_s18 = smov 16   ;;  %s259_s20 = int_to_ptr.hbm [resolvable:$true] %s258_s20 }
  0x18   : > { %12647 = dma.hbm_to_vmem [thread:$0]  (!%p13058_p12), %s259_s20, 4096, %s261_s22, [#allocation10], %s12941_s27, %s12941_s27, %s12942_s28  }
  0x19   : > { %s244_s26 = sshll.u32 %s15355_s1, 4  ;;  %s273_s24 = sshll.u32 %s15322_s5, 4  ;;  %s245_s26 = int_to_ptr.hbm [resolvable:$true] %s244_s26  ;;  %s274_s24 = int_to_ptr.hbm [resolvable:$true] %s273_s24 }
  0x1a   : > { %12644 = dma.hbm_to_vmem [thread:$0]  (!%p13058_p12), %s245_s26, 4096, %s247_s12, [#allocation5], %s12944_s13, %s12944_s13, %s12945_s18  }
  0x1b   : > { %s12946_s25 = smov [#allocation11]   ;;  %s285_s20 = sshll.u32 %s15323_s6, 4  ;;  %s286_s20 = int_to_ptr.hbm [resolvable:$true] %s285_s20 }
  0x1c   : > { %s275_s1 = sshll.u32 %s12946_s25, 4  ;;  %s12947_s22 = smov [#allocation12]   ;;  %s276_s1 = int_to_ptr.vmem [resolvable:$true] %s275_s1 }
  0x1d   : > { %12650 = dma.hbm_to_vmem [thread:$0]  (!%p13058_p12), %s274_s24, 32, %s276_s1, [#allocation10]  }
  0x1e   : > { %s287_s27 = sshll.u32 %s12947_s22, 4  ;;  %p7957_p13 = scmp.ge.s32.totalorder %s12938_s10, 2  ;;  %s288_s27 = int_to_ptr.vmem [resolvable:$true] %s287_s27 }
  0x1f   : > { %12653 = dma.hbm_to_vmem [thread:$0]  (!%p13058_p12), %s286_s20, 32, %s288_s27, [#allocation13]  }
  0x20   : > { %297 = sbr.rel (%p7957_p13) target bundleno = 93 (0x5d), region = 40 }
  0x25   : > { %300 = sbr.rel (!%p13033_p4) target bundleno = 74 (0x4a), region = 44  ;;  %s301_s26 = sand.u32 (%p13033_p4), 1, %s12938_s10  }
  0x26   : > { %s303_s4 = sand.u32 (%p13033_p4), 1, %s12934_s9   ;;  %s306_s28 = smul.u32 (%p13033_p4), 56, %s12938_s10 }
  0x27   : > { %s12618_s14 = smul.u32 (%p13033_p4), 112, %s303_s4  ;;  %s13088_s13 = scalar_lea.sflag (%p13033_p4), [#allocation7], %s301_s26 }
  0x28   : > { %s307_s1 = ssub.s32 (%p13033_p4), 113, %s306_s28 }
  0x29   : > { %p308_p0 = scmp.lt.s32.totalorder (%p13033_p4), %s307_s1, 56  ;;  %s305_s18 = scalar_lea.vmem (%p13033_p4), [#allocation6], %s12618_s14 }
  0x2b   : > { %s15410_s1 = smov (!%p308_p0, %s307_s1), 56 }
  0x2c   : > { %s7958_s23 = sshll.u32 %s15410_s1, 1 }
  0x2d   : > { %s311_s29 = ssub.s32 112, %s7958_s23 }
  0x2e   : > { %s312_s12 = sshll.u32 %s311_s29, 4 }
  0x2f   : > { %313 = vsyncadd %s13088_s13, %s312_s12  ;;  %p13091_p1 = scmp.ne.s32.totalorder %s7958_s23, 0  ;;  %s11686_s21 = smul.u32 112, %s12938_s10 }
  0x30   : > { %s7962_s24 = sshll.u32 %s15410_s1, 5  ;;  %s13097_s25 = sshll.u32 %s305_s18, 4  ;;  %s322_s25 = int_to_ptr.vmem [resolvable:$true] %s13097_s25 }
  0x31   : > { %s316_s27 = scalar_lea.hbm %s15319_s2, %s11686_s21  ;;  %s12827_s14 = sshrl.u32 %s7962_s24, 4 }
  0x32   : > { %s319_s26 = sshll.u32 %s316_s27, 4  ;;  %s12836_s12 = scalar_lea.hbm %s15319_s2, 226  ;;  %s320_s26 = int_to_ptr.hbm [resolvable:$true] %s319_s26 }
  0x33   : > { %s12825_s4 = sshra.s32 %s320_s26, 4  ;;  %s12826_s4 = int_to_ptr.hbm [resolvable:$true] %s12825_s4 }
  0x34   : > { %s12832_s28 = scalar_lea.hbm %s12826_s4, %s12827_s14  ;;  %p12837_p7 = scmp.lt.s32.totalorder %s12826_s4, %s15319_s2 }
  0x35   : > { %p12833_p2 = scmp.ne.s32.totalorder %s12826_s4, %s12832_s28  ;;  %p12838_p11 = scmp.lt.s32.totalorder %s12836_s12, %s12832_s28 }
  0x37   : > { %p12834_p3 = pnand %p12833_p2, %p13091_p1  ;;  %p12839_p12 = por %p12838_p11, %p12837_p7 }
  0x39   : > { %p12835_p6 = pneg %p12834_p3 }
  0x3b   : > { %p12840_p13 = pnand %p12839_p12, %p12835_p6 }
  0x3d   : > { %12843 = shalt.err (!%p12840_p13)
}
  0x3e   : > { %s12844_s21 = sshra.s32 %s322_s25, 4  ;;  %s12948_s27 = smov [#allocation6]   ;;  %s12845_s21 = int_to_ptr.vmem [resolvable:$true] %s12844_s21 }
  0x3f   : > { %s12851_s22 = scalar_lea.vmem %s12845_s21, %s12827_s14  ;;  %s12855_s23 = scalar_lea.vmem %s12948_s27, 224 }
  0x40   : > { %p12852_p0 = scmp.ne.s32.totalorder %s12845_s21, %s12851_s22  ;;  %p12857_p9 = scmp.lt.s32.totalorder %s12855_s23, %s12851_s22 }
  0x42   : > { %p12853_p2 = pnand %p12852_p0, %p13091_p1 }
  0x44   : > { %p12854_p3 = pneg %p12853_p2 }
  0x46   : > { %p12859_p5 = pnand %p12857_p9, %p12854_p3 }
  0x48   : > { %12862 = shalt.err (!%p12859_p5)
}
  0x49   : > { %324 = dma.hbm_to_vmem [thread:$0]  (%p13091_p1), %s320_s26, %s7962_s24, %s322_s25, %s13088_s13  }
  0x4a PF: > { %s328_s4 = sand.u32 1, %s12938_s10   ;;  %s330_s14 = sand.u32 1, %s12934_s9  }
  0x4b   : > { %s12619_s28 = smul.u32 7168, %s330_s14  ;;  %s329_s1 = scalar_lea.sflag [#allocation7], %s328_s4 }
  0x4c   : > { %s12617_s29 = smul.u32 7168, %s12938_s10  ;;  %s12870_s10 = scalar_lea.hbm %s15320_s3, 14336 }
  0x4d   : > { %s332_s19 = scalar_lea.vmem [#allocation8], %s12619_s28 }
  0x4e   : > { %s338_s20 = scalar_lea.hbm %s15320_s3, %s12617_s29  ;;  %s341_s21 = sshll.u32 %s332_s19, 4  ;;  %s342_s21 = int_to_ptr.vmem [resolvable:$true] %s341_s21 }
  0x4f   : > { %s339_s22 = sshll.u32 %s338_s20, 4  ;;  %s340_s22 = int_to_ptr.hbm [resolvable:$true] %s339_s22 }
  0x50   : > { %s12864_s13 = sshra.s32 %s340_s22, 4  ;;  %s12865_s13 = int_to_ptr.hbm [resolvable:$true] %s12864_s13 }
  0x51   : > { %s12866_s24 = scalar_lea.hbm %s12865_s13, 7168  ;;  %p12871_p6 = scmp.lt.s32.totalorder %s12865_s13, %s15320_s3 }
  0x52   : > { %p12867_p5 = scmp.ne.s32.totalorder %s12865_s13, %s12866_s24  ;;  %p12872_p7 = scmp.lt.s32.totalorder %s12870_s10, %s12866_s24 }
  0x54   : > { %p12868_p9 = pnand %p12867_p5, %p13033_p4  ;;  %p12873_p11 = por %p12872_p7, %p12871_p6 }
  0x56   : > { %p12869_p1 = pneg %p12868_p9 }
  0x58   : > { %p12874_p12 = pnand %p12873_p11, %p12869_p1 }
  0x5a   : > { %12877 = shalt.err (!%p12874_p12)
}
  0x5b   : > { %s12949_s4 = smov 128   ;;  %s12950_s14 = smov 8  }
  0x5c   : > { %12630 = dma.hbm_to_vmem [thread:$0]  (%p13033_p4), %s340_s22, 114688, %s342_s21, %s329_s1, %s12949_s4, %s12949_s4, %s12950_s14  }
  0x5d PF: > { %353 = sbr.rel (%p13047_p10) target bundleno = 1621 (0x655), region = 52 }
  0x62   : > { %p15357_p13 = scmp.eq.s32.totalorder %s13018_s7, 0 }
  0x64   : > { %12909 = dma.done.wait (%p15357_p13), [#allocation5], 4096   ;;  %p15358_p0 = pmov %p15357_p13 }
  0x65   : > { %s360_s28 = sand.u32 1, %s13018_s7   ;;  %s362_s29 = sand.u32 1, %s12930_s30  }
  0x66   : > { %12911 = vsyncadd (%p15358_p0), [#allocation5], 4294963200  ;;  %s12620_s12 = smul.u32 112, %s362_s29  ;;  %s361_s18 = scalar_lea.sflag [#allocation7], %s360_s28 }
  0x68   : > { %s13148_s20 = scalar_lea.vmem [#allocation6], %s12620_s12 }
  0x69   : > { %12913 = dma.done.wait (%p13042_p8), %s361_s18, 116480  }
  0x6a   : > { %12915 = vsyncadd (%p13042_p8), %s361_s18, 4294850816  ;;  %s12621_s15 = smul.u32 7168, %s362_s29  ;;  %p15359_p4 = pmov %p15358_p0 }
  0x6c   : > { %s13154_s17 = scalar_lea.vmem [#allocation8], %s12621_s15 }
  0x6d   : > { %12917 = dma.done.wait (%p15359_p4), [#allocation10], 4128   ;;  %p15360_p10 = pmov %p15358_p0 }
  0x6e   : > { %p15361_p2 = pmov %p15358_p0 }
  0x6f   : > { %12919 = vsyncadd (%p15360_p10), [#allocation10], 4294963168 }
  0x70   : > { %12921 = dma.done.wait (%p15361_p2), [#allocation13], 32   ;;  %p15362_p3 = pmov %p15358_p0 }
  0x71   : > { %p15363_p5 = scmp.ne.s32.totalorder %s13018_s7, 0 }
  0x72   : > { %12923 = vsyncadd (%p15362_p3), [#allocation13], 4294967264 }
  0x73   : > { %432 = sbr.rel (%p15363_p5) target bundleno = 282 (0x11a), region = 80 }
  0x78   : > { %v465_v1 = vld [vmem:[#allocation4 + $0xf8] sm:$0xff]  ;;  %v464_v2 = vld [vmem:[#allocation4 + $0xf0] sm:$0xff]  ;;  %v463_v3 = vld [vmem:[#allocation4 + $0xe8] sm:$0xff]  ;;  %vm509_vm0 = vcmask 1041408  }
  0x79   : > { %486 = vmatpush.msra.mxu1 %v465_v1  ;;  %466 = vmatpush.msra.mxu0 %v464_v2  ;;  %v462_v4 = vld [vmem:[#allocation4 + $0xe0] sm:$0xff]  ;;  %v461_v5 = vld [vmem:[#allocation4 + $0xd8] sm:$0xff]  ;;  %v460_v6 = vld [vmem:[#allocation4 + $0xd0] sm:$0xff] }
  0x7a   : > { %v459_v7 = vld [vmem:[#allocation4 + $0xc8] sm:$0xff]  ;;  %v458_v8 = vld [vmem:[#allocation4 + $0xc0] sm:$0xff]  ;;  %v457_v9 = vld [vmem:[#allocation4 + $0xb8] sm:$0xff] }
  0x7b   : > { %487 = vmatpush.msra.mxu1 %v463_v3  ;;  %467 = vmatpush.msra.mxu0 %v462_v4  ;;  %v456_v10 = vld [vmem:[#allocation4 + $0xb0] sm:$0xff]  ;;  %v455_v11 = vld [vmem:[#allocation4 + $0xa8] sm:$0xff]  ;;  %v454_v12 = vld [vmem:[#allocation4 + $0xa0] sm:$0xff] }
  0x7c   : > { %v453_v13 = vld [vmem:[#allocation4 + $0x98] sm:$0xff]  ;;  %v452_v14 = vld [vmem:[#allocation4 + $0x90] sm:$0xff]  ;;  %v451_v15 = vld [vmem:[#allocation4 + $0x88] sm:$0xff] }
  0x7d   : > { %488 = vmatpush.msra.mxu1 %v461_v5  ;;  %468 = vmatpush.msra.mxu0 %v460_v6  ;;  %v450_v16 = vld [vmem:[#allocation4 + $0x80] sm:$0xff]  ;;  %v449_v17 = vld [vmem:[#allocation4 + $0x78] sm:$0xff]  ;;  %v448_v18 = vld [vmem:[#allocation4 + $0x70] sm:$0xff] }
  0x7e   : > { %v447_v19 = vld [vmem:[#allocation4 + $0x68] sm:$0xff]  ;;  %v446_v20 = vld [vmem:[#allocation4 + $0x60] sm:$0xff]  ;;  %v445_v21 = vld [vmem:[#allocation4 + $0x58] sm:$0xff] }
  0x7f   : > { %489 = vmatpush.msra.mxu1 %v459_v7  ;;  %469 = vmatpush.msra.mxu0 %v458_v8  ;;  %v444_v22 = vld [vmem:[#allocation4 + $0x50] sm:$0xff]  ;;  %v443_v23 = vld [vmem:[#allocation4 + $0x48] sm:$0xff]  ;;  %v442_v24 = vld [vmem:[#allocation4 + $0x40] sm:$0xff] }
  0x80   : > { %v441_v25 = vld [vmem:[#allocation4 + $0x38] sm:$0xff]  ;;  %v440_v26 = vld [vmem:[#allocation4 + $0x30] sm:$0xff]  ;;  %v439_v27 = vld [vmem:[#allocation4 + $0x28] sm:$0xff] }
  0x81   : > { %490 = vmatpush.msra.mxu1 %v457_v9  ;;  %470 = vmatpush.msra.mxu0 %v456_v10  ;;  %v438_v28 = vld [vmem:[#allocation4 + $0x20] sm:$0xff]  ;;  %v437_v29 = vld [vmem:[#allocation4 + $0x18] sm:$0xff]  ;;  %v436_v30 = vld [vmem:[#allocation4 + $0x10] sm:$0xff] }
  0x82   : > { %v435_v31 = vld [vmem:[#allocation4 + $0x8] sm:$0xff]  ;;  %v434_v32 = vld [vmem:[#allocation4] sm:$0xff]  ;;  %v433_v33 = vld [vmem:[%s15317_s0] sm:$0x3] }
  0x83   : > { %491 = vmatpush.msra.mxu1 %v455_v11  ;;  %471 = vmatpush.msra.mxu0 %v454_v12 }
  0x85   : > { %492 = vmatpush.msra.mxu1 %v453_v13  ;;  %472 = vmatpush.msra.mxu0 %v452_v14 }
  0x87   : > { %493 = vmatpush.msra.mxu1 %v451_v15  ;;  %473 = vmatpush.msra.mxu0 %v450_v16 }
  0x89   : > { %494 = vmatpush.msra.mxu1 %v449_v17  ;;  %474 = vmatpush.msra.mxu0 %v448_v18 }
  0x8b   : > { %495 = vmatpush.msra.mxu1 %v447_v19  ;;  %475 = vmatpush.msra.mxu0 %v446_v20 }
  0x8d   : > { %496 = vmatpush.msra.mxu1 %v445_v21  ;;  %476 = vmatpush.msra.mxu0 %v444_v22 }
  0x8f   : > { %497 = vmatpush.msra.mxu1 %v443_v23  ;;  %477 = vmatpush.msra.mxu0 %v442_v24 }
  0x91   : > { %498 = vmatpush.msra.mxu1 %v441_v25  ;;  %478 = vmatpush.msra.mxu0 %v440_v26 }
  0x93   : > { %499 = vmatpush.msra.mxu1 %v439_v27  ;;  %479 = vmatpush.msra.mxu0 %v438_v28 }
  0x95   : > { %500 = vmatpush.msra.mxu1 %v437_v29  ;;  %480 = vmatpush.msra.mxu0 %v436_v30 }
  0x97   : > { %501 = vmatpush.msra.mxu1 %v435_v31  ;;  %481 = vmatpush.msra.mxu0 %v434_v32 }
  0x98   : > { %502 = vmatmul.f32.vlgmr.msra.gmra.mxu1 %v433_v33  ;;  %482 = vmatmul.f32.vlgmr.msra.gmra.mxu0 %v433_v33 }
 0x115   : > { %v503_v34 = vpop.f32.mrf.mxu1  ;;  %v483_v35 = vpop.f32.mrf.mxu0 }
 0x116   : > { %v508_v36 = vrot.slane %v503_v34, 6 }
 0x118   : > { %v510_v37 = vsel %vm509_vm0, %v483_v35, %v508_v36 }
 0x119   : > { %512 = vst [vmem:[#allocation2] sm:$0xf] %v510_v37 }
 0x11a PF: > { %v8029_v38 = vld [vmem:[%s13154_s17 + $0x70] sm:$0xf]  ;;  %v11704_v39 = vld [vmem:[%s13154_s17 + $0x74] sm:$0xf0]  ;;  %v8021_v49 = vld [vmem:[%s13154_s17 + $0x60] sm:$0xf] }
 0x11b   : > { %v8093_v40 = vld [vmem:[%s13154_s17 + $0xf0] sm:$0xf]  ;;  %v8030_v41 = vor.u32 %v11704_v39, %v8029_v38  ;;  %v11720_v42 = vld [vmem:[%s13154_s17 + $0xf4] sm:$0xf0]  ;;  %v11702_v51 = vld [vmem:[%s13154_s17 + $0x64] sm:$0xf0] }
 0x11c   : > { %v8157_v43 = vld [vmem:[%s13154_s17 + $0x170] sm:$0xf]  ;;  %v11736_v44 = vld [vmem:[%s13154_s17 + $0x174] sm:$0xf0]  ;;  %v8094_v45 = vor.u32 %v11720_v42, %v8093_v40  ;;  %v8085_v52 = vld [vmem:[%s13154_s17 + $0xe0] sm:$0xf]  ;;  %v8022_v54 = vor.u32 %v11702_v51, %v8021_v49 }
 0x11d   : > { %v8158_v46 = vor.u32 %v11736_v44, %v8157_v43  ;;  %v8221_v47 = vld [vmem:[%s13154_s17 + $0x1f0] sm:$0xf]  ;;  %v11752_v48 = vld [vmem:[%s13154_s17 + $0x1f4] sm:$0xf0]  ;;  %6101 = vmatpush.bf16.msra.mxu0 %v8030_v41  ;;  %v11718_v53 = vld [vmem:[%s13154_s17 + $0xe4] sm:$0xf0] }
 0x11e   : > { %v8222_v50 = vor.u32 %v11752_v48, %v8221_v47  ;;  %6114 = vmatpush.bf16.msra.mxu1 %v8094_v45  ;;  %v8086_v55 = vor.u32 %v11718_v53, %v8085_v52  ;;  %v8149_v56 = vld [vmem:[%s13154_s17 + $0x160] sm:$0xf]  ;;  %v11734_v57 = vld [vmem:[%s13154_s17 + $0x164] sm:$0xf0]  ;;  %v8013_v61 = vld [vmem:[%s13154_s17 + $0x50] sm:$0xf] }
 0x11f   : > { %6127 = vmatpush.bf16.msra.mxu2 %v8158_v46  ;;  %v8213_v58 = vld [vmem:[%s13154_s17 + $0x1e0] sm:$0xf]  ;;  %v8150_v59 = vor.u32 %v11734_v57, %v8149_v56  ;;  %v11750_v60 = vld [vmem:[%s13154_s17 + $0x1e4] sm:$0xf0]  ;;  %v11700_v62 = vld [vmem:[%s13154_s17 + $0x54] sm:$0xf0] }
 0x120   : > { %6140 = vmatpush.bf16.msra.mxu3 %v8222_v50  ;;  %v8214_v63 = vor.u32 %v11750_v60, %v8213_v58  ;;  %v8077_v0 = vld [vmem:[%s13154_s17 + $0xd0] sm:$0xf]  ;;  %v11716_v1 = vld [vmem:[%s13154_s17 + $0xd4] sm:$0xf0]  ;;  %v8014_v3 = vor.u32 %v11700_v62, %v8013_v61  ;;  %v8005_v9 = vld [vmem:[%s13154_s17 + $0x40] sm:$0xf] }
 0x121   : > { %v8141_v2 = vld [vmem:[%s13154_s17 + $0x150] sm:$0xf]  ;;  %6102 = vmatpush.bf16.msra.mxu0 %v8022_v54  ;;  %v11732_v4 = vld [vmem:[%s13154_s17 + $0x154] sm:$0xf0]  ;;  %v8078_v7 = vor.u32 %v11716_v1, %v8077_v0  ;;  %v11698_v10 = vld [vmem:[%s13154_s17 + $0x44] sm:$0xf0] }
 0x122   : > { %v8205_v5 = vld [vmem:[%s13154_s17 + $0x1d0] sm:$0xf]  ;;  %v11748_v6 = vld [vmem:[%s13154_s17 + $0x1d4] sm:$0xf0]  ;;  %6115 = vmatpush.bf16.msra.mxu1 %v8086_v55  ;;  %v8142_v8 = vor.u32 %v11732_v4, %v8141_v2  ;;  %v8069_v11 = vld [vmem:[%s13154_s17 + $0xc0] sm:$0xf]  ;;  %v8006_v18 = vor.u32 %v11698_v10, %v8005_v9 }
 0x123   : > { %6128 = vmatpush.bf16.msra.mxu2 %v8150_v59  ;;  %v8206_v12 = vor.u32 %v11748_v6, %v8205_v5  ;;  %v11714_v13 = vld [vmem:[%s13154_s17 + $0xc4] sm:$0xf0]  ;;  %v8133_v14 = vld [vmem:[%s13154_s17 + $0x140] sm:$0xf]  ;;  %v7997_v21 = vld [vmem:[%s13154_s17 + $0x30] sm:$0xf] }
 0x124   : > { %6141 = vmatpush.bf16.msra.mxu3 %v8214_v63  ;;  %v11730_v15 = vld [vmem:[%s13154_s17 + $0x144] sm:$0xf0]  ;;  %v8197_v16 = vld [vmem:[%s13154_s17 + $0x1c0] sm:$0xf]  ;;  %v8070_v19 = vor.u32 %v11714_v13, %v8069_v11  ;;  %v11696_v22 = vld [vmem:[%s13154_s17 + $0x34] sm:$0xf0] }
 0x125   : > { %v11746_v17 = vld [vmem:[%s13154_s17 + $0x1c4] sm:$0xf0]  ;;  %6103 = vmatpush.bf16.msra.mxu0 %v8014_v3  ;;  %v8134_v20 = vor.u32 %v11730_v15, %v8133_v14  ;;  %v8061_v23 = vld [vmem:[%s13154_s17 + $0xb0] sm:$0xf]  ;;  %v11712_v25 = vld [vmem:[%s13154_s17 + $0xb4] sm:$0xf0]  ;;  %v7998_v30 = vor.u32 %v11696_v22, %v7997_v21 }
 0x126   : > { %6116 = vmatpush.bf16.msra.mxu1 %v8078_v7  ;;  %v8198_v24 = vor.u32 %v11746_v17, %v8197_v16  ;;  %v8125_v26 = vld [vmem:[%s13154_s17 + $0x130] sm:$0xf]  ;;  %v11728_v27 = vld [vmem:[%s13154_s17 + $0x134] sm:$0xf0]  ;;  %v8062_v31 = vor.u32 %v11712_v25, %v8061_v23  ;;  %v7989_v33 = vld [vmem:[%s13154_s17 + $0x20] sm:$0xf] }
 0x127   : > { %6129 = vmatpush.bf16.msra.mxu2 %v8142_v8  ;;  %v8189_v28 = vld [vmem:[%s13154_s17 + $0x1b0] sm:$0xf]  ;;  %v11744_v29 = vld [vmem:[%s13154_s17 + $0x1b4] sm:$0xf0]  ;;  %v8126_v32 = vor.u32 %v11728_v27, %v8125_v26  ;;  %v11694_v34 = vld [vmem:[%s13154_s17 + $0x24] sm:$0xf0] }
 0x128   : > { %6142 = vmatpush.bf16.msra.mxu3 %v8206_v12  ;;  %v8053_v35 = vld [vmem:[%s13154_s17 + $0xa0] sm:$0xf]  ;;  %v8190_v36 = vor.u32 %v11744_v29, %v8189_v28  ;;  %v11710_v37 = vld [vmem:[%s13154_s17 + $0xa4] sm:$0xf0]  ;;  %v7990_v42 = vor.u32 %v11694_v34, %v7989_v33  ;;  %v7981_v45 = vld [vmem:[%s13154_s17 + $0x10] sm:$0xf] }
 0x129   : > { %6104 = vmatpush.bf16.msra.mxu0 %v8006_v18  ;;  %v8117_v38 = vld [vmem:[%s13154_s17 + $0x120] sm:$0xf]  ;;  %v11726_v39 = vld [vmem:[%s13154_s17 + $0x124] sm:$0xf0]  ;;  %v8054_v43 = vor.u32 %v11710_v37, %v8053_v35  ;;  %v11692_v46 = vld [vmem:[%s13154_s17 + $0x14] sm:$0xf0] }
 0x12a   : > { %6117 = vmatpush.bf16.msra.mxu1 %v8070_v19  ;;  %v8181_v40 = vld [vmem:[%s13154_s17 + $0x1a0] sm:$0xf]  ;;  %v11742_v41 = vld [vmem:[%s13154_s17 + $0x1a4] sm:$0xf0]  ;;  %v8118_v44 = vor.u32 %v11726_v39, %v8117_v38  ;;  %v8045_v47 = vld [vmem:[%s13154_s17 + $0x90] sm:$0xf]  ;;  %v7982_v54 = vor.u32 %v11692_v46, %v7981_v45 }
 0x12b   : > { %6130 = vmatpush.bf16.msra.mxu2 %v8134_v20  ;;  %v8182_v48 = vor.u32 %v11742_v41, %v8181_v40  ;;  %v11708_v49 = vld [vmem:[%s13154_s17 + $0x94] sm:$0xf0]  ;;  %v8109_v50 = vld [vmem:[%s13154_s17 + $0x110] sm:$0xf]  ;;  %v7973_v55 = vld [vmem:[%s13154_s17] sm:$0xf] }
 0x12c   : > { %6143 = vmatpush.bf16.msra.mxu3 %v8198_v24  ;;  %v11724_v51 = vld [vmem:[%s13154_s17 + $0x114] sm:$0xf0]  ;;  %v8173_v52 = vld [vmem:[%s13154_s17 + $0x190] sm:$0xf]  ;;  %v11690_v56 = vld [vmem:[%s13154_s17 + $0x4] sm:$0xf0]  ;;  %v8046_v57 = vor.u32 %v11708_v49, %v8045_v47 }
 0x12d   : > { %6105 = vmatpush.bf16.msra.mxu0 %v7998_v30  ;;  %v11740_v53 = vld [vmem:[%s13154_s17 + $0x194] sm:$0xf0]  ;;  %v8110_v58 = vor.u32 %v11724_v51, %v8109_v50  ;;  %v8037_v59 = vld [vmem:[%s13154_s17 + $0x80] sm:$0xf]  ;;  %v11706_v60 = vld [vmem:[%s13154_s17 + $0x84] sm:$0xf0]  ;;  %v7974_v5 = vor.u32 %v11690_v56, %v7973_v55 }
 0x12e   : > { %6118 = vmatpush.bf16.msra.mxu1 %v8062_v31  ;;  %v8101_v61 = vld [vmem:[%s13154_s17 + $0x100] sm:$0xf]  ;;  %v8174_v62 = vor.u32 %v11740_v53, %v8173_v52  ;;  %v11722_v63 = vld [vmem:[%s13154_s17 + $0x104] sm:$0xf0]  ;;  %v8285_v2 = vld [vmem:[%s13154_s17 + $0x270] sm:$0xf]  ;;  %v8038_v9 = vor.u32 %v11706_v60, %v8037_v59 }
 0x12f   : > { %6131 = vmatpush.bf16.msra.mxu2 %v8126_v32  ;;  %v8165_v0 = vld [vmem:[%s13154_s17 + $0x180] sm:$0xf]  ;;  %v11738_v1 = vld [vmem:[%s13154_s17 + $0x184] sm:$0xf0]  ;;  %v11768_v3 = vld [vmem:[%s13154_s17 + $0x274] sm:$0xf0]  ;;  %v8102_v10 = vor.u32 %v11722_v63, %v8101_v61 }
 0x130   : > { %6144 = vmatpush.bf16.msra.mxu3 %v8190_v36  ;;  %v8349_v4 = vld [vmem:[%s13154_s17 + $0x2f0] sm:$0xf]  ;;  %v11784_v6 = vld [vmem:[%s13154_s17 + $0x2f4] sm:$0xf0]  ;;  %v8166_v13 = vor.u32 %v11738_v1, %v8165_v0  ;;  %v8286_v14 = vor.u32 %v11768_v3, %v8285_v2  ;;  %v8277_v17 = vld [vmem:[%s13154_s17 + $0x260] sm:$0xf] }
 0x131   : > { %6106 = vmatpush.bf16.msra.mxu0 %v7990_v42  ;;  %v8413_v7 = vld [vmem:[%s13154_s17 + $0x370] sm:$0xf]  ;;  %v11800_v8 = vld [vmem:[%s13154_s17 + $0x374] sm:$0xf0]  ;;  %v8350_v15 = vor.u32 %v11784_v6, %v8349_v4  ;;  %v11766_v18 = vld [vmem:[%s13154_s17 + $0x264] sm:$0xf0] }
 0x132   : > { %6119 = vmatpush.bf16.msra.mxu1 %v8054_v43  ;;  %v8477_v11 = vld [vmem:[%s13154_s17 + $0x3f0] sm:$0xf]  ;;  %v11816_v12 = vld [vmem:[%s13154_s17 + $0x3f4] sm:$0xf0]  ;;  %v8414_v16 = vor.u32 %v11800_v8, %v8413_v7  ;;  %v8341_v19 = vld [vmem:[%s13154_s17 + $0x2e0] sm:$0xf]  ;;  %v8278_v26 = vor.u32 %v11766_v18, %v8277_v17 }
 0x133   : > { %6132 = vmatpush.bf16.msra.mxu2 %v8118_v44  ;;  %v8478_v20 = vor.u32 %v11816_v12, %v8477_v11  ;;  %v11782_v21 = vld [vmem:[%s13154_s17 + $0x2e4] sm:$0xf0]  ;;  %v8405_v22 = vld [vmem:[%s13154_s17 + $0x360] sm:$0xf]  ;;  %v8269_v27 = vld [vmem:[%s13154_s17 + $0x250] sm:$0xf] }
 0x134   : > { %6145 = vmatpush.bf16.msra.mxu3 %v8182_v48  ;;  %v11798_v23 = vld [vmem:[%s13154_s17 + $0x364] sm:$0xf0]  ;;  %v8469_v24 = vld [vmem:[%s13154_s17 + $0x3e0] sm:$0xf]  ;;  %v11764_v28 = vld [vmem:[%s13154_s17 + $0x254] sm:$0xf0]  ;;  %v8342_v29 = vor.u32 %v11782_v21, %v8341_v19 }
 0x135   : > { %6107 = vmatpush.bf16.msra.mxu0 %v7982_v54  ;;  %v11814_v25 = vld [vmem:[%s13154_s17 + $0x3e4] sm:$0xf0]  ;;  %v8406_v30 = vor.u32 %v11798_v23, %v8405_v22  ;;  %v8333_v31 = vld [vmem:[%s13154_s17 + $0x2d0] sm:$0xf]  ;;  %v11780_v32 = vld [vmem:[%s13154_s17 + $0x2d4] sm:$0xf0]  ;;  %v8270_v39 = vor.u32 %v11764_v28, %v8269_v27 }
 0x136   : > { %6120 = vmatpush.bf16.msra.mxu1 %v8046_v57  ;;  %v514_v33 = vld [vmem:[%s13148_s20] sm:$0xff]  ;;  %v8470_v34 = vor.u32 %v11814_v25, %v8469_v24  ;;  %v11796_v36 = vld [vmem:[%s13154_s17 + $0x354] sm:$0xf0]  ;;  %v8334_v41 = vor.u32 %v11780_v32, %v8333_v31  ;;  %v11762_v43 = vld [vmem:[%s13154_s17 + $0x244] sm:$0xf0]  ;;  %vm7560_vm1 = vcmask 1041408  }
 0x137   : > { %6133 = vmatpush.bf16.msra.mxu2 %v8110_v58  ;;  %v8397_v35 = vld [vmem:[%s13154_s17 + $0x350] sm:$0xf]  ;;  %542 = vst [vmem:[#allocation1] ss:$4 sm:$0xff] %v514_v33  ;;  %v11812_v38 = vld [vmem:[%s13154_s17 + $0x3d4] sm:$0xf0] }
 0x138   : > { %6146 = vmatpush.bf16.msra.mxu3 %v8174_v62  ;;  %v8461_v37 = vld [vmem:[%s13154_s17 + $0x3d0] sm:$0xf]  ;;  %v8261_v40 = vld [vmem:[%s13154_s17 + $0x240] sm:$0xf]  ;;  %v8398_v42 = vor.u32 %v11796_v36, %v8397_v35  ;;  %v11778_v45 = vld [vmem:[%s13154_s17 + $0x2c4] sm:$0xf0] }
 0x139   : > { %6108 = vmatpush.bf16.msra.mxu0 %v7974_v5  ;;  %v8325_v44 = vld [vmem:[%s13154_s17 + $0x2c0] sm:$0xf]  ;;  %v8462_v46 = vor.u32 %v11812_v38, %v8461_v37  ;;  %v11794_v48 = vld [vmem:[%s13154_s17 + $0x344] sm:$0xf0]  ;;  %v8253_v51 = vld [vmem:[%s13154_s17 + $0x230] sm:$0xf]  ;;  %v8262_v53 = vor.u32 %v11762_v43, %v8261_v40 }
 0x13a   : > { %6121 = vmatpush.bf16.msra.mxu1 %v8038_v9  ;;  %v8389_v47 = vld [vmem:[%s13154_s17 + $0x340] sm:$0xf]  ;;  %v11810_v50 = vld [vmem:[%s13154_s17 + $0x3c4] sm:$0xf0]  ;;  %v11760_v52 = vld [vmem:[%s13154_s17 + $0x234] sm:$0xf0]  ;;  %v8326_v59 = vor.u32 %v11778_v45, %v8325_v44 }
 0x13b   : > { %6134 = vmatpush.bf16.msra.mxu2 %v8102_v10  ;;  %v8453_v49 = vld [vmem:[%s13154_s17 + $0x3c0] sm:$0xf]  ;;  %v8317_v54 = vld [vmem:[%s13154_s17 + $0x2b0] sm:$0xf]  ;;  %v11776_v55 = vld [vmem:[%s13154_s17 + $0x2b4] sm:$0xf0]  ;;  %v8390_v60 = vor.u32 %v11794_v48, %v8389_v47  ;;  %v8254_v8 = vor.u32 %v11760_v52, %v8253_v51 }
 0x13c   : > { %6147 = vmatpush.bf16.msra.mxu3 %v8166_v13  ;;  %v8381_v56 = vld [vmem:[%s13154_s17 + $0x330] sm:$0xf]  ;;  %v11792_v57 = vld [vmem:[%s13154_s17 + $0x334] sm:$0xf0]  ;;  %v8454_v63 = vor.u32 %v11810_v50, %v8453_v49  ;;  %v8318_v9 = vor.u32 %v11776_v55, %v8317_v54  ;;  %v8245_v11 = vld [vmem:[%s13154_s17 + $0x220] sm:$0xf] }
 0x13d   : > { %6153 = vmatpush.bf16.msrb.mxu0 %v8286_v14  ;;  %v516_v58 = vld [vmem:[%s13148_s20 + $0x10] sm:$0xff]  ;;  %v11808_v5 = vld [vmem:[%s13154_s17 + $0x3b4] sm:$0xf0]  ;;  %v8382_v10 = vor.u32 %v11792_v57, %v8381_v56  ;;  %v11758_v12 = vld [vmem:[%s13154_s17 + $0x224] sm:$0xf0]  ;;  %p11555_p8 = scmp.ne.s32.totalorder %s13018_s7, 1 }
 0x13e   : > { %6166 = vmatpush.bf16.msrb.mxu1 %v8350_v15  ;;  %v547_v61 = vld.sshfl [vmem:[#allocation1 + $0x10] sm:$0xff pattern:$0x73625140]  ;;  %v545_v62 = vld.sshfl [vmem:[#allocation1] sm:$0xff pattern:$0x73625140] }
 0x13f   : > { %6179 = vmatpush.bf16.msrb.mxu2 %v8414_v16  ;;  %v13273_v0 = vpack.c.bf16 %v547_v61, %v547_v61  ;;  %v13275_v1 = vpack.c.bf16 %v545_v62, %v545_v62  ;;  %v548_v2 = vld.sshfl [vmem:[#allocation1 + $0x18] sm:$0xff pattern:$0x73625140]  ;;  %v546_v3 = vld.sshfl [vmem:[#allocation1 + $0x8] sm:$0xff pattern:$0x73625140] }
 0x140   : > { %6192 = vmatpush.bf16.msrb.mxu3 %v8478_v20  ;;  %v8445_v4 = vld [vmem:[%s13154_s17 + $0x3b0] sm:$0xf]  ;;  %v13279_v6 = vpack.c.bf16 %v548_v2, %v548_v2  ;;  %553 = vst [vmem:[#allocation1] ss:$4 sm:$0xff] %v516_v58  ;;  %v13281_v7 = vpack.c.bf16 %v546_v3, %v546_v3  ;;  %v8309_v13 = vld [vmem:[%s13154_s17 + $0x2a0] sm:$0xf]  ;;  %v8246_v20 = vor.u32 %v11758_v12, %v8245_v11 }
 0x141   : > { %6154 = vmatpush.bf16.msrb.mxu0 %v8278_v26  ;;  %6135 = vmatmul.bf16.vlgmr.msra.gmra.mxu2 %v13273_v0  ;;  %v8446_v14 = vor.u32 %v11808_v5, %v8445_v4  ;;  %v11774_v15 = vld [vmem:[%s13154_s17 + $0x2a4] sm:$0xf0]  ;;  %v8373_v16 = vld [vmem:[%s13154_s17 + $0x320] sm:$0xf]  ;;  %v8237_v21 = vld [vmem:[%s13154_s17 + $0x210] sm:$0xf] }
 0x142   : > { %6167 = vmatpush.bf16.msrb.mxu1 %v8342_v29  ;;  %v11790_v17 = vld [vmem:[%s13154_s17 + $0x324] sm:$0xf0]  ;;  %6109 = vmatmul.bf16.vlgmr.msra.gmra.mxu0 %v13275_v1  ;;  %v8437_v18 = vld [vmem:[%s13154_s17 + $0x3a0] sm:$0xf]  ;;  %v11756_v22 = vld [vmem:[%s13154_s17 + $0x214] sm:$0xf0]  ;;  %v8310_v23 = vor.u32 %v11774_v15, %v8309_v13 }
 0x143   : > { %6180 = vmatpush.bf16.msrb.mxu2 %v8406_v30  ;;  %v11806_v19 = vld [vmem:[%s13154_s17 + $0x3a4] sm:$0xf0]  ;;  %6148 = vmatmul.bf16.vlgmr.msra.gmra.mxu3 %v13279_v6  ;;  %v8374_v24 = vor.u32 %v11790_v17, %v8373_v16  ;;  %v8301_v25 = vld [vmem:[%s13154_s17 + $0x290] sm:$0xf]  ;;  %v11772_v26 = vld [vmem:[%s13154_s17 + $0x294] sm:$0xf0] }
 0x144   : > { %6193 = vmatpush.bf16.msrb.mxu3 %v8470_v34  ;;  %6122 = vmatmul.bf16.vlgmr.msra.gmra.mxu1 %v13281_v7  ;;  %v8365_v27 = vld [vmem:[%s13154_s17 + $0x310] sm:$0xf]  ;;  %v8438_v28 = vor.u32 %v11806_v19, %v8437_v18  ;;  %v11788_v29 = vld [vmem:[%s13154_s17 + $0x314] sm:$0xf0]  ;;  %v8229_v33 = vld [vmem:[%s13154_s17 + $0x200] sm:$0xf]  ;;  %v8238_v34 = vor.u32 %v11756_v22, %v8237_v21  ;;  %v8302_v38 = vor.u32 %v11772_v26, %v8301_v25 }
 0x145   : > { %6155 = vmatpush.bf16.msrb.mxu0 %v8270_v39  ;;  %v8429_v30 = vld [vmem:[%s13154_s17 + $0x390] sm:$0xf]  ;;  %v515_v31 = vld [vmem:[%s13148_s20 + $0x8] sm:$0xff]  ;;  %v8293_v36 = vld [vmem:[%s13154_s17 + $0x280] sm:$0xf]  ;;  %v8366_v39 = vor.u32 %v11788_v29, %v8365_v27 }
 0x146   : > { %6168 = vmatpush.bf16.msrb.mxu1 %v8334_v41  ;;  %v11804_v32 = vld [vmem:[%s13154_s17 + $0x394] sm:$0xf0]  ;;  %544 = vst [vmem:[#allocation1 + $0x20] ss:$4 sm:$0xff] %v515_v31  ;;  %v11754_v35 = vld [vmem:[%s13154_s17 + $0x204] sm:$0xf0] }
 0x147   : > { %6181 = vmatpush.bf16.msrb.mxu2 %v8398_v42  ;;  %v11770_v37 = vld [vmem:[%s13154_s17 + $0x284] sm:$0xf0]  ;;  %v8357_v40 = vld [vmem:[%s13154_s17 + $0x300] sm:$0xf]  ;;  %v8430_v43 = vor.u32 %v11804_v32, %v8429_v30  ;;  %v8541_v45 = vld [vmem:[%s13154_s17 + $0x470] sm:$0xf]  ;;  %v8230_v50 = vor.u32 %v11754_v35, %v8229_v33 }
 0x148   : > { %6194 = vmatpush.bf16.msrb.mxu3 %v8462_v46  ;;  %v11786_v41 = vld [vmem:[%s13154_s17 + $0x304] sm:$0xf0]  ;;  %v8421_v42 = vld [vmem:[%s13154_s17 + $0x380] sm:$0xf]  ;;  %v11832_v46 = vld [vmem:[%s13154_s17 + $0x474] sm:$0xf0]  ;;  %v8294_v54 = vor.u32 %v11770_v37, %v8293_v36 }
 0x149   : > { %6156 = vmatpush.bf16.msrb.mxu0 %v8262_v53  ;;  %v11802_v44 = vld [vmem:[%s13154_s17 + $0x384] sm:$0xf0]  ;;  %v8605_v47 = vld [vmem:[%s13154_s17 + $0x4f0] sm:$0xf]  ;;  %v11848_v48 = vld [vmem:[%s13154_s17 + $0x4f4] sm:$0xf0]  ;;  %v8358_v55 = vor.u32 %v11786_v41, %v8357_v40 }
 0x14a   : > { %6169 = vmatpush.bf16.msrb.mxu1 %v8326_v59  ;;  %v8669_v49 = vld [vmem:[%s13154_s17 + $0x570] sm:$0xf]  ;;  %v11864_v51 = vld [vmem:[%s13154_s17 + $0x574] sm:$0xf0]  ;;  %v8533_v56 = vld [vmem:[%s13154_s17 + $0x460] sm:$0xf]  ;;  %v8422_v59 = vor.u32 %v11802_v44, %v8421_v42  ;;  %v8606_v3 = vor.u32 %v11848_v48, %v8605_v47 }
 0x14b   : > { %6182 = vmatpush.bf16.msrb.mxu2 %v8390_v60  ;;  %v8733_v52 = vld [vmem:[%s13154_s17 + $0x5f0] sm:$0xf]  ;;  %v11880_v53 = vld [vmem:[%s13154_s17 + $0x5f4] sm:$0xf0]  ;;  %v11830_v57 = vld [vmem:[%s13154_s17 + $0x464] sm:$0xf0]  ;;  %v8542_v60 = vor.u32 %v11832_v46, %v8541_v45  ;;  %v8670_v4 = vor.u32 %v11864_v51, %v8669_v49 }
 0x14c   : > { %6195 = vmatpush.bf16.msrb.mxu3 %v8454_v63  ;;  %v517_v58 = vld [vmem:[%s13148_s20 + $0x18] sm:$0xff]  ;;  %v8597_v61 = vld [vmem:[%s13154_s17 + $0x4e0] sm:$0xf]  ;;  %v8534_v17 = vor.u32 %v11830_v57, %v8533_v56  ;;  %v8525_v21 = vld [vmem:[%s13154_s17 + $0x450] sm:$0xf] }
 0x14d   : > { %6157 = vmatpush.bf16.msrb.mxu0 %v8254_v8  ;;  %v11846_v62 = vld [vmem:[%s13154_s17 + $0x4e4] sm:$0xf0]  ;;  %v549_v2 = vld.sshfl [vmem:[#allocation1 + $0x20] sm:$0xff pattern:$0x73625140] }
 0x14e   : > { %6170 = vmatpush.bf16.msrb.mxu1 %v8318_v9  ;;  %v551_v63 = vld.sshfl [vmem:[#allocation1 + $0x30] sm:$0xff pattern:$0x73625140]  ;;  %v552_v5 = vld.sshfl [vmem:[#allocation1 + $0x38] sm:$0xff pattern:$0x73625140]  ;;  %v8734_v9 = vor.u32 %v11880_v53, %v8733_v52  ;;  %v13331_v15 = vpack.c.bf16 %v549_v2, %v549_v2  ;;  %v8598_v19 = vor.u32 %v11846_v62, %v8597_v61 }
 0x14f   : > { %6183 = vmatpush.bf16.msrb.mxu2 %v8382_v10  ;;  %v550_v8 = vld.sshfl [vmem:[#allocation1 + $0x28] sm:$0xff pattern:$0x73625140]  ;;  %v11862_v11 = vld [vmem:[%s13154_s17 + $0x564] sm:$0xf0]  ;;  %v13327_v12 = vpack.c.bf16 %v551_v63, %v551_v63  ;;  %v13333_v16 = vpack.c.bf16 %v552_v5, %v552_v5 }
 0x150   : > { %6196 = vmatpush.bf16.msrb.mxu3 %v8446_v14  ;;  %v8661_v10 = vld [vmem:[%s13154_s17 + $0x560] sm:$0xf]  ;;  %554 = vst [vmem:[#allocation1 + $0x20] ss:$4 sm:$0xff] %v517_v58  ;;  %v11878_v14 = vld [vmem:[%s13154_s17 + $0x5e4] sm:$0xf0]  ;;  %v13335_v18 = vpack.c.bf16 %v550_v8, %v550_v8 }
 0x151   : > { %6158 = vmatpush.bf16.msrb.mxu0 %v8246_v20  ;;  %v8725_v13 = vld [vmem:[%s13154_s17 + $0x5e0] sm:$0xf]  ;;  %v8662_v20 = vor.u32 %v11862_v11, %v8661_v10  ;;  %v11828_v22 = vld [vmem:[%s13154_s17 + $0x454] sm:$0xf0]  ;;  %v8653_v26 = vld [vmem:[%s13154_s17 + $0x550] sm:$0xf] }
 0x152   : > { %6171 = vmatpush.bf16.msrb.mxu1 %v8310_v23  ;;  %v8589_v23 = vld [vmem:[%s13154_s17 + $0x4d0] sm:$0xf]  ;;  %v11844_v25 = vld [vmem:[%s13154_s17 + $0x4d4] sm:$0xf0]  ;;  %v8526_v30 = vor.u32 %v11828_v22, %v8525_v21  ;;  %v8517_v33 = vld [vmem:[%s13154_s17 + $0x440] sm:$0xf] }
 0x153   : > { %6184 = vmatpush.bf16.msrb.mxu2 %v8374_v24  ;;  %v8726_v24 = vor.u32 %v11878_v14, %v8725_v13  ;;  %v11860_v27 = vld [vmem:[%s13154_s17 + $0x554] sm:$0xf0]  ;;  %v8590_v31 = vor.u32 %v11844_v25, %v8589_v23  ;;  %v8581_v35 = vld [vmem:[%s13154_s17 + $0x4c0] sm:$0xf]  ;;  %v11842_v37 = vld [vmem:[%s13154_s17 + $0x4c4] sm:$0xf0] }
 0x154   : > { %6197 = vmatpush.bf16.msrb.mxu3 %v8438_v28  ;;  %v8717_v28 = vld [vmem:[%s13154_s17 + $0x5d0] sm:$0xf]  ;;  %v11876_v29 = vld [vmem:[%s13154_s17 + $0x5d4] sm:$0xf0]  ;;  %v8654_v32 = vor.u32 %v11860_v27, %v8653_v26  ;;  %v8709_v40 = vld [vmem:[%s13154_s17 + $0x5c0] sm:$0xf]  ;;  %v8582_v46 = vor.u32 %v11842_v37, %v8581_v35 }
 0x155   : > { %6159 = vmatpush.bf16.msrb.mxu0 %v8238_v34  ;;  %v11826_v34 = vld [vmem:[%s13154_s17 + $0x444] sm:$0xf0]  ;;  %v8718_v36 = vor.u32 %v11876_v29, %v8717_v28  ;;  %v11824_v44 = vld [vmem:[%s13154_s17 + $0x434] sm:$0xf0]  ;;  %v8573_v45 = vld [vmem:[%s13154_s17 + $0x4b0] sm:$0xf] }
 0x156   : > { %6172 = vmatpush.bf16.msrb.mxu1 %v8302_v38  ;;  %v8645_v38 = vld [vmem:[%s13154_s17 + $0x540] sm:$0xf]  ;;  %v11874_v41 = vld [vmem:[%s13154_s17 + $0x5c4] sm:$0xf0]  ;;  %v8518_v42 = vor.u32 %v11826_v34, %v8517_v33  ;;  %v11840_v48 = vld [vmem:[%s13154_s17 + $0x4b4] sm:$0xf0] }
 0x157   : > { %6185 = vmatpush.bf16.msrb.mxu2 %v8366_v39  ;;  %v11858_v39 = vld [vmem:[%s13154_s17 + $0x544] sm:$0xf0]  ;;  %v8637_v49 = vld [vmem:[%s13154_s17 + $0x530] sm:$0xf]  ;;  %v8710_v51 = vor.u32 %v11874_v41, %v8709_v40  ;;  %v11872_v53 = vld [vmem:[%s13154_s17 + $0x5b4] sm:$0xf0]  ;;  %v8574_v61 = vor.u32 %v11840_v48, %v8573_v45 }
 0x158   : > { %6198 = vmatpush.bf16.msrb.mxu3 %v8430_v43  ;;  %v8509_v43 = vld [vmem:[%s13154_s17 + $0x430] sm:$0xf]  ;;  %v8646_v47 = vor.u32 %v11858_v39, %v8645_v38  ;;  %v13369_v57 = vld.sshfl [vmem:[#allocation1 + $0x10] sm:$0xff pattern:$0x73625140] }
 0x159   : > { %6160 = vmatpush.bf16.msrb.mxu0 %v8230_v50  ;;  %v11856_v50 = vld [vmem:[%s13154_s17 + $0x534] sm:$0xf0]  ;;  %v8701_v52 = vld [vmem:[%s13154_s17 + $0x5b0] sm:$0xf]  ;;  %v8510_v58 = vor.u32 %v11824_v44, %v8509_v43  ;;  %v11822_v63 = vld [vmem:[%s13154_s17 + $0x424] sm:$0xf0] }
 0x15a   : > { %6173 = vmatpush.bf16.msrb.mxu1 %v8294_v54  ;;  %v518_v54 = vld [vmem:[%s13148_s20 + $0x20] sm:$0xff]  ;;  %v8638_v62 = vor.u32 %v11856_v50, %v8637_v49  ;;  %v11854_v8 = vld [vmem:[%s13154_s17 + $0x524] sm:$0xf0]  ;;  %v11836_v22 = vld [vmem:[%s13154_s17 + $0x494] sm:$0xf0] }
 0x15b   : > { %6186 = vmatpush.bf16.msrb.mxu2 %v8358_v55  ;;  %v8501_v55 = vld [vmem:[%s13154_s17 + $0x420] sm:$0xf]  ;;  %v13367_v56 = vld.sshfl [vmem:[#allocation1] sm:$0xff pattern:$0x73625140] }
 0x15c   : > { %6199 = vmatpush.bf16.msrb.mxu3 %v8422_v59  ;;  %6161 = vmatmul.bf16.vlgmr.msrb.gmra.mxu0 %v13331_v15  ;;  %v13371_v59 = vld.sshfl [vmem:[#allocation1 + $0x8] sm:$0xff pattern:$0x73625140]  ;;  %v11870_v10 = vld [vmem:[%s13154_s17 + $0x5a4] sm:$0xf0]  ;;  %v8502_v11 = vor.u32 %v11822_v63, %v8501_v55 }
 0x15d   : > { %6205 = vmatpush.bf16.msra.mxu0 %v8542_v60  ;;  %6174 = vmatmul.bf16.vlgmr.msrb.gmra.mxu1 %v13335_v18  ;;  %v13373_v60 = vld.sshfl [vmem:[#allocation1 + $0x18] sm:$0xff pattern:$0x73625140]  ;;  %v8565_v2 = vld [vmem:[%s13154_s17 + $0x4a0] sm:$0xf] }
 0x15e   : > { %6218 = vmatpush.bf16.msra.mxu1 %v8606_v3  ;;  %6187 = vmatmul.bf16.vlgmr.msrb.gmra.mxu2 %v13327_v12  ;;  %563 = vst [vmem:[#allocation1] ss:$4 sm:$0xff] %v518_v54  ;;  %v8702_v3 = vor.u32 %v11872_v53, %v8701_v52  ;;  %v8629_v5 = vld [vmem:[%s13154_s17 + $0x520] sm:$0xf]  ;;  %v8621_v23 = vld [vmem:[%s13154_s17 + $0x510] sm:$0xf] }
 0x15f   : > { %6231 = vmatpush.bf16.msra.mxu2 %v8670_v4  ;;  %6200 = vmatmul.bf16.vlgmr.msrb.gmra.mxu3 %v13333_v16  ;;  %v11838_v4 = vld [vmem:[%s13154_s17 + $0x4a4] sm:$0xf0]  ;;  %v8630_v14 = vor.u32 %v11854_v8, %v8629_v5  ;;  %v8685_v25 = vld [vmem:[%s13154_s17 + $0x590] sm:$0xf]  ;;  %v11868_v26 = vld [vmem:[%s13154_s17 + $0x594] sm:$0xf0]  ;;  %v13422_v5 = vpack.c.bf16 %v13371_v59, %v13371_v59 }
 0x160   : > { %6244 = vmatpush.bf16.msra.mxu3 %v8734_v9  ;;  %v8693_v9 = vld [vmem:[%s13154_s17 + $0x5a0] sm:$0xf]  ;;  %v8566_v13 = vor.u32 %v11838_v4, %v8565_v2  ;;  %v11818_v29 = vld [vmem:[%s13154_s17 + $0x404] sm:$0xf0]  ;;  %v8686_v35 = vor.u32 %v11868_v26, %v8685_v25  ;;  %v8797_v39 = vld [vmem:[%s13154_s17 + $0x670] sm:$0xf]  ;;  %v13418_v4 = vpack.c.bf16 %v13369_v57, %v13369_v57 }
 0x161   : > { %6206 = vmatpush.bf16.msra.mxu0 %v8534_v17  ;;  %v8493_v17 = vld [vmem:[%s13154_s17 + $0x410] sm:$0xf]  ;;  %v8694_v21 = vor.u32 %v11870_v10, %v8693_v9  ;;  %v8485_v28 = vld [vmem:[%s13154_s17 + $0x400] sm:$0xf]  ;;  %v11834_v33 = vld [vmem:[%s13154_s17 + $0x484] sm:$0xf0] }
 0x162   : > { %6219 = vmatpush.bf16.msra.mxu1 %v8598_v19  ;;  %v11820_v19 = vld [vmem:[%s13154_s17 + $0x414] sm:$0xf0]  ;;  %v8613_v34 = vld [vmem:[%s13154_s17 + $0x500] sm:$0xf]  ;;  %v11866_v38 = vld [vmem:[%s13154_s17 + $0x584] sm:$0xf0] }
 0x163   : > { %6232 = vmatpush.bf16.msra.mxu2 %v8662_v20  ;;  %v8557_v20 = vld [vmem:[%s13154_s17 + $0x490] sm:$0xf]  ;;  %v8494_v27 = vor.u32 %v11820_v19, %v8493_v17  ;;  %v8677_v37 = vld [vmem:[%s13154_s17 + $0x580] sm:$0xf]  ;;  %v11896_v40 = vld [vmem:[%s13154_s17 + $0x674] sm:$0xf0] }
 0x164   : > { %6245 = vmatpush.bf16.msra.mxu3 %v8726_v24  ;;  %v11852_v24 = vld [vmem:[%s13154_s17 + $0x514] sm:$0xf0]  ;;  %v8861_v41 = vld [vmem:[%s13154_s17 + $0x6f0] sm:$0xf]  ;;  %v8678_v50 = vor.u32 %v11866_v38, %v8677_v37  ;;  %v8789_v54 = vld [vmem:[%s13154_s17 + $0x660] sm:$0xf] }
 0x165   : > { %6207 = vmatpush.bf16.msra.mxu0 %v8526_v30  ;;  %v8558_v30 = vor.u32 %v11836_v22, %v8557_v20  ;;  %v11912_v43 = vld [vmem:[%s13154_s17 + $0x6f4] sm:$0xf0]  ;;  %v8925_v44 = vld [vmem:[%s13154_s17 + $0x770] sm:$0xf]  ;;  %v11894_v55 = vld [vmem:[%s13154_s17 + $0x664] sm:$0xf0] }
 0x166   : > { %6220 = vmatpush.bf16.msra.mxu1 %v8590_v31  ;;  %v8622_v31 = vor.u32 %v11852_v24, %v8621_v23  ;;  %v11928_v45 = vld [vmem:[%s13154_s17 + $0x774] sm:$0xf0]  ;;  %v8989_v48 = vld [vmem:[%s13154_s17 + $0x7f0] sm:$0xf]  ;;  %v8862_v52 = vor.u32 %v11912_v43, %v8861_v41  ;;  %v11910_v63 = vld [vmem:[%s13154_s17 + $0x6e4] sm:$0xf0]  ;;  %v8790_v10 = vor.u32 %v11894_v55, %v8789_v54 }
 0x167   : > { %6233 = vmatpush.bf16.msra.mxu2 %v8654_v32  ;;  %v8549_v32 = vld [vmem:[%s13154_s17 + $0x480] sm:$0xf]  ;;  %v11944_v49 = vld [vmem:[%s13154_s17 + $0x7f4] sm:$0xf0]  ;;  %v8926_v53 = vor.u32 %v11928_v45, %v8925_v44  ;;  %v11942_v9 = vld [vmem:[%s13154_s17 + $0x7e4] sm:$0xf0] }
 0x168   : > { %6246 = vmatpush.bf16.msra.mxu3 %v8718_v36  ;;  %v11850_v36 = vld [vmem:[%s13154_s17 + $0x504] sm:$0xf0]  ;;  %v8917_v2 = vld [vmem:[%s13154_s17 + $0x760] sm:$0xf]  ;;  %v11908_v17 = vld [vmem:[%s13154_s17 + $0x6d4] sm:$0xf0] }
 0x169   : > { %6208 = vmatpush.bf16.msra.mxu0 %v8518_v42  ;;  %v8486_v42 = vor.u32 %v11818_v29, %v8485_v28  ;;  %v8981_v8 = vld [vmem:[%s13154_s17 + $0x7e0] sm:$0xf]  ;;  %v8909_v19 = vld [vmem:[%s13154_s17 + $0x750] sm:$0xf]  ;;  %v11924_v20 = vld [vmem:[%s13154_s17 + $0x754] sm:$0xf0] }
 0x16a   : > { %6221 = vmatpush.bf16.msra.mxu1 %v8582_v46  ;;  %v8550_v46 = vor.u32 %v11834_v33, %v8549_v32  ;;  %v11940_v22 = vld [vmem:[%s13154_s17 + $0x7d4] sm:$0xf0]  ;;  %v8773_v23 = vld [vmem:[%s13154_s17 + $0x640] sm:$0xf]  ;;  %v11890_v24 = vld [vmem:[%s13154_s17 + $0x644] sm:$0xf0]  ;;  %v8910_v32 = vor.u32 %v11924_v20, %v8909_v19 }
 0x16b   : > { %6234 = vmatpush.bf16.msra.mxu2 %v8646_v47  ;;  %v8614_v47 = vor.u32 %v11850_v36, %v8613_v34  ;;  %v8837_v26 = vld [vmem:[%s13154_s17 + $0x6c0] sm:$0xf]  ;;  %v11922_v29 = vld [vmem:[%s13154_s17 + $0x744] sm:$0xf0]  ;;  %v8765_v43 = vld [vmem:[%s13154_s17 + $0x630] sm:$0xf] }
 0x16c   : > { %6247 = vmatpush.bf16.msra.mxu3 %v8710_v51  ;;  %v8798_v51 = vor.u32 %v11896_v40, %v8797_v39  ;;  %v8901_v28 = vld [vmem:[%s13154_s17 + $0x740] sm:$0xf]  ;;  %v13449_v33 = vld.sshfl [vmem:[#allocation1 + $0x20] sm:$0xff pattern:$0x73625140]  ;;  %v8774_v40 = vor.u32 %v11890_v24, %v8773_v23 }
 0x16d   : > { %6209 = vmatpush.bf16.msra.mxu0 %v8510_v58  ;;  %v8853_v58 = vld [vmem:[%s13154_s17 + $0x6e0] sm:$0xf]  ;;  %v13455_v37 = vld.sshfl [vmem:[#allocation1 + $0x38] sm:$0xff pattern:$0x73625140] }
 0x16e   : > { %6222 = vmatpush.bf16.msra.mxu1 %v8574_v61  ;;  %v8990_v61 = vor.u32 %v11944_v49, %v8989_v48  ;;  %v8854_v57 = vor.u32 %v11910_v63, %v8853_v58  ;;  %v13451_v34 = vld.sshfl [vmem:[#allocation1 + $0x30] sm:$0xff pattern:$0x73625140]  ;;  %v13453_v36 = vld.sshfl [vmem:[#allocation1 + $0x28] sm:$0xff pattern:$0x73625140] }
 0x16f   : > { %6235 = vmatpush.bf16.msra.mxu2 %v8638_v62  ;;  %v13411_v62 = vpack.c.bf16 %v13367_v56, %v13367_v56  ;;  %v13428_v56 = vpack.c.bf16 %v13373_v60, %v13373_v60  ;;  %v8982_v60 = vor.u32 %v11942_v9, %v8981_v8  ;;  %v8965_v38 = vld [vmem:[%s13154_s17 + $0x7c0] sm:$0xf]  ;;  %v11938_v39 = vld [vmem:[%s13154_s17 + $0x7c4] sm:$0xf0]  ;;  %v11888_v44 = vld [vmem:[%s13154_s17 + $0x634] sm:$0xf0] }
 0x170   : > { %6248 = vmatpush.bf16.msra.mxu3 %v8702_v3  ;;  %v11926_v3 = vld [vmem:[%s13154_s17 + $0x764] sm:$0xf0]  ;;  %v8829_v45 = vld [vmem:[%s13154_s17 + $0x6b0] sm:$0xf]  ;;  %v11920_v49 = vld [vmem:[%s13154_s17 + $0x734] sm:$0xf0] }
 0x171   : > { %6210 = vmatpush.bf16.msra.mxu0 %v8502_v11  ;;  %v8781_v11 = vld [vmem:[%s13154_s17 + $0x650] sm:$0xf]  ;;  %v8918_v59 = vor.u32 %v11926_v3, %v8917_v2  ;;  %v8757_v55 = vld [vmem:[%s13154_s17 + $0x620] sm:$0xf]  ;;  %v11886_v58 = vld [vmem:[%s13154_s17 + $0x624] sm:$0xf0] }
 0x172   : > { %6223 = vmatpush.bf16.msra.mxu1 %v8566_v13  ;;  %v11892_v13 = vld [vmem:[%s13154_s17 + $0x654] sm:$0xf0]  ;;  %v8893_v48 = vld [vmem:[%s13154_s17 + $0x730] sm:$0xf]  ;;  %v11902_v2 = vld [vmem:[%s13154_s17 + $0x6a4] sm:$0xf0] }
 0x173   : > { %6236 = vmatpush.bf16.msra.mxu2 %v8630_v14  ;;  %v8845_v14 = vld [vmem:[%s13154_s17 + $0x6d0] sm:$0xf]  ;;  %v8782_v25 = vor.u32 %v11892_v13, %v8781_v11  ;;  %v8894_v54 = vor.u32 %v11920_v49, %v8893_v48  ;;  %v8885_v3 = vld [vmem:[%s13154_s17 + $0x720] sm:$0xf]  ;;  %v11918_v8 = vld [vmem:[%s13154_s17 + $0x724] sm:$0xf0]  ;;  %v8758_v11 = vor.u32 %v11886_v58, %v8757_v55 }
 0x174   : > { %6249 = vmatpush.bf16.msra.mxu3 %v8694_v21  ;;  %v8973_v21 = vld [vmem:[%s13154_s17 + $0x7d0] sm:$0xf]  ;;  %v8949_v9 = vld [vmem:[%s13154_s17 + $0x7a0] sm:$0xf]  ;;  %v11900_v19 = vld [vmem:[%s13154_s17 + $0x694] sm:$0xf0] }
 0x175   : > { %6211 = vmatpush.bf16.msra.mxu0 %v8494_v27  ;;  %v11906_v27 = vld [vmem:[%s13154_s17 + $0x6c4] sm:$0xf0]  ;;  %v8749_v13 = vld [vmem:[%s13154_s17 + $0x610] sm:$0xf]  ;;  %v11932_v23 = vld [vmem:[%s13154_s17 + $0x794] sm:$0xf0] }
 0x176   : > { %6224 = vmatpush.bf16.msra.mxu1 %v8558_v30  ;;  %v519_v30 = vld [vmem:[%s13148_s20 + $0x28] sm:$0xff]  ;;  %v8838_v41 = vor.u32 %v11906_v27, %v8837_v26  ;;  %v8877_v20 = vld [vmem:[%s13154_s17 + $0x710] sm:$0xf]  ;;  %v9045_v55 = vld [vmem:[%s13154_s17 + $0x860] sm:$0xf] }
 0x177   : > { %6237 = vmatpush.bf16.msra.mxu2 %v8622_v31  ;;  %v8846_v31 = vor.u32 %v11908_v17, %v8845_v14  ;;  %564 = vst [vmem:[#allocation1 + $0x20] ss:$4 sm:$0xff] %v519_v30  ;;  %v11884_v14 = vld [vmem:[%s13154_s17 + $0x614] sm:$0xf0]  ;;  %v8813_v17 = vld [vmem:[%s13154_s17 + $0x690] sm:$0xf] }
 0x178   : > { %6250 = vmatpush.bf16.msra.mxu3 %v8686_v35  ;;  %v8974_v35 = vor.u32 %v11940_v22, %v8973_v21  ;;  %v11916_v21 = vld [vmem:[%s13154_s17 + $0x714] sm:$0xf0]  ;;  %v8941_v22 = vld [vmem:[%s13154_s17 + $0x790] sm:$0xf]  ;;  %v8750_v24 = vor.u32 %v11884_v14, %v8749_v13  ;;  %v11882_v26 = vld [vmem:[%s13154_s17 + $0x604] sm:$0xf0]  ;;  %v8814_v27 = vor.u32 %v11900_v19, %v8813_v17 }
 0x179   : > { %6212 = vmatpush.bf16.msra.mxu0 %v8486_v42  ;;  %v8902_v42 = vor.u32 %v11922_v29, %v8901_v28  ;;  %v8878_v28 = vor.u32 %v11916_v21, %v8877_v20  ;;  %v8805_v29 = vld [vmem:[%s13154_s17 + $0x680] sm:$0xf]  ;;  %v11898_v30 = vld [vmem:[%s13154_s17 + $0x684] sm:$0xf0]  ;;  %v9245_v49 = vld [vmem:[%s13154_s17 + $0x9f0] sm:$0xf] }
 0x17a   : > { %6225 = vmatpush.bf16.msra.mxu1 %v8550_v46  ;;  %v8966_v46 = vor.u32 %v11938_v39, %v8965_v38  ;;  %v8933_v38 = vld [vmem:[%s13154_s17 + $0x780] sm:$0xf]  ;;  %v11930_v39 = vld [vmem:[%s13154_s17 + $0x784] sm:$0xf0]  ;;  %v11956_v17 = vld [vmem:[%s13154_s17 + $0x854] sm:$0xf0] }
 0x17b   : > { %6238 = vmatpush.bf16.msra.mxu2 %v8614_v47  ;;  %v11904_v47 = vld [vmem:[%s13154_s17 + $0x6b4] sm:$0xf0]  ;;  %v11958_v58 = vld [vmem:[%s13154_s17 + $0x864] sm:$0xf0] }
 0x17c   : > { %6251 = vmatpush.bf16.msra.mxu3 %v8678_v50  ;;  %6213 = vmatmul.bf16.vlgmr.msra.gmra.mxu0 %v13411_v62  ;;  %v8957_v50 = vld [vmem:[%s13154_s17 + $0x7b0] sm:$0xf]  ;;  %v9046_v13 = vor.u32 %v11958_v58, %v9045_v55  ;;  %v11972_v20 = vld [vmem:[%s13154_s17 + $0x8d4] sm:$0xf0]  ;;  %v9013_v55 = vld [vmem:[%s13154_s17 + $0x820] sm:$0xf] }
 0x17d   : > { %6257 = vmatpush.bf16.msrb.mxu0 %v8798_v51  ;;  %6226 = vmatmul.bf16.vlgmr.msra.gmra.mxu1 %v13422_v5  ;;  %v11936_v51 = vld [vmem:[%s13154_s17 + $0x7b4] sm:$0xf0]  ;;  %v11950_v58 = vld [vmem:[%s13154_s17 + $0x824] sm:$0xf0] }
 0x17e   : > { %6270 = vmatpush.bf16.msrb.mxu1 %v8862_v52  ;;  %6239 = vmatmul.bf16.vlgmr.msra.gmra.mxu2 %v13418_v4  ;;  %v8766_v52 = vor.u32 %v11888_v44, %v8765_v43  ;;  %v8958_v63 = vor.u32 %v11936_v51, %v8957_v50  ;;  %v11976_v44 = vld [vmem:[%s13154_s17 + $0x8f4] sm:$0xf0]  ;;  %v8934_v51 = vor.u32 %v11930_v39, %v8933_v38  ;;  %v9221_v38 = vld [vmem:[%s13154_s17 + $0x9c0] sm:$0xf]  ;;  %v12002_v39 = vld [vmem:[%s13154_s17 + $0x9c4] sm:$0xf0] }
 0x17f   : > { %6283 = vmatpush.bf16.msrb.mxu2 %v8926_v53  ;;  %6252 = vmatmul.bf16.vlgmr.msra.gmra.mxu3 %v13428_v56  ;;  %v8830_v53 = vor.u32 %v11904_v47, %v8829_v45  ;;  %v9181_v45 = vld [vmem:[%s13154_s17 + $0x970] sm:$0xf]  ;;  %v8806_v47 = vor.u32 %v11898_v30, %v8805_v29  ;;  %v12008_v50 = vld [vmem:[%s13154_s17 + $0x9f4] sm:$0xf0]  ;;  %v9093_v29 = vld [vmem:[%s13154_s17 + $0x8c0] sm:$0xf] }
 0x180   : > { %6296 = vmatpush.bf16.msrb.mxu3 %v8990_v61  ;;  %v8821_v61 = vld [vmem:[%s13154_s17 + $0x6a0] sm:$0xf]  ;;  %v11988_v21 = vld [vmem:[%s13154_s17 + $0x954] sm:$0xf0] }
 0x181   : > { %6258 = vmatpush.bf16.msrb.mxu0 %v8790_v10  ;;  %v11934_v10 = vld [vmem:[%s13154_s17 + $0x7a4] sm:$0xf0] }
 0x182   : > { %6271 = vmatpush.bf16.msrb.mxu1 %v8854_v57  ;;  %v8822_v57 = vor.u32 %v11902_v2, %v8821_v61  ;;  %v9109_v61 = vld [vmem:[%s13154_s17 + $0x8e0] sm:$0xf]  ;;  %v13504_v2 = vpack.c.bf16 %v13449_v33, %v13449_v33  ;;  %v12006_v33 = vld [vmem:[%s13154_s17 + $0x9e4] sm:$0xf0] }
 0x183   : > { %6284 = vmatpush.bf16.msrb.mxu2 %v8918_v59  ;;  %v8886_v59 = vor.u32 %v11918_v8, %v8885_v3  ;;  %v11974_v3 = vld [vmem:[%s13154_s17 + $0x8e4] sm:$0xf0]  ;;  %v9173_v8 = vld [vmem:[%s13154_s17 + $0x960] sm:$0xf] }
 0x184   : > { %6297 = vmatpush.bf16.msrb.mxu3 %v8982_v60  ;;  %v8950_v60 = vor.u32 %v11934_v10, %v8949_v9  ;;  %v11990_v9 = vld [vmem:[%s13154_s17 + $0x964] sm:$0xf0]  ;;  %v13511_v10 = vpack.c.bf16 %v13451_v34, %v13451_v34  ;;  %v9110_v34 = vor.u32 %v11974_v3, %v9109_v61  ;;  %v9077_v61 = vld [vmem:[%s13154_s17 + $0x8a0] sm:$0xf] }
 0x185   : > { %6259 = vmatpush.bf16.msrb.mxu0 %v8782_v25  ;;  %v8741_v25 = vld [vmem:[%s13154_s17 + $0x600] sm:$0xf]  ;;  %v9174_v14 = vor.u32 %v11990_v9, %v9173_v8  ;;  %v11966_v3 = vld [vmem:[%s13154_s17 + $0x8a4] sm:$0xf0] }
 0x186   : > { %6272 = vmatpush.bf16.msrb.mxu1 %v8846_v31  ;;  %v8869_v31 = vld [vmem:[%s13154_s17 + $0x700] sm:$0xf]  ;;  %v8742_v43 = vor.u32 %v11882_v26, %v8741_v25  ;;  %v11982_v9 = vld [vmem:[%s13154_s17 + $0x924] sm:$0xf0] }
 0x187   : > { %6285 = vmatpush.bf16.msrb.mxu2 %v8910_v32  ;;  %v8942_v32 = vor.u32 %v11932_v23, %v8941_v22  ;;  %v9229_v22 = vld [vmem:[%s13154_s17 + $0x9d0] sm:$0xf]  ;;  %v12004_v23 = vld [vmem:[%s13154_s17 + $0x9d4] sm:$0xf0]  ;;  %v9141_v8 = vld [vmem:[%s13154_s17 + $0x920] sm:$0xf] }
 0x188   : > { %6298 = vmatpush.bf16.msrb.mxu3 %v8974_v35  ;;  %v11914_v35 = vld [vmem:[%s13154_s17 + $0x704] sm:$0xf0]  ;;  %v9230_v30 = vor.u32 %v12004_v23, %v9229_v22  ;;  %v9197_v22 = vld [vmem:[%s13154_s17 + $0x990] sm:$0xf]  ;;  %v11996_v23 = vld [vmem:[%s13154_s17 + $0x994] sm:$0xf0] }
 0x189   : > { %6260 = vmatpush.bf16.msrb.mxu0 %v8774_v40  ;;  %v9053_v40 = vld [vmem:[%s13154_s17 + $0x870] sm:$0xf]  ;;  %v8870_v48 = vor.u32 %v11914_v35, %v8869_v31  ;;  %v11970_v31 = vld [vmem:[%s13154_s17 + $0x8c4] sm:$0xf0] }
 0x18a   : > { %6273 = vmatpush.bf16.msrb.mxu1 %v8838_v41  ;;  %v11960_v41 = vld [vmem:[%s13154_s17 + $0x874] sm:$0xf0]  ;;  %v11986_v35 = vld [vmem:[%s13154_s17 + $0x944] sm:$0xf0] }
 0x18b   : > { %6286 = vmatpush.bf16.msrb.mxu2 %v8902_v42  ;;  %v9117_v42 = vld [vmem:[%s13154_s17 + $0x8f0] sm:$0xf] }
 0x18c   : > { %6299 = vmatpush.bf16.msrb.mxu3 %v8966_v46  ;;  %v11992_v46 = vld [vmem:[%s13154_s17 + $0x974] sm:$0xf0] }
 0x18d   : > { %6261 = vmatpush.bf16.msrb.mxu0 %v8766_v52  ;;  %v9054_v52 = vor.u32 %v11960_v41, %v9053_v40  ;;  %v9094_v41 = vor.u32 %v11970_v31, %v9093_v29  ;;  %v9125_v31 = vld [vmem:[%s13154_s17 + $0x900] sm:$0xf] }
 0x18e   : > { %6274 = vmatpush.bf16.msrb.mxu1 %v8830_v53  ;;  %v9118_v53 = vor.u32 %v11976_v44, %v9117_v42  ;;  %v11952_v44 = vld [vmem:[%s13154_s17 + $0x834] sm:$0xf0] }
 0x18f   : > { %6287 = vmatpush.bf16.msrb.mxu2 %v8894_v54  ;;  %v9182_v54 = vor.u32 %v11992_v46, %v9181_v45  ;;  %v9085_v45 = vld [vmem:[%s13154_s17 + $0x8b0] sm:$0xf]  ;;  %v9222_v46 = vor.u32 %v12002_v39, %v9221_v38  ;;  %v9198_v38 = vor.u32 %v11996_v23, %v9197_v22  ;;  %v11994_v39 = vld [vmem:[%s13154_s17 + $0x984] sm:$0xf0] }
 0x190   : > { %6300 = vmatpush.bf16.msrb.mxu3 %v8958_v63  ;;  %v9246_v63 = vor.u32 %v12008_v50, %v9245_v49  ;;  %v11984_v49 = vld [vmem:[%s13154_s17 + $0x934] sm:$0xf0]  ;;  %v9213_v50 = vld [vmem:[%s13154_s17 + $0x9b0] sm:$0xf] }
 0x191   : > { %6262 = vmatpush.bf16.msrb.mxu0 %v8758_v11  ;;  %v13515_v11 = vpack.c.bf16 %v13453_v36, %v13453_v36  ;;  %v9037_v36 = vld [vmem:[%s13154_s17 + $0x850] sm:$0xf] }
 0x192   : > { %6275 = vmatpush.bf16.msrb.mxu1 %v8822_v57  ;;  %v9237_v57 = vld [vmem:[%s13154_s17 + $0x9e0] sm:$0xf]  ;;  %v9293_v23 = vld [vmem:[%s13154_s17 + $0xa50] sm:$0xf] }
 0x193   : > { %6288 = vmatpush.bf16.msrb.mxu2 %v8886_v59  ;;  %v13521_v59 = vpack.c.bf16 %v13455_v37, %v13455_v37  ;;  %v9238_v19 = vor.u32 %v12006_v33, %v9237_v57  ;;  %v9165_v37 = vld [vmem:[%s13154_s17 + $0x950] sm:$0xf]  ;;  %v9205_v57 = vld [vmem:[%s13154_s17 + $0x9a0] sm:$0xf]  ;;  %v11998_v33 = vld [vmem:[%s13154_s17 + $0x9a4] sm:$0xf0] }
 0x194   : > { %6301 = vmatpush.bf16.msrb.mxu3 %v8950_v60  ;;  %v9101_v60 = vld [vmem:[%s13154_s17 + $0x8d0] sm:$0xf]  ;;  %v9166_v26 = vor.u32 %v11988_v21, %v9165_v37  ;;  %v11980_v21 = vld [vmem:[%s13154_s17 + $0x914] sm:$0xf0] }
 0x195   : > { %6263 = vmatpush.bf16.msrb.mxu0 %v8750_v24  ;;  %v9038_v24 = vor.u32 %v11956_v17, %v9037_v36  ;;  %v9102_v25 = vor.u32 %v11972_v20, %v9101_v60  ;;  %v9005_v36 = vld [vmem:[%s13154_s17 + $0x810] sm:$0xf]  ;;  %v11948_v17 = vld [vmem:[%s13154_s17 + $0x814] sm:$0xf0] }
 0x196   : > { %6276 = vmatpush.bf16.msrb.mxu1 %v8814_v27  ;;  %v9029_v27 = vld [vmem:[%s13154_s17 + $0x840] sm:$0xf]  ;;  %v9069_v60 = vld [vmem:[%s13154_s17 + $0x890] sm:$0xf]  ;;  %v11964_v20 = vld [vmem:[%s13154_s17 + $0x894] sm:$0xf0] }
 0x197   : > { %6289 = vmatpush.bf16.msrb.mxu2 %v8878_v28  ;;  %v11954_v28 = vld [vmem:[%s13154_s17 + $0x844] sm:$0xf0]  ;;  %v9133_v37 = vld [vmem:[%s13154_s17 + $0x910] sm:$0xf]  ;;  %v9070_v29 = vor.u32 %v11964_v20, %v9069_v60  ;;  %v9493_v60 = vld [vmem:[%s13154_s17 + $0xbe0] sm:$0xf] }
 0x198   : > { %6302 = vmatpush.bf16.msrb.mxu3 %v8942_v32  ;;  %v9157_v32 = vld [vmem:[%s13154_s17 + $0x940] sm:$0xf]  ;;  %v9030_v40 = vor.u32 %v11954_v28, %v9029_v27  ;;  %v11962_v28 = vld [vmem:[%s13154_s17 + $0x884] sm:$0xf0] }
 0x199   : > { %6264 = vmatpush.bf16.msrb.mxu0 %v8742_v43  ;;  %v9158_v42 = vor.u32 %v11986_v35, %v9157_v32  ;;  %v9021_v43 = vld [vmem:[%s13154_s17 + $0x830] sm:$0xf]  ;;  %v9061_v27 = vld [vmem:[%s13154_s17 + $0x880] sm:$0xf]  ;;  %v11978_v32 = vld [vmem:[%s13154_s17 + $0x904] sm:$0xf0] }
 0x19a   : > { %6277 = vmatpush.bf16.msrb.mxu1 %v8806_v47  ;;  %v11968_v47 = vld [vmem:[%s13154_s17 + $0x8b4] sm:$0xf0]  ;;  %v9189_v35 = vld [vmem:[%s13154_s17 + $0x980] sm:$0xf] }
 0x19b   : > { %6290 = vmatpush.bf16.msrb.mxu2 %v8870_v48  ;;  %v9149_v48 = vld [vmem:[%s13154_s17 + $0x930] sm:$0xf] }
 0x19c   : > { %6303 = vmatpush.bf16.msrb.mxu3 %v8934_v51  ;;  %6265 = vmatmul.bf16.vlgmr.msrb.gmra.mxu0 %v13504_v2  ;;  %v12000_v51 = vld [vmem:[%s13154_s17 + $0x9b4] sm:$0xf0] }
 0x19d   : > { %6309 = vmatpush.bf16.msra.mxu0 %v9054_v52  ;;  %6278 = vmatmul.bf16.vlgmr.msrb.gmra.mxu1 %v13515_v11  ;;  %v9022_v52 = vor.u32 %v11952_v44, %v9021_v43  ;;  %v12040_v43 = vld [vmem:[%s13154_s17 + $0xaf4] sm:$0xf0]  ;;  %v9437_v44 = vld [vmem:[%s13154_s17 + $0xb70] sm:$0xf] }
 0x19e   : > { %6322 = vmatpush.bf16.msra.mxu1 %v9118_v53  ;;  %6291 = vmatmul.bf16.vlgmr.msrb.gmra.mxu2 %v13511_v10  ;;  %v9086_v53 = vor.u32 %v11968_v47, %v9085_v45  ;;  %v9501_v47 = vld [vmem:[%s13154_s17 + $0xbf0] sm:$0xf] }
 0x19f   : > { %6335 = vmatpush.bf16.msra.mxu2 %v9182_v54  ;;  %6304 = vmatmul.bf16.vlgmr.msrb.gmra.mxu3 %v13521_v59  ;;  %v9150_v54 = vor.u32 %v11984_v49, %v9149_v48  ;;  %v12072_v48 = vld [vmem:[%s13154_s17 + $0xbf4] sm:$0xf0]  ;;  %v9062_v49 = vor.u32 %v11962_v28, %v9061_v27  ;;  %v9421_v28 = vld [vmem:[%s13154_s17 + $0xb50] sm:$0xf] }
 0x1a0   : > { %6348 = vmatpush.bf16.msra.mxu3 %v9246_v63  ;;  %v9214_v63 = vor.u32 %v12000_v51, %v9213_v50  ;;  %v9126_v50 = vor.u32 %v11978_v32, %v9125_v31  ;;  %v565_v51 = vld.sshfl [vmem:[#allocation1] sm:$0xff pattern:$0x73625140] }
 0x1a1   : > { %6310 = vmatpush.bf16.msra.mxu0 %v9046_v13  ;;  %v9014_v13 = vor.u32 %v11950_v58, %v9013_v55  ;;  %v566_v55 = vld.sshfl [vmem:[#allocation1 + $0x8] sm:$0xff pattern:$0x73625140]  ;;  %v568_v58 = vld.sshfl [vmem:[#allocation1 + $0x18] sm:$0xff pattern:$0x73625140] }
 0x1a2   : > { %6323 = vmatpush.bf16.msra.mxu1 %v9110_v34  ;;  %v9078_v34 = vor.u32 %v11966_v3, %v9077_v61  ;;  %v9301_v3 = vld [vmem:[%s13154_s17 + $0xa60] sm:$0xf]  ;;  %v13597_v20 = vpack.c.bf16 %v568_v58, %v568_v58  ;;  %v12036_v27 = vld [vmem:[%s13154_s17 + $0xad4] sm:$0xf0]  ;;  %v9405_v58 = vld [vmem:[%s13154_s17 + $0xb30] sm:$0xf] }
 0x1a3   : > { %6336 = vmatpush.bf16.msra.mxu2 %v9174_v14  ;;  %v9142_v14 = vor.u32 %v11982_v9, %v9141_v8  ;;  %v12022_v8 = vld [vmem:[%s13154_s17 + $0xa64] sm:$0xf0]  ;;  %v9365_v9 = vld [vmem:[%s13154_s17 + $0xae0] sm:$0xf]  ;;  %v12068_v31 = vld [vmem:[%s13154_s17 + $0xbd4] sm:$0xf0] }
 0x1a4   : > { %6349 = vmatpush.bf16.msra.mxu3 %v9238_v19  ;;  %v9206_v19 = vor.u32 %v11998_v33, %v9205_v57  ;;  %v9502_v57 = vor.u32 %v12072_v48, %v9501_v47  ;;  %v13586_v33 = vpack.c.bf16 %v565_v51, %v565_v51  ;;  %v12066_v47 = vld [vmem:[%s13154_s17 + $0xbc4] sm:$0xf0]  ;;  %v9277_v51 = vld [vmem:[%s13154_s17 + $0xa30] sm:$0xf] }
 0x1a5   : > { %6311 = vmatpush.bf16.msra.mxu0 %v9038_v24  ;;  %v8997_v24 = vld [vmem:[%s13154_s17 + $0x800] sm:$0xf] }
 0x1a6   : > { %6324 = vmatpush.bf16.msra.mxu1 %v9102_v25  ;;  %v9006_v25 = vor.u32 %v11948_v17, %v9005_v36  ;;  %v13593_v17 = vpack.c.bf16 %v566_v55, %v566_v55  ;;  %v12032_v55 = vld [vmem:[%s13154_s17 + $0xab4] sm:$0xf0] }
 0x1a7   : > { %6337 = vmatpush.bf16.msra.mxu2 %v9166_v26  ;;  %v11946_v26 = vld [vmem:[%s13154_s17 + $0x804] sm:$0xf0] }
 0x1a8   : > { %6350 = vmatpush.bf16.msra.mxu3 %v9230_v30  ;;  %v9134_v30 = vor.u32 %v11980_v21, %v9133_v37  ;;  %v8998_v45 = vor.u32 %v11946_v26, %v8997_v24  ;;  %v9302_v37 = vor.u32 %v12022_v8, %v9301_v3  ;;  %v12020_v24 = vld [vmem:[%s13154_s17 + $0xa54] sm:$0xf0] }
 0x1a9   : > { %6312 = vmatpush.bf16.msra.mxu0 %v9030_v40  ;;  %v9309_v40 = vld [vmem:[%s13154_s17 + $0xa70] sm:$0xf]  ;;  %v9294_v32 = vor.u32 %v12020_v24, %v9293_v23  ;;  %v12064_v3 = vld [vmem:[%s13154_s17 + $0xbb4] sm:$0xf0]  ;;  %v12062_v23 = vld [vmem:[%s13154_s17 + $0xba4] sm:$0xf0] }
 0x1aa   : > { %6325 = vmatpush.bf16.msra.mxu1 %v9094_v41  ;;  %v12024_v41 = vld [vmem:[%s13154_s17 + $0xa74] sm:$0xf0] }
 0x1ab   : > { %6338 = vmatpush.bf16.msra.mxu2 %v9158_v42  ;;  %v9373_v42 = vld [vmem:[%s13154_s17 + $0xaf0] sm:$0xf] }
 0x1ac   : > { %6351 = vmatpush.bf16.msra.mxu3 %v9222_v46  ;;  %v12056_v46 = vld [vmem:[%s13154_s17 + $0xb74] sm:$0xf0]  ;;  %v9374_v61 = vor.u32 %v12040_v43, %v9373_v42  ;;  %v12034_v43 = vld [vmem:[%s13154_s17 + $0xac4] sm:$0xf0] }
 0x1ad   : > { %6313 = vmatpush.bf16.msra.mxu0 %v9022_v52  ;;  %v567_v52 = vld.sshfl [vmem:[#allocation1 + $0x10] sm:$0xff pattern:$0x73625140] }
 0x1ae   : > { %6326 = vmatpush.bf16.msra.mxu1 %v9086_v53  ;;  %v9190_v53 = vor.u32 %v11994_v39, %v9189_v35  ;;  %v13591_v36 = vpack.c.bf16 %v567_v52, %v567_v52  ;;  %v9285_v39 = vld [vmem:[%s13154_s17 + $0xa40] sm:$0xf]  ;;  %v12016_v52 = vld [vmem:[%s13154_s17 + $0xa34] sm:$0xf0] }
 0x1af   : > { %6339 = vmatpush.bf16.msra.mxu2 %v9150_v54  ;;  %v9310_v54 = vor.u32 %v12024_v41, %v9309_v40  ;;  %v12018_v40 = vld [vmem:[%s13154_s17 + $0xa44] sm:$0xf0]  ;;  %v9349_v41 = vld [vmem:[%s13154_s17 + $0xac0] sm:$0xf]  ;;  %v9278_v8 = vor.u32 %v12016_v52, %v9277_v51 }
 0x1b0   : > { %6352 = vmatpush.bf16.msra.mxu3 %v9214_v63  ;;  %v9438_v63 = vor.u32 %v12056_v46, %v9437_v44  ;;  %v9413_v44 = vld [vmem:[%s13154_s17 + $0xb40] sm:$0xf]  ;;  %v9286_v48 = vor.u32 %v12018_v40, %v9285_v39  ;;  %v12060_v39 = vld [vmem:[%s13154_s17 + $0xb94] sm:$0xf0]  ;;  %v12058_v52 = vld [vmem:[%s13154_s17 + $0xb84] sm:$0xf0] }
 0x1b1   : > { %6314 = vmatpush.bf16.msra.mxu0 %v9014_v13  ;;  %v12038_v13 = vld [vmem:[%s13154_s17 + $0xae4] sm:$0xf0]  ;;  %v9477_v46 = vld [vmem:[%s13154_s17 + $0xbc0] sm:$0xf] }
 0x1b2   : > { %6327 = vmatpush.bf16.msra.mxu1 %v9078_v34  ;;  %v9429_v34 = vld [vmem:[%s13154_s17 + $0xb60] sm:$0xf]  ;;  %v9366_v21 = vor.u32 %v12038_v13, %v9365_v9 }
 0x1b3   : > { %6340 = vmatpush.bf16.msra.mxu2 %v9142_v14  ;;  %v12054_v14 = vld [vmem:[%s13154_s17 + $0xb64] sm:$0xf0]  ;;  %v9269_v13 = vld [vmem:[%s13154_s17 + $0xa20] sm:$0xf] }
 0x1b4   : > { %6353 = vmatpush.bf16.msra.mxu3 %v9206_v19  ;;  %v12070_v19 = vld [vmem:[%s13154_s17 + $0xbe4] sm:$0xf0]  ;;  %v9430_v22 = vor.u32 %v12054_v14, %v9429_v34  ;;  %v9333_v14 = vld [vmem:[%s13154_s17 + $0xaa0] sm:$0xf] }
 0x1b5   : > { %6315 = vmatpush.bf16.msra.mxu0 %v9006_v25  ;;  %v9357_v25 = vld [vmem:[%s13154_s17 + $0xad0] sm:$0xf]  ;;  %v9494_v26 = vor.u32 %v12070_v19, %v9493_v60  ;;  %v12014_v34 = vld [vmem:[%s13154_s17 + $0xa24] sm:$0xf0]  ;;  %v9253_v40 = vld [vmem:[%s13154_s17 + $0xa00] sm:$0xf] }
 0x1b6   : > { %6328 = vmatpush.bf16.msra.mxu1 %v9070_v29  ;;  %v12052_v29 = vld [vmem:[%s13154_s17 + $0xb54] sm:$0xf0]  ;;  %v9358_v35 = vor.u32 %v12036_v27, %v9357_v25  ;;  %v12030_v19 = vld [vmem:[%s13154_s17 + $0xaa4] sm:$0xf0]  ;;  %v9270_v24 = vor.u32 %v12014_v34, %v9269_v13  ;;  %v9261_v25 = vld [vmem:[%s13154_s17 + $0xa10] sm:$0xf] }
 0x1b7   : > { %6341 = vmatpush.bf16.msra.mxu2 %v9134_v30  ;;  %v9485_v30 = vld [vmem:[%s13154_s17 + $0xbd0] sm:$0xf]  ;;  %v9445_v51 = vld [vmem:[%s13154_s17 + $0xb80] sm:$0xf] }
 0x1b8   : > { %6354 = vmatpush.bf16.msra.mxu3 %v9198_v38  ;;  %v9422_v38 = vor.u32 %v12052_v29, %v9421_v28  ;;  %v9486_v42 = vor.u32 %v12068_v31, %v9485_v30  ;;  %v12012_v28 = vld [vmem:[%s13154_s17 + $0xa14] sm:$0xf0]  ;;  %v9325_v29 = vld [vmem:[%s13154_s17 + $0xa90] sm:$0xf] }
 0x1b9   : > { %6316 = vmatpush.bf16.msra.mxu0 %v8998_v45  ;;  %v12050_v45 = vld [vmem:[%s13154_s17 + $0xb44] sm:$0xf0]  ;;  %v12028_v30 = vld [vmem:[%s13154_s17 + $0xa94] sm:$0xf0]  ;;  %v9757_v34 = vld [vmem:[%s13154_s17 + $0xdf0] sm:$0xf] }
 0x1ba   : > { %6329 = vmatpush.bf16.msra.mxu1 %v9062_v49  ;;  %v9350_v49 = vor.u32 %v12034_v43, %v9349_v41  ;;  %v12010_v41 = vld [vmem:[%s13154_s17 + $0xa04] sm:$0xf0]  ;;  %v9262_v43 = vor.u32 %v12012_v28, %v9261_v25  ;;  %v570_v25 = vld.sshfl [vmem:[#allocation1 + $0x28] sm:$0xff pattern:$0x73625140] }
 0x1bb   : > { %6342 = vmatpush.bf16.msra.mxu2 %v9126_v50  ;;  %v9414_v50 = vor.u32 %v12050_v45, %v9413_v44  ;;  %v9317_v44 = vld [vmem:[%s13154_s17 + $0xa80] sm:$0xf]  ;;  %v12026_v45 = vld [vmem:[%s13154_s17 + $0xa84] sm:$0xf0]  ;;  %v9254_v13 = vor.u32 %v12010_v41, %v9253_v40 }
 0x1bc   : > { %6355 = vmatpush.bf16.msra.mxu3 %v9190_v53  ;;  %6317 = vmatmul.bf16.vlgmr.msra.gmra.mxu0 %v13586_v33  ;;  %v9341_v53 = vld [vmem:[%s13154_s17 + $0xab0] sm:$0xf]  ;;  %v12102_v41 = vld [vmem:[%s13154_s17 + $0xce4] sm:$0xf0] }
 0x1bd   : > { %6361 = vmatpush.bf16.msrb.mxu0 %v9310_v54  ;;  %6330 = vmatmul.bf16.vlgmr.msra.gmra.mxu1 %v13593_v17  ;;  %v9478_v54 = vor.u32 %v12066_v47, %v9477_v46  ;;  %v9342_v9 = vor.u32 %v12032_v55, %v9341_v53  ;;  %v9381_v46 = vld [vmem:[%s13154_s17 + $0xb00] sm:$0xf]  ;;  %v12042_v47 = vld [vmem:[%s13154_s17 + $0xb04] sm:$0xf0]  ;;  %v9565_v53 = vld [vmem:[%s13154_s17 + $0xc70] sm:$0xf] }
 0x1be   : > { %6374 = vmatpush.bf16.msrb.mxu1 %v9374_v61  ;;  %6343 = vmatmul.bf16.vlgmr.msra.gmra.mxu2 %v13591_v36  ;;  %v12048_v61 = vld [vmem:[%s13154_s17 + $0xb34] sm:$0xf0] }
 0x1bf   : > { %6387 = vmatpush.bf16.msrb.mxu2 %v9438_v63  ;;  %6356 = vmatmul.bf16.vlgmr.msra.gmra.mxu3 %v13597_v20  ;;  %v9469_v63 = vld [vmem:[%s13154_s17 + $0xbb0] sm:$0xf] }
 0x1c0   : > { %6400 = vmatpush.bf16.msrb.mxu3 %v9502_v57  ;;  %v9406_v57 = vor.u32 %v12048_v61, %v9405_v58  ;;  %v9470_v60 = vor.u32 %v12064_v3, %v9469_v63  ;;  %v12088_v58 = vld [vmem:[%s13154_s17 + $0xc74] sm:$0xf0]  ;;  %v9629_v61 = vld [vmem:[%s13154_s17 + $0xcf0] sm:$0xf] }
 0x1c1   : > { %6362 = vmatpush.bf16.msrb.mxu0 %v9302_v37  ;;  %v9397_v37 = vld [vmem:[%s13154_s17 + $0xb20] sm:$0xf]  ;;  %v12104_v63 = vld [vmem:[%s13154_s17 + $0xcf4] sm:$0xf0]  ;;  %v9693_v3 = vld [vmem:[%s13154_s17 + $0xd70] sm:$0xf] }
 0x1c2   : > { %6375 = vmatpush.bf16.msrb.mxu1 %v9366_v21  ;;  %v12046_v21 = vld [vmem:[%s13154_s17 + $0xb24] sm:$0xf0]  ;;  %v9630_v28 = vor.u32 %v12104_v63, %v9629_v61  ;;  %v12100_v63 = vld [vmem:[%s13154_s17 + $0xcd4] sm:$0xf0] }
 0x1c3   : > { %6388 = vmatpush.bf16.msrb.mxu2 %v9430_v22  ;;  %v9461_v22 = vld [vmem:[%s13154_s17 + $0xba0] sm:$0xf]  ;;  %v9398_v27 = vor.u32 %v12046_v21, %v9397_v37  ;;  %v9382_v37 = vor.u32 %v12042_v47, %v9381_v46  ;;  %v569_v21 = vld.sshfl [vmem:[#allocation1 + $0x20] sm:$0xff pattern:$0x73625140]  ;;  %v13672_v46 = vpack.c.bf16 %v570_v25, %v570_v25 }
 0x1c4   : > { %6401 = vmatpush.bf16.msrb.mxu3 %v9494_v26  ;;  %v9334_v26 = vor.u32 %v12030_v19, %v9333_v14  ;;  %v9462_v31 = vor.u32 %v12062_v23, %v9461_v22  ;;  %v12136_v14 = vld [vmem:[%s13154_s17 + $0xdf4] sm:$0xf0]  ;;  %v9318_v19 = vor.u32 %v12026_v45, %v9317_v44  ;;  %v571_v22 = vld.sshfl [vmem:[#allocation1 + $0x30] sm:$0xff pattern:$0x73625140]  ;;  %v9446_v23 = vor.u32 %v12058_v52, %v9445_v51 }
 0x1c5   : > { %6363 = vmatpush.bf16.msrb.mxu0 %v9294_v32  ;;  %v9389_v32 = vld [vmem:[%s13154_s17 + $0xb10] sm:$0xf]  ;;  %v13665_v40 = vpack.c.bf16 %v569_v21, %v569_v21  ;;  %v13670_v45 = vpack.c.bf16 %v571_v22, %v571_v22  ;;  %v9749_v47 = vld [vmem:[%s13154_s17 + $0xde0] sm:$0xf]  ;;  %v12114_v25 = vld [vmem:[%s13154_s17 + $0xd44] sm:$0xf0] }
 0x1c6   : > { %6376 = vmatpush.bf16.msrb.mxu1 %v9358_v35  ;;  %v12044_v35 = vld [vmem:[%s13154_s17 + $0xb14] sm:$0xf0]  ;;  %v9605_v21 = vld [vmem:[%s13154_s17 + $0xcc0] sm:$0xf] }
 0x1c7   : > { %6389 = vmatpush.bf16.msrb.mxu2 %v9422_v38  ;;  %v9453_v38 = vld [vmem:[%s13154_s17 + $0xb90] sm:$0xf] }
 0x1c8   : > { %6402 = vmatpush.bf16.msrb.mxu3 %v9486_v42  ;;  %v6110_v42 = vpop.f32.mrf.mxu0  ;;  %v9454_v55 = vor.u32 %v12060_v39, %v9453_v38  ;;  %v9758_v39 = vor.u32 %v12136_v14, %v9757_v34 }
 0x1c9   : > { %6364 = vmatpush.bf16.msrb.mxu0 %v9286_v48  ;;  %v6123_v48 = vpop.f32.mrf.mxu1 }
 0x1ca   : > { %6377 = vmatpush.bf16.msrb.mxu1 %v9350_v49  ;;  %v9326_v49 = vor.u32 %v12028_v30, %v9325_v29  ;;  %v9557_v30 = vld [vmem:[%s13154_s17 + $0xc60] sm:$0xf] }
 0x1cb   : > { %6390 = vmatpush.bf16.msrb.mxu2 %v9414_v50  ;;  %v9390_v50 = vor.u32 %v12044_v35, %v9389_v32  ;;  %v9621_v32 = vld [vmem:[%s13154_s17 + $0xce0] sm:$0xf] }
 0x1cc   : > { %6403 = vmatpush.bf16.msrb.mxu3 %v9478_v54  ;;  %v6124_v54 = vadd.f32 %v6123_v48, %v6110_v42  ;;  %v9685_v42 = vld [vmem:[%s13154_s17 + $0xd60] sm:$0xf]  ;;  %v12134_v48 = vld [vmem:[%s13154_s17 + $0xde4] sm:$0xf0]  ;;  %v9622_v51 = vor.u32 %v12102_v41, %v9621_v32  ;;  %v9533_v32 = vld [vmem:[%s13154_s17 + $0xc30] sm:$0xf] }
 0x1cd   : > { %6365 = vmatpush.bf16.msrb.mxu0 %v9278_v8  ;;  %v12120_v8 = vld [vmem:[%s13154_s17 + $0xd74] sm:$0xf0]  ;;  %v9750_v61 = vor.u32 %v12134_v48, %v9749_v47  ;;  %v9661_v47 = vld [vmem:[%s13154_s17 + $0xd30] sm:$0xf] }
 0x1ce   : > { %6378 = vmatpush.bf16.msrb.mxu1 %v9342_v9  ;;  %v6136_v9 = vpop.f32.mrf.mxu2  ;;  %v9694_v29 = vor.u32 %v12120_v8, %v9693_v3  ;;  %v9677_v3 = vld [vmem:[%s13154_s17 + $0xd50] sm:$0xf]  ;;  %v12116_v8 = vld [vmem:[%s13154_s17 + $0xd54] sm:$0xf0] }
 0x1cf   : > { %6391 = vmatpush.bf16.msrb.mxu2 %v9406_v57  ;;  %v520_v57 = vld [vmem:[%s13148_s20 + $0x30] sm:$0xff]  ;;  %v12112_v48 = vld [vmem:[%s13154_s17 + $0xd34] sm:$0xf0] }
 0x1d0   : > { %6404 = vmatpush.bf16.msrb.mxu3 %v9470_v60  ;;  %v6137_v60 = vadd.f32 %v6136_v9, %v6124_v54  ;;  %573 = vst [vmem:[#allocation1] ss:$4 sm:$0xff] %v520_v57  ;;  %v6112_v38 = vpop.f32.mrf.mxu0  ;;  %v12084_v54 = vld [vmem:[%s13154_s17 + $0xc54] sm:$0xf0]  ;;  %v9741_v9 = vld [vmem:[%s13154_s17 + $0xdd0] sm:$0xf] }
 0x1d1   : > { %6366 = vmatpush.bf16.msrb.mxu0 %v9270_v24  ;;  %v9566_v24 = vor.u32 %v12088_v58, %v9565_v53  ;;  %v6125_v44 = vpop.f32.mrf.mxu1  ;;  %v9549_v53 = vld [vmem:[%s13154_s17 + $0xc50] sm:$0xf]  ;;  %v12132_v57 = vld [vmem:[%s13154_s17 + $0xdd4] sm:$0xf0] }
 0x1d2   : > { %6379 = vmatpush.bf16.msrb.mxu1 %v9334_v26  ;;  %v572_v26 = vld.sshfl [vmem:[#allocation1 + $0x38] sm:$0xff pattern:$0x73625140]  ;;  %v9742_v22 = vor.u32 %v12132_v57, %v9741_v9  ;;  %v12080_v38 = vld [vmem:[%s13154_s17 + $0xc34] sm:$0xf0] }
 0x1d3   : > { %6392 = vmatpush.bf16.msrb.mxu2 %v9398_v27  ;;  %v6149_v27 = vpop.f32.mrf.mxu3  ;;  %v12096_v44 = vld [vmem:[%s13154_s17 + $0xcb4] sm:$0xf0]  ;;  %v9653_v9 = vld [vmem:[%s13154_s17 + $0xd20] sm:$0xf]  ;;  %v12110_v57 = vld [vmem:[%s13154_s17 + $0xd24] sm:$0xf0] }
 0x1d4   : > { %6405 = vmatpush.bf16.msrb.mxu3 %v9462_v31  ;;  %v12086_v31 = vld [vmem:[%s13154_s17 + $0xc64] sm:$0xf0]  ;;  %v13663_v35 = vadd.f32 %v6149_v27, %v6137_v60  ;;  %v9678_v60 = vor.u32 %v12116_v8, %v9677_v3 }
 0x1d5   : > { %6367 = vmatpush.bf16.msrb.mxu0 %v9262_v43  ;;  %v12118_v43 = vld [vmem:[%s13154_s17 + $0xd64] sm:$0xf0] }
 0x1d6   : > { %6380 = vmatpush.bf16.msrb.mxu1 %v9326_v49  ;;  %v13676_v49 = vpack.c.bf16 %v572_v26, %v572_v26  ;;  %v9686_v52 = vor.u32 %v12118_v43, %v9685_v42  ;;  %v6138_v58 = vpop.f32.mrf.mxu2  ;;  %v9733_v26 = vld [vmem:[%s13154_s17 + $0xdc0] sm:$0xf]  ;;  %v12130_v27 = vld [vmem:[%s13154_s17 + $0xdc4] sm:$0xf0] }
 0x1d7   : > { %6393 = vmatpush.bf16.msrb.mxu2 %v9390_v50  ;;  %v9558_v50 = vor.u32 %v12086_v31, %v9557_v30  ;;  %v9734_v43 = vor.u32 %v12130_v27, %v9733_v26  ;;  %v12078_v58 = vld [vmem:[%s13154_s17 + $0xc24] sm:$0xf0]  ;;  %v9581_v26 = vld [vmem:[%s13154_s17 + $0xc90] sm:$0xf]  ;;  %v12092_v27 = vld [vmem:[%s13154_s17 + $0xc94] sm:$0xf0] }
 0x1d8   : > { %6406 = vmatpush.bf16.msrb.mxu3 %v9454_v55  ;;  %v9613_v55 = vld [vmem:[%s13154_s17 + $0xcd0] sm:$0xf]  ;;  %v12094_v8 = vld [vmem:[%s13154_s17 + $0xca4] sm:$0xf0] }
 0x1d9   : > { %6368 = vmatpush.bf16.msrb.mxu0 %v9254_v13  ;;  %v9550_v13 = vor.u32 %v12084_v54, %v9549_v53  ;;  %v9614_v14 = vor.u32 %v12100_v63, %v9613_v55  ;;  %v9534_v53 = vor.u32 %v12080_v38, %v9533_v32  ;;  %v9662_v54 = vor.u32 %v12112_v48, %v9661_v47  ;;  %v9525_v55 = vld [vmem:[%s13154_s17 + $0xc20] sm:$0xf]  ;;  %v9709_v32 = vld [vmem:[%s13154_s17 + $0xd90] sm:$0xf]  ;;  %v12124_v38 = vld [vmem:[%s13154_s17 + $0xd94] sm:$0xf0] }
 0x1da   : > { %6381 = vmatpush.bf16.msrb.mxu1 %v9318_v19  ;;  %v9541_v19 = vld [vmem:[%s13154_s17 + $0xc40] sm:$0xf]  ;;  %v6175_v42 = vpop.f32.mrf.mxu1  ;;  %v12106_v48 = vld [vmem:[%s13154_s17 + $0xd04] sm:$0xf0] }
 0x1db   : > { %6394 = vmatpush.bf16.msrb.mxu2 %v9382_v37  ;;  %v6151_v34 = vpop.f32.mrf.mxu3  ;;  %v12082_v37 = vld [vmem:[%s13154_s17 + $0xc44] sm:$0xf0]  ;;  %v9637_v47 = vld [vmem:[%s13154_s17 + $0xd00] sm:$0xf] }
 0x1dc   : > { %6407 = vmatpush.bf16.msrb.mxu3 %v9446_v23  ;;  %6369 = vmatmul.bf16.vlgmr.msrb.gmra.mxu0 %v13665_v40  ;;  %v12098_v23 = vld [vmem:[%s13154_s17 + $0xcc4] sm:$0xf0] }
 0x1dd   : > { %6413 = vmatpush.bf16.msra.mxu0 %v9566_v24  ;;  %6382 = vmatmul.bf16.vlgmr.msrb.gmra.mxu1 %v13672_v46  ;;  %v9669_v24 = vld [vmem:[%s13154_s17 + $0xd40] sm:$0xf]  ;;  %v9606_v30 = vor.u32 %v12098_v23, %v9605_v21  ;;  %v9517_v21 = vld [vmem:[%s13154_s17 + $0xc10] sm:$0xf] }
 0x1de   : > { %6426 = vmatpush.bf16.msra.mxu1 %v9630_v28  ;;  %6395 = vmatmul.bf16.vlgmr.msrb.gmra.mxu2 %v13670_v45  ;;  %v9542_v28 = vor.u32 %v12082_v37, %v9541_v19  ;;  %v9670_v31 = vor.u32 %v12114_v25, %v9669_v24  ;;  %v9526_v19 = vor.u32 %v12078_v58, %v9525_v55  ;;  %v12076_v25 = vld [vmem:[%s13154_s17 + $0xc14] sm:$0xf0] }
 0x1df   : > { %6439 = vmatpush.bf16.msra.mxu2 %v9694_v29  ;;  %6408 = vmatmul.bf16.vlgmr.msrb.gmra.mxu3 %v13676_v49  ;;  %v6162_v29 = vpop.f32.mrf.mxu0  ;;  %v9654_v24 = vor.u32 %v12110_v57, %v9653_v9  ;;  %v9710_v55 = vor.u32 %v12124_v38, %v9709_v32  ;;  %v12152_v58 = vld [vmem:[%s13154_s17 + $0xe74] sm:$0xf0] }
 0x1e0   : > { %6452 = vmatpush.bf16.msra.mxu3 %v9758_v39  ;;  %v9597_v39 = vld [vmem:[%s13154_s17 + $0xcb0] sm:$0xf]  ;;  %v6163_v41 = vadd.f32 %v6162_v29, %v13663_v35  ;;  %v12184_v9 = vld [vmem:[%s13154_s17 + $0xf74] sm:$0xf0] }
 0x1e1   : > { %6414 = vmatpush.bf16.msra.mxu0 %v9558_v50  ;;  %v9725_v50 = vld [vmem:[%s13154_s17 + $0xdb0] sm:$0xf]  ;;  %v9598_v35 = vor.u32 %v12096_v44, %v9597_v39  ;;  %v6188_v63 = vpop.f32.mrf.mxu2  ;;  %v9509_v39 = vld [vmem:[%s13154_s17 + $0xc00] sm:$0xf]  ;;  %v12090_v44 = vld [vmem:[%s13154_s17 + $0xc84] sm:$0xf0] }
 0x1e2   : > { %6427 = vmatpush.bf16.msra.mxu1 %v9622_v51  ;;  %v12128_v51 = vld [vmem:[%s13154_s17 + $0xdb4] sm:$0xf0] }
 0x1e3   : > { %6440 = vmatpush.bf16.msra.mxu2 %v9686_v52  ;;  %v6176_v52 = vadd.f32 %v6175_v42, %v6163_v41  ;;  %v9726_v3 = vor.u32 %v12128_v51, %v9725_v50  ;;  %v6201_v34 = vpop.f32.mrf.mxu3  ;;  %v12074_v41 = vld [vmem:[%s13154_s17 + $0xc04] sm:$0xf0]  ;;  %v9518_v42 = vor.u32 %v12076_v25, %v9517_v21  ;;  %v9582_v50 = vor.u32 %v12092_v27, %v9581_v26  ;;  %v575_v21 = vld.sshfl [vmem:[#allocation1] sm:$0xff pattern:$0x73625140] }
 0x1e4   : > { %6453 = vmatpush.bf16.msra.mxu3 %v9750_v61  ;;  %v9589_v61 = vld [vmem:[%s13154_s17 + $0xca0] sm:$0xf]  ;;  %v521_v57 = vld [vmem:[%s13148_s20 + $0x38] sm:$0xff]  ;;  %v13745_v38 = vpack.c.bf16 %v575_v21, %v575_v21 }
 0x1e5   : > { %6415 = vmatpush.bf16.msra.mxu0 %v9550_v13  ;;  %v6189_v13 = vadd.f32 %v6188_v63, %v6176_v52  ;;  %v9590_v23 = vor.u32 %v12094_v8, %v9589_v61  ;;  %v9701_v52 = vld [vmem:[%s13154_s17 + $0xd80] sm:$0xf]  ;;  %v9885_v61 = vld [vmem:[%s13154_s17 + $0xef0] sm:$0xf]  ;;  %v12168_v63 = vld [vmem:[%s13154_s17 + $0xef4] sm:$0xf0] }
 0x1e6   : > { %6428 = vmatpush.bf16.msra.mxu1 %v9614_v14  ;;  %v9717_v14 = vld [vmem:[%s13154_s17 + $0xda0] sm:$0xf]  ;;  %v9949_v8 = vld [vmem:[%s13154_s17 + $0xf70] sm:$0xf]  ;;  %574 = vst [vmem:[#allocation1 + $0x20] ss:$4 sm:$0xff] %v521_v57  ;;  %v9886_v27 = vor.u32 %v12168_v63, %v9885_v61 }
 0x1e7   : > { %6441 = vmatpush.bf16.msra.mxu2 %v9678_v60  ;;  %v12126_v60 = vld [vmem:[%s13154_s17 + $0xda4] sm:$0xf0]  ;;  %v13715_v37 = vadd.f32 %v6201_v34, %v6189_v13  ;;  %v9510_v13 = vor.u32 %v12074_v41, %v9509_v39  ;;  %v10013_v34 = vld [vmem:[%s13154_s17 + $0xff0] sm:$0xf]  ;;  %v9941_v41 = vld [vmem:[%s13154_s17 + $0xf60] sm:$0xf] }
 0x1e8   : > { %6454 = vmatpush.bf16.msra.mxu3 %v9742_v22  ;;  %v6164_v22 = vpop.f32.mrf.mxu0  ;;  %v9718_v29 = vor.u32 %v12126_v60, %v9717_v14  ;;  %v12200_v14 = vld [vmem:[%s13154_s17 + $0xff4] sm:$0xf0]  ;;  %v578_v26 = vld.sshfl [vmem:[#allocation1 + $0x18] sm:$0xff pattern:$0x73625140] }
 0x1e9   : > { %6416 = vmatpush.bf16.msra.mxu0 %v9542_v28  ;;  %v6177_v28 = vpop.f32.mrf.mxu1  ;;  %v577_v22 = vld.sshfl [vmem:[#allocation1 + $0x10] sm:$0xff pattern:$0x73625140]  ;;  %v576_v25 = vld.sshfl [vmem:[#allocation1 + $0x8] sm:$0xff pattern:$0x73625140]  ;;  %v10014_v32 = vor.u32 %v12200_v14, %v10013_v34 }
 0x1ea   : > { %6429 = vmatpush.bf16.msra.mxu1 %v9606_v30  ;;  %v9645_v30 = vld [vmem:[%s13154_s17 + $0xd10] sm:$0xf]  ;;  %v9950_v28 = vor.u32 %v12184_v9, %v9949_v8  ;;  %v12166_v39 = vld [vmem:[%s13154_s17 + $0xee4] sm:$0xf0]  ;;  %v12164_v61 = vld [vmem:[%s13154_s17 + $0xed4] sm:$0xf0] }
 0x1eb   : > { %6442 = vmatpush.bf16.msra.mxu2 %v9670_v31  ;;  %v12108_v31 = vld [vmem:[%s13154_s17 + $0xd14] sm:$0xf0]  ;;  %v9933_v63 = vld [vmem:[%s13154_s17 + $0xf50] sm:$0xf]  ;;  %v9797_v14 = vld [vmem:[%s13154_s17 + $0xe40] sm:$0xf] }
 0x1ec   : > { %6455 = vmatpush.bf16.msra.mxu3 %v9734_v43  ;;  %v9573_v43 = vld [vmem:[%s13154_s17 + $0xc80] sm:$0xf]  ;;  %v9646_v51 = vor.u32 %v12108_v31, %v9645_v30  ;;  %v12150_v30 = vld [vmem:[%s13154_s17 + $0xe64] sm:$0xf0]  ;;  %v9997_v8 = vld [vmem:[%s13154_s17 + $0xfd0] sm:$0xf] }
 0x1ed   : > { %6417 = vmatpush.bf16.msra.mxu0 %v9534_v53  ;;  %v12122_v53 = vld [vmem:[%s13154_s17 + $0xd84] sm:$0xf0]  ;;  %v9574_v60 = vor.u32 %v12090_v44, %v9573_v43  ;;  %v9877_v31 = vld [vmem:[%s13154_s17 + $0xee0] sm:$0xf]  ;;  %v13750_v43 = vpack.c.bf16 %v577_v22, %v577_v22  ;;  %v13752_v44 = vpack.c.bf16 %v576_v25, %v576_v25  ;;  %v12196_v9 = vld [vmem:[%s13154_s17 + $0xfd4] sm:$0xf0] }
 0x1ee   : > { %6430 = vmatpush.bf16.msra.mxu1 %v9598_v35  ;;  %v9821_v35 = vld [vmem:[%s13154_s17 + $0xe70] sm:$0xf]  ;;  %v9998_v21 = vor.u32 %v12196_v9, %v9997_v8  ;;  %v12162_v22 = vld [vmem:[%s13154_s17 + $0xec4] sm:$0xf0] }
 0x1ef   : > { %6443 = vmatpush.bf16.msra.mxu2 %v9662_v54  ;;  %v6190_v54 = vpop.f32.mrf.mxu2 }
 0x1f0   : > { %6456 = vmatpush.bf16.msra.mxu3 %v9726_v3  ;;  %v6203_v3 = vpop.f32.mrf.mxu3  ;;  %v12148_v54 = vld [vmem:[%s13154_s17 + $0xe54] sm:$0xf0] }
 0x1f1   : > { %6418 = vmatpush.bf16.msra.mxu0 %v9526_v19  ;;  %v9638_v19 = vor.u32 %v12106_v48, %v9637_v47  ;;  %v10005_v47 = vld [vmem:[%s13154_s17 + $0xfe0] sm:$0xf]  ;;  %v12198_v48 = vld [vmem:[%s13154_s17 + $0xfe4] sm:$0xf0]  ;;  %v12180_v3 = vld [vmem:[%s13154_s17 + $0xf54] sm:$0xf0] }
 0x1f2   : > { %6431 = vmatpush.bf16.msra.mxu1 %v9590_v23  ;;  %v9702_v23 = vor.u32 %v12122_v53, %v9701_v52  ;;  %v9878_v52 = vor.u32 %v12166_v39, %v9877_v31  ;;  %v9934_v34 = vor.u32 %v12180_v3, %v9933_v63  ;;  %v9789_v39 = vld [vmem:[%s13154_s17 + $0xe30] sm:$0xf]  ;;  %v12142_v63 = vld [vmem:[%s13154_s17 + $0xe24] sm:$0xf0]  ;;  %v9845_v3 = vld [vmem:[%s13154_s17 + $0xea0] sm:$0xf] }
 0x1f3   : > { %6444 = vmatpush.bf16.msra.mxu2 %v9654_v24  ;;  %v9822_v24 = vor.u32 %v12152_v58, %v9821_v35  ;;  %v9805_v35 = vld [vmem:[%s13154_s17 + $0xe50] sm:$0xf]  ;;  %v10006_v58 = vor.u32 %v12198_v48, %v10005_v47 }
 0x1f4   : > { %6457 = vmatpush.bf16.msra.mxu3 %v9718_v29  ;;  %v9813_v29 = vld [vmem:[%s13154_s17 + $0xe60] sm:$0xf]  ;;  %v9806_v57 = vor.u32 %v12148_v54, %v9805_v35  ;;  %v12192_v35 = vld [vmem:[%s13154_s17 + $0xfb4] sm:$0xf0] }
 0x1f5   : > { %6419 = vmatpush.bf16.msra.mxu0 %v9518_v42  ;;  %v12182_v42 = vld [vmem:[%s13154_s17 + $0xf64] sm:$0xf0] }
 0x1f6   : > { %6432 = vmatpush.bf16.msra.mxu1 %v9582_v50  ;;  %v13756_v50 = vpack.c.bf16 %v578_v26, %v578_v26  ;;  %v9942_v53 = vor.u32 %v12182_v42, %v9941_v41  ;;  %v9989_v26 = vld [vmem:[%s13154_s17 + $0xfc0] sm:$0xf]  ;;  %v12144_v41 = vld [vmem:[%s13154_s17 + $0xe34] sm:$0xf0]  ;;  %v9853_v42 = vld [vmem:[%s13154_s17 + $0xeb0] sm:$0xf] }
 0x1f7   : > { %6445 = vmatpush.bf16.msra.mxu2 %v9646_v51  ;;  %v9814_v51 = vor.u32 %v12150_v30, %v9813_v29  ;;  %v9790_v54 = vor.u32 %v12144_v41, %v9789_v39  ;;  %v9901_v39 = vld [vmem:[%s13154_s17 + $0xf10] sm:$0xf]  ;;  %v12172_v41 = vld [vmem:[%s13154_s17 + $0xf14] sm:$0xf0] }
 0x1f8   : > { %6458 = vmatpush.bf16.msra.mxu3 %v9710_v55  ;;  %v9869_v55 = vld [vmem:[%s13154_s17 + $0xed0] sm:$0xf] }
 0x1f9   : > { %6420 = vmatpush.bf16.msra.mxu0 %v9510_v13  ;;  %v9870_v13 = vor.u32 %v12164_v61, %v9869_v55  ;;  %v6214_v25 = vpop.f32.mrf.mxu0  ;;  %v9781_v61 = vld [vmem:[%s13154_s17 + $0xe20] sm:$0xf] }
 0x1fa   : > { %6433 = vmatpush.bf16.msra.mxu1 %v9574_v60  ;;  %v12146_v60 = vld [vmem:[%s13154_s17 + $0xe44] sm:$0xf0]  ;;  %v6227_v30 = vpop.f32.mrf.mxu1 }
 0x1fb   : > { %6446 = vmatpush.bf16.msra.mxu2 %v9638_v19  ;;  %v9861_v19 = vld [vmem:[%s13154_s17 + $0xec0] sm:$0xf]  ;;  %v9798_v29 = vor.u32 %v12146_v60, %v9797_v14 }
 0x1fc   : > { %6459 = vmatpush.bf16.msra.mxu3 %v9702_v23  ;;  %6421 = vmatmul.bf16.vlgmr.msra.gmra.mxu0 %v13745_v38  ;;  %v9925_v23 = vld [vmem:[%s13154_s17 + $0xf40] sm:$0xf]  ;;  %v9862_v31 = vor.u32 %v12162_v22, %v9861_v19 }
 0x1fd   : > { %6465 = vmatpush.bf16.msrb.mxu0 %v9822_v24  ;;  %6434 = vmatmul.bf16.vlgmr.msra.gmra.mxu1 %v13752_v44  ;;  %v12178_v24 = vld [vmem:[%s13154_s17 + $0xf44] sm:$0xf0]  ;;  %v9973_v19 = vld [vmem:[%s13154_s17 + $0xfa0] sm:$0xf] }
 0x1fe   : > { %6478 = vmatpush.bf16.msrb.mxu1 %v9886_v27  ;;  %6447 = vmatmul.bf16.vlgmr.msra.gmra.mxu2 %v13750_v43  ;;  %v12194_v27 = vld [vmem:[%s13154_s17 + $0xfc4] sm:$0xf0] }
 0x1ff   : > { %6491 = vmatpush.bf16.msrb.mxu2 %v9950_v28  ;;  %6460 = vmatmul.bf16.vlgmr.msra.gmra.mxu3 %v13756_v50  ;;  %v6215_v28 = vadd.f32 %v6214_v25, %v13715_v37  ;;  %v9990_v47 = vor.u32 %v12194_v27, %v9989_v26  ;;  %v12176_v37 = vld [vmem:[%s13154_s17 + $0xf34] sm:$0xf0] }
 0x200   : > { %6504 = vmatpush.bf16.msrb.mxu3 %v10014_v32  ;;  %v9926_v32 = vor.u32 %v12178_v24, %v9925_v23  ;;  %v9782_v23 = vor.u32 %v12142_v63, %v9781_v61  ;;  %v9773_v24 = vld [vmem:[%s13154_s17 + $0xe10] sm:$0xf]  ;;  %v9957_v61 = vld [vmem:[%s13154_s17 + $0xf80] sm:$0xf]  ;;  %v12186_v63 = vld [vmem:[%s13154_s17 + $0xf84] sm:$0xf0] }
 0x201   : > { %6466 = vmatpush.bf16.msrb.mxu0 %v9814_v51  ;;  %v6228_v48 = vadd.f32 %v6227_v30, %v6215_v28  ;;  %v12160_v51 = vld [vmem:[%s13154_s17 + $0xeb4] sm:$0xf0]  ;;  %v6240_v9 = vpop.f32.mrf.mxu2  ;;  %v6216_v22 = vpop.f32.mrf.mxu0  ;;  %v9837_v30 = vld [vmem:[%s13154_s17 + $0xe90] sm:$0xf] }
 0x202   : > { %6479 = vmatpush.bf16.msrb.mxu1 %v9878_v52  ;;  %v9917_v52 = vld [vmem:[%s13154_s17 + $0xf30] sm:$0xf]  ;;  %v9854_v55 = vor.u32 %v12160_v51, %v9853_v42  ;;  %v6253_v60 = vpop.f32.mrf.mxu3  ;;  %v6229_v25 = vpop.f32.mrf.mxu1  ;;  %v12138_v51 = vld [vmem:[%s13154_s17 + $0xe04] sm:$0xf0] }
 0x203   : > { %6492 = vmatpush.bf16.msrb.mxu2 %v9942_v53  ;;  %v9981_v53 = vld [vmem:[%s13154_s17 + $0xfb0] sm:$0xf]  ;;  %v6241_v14 = vadd.f32 %v6240_v9, %v6228_v48  ;;  %v9765_v48 = vld [vmem:[%s13154_s17 + $0xe00] sm:$0xf]  ;;  %v12216_v9 = vld [vmem:[%s13154_s17 + $0x1074] sm:$0xf0] }
 0x204   : > { %6505 = vmatpush.bf16.msrb.mxu3 %v10006_v58  ;;  %v9918_v58 = vor.u32 %v12176_v37, %v9917_v52  ;;  %v9982_v8 = vor.u32 %v12192_v35, %v9981_v53  ;;  %v9965_v42 = vld [vmem:[%s13154_s17 + $0xf90] sm:$0xf]  ;;  %v9829_v37 = vld [vmem:[%s13154_s17 + $0xe80] sm:$0xf]  ;;  %v12154_v53 = vld [vmem:[%s13154_s17 + $0xe84] sm:$0xf0]  ;;  %v9766_v22 = vor.u32 %v12138_v51, %v9765_v48 }
 0x205   : > { %6467 = vmatpush.bf16.msrb.mxu0 %v9806_v57  ;;  %v12158_v57 = vld [vmem:[%s13154_s17 + $0xea4] sm:$0xf0]  ;;  %v13796_v26 = vadd.f32 %v6253_v60, %v6241_v14  ;;  %v9893_v35 = vld [vmem:[%s13154_s17 + $0xf00] sm:$0xf]  ;;  %v10205_v14 = vld [vmem:[%s13154_s17 + $0x1170] sm:$0xf]  ;;  %v9830_v25 = vor.u32 %v12154_v53, %v9829_v37 }
 0x206   : > { %6480 = vmatpush.bf16.msrb.mxu1 %v9870_v13  ;;  %v9909_v13 = vld [vmem:[%s13154_s17 + $0xf20] sm:$0xf]  ;;  %v9846_v27 = vor.u32 %v12158_v57, %v9845_v3  ;;  %v10077_v3 = vld [vmem:[%s13154_s17 + $0x1070] sm:$0xf]  ;;  %v12248_v60 = vld [vmem:[%s13154_s17 + $0x1174] sm:$0xf0] }
 0x207   : > { %6493 = vmatpush.bf16.msrb.mxu2 %v9934_v34  ;;  %v12174_v34 = vld [vmem:[%s13154_s17 + $0xf24] sm:$0xf0]  ;;  %v10141_v57 = vld [vmem:[%s13154_s17 + $0x10f0] sm:$0xf]  ;;  %v10133_v51 = vld [vmem:[%s13154_s17 + $0x10e0] sm:$0xf] }
 0x208   : > { %6506 = vmatpush.bf16.msrb.mxu3 %v9998_v21  ;;  %v12190_v21 = vld [vmem:[%s13154_s17 + $0xfa4] sm:$0xf0]  ;;  %v9910_v28 = vor.u32 %v12174_v34, %v9909_v13  ;;  %v12232_v13 = vld [vmem:[%s13154_s17 + $0x10f4] sm:$0xf0] }
 0x209   : > { %6468 = vmatpush.bf16.msrb.mxu0 %v9798_v29  ;;  %v12140_v29 = vld [vmem:[%s13154_s17 + $0xe14] sm:$0xf0]  ;;  %v6242_v34 = vpop.f32.mrf.mxu2  ;;  %v12214_v48 = vld [vmem:[%s13154_s17 + $0x1064] sm:$0xf0] }
 0x20a   : > { %6481 = vmatpush.bf16.msrb.mxu1 %v9862_v31  ;;  %v12156_v31 = vld [vmem:[%s13154_s17 + $0xe94] sm:$0xf0]  ;;  %v9774_v52 = vor.u32 %v12140_v29, %v9773_v24  ;;  %v581_v29 = vld.sshfl [vmem:[#allocation1 + $0x30] sm:$0xff pattern:$0x73625140] }
 0x20b   : > { %6494 = vmatpush.bf16.msrb.mxu2 %v9926_v32  ;;  %v9974_v32 = vor.u32 %v12190_v21, %v9973_v19  ;;  %v6255_v19 = vpop.f32.mrf.mxu3  ;;  %v522_v21 = vld [vmem:[%s13148_s20 + $0x40] sm:$0xff]  ;;  %v12264_v24 = vld [vmem:[%s13154_s17 + $0x11f4] sm:$0xf0]  ;;  %v12230_v53 = vld [vmem:[%s13154_s17 + $0x10e4] sm:$0xf0] }
 0x20c   : > { %6507 = vmatpush.bf16.msrb.mxu3 %v9990_v47  ;;  %v12188_v47 = vld [vmem:[%s13154_s17 + $0xf94] sm:$0xf0]  ;;  %583 = vst [vmem:[#allocation1] ss:$4 sm:$0xff] %v522_v21  ;;  %v10189_v21 = vld [vmem:[%s13154_s17 + $0x1150] sm:$0xf] }
 0x20d   : > { %6469 = vmatpush.bf16.msrb.mxu0 %v9790_v54  ;;  %v12170_v54 = vld [vmem:[%s13154_s17 + $0xf04] sm:$0xf0]  ;;  %v12212_v34 = vld [vmem:[%s13154_s17 + $0x1054] sm:$0xf0] }
 0x20e   : > { %6482 = vmatpush.bf16.msrb.mxu1 %v9854_v55  ;;  %v9838_v55 = vor.u32 %v12156_v31, %v9837_v30  ;;  %v9958_v30 = vor.u32 %v12186_v63, %v9957_v61  ;;  %v10078_v31 = vor.u32 %v12216_v9, %v10077_v3  ;;  %v10261_v61 = vld [vmem:[%s13154_s17 + $0x11e0] sm:$0xf]  ;;  %v12262_v63 = vld [vmem:[%s13154_s17 + $0x11e4] sm:$0xf0]  ;;  %v10134_v9 = vor.u32 %v12230_v53, %v10133_v51  ;;  %v12228_v19 = vld [vmem:[%s13154_s17 + $0x10d4] sm:$0xf0] }
 0x20f   : > { %6495 = vmatpush.bf16.msrb.mxu2 %v9918_v58  ;;  %v9902_v58 = vor.u32 %v12172_v41, %v9901_v39  ;;  %v582_v39 = vld.sshfl [vmem:[#allocation1 + $0x38] sm:$0xff pattern:$0x73625140]  ;;  %v10142_v41 = vor.u32 %v12232_v13, %v10141_v57 }
 0x210   : > { %6508 = vmatpush.bf16.msrb.mxu3 %v9982_v8  ;;  %v9966_v8 = vor.u32 %v12188_v47, %v9965_v42  ;;  %v10206_v42 = vor.u32 %v12248_v60, %v10205_v14  ;;  %v10069_v47 = vld [vmem:[%s13154_s17 + $0x1060] sm:$0xf]  ;;  %v13836_v3 = vpack.c.bf16 %v582_v39, %v582_v39  ;;  %v10061_v13 = vld [vmem:[%s13154_s17 + $0x1050] sm:$0xf]  ;;  %v10262_v60 = vor.u32 %v12262_v63, %v10261_v61  ;;  %v12226_v39 = vld [vmem:[%s13154_s17 + $0x10c4] sm:$0xf0] }
 0x211   : > { %6470 = vmatpush.bf16.msrb.mxu0 %v9782_v23  ;;  %v10269_v23 = vld [vmem:[%s13154_s17 + $0x11f0] sm:$0xf]  ;;  %v12258_v51 = vld [vmem:[%s13154_s17 + $0x11c4] sm:$0xf0] }
 0x212   : > { %6483 = vmatpush.bf16.msrb.mxu1 %v9846_v27  ;;  %v9894_v27 = vor.u32 %v12170_v54, %v9893_v35  ;;  %v10197_v35 = vld [vmem:[%s13154_s17 + $0x1160] sm:$0xf]  ;;  %v12246_v54 = vld [vmem:[%s13154_s17 + $0x1164] sm:$0xf0]  ;;  %v10125_v14 = vld [vmem:[%s13154_s17 + $0x10d0] sm:$0xf] }
 0x213   : > { %6496 = vmatpush.bf16.msrb.mxu2 %v9910_v28  ;;  %v579_v28 = vld.sshfl [vmem:[#allocation1 + $0x20] sm:$0xff pattern:$0x73625140]  ;;  %v10198_v57 = vor.u32 %v12246_v54, %v10197_v35 }
 0x214   : > { %6509 = vmatpush.bf16.msrb.mxu3 %v9974_v32  ;;  %v580_v32 = vld.sshfl [vmem:[#allocation1 + $0x28] sm:$0xff pattern:$0x73625140]  ;;  %v13825_v37 = vpack.c.bf16 %v579_v28, %v579_v28  ;;  %v10045_v63 = vld [vmem:[%s13154_s17 + $0x1030] sm:$0xf] }
 0x215   : > { %6471 = vmatpush.bf16.msrb.mxu0 %v9774_v52  ;;  %v10270_v52 = vor.u32 %v12264_v24, %v10269_v23  ;;  %v10253_v23 = vld [vmem:[%s13154_s17 + $0x11d0] sm:$0xf]  ;;  %v12260_v24 = vld [vmem:[%s13154_s17 + $0x11d4] sm:$0xf0] }
 0x216   : > { %6484 = vmatpush.bf16.msrb.mxu1 %v9838_v55  ;;  %v13830_v55 = vpack.c.bf16 %v581_v29, %v581_v29  ;;  %v10053_v29 = vld [vmem:[%s13154_s17 + $0x1040] sm:$0xf] }
 0x217   : > { %6497 = vmatpush.bf16.msrb.mxu2 %v9902_v58  ;;  %v13832_v58 = vpack.c.bf16 %v580_v32, %v580_v32  ;;  %v10254_v32 = vor.u32 %v12260_v24, %v10253_v23  ;;  %v10037_v24 = vld [vmem:[%s13154_s17 + $0x1020] sm:$0xf] }
 0x218   : > { %6510 = vmatpush.bf16.msrb.mxu3 %v9966_v8  ;;  %v10070_v8 = vor.u32 %v12214_v48, %v10069_v47  ;;  %v10245_v48 = vld [vmem:[%s13154_s17 + $0x11c0] sm:$0xf] }
 0x219   : > { %6472 = vmatpush.bf16.msrb.mxu0 %v9766_v22  ;;  %v12244_v22 = vld [vmem:[%s13154_s17 + $0x1154] sm:$0xf0]  ;;  %v6266_v47 = vpop.f32.mrf.mxu0 }
 0x21a   : > { %6485 = vmatpush.bf16.msrb.mxu1 %v9830_v25  ;;  %v10062_v25 = vor.u32 %v12212_v34, %v10061_v13  ;;  %v10190_v28 = vor.u32 %v12244_v22, %v10189_v21  ;;  %v6279_v35 = vpop.f32.mrf.mxu1  ;;  %v12224_v34 = vld [vmem:[%s13154_s17 + $0x10b4] sm:$0xf0] }
 0x21b   : > { %6498 = vmatpush.bf16.msrb.mxu2 %v9894_v27  ;;  %v10126_v27 = vor.u32 %v12228_v19, %v10125_v14  ;;  %v10173_v14 = vld [vmem:[%s13154_s17 + $0x1130] sm:$0xf]  ;;  %v12256_v19 = vld [vmem:[%s13154_s17 + $0x11b4] sm:$0xf0] }
 0x21c   : > { %6511 = vmatpush.bf16.msrb.mxu3 %v9958_v30  ;;  %6473 = vmatmul.bf16.vlgmr.msrb.gmra.mxu0 %v13825_v37  ;;  %v12210_v30 = vld [vmem:[%s13154_s17 + $0x1044] sm:$0xf0] }
 0x21d   : > { %6517 = vmatpush.bf16.msra.mxu0 %v10078_v31  ;;  %6486 = vmatmul.bf16.vlgmr.msrb.gmra.mxu1 %v13832_v58  ;;  %v10117_v31 = vld [vmem:[%s13154_s17 + $0x10c0] sm:$0xf]  ;;  %v10054_v53 = vor.u32 %v12210_v30, %v10053_v29  ;;  %v12222_v30 = vld [vmem:[%s13154_s17 + $0x10a4] sm:$0xf0] }
 0x21e   : > { %6530 = vmatpush.bf16.msra.mxu1 %v10142_v41  ;;  %6499 = vmatmul.bf16.vlgmr.msrb.gmra.mxu2 %v13830_v55  ;;  %v10181_v41 = vld [vmem:[%s13154_s17 + $0x1140] sm:$0xf]  ;;  %v10118_v54 = vor.u32 %v12226_v39, %v10117_v31 }
 0x21f   : > { %6543 = vmatpush.bf16.msra.mxu2 %v10206_v42  ;;  %6512 = vmatmul.bf16.vlgmr.msrb.gmra.mxu3 %v13836_v3  ;;  %v12242_v42 = vld [vmem:[%s13154_s17 + $0x1144] sm:$0xf0]  ;;  %v10165_v31 = vld [vmem:[%s13154_s17 + $0x1120] sm:$0xf] }
 0x220   : > { %6556 = vmatpush.bf16.msra.mxu3 %v10270_v52  ;;  %v6267_v52 = vadd.f32 %v6266_v47, %v13796_v26  ;;  %v10182_v61 = vor.u32 %v12242_v42, %v10181_v41  ;;  %v12240_v26 = vld [vmem:[%s13154_s17 + $0x1134] sm:$0xf0]  ;;  %v10229_v42 = vld [vmem:[%s13154_s17 + $0x11a0] sm:$0xf]  ;;  %v12254_v47 = vld [vmem:[%s13154_s17 + $0x11a4] sm:$0xf0] }
 0x221   : > { %6518 = vmatpush.bf16.msra.mxu0 %v10070_v8  ;;  %v12208_v8 = vld [vmem:[%s13154_s17 + $0x1034] sm:$0xf0]  ;;  %v10174_v23 = vor.u32 %v12240_v26, %v10173_v14  ;;  %v6292_v29 = vpop.f32.mrf.mxu2  ;;  %v10221_v14 = vld [vmem:[%s13154_s17 + $0x1190] sm:$0xf] }
 0x222   : > { %6531 = vmatpush.bf16.msra.mxu1 %v10134_v9  ;;  %v10109_v9 = vld [vmem:[%s13154_s17 + $0x10b0] sm:$0xf]  ;;  %v6280_v13 = vadd.f32 %v6279_v35, %v6267_v52  ;;  %v10046_v21 = vor.u32 %v12208_v8, %v10045_v63  ;;  %v6305_v41 = vpop.f32.mrf.mxu3  ;;  %v12204_v63 = vld [vmem:[%s13154_s17 + $0x1014] sm:$0xf0] }
 0x223   : > { %6544 = vmatpush.bf16.msra.mxu2 %v10198_v57  ;;  %v10246_v57 = vor.u32 %v12258_v51, %v10245_v48  ;;  %v10110_v22 = vor.u32 %v12224_v34, %v10109_v9  ;;  %v6268_v48 = vpop.f32.mrf.mxu0  ;;  %v10029_v52 = vld [vmem:[%s13154_s17 + $0x1010] sm:$0xf]  ;;  %v12220_v9 = vld [vmem:[%s13154_s17 + $0x1094] sm:$0xf0] }
 0x224   : > { %6557 = vmatpush.bf16.msra.mxu3 %v10262_v60  ;;  %v10237_v60 = vld [vmem:[%s13154_s17 + $0x11b0] sm:$0xf]  ;;  %v6293_v39 = vadd.f32 %v6292_v29, %v6280_v13  ;;  %v12236_v34 = vld [vmem:[%s13154_s17 + $0x1114] sm:$0xf0]  ;;  %v10213_v29 = vld [vmem:[%s13154_s17 + $0x1180] sm:$0xf] }
 0x225   : > { %6519 = vmatpush.bf16.msra.mxu0 %v10062_v25  ;;  %v12206_v25 = vld [vmem:[%s13154_s17 + $0x1024] sm:$0xf0]  ;;  %v10093_v8 = vld [vmem:[%s13154_s17 + $0x1090] sm:$0xf]  ;;  %v12252_v26 = vld [vmem:[%s13154_s17 + $0x1194] sm:$0xf0] }
 0x226   : > { %6532 = vmatpush.bf16.msra.mxu1 %v10126_v27  ;;  %v10101_v27 = vld [vmem:[%s13154_s17 + $0x10a0] sm:$0xf]  ;;  %v10038_v51 = vor.u32 %v12206_v25, %v10037_v24  ;;  %v13876_v35 = vadd.f32 %v6305_v41, %v6293_v39  ;;  %v10157_v13 = vld [vmem:[%s13154_s17 + $0x1110] sm:$0xf]  ;;  %v12234_v25 = vld [vmem:[%s13154_s17 + $0x1104] sm:$0xf0] }
 0x227   : > { %6545 = vmatpush.bf16.msra.mxu2 %v10190_v28  ;;  %v10238_v28 = vor.u32 %v12256_v19, %v10237_v60  ;;  %v10021_v60 = vld [vmem:[%s13154_s17 + $0x1000] sm:$0xf]  ;;  %v12202_v19 = vld [vmem:[%s13154_s17 + $0x1004] sm:$0xf0]  ;;  %v12280_v39 = vld [vmem:[%s13154_s17 + $0x1274] sm:$0xf0] }
 0x228   : > { %6558 = vmatpush.bf16.msra.mxu3 %v10254_v32  ;;  %v12238_v32 = vld [vmem:[%s13154_s17 + $0x1124] sm:$0xf0]  ;;  %v10149_v24 = vld [vmem:[%s13154_s17 + $0x1100] sm:$0xf]  ;;  %v10397_v41 = vld [vmem:[%s13154_s17 + $0x12f0] sm:$0xf] }
 0x229   : > { %6520 = vmatpush.bf16.msra.mxu0 %v10054_v53  ;;  %v6281_v53 = vpop.f32.mrf.mxu1  ;;  %v10461_v48 = vld [vmem:[%s13154_s17 + $0x1370] sm:$0xf] }
 0x22a   : > { %6533 = vmatpush.bf16.msra.mxu1 %v10118_v54  ;;  %v10102_v54 = vor.u32 %v12222_v30, %v10101_v27  ;;  %v10094_v27 = vor.u32 %v12220_v9, %v10093_v8  ;;  %v12250_v30 = vld [vmem:[%s13154_s17 + $0x1184] sm:$0xf0]  ;;  %v10150_v9 = vor.u32 %v12234_v25, %v10149_v24  ;;  %v10453_v25 = vld [vmem:[%s13154_s17 + $0x1360] sm:$0xf] }
 0x22b   : > { %6546 = vmatpush.bf16.msra.mxu2 %v10182_v61  ;;  %v10166_v61 = vor.u32 %v12238_v32, %v10165_v31  ;;  %v10333_v31 = vld [vmem:[%s13154_s17 + $0x1270] sm:$0xf]  ;;  %v10222_v32 = vor.u32 %v12252_v26, %v10221_v14  ;;  %v523_v53 = vld [vmem:[%s13148_s20 + $0x48] sm:$0xff] }
 0x22c   : > { %6559 = vmatpush.bf16.msra.mxu3 %v10246_v57  ;;  %v10230_v57 = vor.u32 %v12254_v47, %v10229_v42  ;;  %v12296_v42 = vld [vmem:[%s13154_s17 + $0x12f4] sm:$0xf0]  ;;  %v6294_v47 = vpop.f32.mrf.mxu2  ;;  %584 = vst [vmem:[#allocation1 + $0x20] ss:$4 sm:$0xff] %v523_v53  ;;  %v10334_v14 = vor.u32 %v12280_v39, %v10333_v31  ;;  %v12294_v24 = vld [vmem:[%s13154_s17 + $0x12e4] sm:$0xf0] }
 0x22d   : > { %6521 = vmatpush.bf16.msra.mxu0 %v10046_v21  ;;  %v10030_v21 = vor.u32 %v12204_v63, %v10029_v52  ;;  %v6307_v52 = vpop.f32.mrf.mxu3  ;;  %v12328_v63 = vld [vmem:[%s13154_s17 + $0x13f4] sm:$0xf0]  ;;  %v10325_v47 = vld [vmem:[%s13154_s17 + $0x1260] sm:$0xf] }
 0x22e   : > { %6534 = vmatpush.bf16.msra.mxu1 %v10110_v22  ;;  %v10085_v22 = vld [vmem:[%s13154_s17 + $0x1080] sm:$0xf]  ;;  %v12278_v52 = vld [vmem:[%s13154_s17 + $0x1264] sm:$0xf0]  ;;  %v12276_v53 = vld [vmem:[%s13154_s17 + $0x1254] sm:$0xf0] }
 0x22f   : > { %6547 = vmatpush.bf16.msra.mxu2 %v10174_v23  ;;  %v12218_v23 = vld [vmem:[%s13154_s17 + $0x1084] sm:$0xf0]  ;;  %v586_v26 = vld.sshfl [vmem:[#allocation1 + $0x8] sm:$0xff pattern:$0x73625140] }
 0x230   : > { %6560 = vmatpush.bf16.msra.mxu3 %v10238_v28  ;;  %v10158_v28 = vor.u32 %v12236_v34, %v10157_v13  ;;  %v10086_v8 = vor.u32 %v12218_v23, %v10085_v22  ;;  %v587_v13 = vld.sshfl [vmem:[#allocation1 + $0x10] sm:$0xff pattern:$0x73625140]  ;;  %v10214_v34 = vor.u32 %v12250_v30, %v10213_v29  ;;  %v13912_v30 = vpack.c.bf16 %v586_v26, %v586_v26 }
 0x231   : > { %6522 = vmatpush.bf16.msra.mxu0 %v10038_v51  ;;  %v12312_v51 = vld [vmem:[%s13154_s17 + $0x1374] sm:$0xf0]  ;;  %v13910_v29 = vpack.c.bf16 %v587_v13, %v587_v13  ;;  %v10517_v31 = vld [vmem:[%s13154_s17 + $0x13e0] sm:$0xf] }
 0x232   : > { %6535 = vmatpush.bf16.msra.mxu1 %v10102_v54  ;;  %v10022_v54 = vor.u32 %v12202_v19, %v10021_v60  ;;  %v588_v60 = vld.sshfl [vmem:[#allocation1 + $0x18] sm:$0xff pattern:$0x73625140]  ;;  %v10398_v19 = vor.u32 %v12296_v42, %v10397_v41  ;;  %15365 = vst [vmem:[#allocation20_spill] sm:$0xff] %v13912_v30  ;;  %v10326_v41 = vor.u32 %v12278_v52, %v10325_v47  ;;  %v12324_v13 = vld [vmem:[%s13154_s17 + $0x13d4] sm:$0xf0] }
 0x233   : > { %6548 = vmatpush.bf16.msra.mxu2 %v10166_v61  ;;  %v10525_v61 = vld [vmem:[%s13154_s17 + $0x13f0] sm:$0xf]  ;;  %15364 = vst [vmem:[#allocation19_spill] sm:$0xff] %v13910_v29  ;;  %v13916_v39 = vpack.c.bf16 %v588_v60, %v588_v60  ;;  %v10309_v60 = vld [vmem:[%s13154_s17 + $0x1240] sm:$0xf] }
 0x234   : > { %6561 = vmatpush.bf16.msra.mxu3 %v10230_v57  ;;  %v585_v57 = vld.sshfl [vmem:[#allocation1] sm:$0xff pattern:$0x73625140]  ;;  %v10526_v22 = vor.u32 %v12328_v63, %v10525_v61  ;;  %v12290_v52 = vld [vmem:[%s13154_s17 + $0x12c4] sm:$0xf0] }
 0x235   : > { %6523 = vmatpush.bf16.msra.mxu0 %v10030_v21  ;;  %v10462_v21 = vor.u32 %v12312_v51, %v10461_v48  ;;  %v13905_v23 = vpack.c.bf16 %v585_v57, %v585_v57  ;;  %15366 = vst [vmem:[#allocation21_spill] sm:$0xff] %v13916_v39  ;;  %v10317_v51 = vld [vmem:[%s13154_s17 + $0x1250] sm:$0xf]  ;;  %v12292_v63 = vld [vmem:[%s13154_s17 + $0x12d4] sm:$0xf0] }
 0x236   : > { %6536 = vmatpush.bf16.msra.mxu1 %v10094_v27  ;;  %v10389_v27 = vld [vmem:[%s13154_s17 + $0x12e0] sm:$0xf]  ;;  %v10509_v57 = vld [vmem:[%s13154_s17 + $0x13d0] sm:$0xf] }
 0x237   : > { %6549 = vmatpush.bf16.msra.mxu2 %v10158_v28  ;;  %v12310_v28 = vld [vmem:[%s13154_s17 + $0x1364] sm:$0xf0]  ;;  %v10390_v42 = vor.u32 %v12294_v24, %v10389_v27  ;;  %v10510_v47 = vor.u32 %v12324_v13, %v10509_v57  ;;  %v10437_v27 = vld [vmem:[%s13154_s17 + $0x1340] sm:$0xf]  ;;  %v10493_v57 = vld [vmem:[%s13154_s17 + $0x13b0] sm:$0xf] }
 0x238   : > { %6562 = vmatpush.bf16.msra.mxu3 %v10222_v32  ;;  %v12326_v32 = vld [vmem:[%s13154_s17 + $0x13e4] sm:$0xf0]  ;;  %v10454_v48 = vor.u32 %v12310_v28, %v10453_v25  ;;  %v10501_v25 = vld [vmem:[%s13154_s17 + $0x13c0] sm:$0xf]  ;;  %v12320_v13 = vld [vmem:[%s13154_s17 + $0x13b4] sm:$0xf0] }
 0x239   : > { %6524 = vmatpush.bf16.msra.mxu0 %v10022_v54  ;;  %v10381_v54 = vld [vmem:[%s13154_s17 + $0x12d0] sm:$0xf]  ;;  %v10518_v61 = vor.u32 %v12326_v32, %v10517_v31  ;;  %v6318_v24 = vpop.f32.mrf.mxu0  ;;  %v12322_v28 = vld [vmem:[%s13154_s17 + $0x13c4] sm:$0xf0] }
 0x23a   : > { %6537 = vmatpush.bf16.msra.mxu1 %v10086_v8  ;;  %v10445_v8 = vld [vmem:[%s13154_s17 + $0x1350] sm:$0xf]  ;;  %v6319_v31 = vadd.f32 %v6318_v24, %v13876_v35  ;;  %v12304_v35 = vld [vmem:[%s13154_s17 + $0x1334] sm:$0xf0]  ;;  %v12302_v24 = vld [vmem:[%s13154_s17 + $0x1324] sm:$0xf0] }
 0x23b   : > { %6550 = vmatpush.bf16.msra.mxu2 %v10150_v9  ;;  %v12308_v9 = vld [vmem:[%s13154_s17 + $0x1354] sm:$0xf0] }
 0x23c   : > { %6563 = vmatpush.bf16.msra.mxu3 %v10214_v34  ;;  %6525 = vmatmul.bf16.vlgmr.msra.gmra.mxu0 %v13905_v23  ;;  %v10318_v34 = vor.u32 %v12276_v53, %v10317_v51  ;;  %v10446_v26 = vor.u32 %v12308_v9, %v10445_v8  ;;  %v10301_v51 = vld [vmem:[%s13154_s17 + $0x1230] sm:$0xf]  ;;  %v12272_v53 = vld [vmem:[%s13154_s17 + $0x1234] sm:$0xf0] }
 0x23d   : > { %6569 = vmatpush.bf16.msrb.mxu0 %v10334_v14  ;;  %6538 = vmatmul.bf16.vlgmr.msra.gmra.mxu1 %v13912_v30  ;;  %v10382_v14 = vor.u32 %v12292_v63, %v10381_v54  ;;  %v10365_v54 = vld [vmem:[%s13154_s17 + $0x12b0] sm:$0xf]  ;;  %v12288_v8 = vld [vmem:[%s13154_s17 + $0x12b4] sm:$0xf0] }
 0x23e   : > { %6582 = vmatpush.bf16.msrb.mxu1 %v10398_v19  ;;  %6551 = vmatmul.bf16.vlgmr.msra.gmra.mxu2 %v13910_v29  ;;  %v12274_v19 = vld [vmem:[%s13154_s17 + $0x1244] sm:$0xf0]  ;;  %v10429_v9 = vld [vmem:[%s13154_s17 + $0x1330] sm:$0xf] }
 0x23f   : > { %6595 = vmatpush.bf16.msrb.mxu2 %v10462_v21  ;;  %6564 = vmatmul.bf16.vlgmr.msra.gmra.mxu3 %v13916_v39  ;;  %v10373_v21 = vld [vmem:[%s13154_s17 + $0x12c0] sm:$0xf]  ;;  %v10310_v32 = vor.u32 %v12274_v19, %v10309_v60  ;;  %v12270_v19 = vld [vmem:[%s13154_s17 + $0x1224] sm:$0xf0]  ;;  %v12376_v39 = vld [vmem:[%s13154_s17 + $0x1574] sm:$0xf0] }
 0x240   : > { %6608 = vmatpush.bf16.msrb.mxu3 %v10526_v22  ;;  %v12306_v22 = vld [vmem:[%s13154_s17 + $0x1344] sm:$0xf0]  ;;  %v10293_v60 = vld [vmem:[%s13154_s17 + $0x1220] sm:$0xf] }
 0x241   : > { %6570 = vmatpush.bf16.msrb.mxu0 %v10326_v41  ;;  %v6331_v41 = vpop.f32.mrf.mxu1  ;;  %v524_v29 = vld [vmem:[%s13148_s20 + $0x50] sm:$0xff] }
 0x242   : > { %6583 = vmatpush.bf16.msrb.mxu1 %v10390_v42  ;;  %v10374_v42 = vor.u32 %v12290_v52, %v10373_v21  ;;  %v6332_v63 = vadd.f32 %v6331_v41, %v6319_v31  ;;  %v10357_v21 = vld [vmem:[%s13154_s17 + $0x12a0] sm:$0xf]  ;;  %v6344_v52 = vpop.f32.mrf.mxu2  ;;  %v6320_v41 = vpop.f32.mrf.mxu0  ;;  %593 = vst [vmem:[#allocation1] ss:$4 sm:$0xff] %v524_v29 }
 0x243   : > { %6596 = vmatpush.bf16.msrb.mxu2 %v10454_v48  ;;  %v10438_v48 = vor.u32 %v12306_v22, %v10437_v27  ;;  %v12286_v27 = vld [vmem:[%s13154_s17 + $0x12a4] sm:$0xf0]  ;;  %v10421_v22 = vld [vmem:[%s13154_s17 + $0x1320] sm:$0xf]  ;;  %v12344_v41 = vld [vmem:[%s13154_s17 + $0x1474] sm:$0xf0] }
 0x244   : > { %6609 = vmatpush.bf16.msrb.mxu3 %v10518_v61  ;;  %v10502_v61 = vor.u32 %v12322_v28, %v10501_v25  ;;  %v6345_v25 = vadd.f32 %v6344_v52, %v6332_v63  ;;  %v6357_v28 = vpop.f32.mrf.mxu3  ;;  %v10485_v31 = vld [vmem:[%s13154_s17 + $0x13a0] sm:$0xf]  ;;  %v12268_v63 = vld [vmem:[%s13154_s17 + $0x1214] sm:$0xf0]  ;;  %v12282_v52 = vld [vmem:[%s13154_s17 + $0x1284] sm:$0xf0] }
 0x245   : > { %6571 = vmatpush.bf16.msrb.mxu0 %v10318_v34  ;;  %v10302_v34 = vor.u32 %v12272_v53, %v10301_v51  ;;  %v10581_v29 = vld [vmem:[%s13154_s17 + $0x1460] sm:$0xf] }
 0x246   : > { %6584 = vmatpush.bf16.msrb.mxu1 %v10382_v14  ;;  %v10366_v14 = vor.u32 %v12288_v8, %v10365_v54  ;;  %v13956_v53 = vadd.f32 %v6357_v28, %v6345_v25  ;;  %v10358_v54 = vor.u32 %v12286_v27, %v10357_v21  ;;  %v10349_v8 = vld [vmem:[%s13154_s17 + $0x1290] sm:$0xf]  ;;  %v10341_v21 = vld [vmem:[%s13154_s17 + $0x1280] sm:$0xf]  ;;  %v12314_v28 = vld [vmem:[%s13154_s17 + $0x1384] sm:$0xf0] }
 0x247   : > { %6597 = vmatpush.bf16.msrb.mxu2 %v10446_v26  ;;  %v10430_v26 = vor.u32 %v12304_v35, %v10429_v9  ;;  %v12284_v9 = vld [vmem:[%s13154_s17 + $0x1294] sm:$0xf0]  ;;  %v10405_v27 = vld [vmem:[%s13154_s17 + $0x1300] sm:$0xf] }
 0x248   : > { %6610 = vmatpush.bf16.msrb.mxu3 %v10510_v47  ;;  %v10494_v47 = vor.u32 %v12320_v13, %v10493_v57  ;;  %v10413_v57 = vld [vmem:[%s13154_s17 + $0x1310] sm:$0xf]  ;;  %v12300_v13 = vld [vmem:[%s13154_s17 + $0x1314] sm:$0xf0]  ;;  %v10469_v25 = vld [vmem:[%s13154_s17 + $0x1380] sm:$0xf] }
 0x249   : > { %6572 = vmatpush.bf16.msrb.mxu0 %v10310_v32  ;;  %v12318_v32 = vld [vmem:[%s13154_s17 + $0x13a4] sm:$0xf0]  ;;  %v6333_v51 = vpop.f32.mrf.mxu1 }
 0x24a   : > { %6585 = vmatpush.bf16.msrb.mxu1 %v10374_v42  ;;  %v10294_v42 = vor.u32 %v12270_v19, %v10293_v60  ;;  %v10486_v35 = vor.u32 %v12318_v32, %v10485_v31  ;;  %v12266_v60 = vld [vmem:[%s13154_s17 + $0x1204] sm:$0xf0]  ;;  %v10589_v31 = vld [vmem:[%s13154_s17 + $0x1470] sm:$0xf]  ;;  %v6346_v51 = vpop.f32.mrf.mxu2 }
 0x24b   : > { %6598 = vmatpush.bf16.msrb.mxu2 %v10438_v48  ;;  %v10285_v48 = vld [vmem:[%s13154_s17 + $0x1210] sm:$0xf]  ;;  %v12342_v51 = vld [vmem:[%s13154_s17 + $0x1464] sm:$0xf0] }
 0x24c   : > { %6611 = vmatpush.bf16.msrb.mxu3 %v10502_v61  ;;  %v10422_v61 = vor.u32 %v12302_v24, %v10421_v22  ;;  %v10286_v19 = vor.u32 %v12268_v63, %v10285_v48  ;;  %v10350_v22 = vor.u32 %v12284_v9, %v10349_v8  ;;  %v10414_v24 = vor.u32 %v12300_v13, %v10413_v57  ;;  %v12360_v48 = vld [vmem:[%s13154_s17 + $0x14f4] sm:$0xf0]  ;;  %v10717_v63 = vld [vmem:[%s13154_s17 + $0x1570] sm:$0xf]  ;;  %v6359_v30 = vpop.f32.mrf.mxu3 }
 0x24d   : > { %6573 = vmatpush.bf16.msrb.mxu0 %v10302_v34  ;;  %v10477_v34 = vld [vmem:[%s13154_s17 + $0x1390] sm:$0xf]  ;;  %v12392_v8 = vld [vmem:[%s13154_s17 + $0x15f4] sm:$0xf0]  ;;  %v10342_v9 = vor.u32 %v12282_v52, %v10341_v21  ;;  %v10470_v30 = vor.u32 %v12314_v28, %v10469_v25 }
 0x24e   : > { %6586 = vmatpush.bf16.msrb.mxu1 %v10366_v14  ;;  %v12316_v14 = vld [vmem:[%s13154_s17 + $0x1394] sm:$0xf0]  ;;  %v591_v13 = vld.sshfl [vmem:[#allocation1 + $0x30] sm:$0xff pattern:$0x73625140] }
 0x24f   : > { %6599 = vmatpush.bf16.msrb.mxu2 %v10430_v26  ;;  %v10277_v26 = vld [vmem:[%s13154_s17 + $0x1200] sm:$0xf]  ;;  %v10478_v32 = vor.u32 %v12316_v14, %v10477_v34  ;;  %v589_v57 = vld.sshfl [vmem:[#allocation1 + $0x20] sm:$0xff pattern:$0x73625140]  ;;  %v10590_v34 = vor.u32 %v12344_v41, %v10589_v31  ;;  %v13990_v25 = vpack.c.bf16 %v591_v13, %v591_v13  ;;  %v10582_v41 = vor.u32 %v12342_v51, %v10581_v29 }
 0x250   : > { %6612 = vmatpush.bf16.msrb.mxu3 %v10494_v47  ;;  %v12298_v47 = vld [vmem:[%s13154_s17 + $0x1304] sm:$0xf0]  ;;  %v590_v14 = vld.sshfl [vmem:[#allocation1 + $0x28] sm:$0xff pattern:$0x73625140]  ;;  %v13985_v52 = vpack.c.bf16 %v589_v57, %v589_v57 }
 0x251   : > { %6574 = vmatpush.bf16.msrb.mxu0 %v10294_v42  ;;  %v10653_v42 = vld [vmem:[%s13154_s17 + $0x14f0] sm:$0xf]  ;;  %15368 = vst [vmem:[#allocation23_spill] sm:$0xff] %v13990_v25  ;;  %v13992_v28 = vpack.c.bf16 %v590_v14, %v590_v14  ;;  %v12390_v31 = vld [vmem:[%s13154_s17 + $0x15e4] sm:$0xf0] }
 0x252   : > { %6587 = vmatpush.bf16.msrb.mxu1 %v10358_v54  ;;  %v10278_v54 = vor.u32 %v12266_v60, %v10277_v26  ;;  %v592_v26 = vld.sshfl [vmem:[#allocation1 + $0x38] sm:$0xff pattern:$0x73625140]  ;;  %v10654_v60 = vor.u32 %v12360_v48, %v10653_v42  ;;  %15367 = vst [vmem:[#allocation22_spill] sm:$0xff] %v13985_v52  ;;  %v12372_v57 = vld [vmem:[%s13154_s17 + $0x1554] sm:$0xf0] }
 0x253   : > { %6600 = vmatpush.bf16.msrb.mxu2 %v10422_v61  ;;  %v10781_v61 = vld [vmem:[%s13154_s17 + $0x15f0] sm:$0xf]  ;;  %15369 = vst [vmem:[#allocation24_spill] sm:$0xff] %v13992_v28  ;;  %v10629_v29 = vld [vmem:[%s13154_s17 + $0x14c0] sm:$0xf] }
 0x254   : > { %6613 = vmatpush.bf16.msrb.mxu3 %v10486_v35  ;;  %v10406_v35 = vor.u32 %v12298_v47, %v10405_v27  ;;  %v10782_v21 = vor.u32 %v12392_v8, %v10781_v61  ;;  %v12358_v27 = vld [vmem:[%s13154_s17 + $0x14e4] sm:$0xf0]  ;;  %v10709_v47 = vld [vmem:[%s13154_s17 + $0x1560] sm:$0xf]  ;;  %v10637_v61 = vld [vmem:[%s13154_s17 + $0x14d0] sm:$0xf] }
 0x255   : > { %6575 = vmatpush.bf16.msrb.mxu0 %v10286_v19  ;;  %v10718_v19 = vor.u32 %v12376_v39, %v10717_v63  ;;  %v10773_v39 = vld [vmem:[%s13154_s17 + $0x15e0] sm:$0xf]  ;;  %v10573_v63 = vld [vmem:[%s13154_s17 + $0x1450] sm:$0xf] }
 0x256   : > { %6588 = vmatpush.bf16.msrb.mxu1 %v10350_v22  ;;  %v10645_v22 = vld [vmem:[%s13154_s17 + $0x14e0] sm:$0xf]  ;;  %v10774_v8 = vor.u32 %v12390_v31, %v10773_v39  ;;  %v10765_v13 = vld [vmem:[%s13154_s17 + $0x15d0] sm:$0xf]  ;;  %v12386_v39 = vld [vmem:[%s13154_s17 + $0x15c4] sm:$0xf0] }
 0x257   : > { %6601 = vmatpush.bf16.msrb.mxu2 %v10414_v24  ;;  %v12374_v24 = vld [vmem:[%s13154_s17 + $0x1564] sm:$0xf0]  ;;  %v10646_v42 = vor.u32 %v12358_v27, %v10645_v22 }
 0x258   : > { %6614 = vmatpush.bf16.msrb.mxu3 %v10478_v32  ;;  %v13996_v32 = vpack.c.bf16 %v592_v26, %v592_v26  ;;  %v10710_v48 = vor.u32 %v12374_v24, %v10709_v47  ;;  %v12354_v22 = vld [vmem:[%s13154_s17 + $0x14c4] sm:$0xf0]  ;;  %v10757_v24 = vld [vmem:[%s13154_s17 + $0x15c0] sm:$0xf] }
 0x259   : > { %6576 = vmatpush.bf16.msrb.mxu0 %v10278_v54  ;;  %v12340_v54 = vld [vmem:[%s13154_s17 + $0x1454] sm:$0xf0]  ;;  %v12370_v27 = vld [vmem:[%s13154_s17 + $0x1544] sm:$0xf0]  ;;  %v6370_v47 = vpop.f32.mrf.mxu0 }
 0x25a   : > { %6589 = vmatpush.bf16.msrb.mxu1 %v10342_v9  ;;  %15370 = vst [vmem:[#allocation25_spill] sm:$0xff] %v13996_v32  ;;  %v12356_v9 = vld [vmem:[%s13154_s17 + $0x14d4] sm:$0xf0]  ;;  %v6371_v31 = vadd.f32 %v6370_v47, %v13956_v53  ;;  %v10677_v47 = vld [vmem:[%s13154_s17 + $0x1520] sm:$0xf] }
 0x25b   : > { %6602 = vmatpush.bf16.msrb.mxu2 %v10406_v35  ;;  %v10701_v35 = vld [vmem:[%s13154_s17 + $0x1550] sm:$0xf]  ;;  %v10638_v14 = vor.u32 %v12356_v9, %v10637_v61  ;;  %v12336_v61 = vld [vmem:[%s13154_s17 + $0x1434] sm:$0xf0]  ;;  %v10758_v9 = vor.u32 %v12386_v39, %v10757_v24  ;;  %v12366_v24 = vld [vmem:[%s13154_s17 + $0x1524] sm:$0xf0] }
 0x25c   : > { %6615 = vmatpush.bf16.msrb.mxu3 %v10470_v30  ;;  %6577 = vmatmul.bf16.vlgmr.msrb.gmra.mxu0 %v13985_v52  ;;  %v12388_v30 = vld [vmem:[%s13154_s17 + $0x15d4] sm:$0xf0]  ;;  %v10702_v26 = vor.u32 %v12372_v57, %v10701_v35 }
 0x25d   : > { %6621 = vmatpush.bf16.msra.mxu0 %v10590_v34  ;;  %6590 = vmatmul.bf16.vlgmr.msrb.gmra.mxu1 %v13992_v28  ;;  %v10574_v34 = vor.u32 %v12340_v54, %v10573_v63  ;;  %v10766_v51 = vor.u32 %v12388_v30, %v10765_v13  ;;  %v10557_v54 = vld [vmem:[%s13154_s17 + $0x1430] sm:$0xf]  ;;  %v12352_v57 = vld [vmem:[%s13154_s17 + $0x14b4] sm:$0xf0] }
 0x25e   : > { %6634 = vmatpush.bf16.msra.mxu1 %v10654_v60  ;;  %6603 = vmatmul.bf16.vlgmr.msrb.gmra.mxu2 %v13990_v25  ;;  %v10565_v60 = vld [vmem:[%s13154_s17 + $0x1440] sm:$0xf]  ;;  %v10685_v13 = vld [vmem:[%s13154_s17 + $0x1530] sm:$0xf]  ;;  %v12368_v53 = vld [vmem:[%s13154_s17 + $0x1534] sm:$0xf0] }
 0x25f   : > { %6647 = vmatpush.bf16.msra.mxu2 %v10718_v19  ;;  %6616 = vmatmul.bf16.vlgmr.msrb.gmra.mxu3 %v13996_v32  ;;  %v12338_v19 = vld [vmem:[%s13154_s17 + $0x1444] sm:$0xf0]  ;;  %v10749_v30 = vld [vmem:[%s13154_s17 + $0x15b0] sm:$0xf]  ;;  %v12440_v28 = vld [vmem:[%s13154_s17 + $0x1774] sm:$0xf0] }
 0x260   : > { %6660 = vmatpush.bf16.msra.mxu3 %v10782_v21  ;;  %v10693_v21 = vld [vmem:[%s13154_s17 + $0x1540] sm:$0xf]  ;;  %v10973_v32 = vld [vmem:[%s13154_s17 + $0x1770] sm:$0xf]  ;;  %v525_v52 = vld [vmem:[%s13148_s20 + $0x58] sm:$0xff] }
 0x261   : > { %6622 = vmatpush.bf16.msra.mxu0 %v10582_v41  ;;  %v10566_v41 = vor.u32 %v12338_v19, %v10565_v60  ;;  %v10694_v63 = vor.u32 %v12370_v27, %v10693_v21  ;;  %v10686_v60 = vor.u32 %v12368_v53, %v10685_v13  ;;  %v10549_v19 = vld [vmem:[%s13154_s17 + $0x1420] sm:$0xf]  ;;  %v6396_v21 = vpop.f32.mrf.mxu2  ;;  %v12350_v27 = vld [vmem:[%s13154_s17 + $0x14a4] sm:$0xf0]  ;;  %v10605_v13 = vld [vmem:[%s13154_s17 + $0x1490] sm:$0xf] }
 0x262   : > { %6635 = vmatpush.bf16.msra.mxu1 %v10646_v42  ;;  %v6383_v42 = vpop.f32.mrf.mxu1  ;;  %v12348_v53 = vld [vmem:[%s13154_s17 + $0x1494] sm:$0xf0]  ;;  %594 = vst [vmem:[#allocation1 + $0x20] ss:$4 sm:$0xff] %v525_v52  ;;  %v10837_v52 = vld [vmem:[%s13154_s17 + $0x1660] sm:$0xf] }
 0x263   : > { %6648 = vmatpush.bf16.msra.mxu2 %v10710_v48  ;;  %v10630_v48 = vor.u32 %v12354_v22, %v10629_v29  ;;  %v6384_v35 = vadd.f32 %v6383_v42, %v6371_v31  ;;  %v12334_v29 = vld [vmem:[%s13154_s17 + $0x1424] sm:$0xf0]  ;;  %v6409_v31 = vpop.f32.mrf.mxu3 }
 0x264   : > { %6661 = vmatpush.bf16.msra.mxu3 %v10774_v8  ;;  %v10621_v8 = vld [vmem:[%s13154_s17 + $0x14b0] sm:$0xf]  ;;  %v12382_v42 = vld [vmem:[%s13154_s17 + $0x15a4] sm:$0xf0] }
 0x265   : > { %6623 = vmatpush.bf16.msra.mxu0 %v10574_v34  ;;  %v12384_v34 = vld [vmem:[%s13154_s17 + $0x15b4] sm:$0xf0]  ;;  %v6397_v39 = vadd.f32 %v6396_v21, %v6384_v35  ;;  %v10678_v35 = vor.u32 %v12366_v24, %v10677_v47  ;;  %v10597_v21 = vld [vmem:[%s13154_s17 + $0x1480] sm:$0xf]  ;;  %v10606_v24 = vor.u32 %v12348_v53, %v10605_v13 }
 0x266   : > { %6636 = vmatpush.bf16.msra.mxu1 %v10638_v14  ;;  %v10558_v14 = vor.u32 %v12336_v61, %v10557_v54  ;;  %v10750_v22 = vor.u32 %v12384_v34, %v10749_v30  ;;  %v10541_v54 = vld [vmem:[%s13154_s17 + $0x1410] sm:$0xf]  ;;  %v10661_v47 = vld [vmem:[%s13154_s17 + $0x1500] sm:$0xf]  ;;  %v12456_v13 = vld [vmem:[%s13154_s17 + $0x17f4] sm:$0xf0] }
 0x267   : > { %6649 = vmatpush.bf16.msra.mxu2 %v10702_v26  ;;  %v10622_v26 = vor.u32 %v12352_v57, %v10621_v8  ;;  %v14036_v8 = vadd.f32 %v6409_v31, %v6397_v39  ;;  %v12332_v57 = vld [vmem:[%s13154_s17 + $0x1414] sm:$0xf0]  ;;  %v10669_v34 = vld [vmem:[%s13154_s17 + $0x1510] sm:$0xf]  ;;  %v10725_v31 = vld [vmem:[%s13154_s17 + $0x1580] sm:$0xf] }
 0x268   : > { %6662 = vmatpush.bf16.msra.mxu3 %v10766_v51  ;;  %v10613_v51 = vld [vmem:[%s13154_s17 + $0x14a0] sm:$0xf] }
 0x269   : > { %6624 = vmatpush.bf16.msra.mxu0 %v10566_v41  ;;  %v10741_v41 = vld [vmem:[%s13154_s17 + $0x15a0] sm:$0xf] }
 0x26a   : > { %6637 = vmatpush.bf16.msra.mxu1 %v10630_v48  ;;  %v6372_v48 = vpop.f32.mrf.mxu0  ;;  %v6385_v61 = vpop.f32.mrf.mxu1  ;;  %v10742_v30 = vor.u32 %v12382_v42, %v10741_v41  ;;  %v12378_v41 = vld [vmem:[%s13154_s17 + $0x1584] sm:$0xf0]  ;;  %v10845_v42 = vld [vmem:[%s13154_s17 + $0x1670] sm:$0xf] }
 0x26b   : > { %6650 = vmatpush.bf16.msra.mxu2 %v10694_v63  ;;  %v10550_v63 = vor.u32 %v12334_v29, %v10549_v19  ;;  %v10733_v19 = vld [vmem:[%s13154_s17 + $0x1590] sm:$0xf]  ;;  %v12330_v29 = vld [vmem:[%s13154_s17 + $0x1404] sm:$0xf0]  ;;  %v12424_v61 = vld [vmem:[%s13154_s17 + $0x16f4] sm:$0xf0]  ;;  %v6411_v25 = vpop.f32.mrf.mxu3 }
 0x26c   : > { %6663 = vmatpush.bf16.msra.mxu3 %v10758_v9  ;;  %v10614_v9 = vor.u32 %v12350_v27, %v10613_v51  ;;  %v10542_v51 = vor.u32 %v12332_v57, %v10541_v54  ;;  %v12346_v27 = vld [vmem:[%s13154_s17 + $0x1484] sm:$0xf0]  ;;  %v10909_v54 = vld [vmem:[%s13154_s17 + $0x16f0] sm:$0xf]  ;;  %v6398_v57 = vpop.f32.mrf.mxu2  ;;  %v10726_v25 = vor.u32 %v12378_v41, %v10725_v31 }
 0x26d   : > { %6625 = vmatpush.bf16.msra.mxu0 %v10558_v14  ;;  %v12364_v14 = vld [vmem:[%s13154_s17 + $0x1514] sm:$0xf0]  ;;  %v10598_v53 = vor.u32 %v12346_v27, %v10597_v21  ;;  %v12406_v57 = vld [vmem:[%s13154_s17 + $0x1664] sm:$0xf0] }
 0x26e   : > { %6638 = vmatpush.bf16.msra.mxu1 %v10622_v26  ;;  %v12380_v26 = vld [vmem:[%s13154_s17 + $0x1594] sm:$0xf0]  ;;  %v10670_v39 = vor.u32 %v12364_v14, %v10669_v34  ;;  %v597_v14 = vld.sshfl [vmem:[#allocation1 + $0x10] sm:$0xff pattern:$0x73625140] }
 0x26f   : > { %6651 = vmatpush.bf16.msra.mxu2 %v10686_v60  ;;  %v10533_v60 = vld [vmem:[%s13154_s17 + $0x1400] sm:$0xf]  ;;  %v10734_v48 = vor.u32 %v12380_v26, %v10733_v19  ;;  %v595_v34 = vld.sshfl [vmem:[#allocation1] sm:$0xff pattern:$0x73625140]  ;;  %v14070_v31 = vpack.c.bf16 %v597_v14, %v597_v14 }
 0x270   : > { %6664 = vmatpush.bf16.msra.mxu3 %v10750_v22  ;;  %v12362_v22 = vld [vmem:[%s13154_s17 + $0x1504] sm:$0xf0]  ;;  %v596_v26 = vld.sshfl [vmem:[#allocation1 + $0x8] sm:$0xff pattern:$0x73625140]  ;;  %v14065_v27 = vpack.c.bf16 %v595_v34, %v595_v34 }
 0x271   : > { %6626 = vmatpush.bf16.msra.mxu0 %v10550_v63  ;;  %v12408_v63 = vld [vmem:[%s13154_s17 + $0x1674] sm:$0xf0]  ;;  %15372 = vst [vmem:[#allocation27_spill] sm:$0xff] %v14070_v31  ;;  %v14072_v41 = vpack.c.bf16 %v596_v26, %v596_v26  ;;  %v11021_v14 = vld [vmem:[%s13154_s17 + $0x17d0] sm:$0xf] }
 0x272   : > { %6639 = vmatpush.bf16.msra.mxu1 %v10614_v9  ;;  %v10534_v9 = vor.u32 %v12330_v29, %v10533_v60  ;;  %v10846_v19 = vor.u32 %v12408_v63, %v10845_v42  ;;  %v598_v60 = vld.sshfl [vmem:[#allocation1 + $0x18] sm:$0xff pattern:$0x73625140]  ;;  %v10910_v29 = vor.u32 %v12424_v61, %v10909_v54  ;;  %15371 = vst [vmem:[#allocation26_spill] sm:$0xff] %v14065_v27  ;;  %v12436_v34 = vld [vmem:[%s13154_s17 + $0x1754] sm:$0xf0] }
 0x273   : > { %6652 = vmatpush.bf16.msra.mxu2 %v10678_v35  ;;  %v11037_v35 = vld [vmem:[%s13154_s17 + $0x17f0] sm:$0xf]  ;;  %15373 = vst [vmem:[#allocation28_spill] sm:$0xff] %v14072_v41  ;;  %v14076_v42 = vpack.c.bf16 %v598_v60, %v598_v60 }
 0x274   : > { %6665 = vmatpush.bf16.msra.mxu3 %v10742_v30  ;;  %v10662_v30 = vor.u32 %v12362_v22, %v10661_v47  ;;  %v11038_v21 = vor.u32 %v12456_v13, %v11037_v35  ;;  %v12422_v47 = vld [vmem:[%s13154_s17 + $0x16e4] sm:$0xf0]  ;;  %v10965_v22 = vld [vmem:[%s13154_s17 + $0x1760] sm:$0xf]  ;;  %v10829_v61 = vld [vmem:[%s13154_s17 + $0x1650] sm:$0xf] }
 0x275   : > { %6627 = vmatpush.bf16.msra.mxu0 %v10542_v51  ;;  %v10974_v51 = vor.u32 %v12440_v28, %v10973_v32  ;;  %v11029_v28 = vld [vmem:[%s13154_s17 + $0x17e0] sm:$0xf]  ;;  %v12454_v32 = vld [vmem:[%s13154_s17 + $0x17e4] sm:$0xf0]  ;;  %15374 = vst [vmem:[#allocation29_spill] sm:$0xff] %v14076_v42 }
 0x276   : > { %6640 = vmatpush.bf16.msra.mxu1 %v10606_v24  ;;  %v10901_v24 = vld [vmem:[%s13154_s17 + $0x16e0] sm:$0xf]  ;;  %v10893_v35 = vld [vmem:[%s13154_s17 + $0x16d0] sm:$0xf]  ;;  %v11030_v13 = vor.u32 %v12454_v32, %v11029_v28  ;;  %v12450_v28 = vld [vmem:[%s13154_s17 + $0x17c4] sm:$0xf0] }
 0x277   : > { %6653 = vmatpush.bf16.msra.mxu2 %v10670_v39  ;;  %v12438_v39 = vld [vmem:[%s13154_s17 + $0x1764] sm:$0xf0]  ;;  %v10902_v63 = vor.u32 %v12422_v47, %v10901_v24 }
 0x278   : > { %6666 = vmatpush.bf16.msra.mxu3 %v10734_v48  ;;  %v10838_v48 = vor.u32 %v12406_v57, %v10837_v52  ;;  %v10966_v54 = vor.u32 %v12438_v39, %v10965_v22  ;;  %v10885_v52 = vld [vmem:[%s13154_s17 + $0x16c0] sm:$0xf]  ;;  %v12418_v24 = vld [vmem:[%s13154_s17 + $0x16c4] sm:$0xf0] }
 0x279   : > { %6628 = vmatpush.bf16.msra.mxu0 %v10534_v9  ;;  %v12404_v9 = vld [vmem:[%s13154_s17 + $0x1654] sm:$0xf0]  ;;  %v12434_v47 = vld [vmem:[%s13154_s17 + $0x1744] sm:$0xf0]  ;;  %v6422_v22 = vpop.f32.mrf.mxu0  ;;  %v11013_v39 = vld [vmem:[%s13154_s17 + $0x17c0] sm:$0xf] }
 0x27a   : > { %6641 = vmatpush.bf16.msra.mxu1 %v10598_v53  ;;  %v12420_v53 = vld [vmem:[%s13154_s17 + $0x16d4] sm:$0xf0]  ;;  %v6423_v32 = vadd.f32 %v6422_v22, %v14036_v8  ;;  %v10933_v22 = vld [vmem:[%s13154_s17 + $0x1720] sm:$0xf] }
 0x27b   : > { %6654 = vmatpush.bf16.msra.mxu2 %v10662_v30  ;;  %v10957_v30 = vld [vmem:[%s13154_s17 + $0x1750] sm:$0xf]  ;;  %v10894_v26 = vor.u32 %v12420_v53, %v10893_v35  ;;  %v12400_v35 = vld [vmem:[%s13154_s17 + $0x1634] sm:$0xf0]  ;;  %v11014_v53 = vor.u32 %v12450_v28, %v11013_v39  ;;  %v12430_v39 = vld [vmem:[%s13154_s17 + $0x1724] sm:$0xf0] }
 0x27c   : > { %6667 = vmatpush.bf16.msra.mxu3 %v10726_v25  ;;  %6629 = vmatmul.bf16.vlgmr.msra.gmra.mxu0 %v14065_v27  ;;  %v12452_v25 = vld [vmem:[%s13154_s17 + $0x17d4] sm:$0xf0]  ;;  %v10958_v60 = vor.u32 %v12436_v34, %v10957_v30  ;;  %v526_v27 = vld [vmem:[%s13148_s20 + $0x60] sm:$0xff] }
 0x27d   : > { %6673 = vmatpush.bf16.msrb.mxu0 %v10846_v19  ;;  %6642 = vmatmul.bf16.vlgmr.msra.gmra.mxu1 %v14072_v41  ;;  %v10830_v19 = vor.u32 %v12404_v9, %v10829_v61  ;;  %v11022_v57 = vor.u32 %v12452_v25, %v11021_v14  ;;  %v10813_v9 = vld [vmem:[%s13154_s17 + $0x1630] sm:$0xf]  ;;  %v12416_v34 = vld [vmem:[%s13154_s17 + $0x16b4] sm:$0xf0]  ;;  %603 = vst [vmem:[#allocation1] ss:$4 sm:$0xff] %v526_v27 }
 0x27e   : > { %6686 = vmatpush.bf16.msrb.mxu1 %v10910_v29  ;;  %6655 = vmatmul.bf16.vlgmr.msra.gmra.mxu2 %v14070_v31  ;;  %v10821_v29 = vld [vmem:[%s13154_s17 + $0x1640] sm:$0xf]  ;;  %v10941_v14 = vld [vmem:[%s13154_s17 + $0x1730] sm:$0xf]  ;;  %v12432_v8 = vld [vmem:[%s13154_s17 + $0x1734] sm:$0xf0] }
 0x27f   : > { %6699 = vmatpush.bf16.msrb.mxu2 %v10974_v51  ;;  %6668 = vmatmul.bf16.vlgmr.msra.gmra.mxu3 %v14076_v42  ;;  %v12402_v51 = vld [vmem:[%s13154_s17 + $0x1644] sm:$0xf0]  ;;  %v11005_v25 = vld [vmem:[%s13154_s17 + $0x17b0] sm:$0xf]  ;;  %v12504_v41 = vld [vmem:[%s13154_s17 + $0x1974] sm:$0xf0] }
 0x280   : > { %6712 = vmatpush.bf16.msrb.mxu3 %v11038_v21  ;;  %v10949_v21 = vld [vmem:[%s13154_s17 + $0x1740] sm:$0xf]  ;;  %v11229_v42 = vld [vmem:[%s13154_s17 + $0x1970] sm:$0xf] }
 0x281   : > { %6674 = vmatpush.bf16.msrb.mxu0 %v10838_v48  ;;  %v10822_v48 = vor.u32 %v12402_v51, %v10821_v29  ;;  %v10950_v61 = vor.u32 %v12434_v47, %v10949_v21  ;;  %v10942_v29 = vor.u32 %v12432_v8, %v10941_v14  ;;  %v10805_v51 = vld [vmem:[%s13154_s17 + $0x1620] sm:$0xf]  ;;  %v6448_v21 = vpop.f32.mrf.mxu2  ;;  %v12414_v47 = vld [vmem:[%s13154_s17 + $0x16a4] sm:$0xf0]  ;;  %v10861_v14 = vld [vmem:[%s13154_s17 + $0x1690] sm:$0xf] }
 0x282   : > { %6687 = vmatpush.bf16.msrb.mxu1 %v10902_v63  ;;  %v6435_v63 = vpop.f32.mrf.mxu1  ;;  %v12412_v8 = vld [vmem:[%s13154_s17 + $0x1694] sm:$0xf0]  ;;  %v11093_v27 = vld [vmem:[%s13154_s17 + $0x1860] sm:$0xf] }
 0x283   : > { %6700 = vmatpush.bf16.msrb.mxu2 %v10966_v54  ;;  %v10886_v54 = vor.u32 %v12418_v24, %v10885_v52  ;;  %v6436_v30 = vadd.f32 %v6435_v63, %v6423_v32  ;;  %v12398_v52 = vld [vmem:[%s13154_s17 + $0x1624] sm:$0xf0]  ;;  %v6461_v32 = vpop.f32.mrf.mxu3 }
 0x284   : > { %6713 = vmatpush.bf16.msrb.mxu3 %v11030_v13  ;;  %v10877_v13 = vld [vmem:[%s13154_s17 + $0x16b0] sm:$0xf]  ;;  %v12446_v63 = vld [vmem:[%s13154_s17 + $0x17a4] sm:$0xf0] }
 0x285   : > { %6675 = vmatpush.bf16.msrb.mxu0 %v10830_v19  ;;  %v12448_v19 = vld [vmem:[%s13154_s17 + $0x17b4] sm:$0xf0]  ;;  %v6449_v28 = vadd.f32 %v6448_v21, %v6436_v30  ;;  %v10934_v30 = vor.u32 %v12430_v39, %v10933_v22  ;;  %v10853_v21 = vld [vmem:[%s13154_s17 + $0x1680] sm:$0xf]  ;;  %v10862_v39 = vor.u32 %v12412_v8, %v10861_v14 }
 0x286   : > { %6688 = vmatpush.bf16.msrb.mxu1 %v10894_v26  ;;  %v10814_v26 = vor.u32 %v12400_v35, %v10813_v9  ;;  %v11006_v24 = vor.u32 %v12448_v19, %v11005_v25  ;;  %v10797_v9 = vld [vmem:[%s13154_s17 + $0x1610] sm:$0xf]  ;;  %v10917_v22 = vld [vmem:[%s13154_s17 + $0x1700] sm:$0xf]  ;;  %v12520_v14 = vld [vmem:[%s13154_s17 + $0x19f4] sm:$0xf0] }
 0x287   : > { %6701 = vmatpush.bf16.msrb.mxu2 %v10958_v60  ;;  %v10878_v60 = vor.u32 %v12416_v34, %v10877_v13  ;;  %v14116_v13 = vadd.f32 %v6461_v32, %v6449_v28  ;;  %v12396_v34 = vld [vmem:[%s13154_s17 + $0x1614] sm:$0xf0]  ;;  %v10925_v19 = vld [vmem:[%s13154_s17 + $0x1710] sm:$0xf]  ;;  %v10981_v32 = vld [vmem:[%s13154_s17 + $0x1780] sm:$0xf] }
 0x288   : > { %6714 = vmatpush.bf16.msrb.mxu3 %v11022_v57  ;;  %v10869_v57 = vld [vmem:[%s13154_s17 + $0x16a0] sm:$0xf] }
 0x289   : > { %6676 = vmatpush.bf16.msrb.mxu0 %v10822_v48  ;;  %v10997_v48 = vld [vmem:[%s13154_s17 + $0x17a0] sm:$0xf] }
 0x28a   : > { %6689 = vmatpush.bf16.msrb.mxu1 %v10886_v54  ;;  %v6424_v54 = vpop.f32.mrf.mxu0  ;;  %v6437_v35 = vpop.f32.mrf.mxu1  ;;  %v10998_v25 = vor.u32 %v12446_v63, %v10997_v48  ;;  %v12442_v48 = vld [vmem:[%s13154_s17 + $0x1784] sm:$0xf0]  ;;  %v11101_v63 = vld [vmem:[%s13154_s17 + $0x1870] sm:$0xf] }
 0x28b   : > { %6702 = vmatpush.bf16.msrb.mxu2 %v10950_v61  ;;  %v10806_v61 = vor.u32 %v12398_v52, %v10805_v51  ;;  %v10989_v51 = vld [vmem:[%s13154_s17 + $0x1790] sm:$0xf]  ;;  %v12394_v52 = vld [vmem:[%s13154_s17 + $0x1604] sm:$0xf0]  ;;  %v12488_v35 = vld [vmem:[%s13154_s17 + $0x18f4] sm:$0xf0]  ;;  %v6463_v31 = vpop.f32.mrf.mxu3 }
 0x28c   : > { %6715 = vmatpush.bf16.msrb.mxu3 %v11014_v53  ;;  %v10870_v53 = vor.u32 %v12414_v47, %v10869_v57  ;;  %v10798_v57 = vor.u32 %v12396_v34, %v10797_v9  ;;  %v12410_v47 = vld [vmem:[%s13154_s17 + $0x1684] sm:$0xf0]  ;;  %v11165_v9 = vld [vmem:[%s13154_s17 + $0x18f0] sm:$0xf]  ;;  %v6450_v34 = vpop.f32.mrf.mxu2  ;;  %v10982_v31 = vor.u32 %v12442_v48, %v10981_v32 }
 0x28d   : > { %6677 = vmatpush.bf16.msrb.mxu0 %v10814_v26  ;;  %v12428_v26 = vld [vmem:[%s13154_s17 + $0x1714] sm:$0xf0]  ;;  %v10854_v8 = vor.u32 %v12410_v47, %v10853_v21  ;;  %v12470_v34 = vld [vmem:[%s13154_s17 + $0x1864] sm:$0xf0] }
 0x28e   : > { %6690 = vmatpush.bf16.msrb.mxu1 %v10878_v60  ;;  %v12444_v60 = vld [vmem:[%s13154_s17 + $0x1794] sm:$0xf0]  ;;  %v10926_v28 = vor.u32 %v12428_v26, %v10925_v19  ;;  %v601_v26 = vld.sshfl [vmem:[#allocation1 + $0x30] sm:$0xff pattern:$0x73625140] }
 0x28f   : > { %6703 = vmatpush.bf16.msrb.mxu2 %v10942_v29  ;;  %v10789_v29 = vld [vmem:[%s13154_s17 + $0x1600] sm:$0xf]  ;;  %v10990_v54 = vor.u32 %v12444_v60, %v10989_v51  ;;  %v599_v19 = vld.sshfl [vmem:[#allocation1 + $0x20] sm:$0xff pattern:$0x73625140]  ;;  %v14150_v32 = vpack.c.bf16 %v601_v26, %v601_v26 }
 0x290   : > { %6716 = vmatpush.bf16.msrb.mxu3 %v11006_v24  ;;  %v12426_v24 = vld [vmem:[%s13154_s17 + $0x1704] sm:$0xf0]  ;;  %v600_v60 = vld.sshfl [vmem:[#allocation1 + $0x28] sm:$0xff pattern:$0x73625140]  ;;  %v14145_v47 = vpack.c.bf16 %v599_v19, %v599_v19 }
 0x291   : > { %6678 = vmatpush.bf16.msrb.mxu0 %v10806_v61  ;;  %v12472_v61 = vld [vmem:[%s13154_s17 + $0x1874] sm:$0xf0]  ;;  %15376 = vst [vmem:[#allocation31_spill] sm:$0xff] %v14150_v32  ;;  %v14152_v48 = vpack.c.bf16 %v600_v60, %v600_v60  ;;  %v11277_v26 = vld [vmem:[%s13154_s17 + $0x19d0] sm:$0xf] }
 0x292   : > { %6691 = vmatpush.bf16.msrb.mxu1 %v10870_v53  ;;  %v10790_v53 = vor.u32 %v12394_v52, %v10789_v29  ;;  %v11102_v51 = vor.u32 %v12472_v61, %v11101_v63  ;;  %v602_v29 = vld.sshfl [vmem:[#allocation1 + $0x38] sm:$0xff pattern:$0x73625140]  ;;  %v11166_v52 = vor.u32 %v12488_v35, %v11165_v9  ;;  %15375 = vst [vmem:[#allocation30_spill] sm:$0xff] %v14145_v47  ;;  %v12500_v19 = vld [vmem:[%s13154_s17 + $0x1954] sm:$0xf0] }
 0x293   : > { %6704 = vmatpush.bf16.msrb.mxu2 %v10934_v30  ;;  %v11293_v30 = vld [vmem:[%s13154_s17 + $0x19f0] sm:$0xf]  ;;  %15377 = vst [vmem:[#allocation32_spill] sm:$0xff] %v14152_v48  ;;  %v14156_v63 = vpack.c.bf16 %v602_v29, %v602_v29 }
 0x294   : > { %6717 = vmatpush.bf16.msrb.mxu3 %v10998_v25  ;;  %v10918_v25 = vor.u32 %v12426_v24, %v10917_v22  ;;  %v11294_v21 = vor.u32 %v12520_v14, %v11293_v30  ;;  %v12486_v22 = vld [vmem:[%s13154_s17 + $0x18e4] sm:$0xf0]  ;;  %v11221_v24 = vld [vmem:[%s13154_s17 + $0x1960] sm:$0xf]  ;;  %v11085_v35 = vld [vmem:[%s13154_s17 + $0x1850] sm:$0xf] }
 0x295   : > { %6679 = vmatpush.bf16.msrb.mxu0 %v10798_v57  ;;  %v11230_v57 = vor.u32 %v12504_v41, %v11229_v42  ;;  %v11285_v41 = vld [vmem:[%s13154_s17 + $0x19e0] sm:$0xf]  ;;  %v12518_v42 = vld [vmem:[%s13154_s17 + $0x19e4] sm:$0xf0]  ;;  %15378 = vst [vmem:[#allocation33_spill] sm:$0xff] %v14156_v63 }
 0x296   : > { %6692 = vmatpush.bf16.msrb.mxu1 %v10862_v39  ;;  %v11157_v39 = vld [vmem:[%s13154_s17 + $0x18e0] sm:$0xf]  ;;  %v11149_v30 = vld [vmem:[%s13154_s17 + $0x18d0] sm:$0xf]  ;;  %v11286_v14 = vor.u32 %v12518_v42, %v11285_v41  ;;  %v12514_v41 = vld [vmem:[%s13154_s17 + $0x19c4] sm:$0xf0] }
 0x297   : > { %6705 = vmatpush.bf16.msrb.mxu2 %v10926_v28  ;;  %v12502_v28 = vld [vmem:[%s13154_s17 + $0x1964] sm:$0xf0]  ;;  %v11158_v61 = vor.u32 %v12486_v22, %v11157_v39 }
 0x298   : > { %6718 = vmatpush.bf16.msrb.mxu3 %v10990_v54  ;;  %v11094_v54 = vor.u32 %v12470_v34, %v11093_v27  ;;  %v11222_v9 = vor.u32 %v12502_v28, %v11221_v24  ;;  %v11141_v27 = vld [vmem:[%s13154_s17 + $0x18c0] sm:$0xf]  ;;  %v12482_v39 = vld [vmem:[%s13154_s17 + $0x18c4] sm:$0xf0] }
 0x299   : > { %6680 = vmatpush.bf16.msrb.mxu0 %v10790_v53  ;;  %v12468_v53 = vld [vmem:[%s13154_s17 + $0x1854] sm:$0xf0]  ;;  %v12498_v22 = vld [vmem:[%s13154_s17 + $0x1944] sm:$0xf0]  ;;  %v6474_v24 = vpop.f32.mrf.mxu0  ;;  %v11269_v28 = vld [vmem:[%s13154_s17 + $0x19c0] sm:$0xf] }
 0x29a   : > { %6693 = vmatpush.bf16.msrb.mxu1 %v10854_v8  ;;  %v12484_v8 = vld [vmem:[%s13154_s17 + $0x18d4] sm:$0xf0]  ;;  %v6475_v42 = vadd.f32 %v6474_v24, %v14116_v13  ;;  %v11189_v24 = vld [vmem:[%s13154_s17 + $0x1920] sm:$0xf] }
 0x29b   : > { %6706 = vmatpush.bf16.msrb.mxu2 %v10918_v25  ;;  %v11213_v25 = vld [vmem:[%s13154_s17 + $0x1950] sm:$0xf]  ;;  %v11150_v60 = vor.u32 %v12484_v8, %v11149_v30  ;;  %v12464_v30 = vld [vmem:[%s13154_s17 + $0x1834] sm:$0xf0]  ;;  %v11270_v8 = vor.u32 %v12514_v41, %v11269_v28  ;;  %v12494_v28 = vld [vmem:[%s13154_s17 + $0x1924] sm:$0xf0] }
 0x29c   : > { %6719 = vmatpush.bf16.msrb.mxu3 %v10982_v31  ;;  %6681 = vmatmul.bf16.vlgmr.msrb.gmra.mxu0 %v14145_v47  ;;  %v12516_v31 = vld [vmem:[%s13154_s17 + $0x19d4] sm:$0xf0]  ;;  %v11214_v29 = vor.u32 %v12500_v19, %v11213_v25 }
 0x29d   : > { %6725 = vmatpush.bf16.msra.mxu0 %v11102_v51  ;;  %6694 = vmatmul.bf16.vlgmr.msrb.gmra.mxu1 %v14152_v48  ;;  %v11086_v51 = vor.u32 %v12468_v53, %v11085_v35  ;;  %v11278_v34 = vor.u32 %v12516_v31, %v11277_v26  ;;  %v11069_v53 = vld [vmem:[%s13154_s17 + $0x1830] sm:$0xf]  ;;  %v12480_v19 = vld [vmem:[%s13154_s17 + $0x18b4] sm:$0xf0] }
 0x29e   : > { %6738 = vmatpush.bf16.msra.mxu1 %v11166_v52  ;;  %6707 = vmatmul.bf16.vlgmr.msrb.gmra.mxu2 %v14150_v32  ;;  %v11077_v52 = vld [vmem:[%s13154_s17 + $0x1840] sm:$0xf]  ;;  %v11197_v26 = vld [vmem:[%s13154_s17 + $0x1930] sm:$0xf]  ;;  %v12496_v13 = vld [vmem:[%s13154_s17 + $0x1934] sm:$0xf0] }
 0x29f   : > { %6751 = vmatpush.bf16.msra.mxu2 %v11230_v57  ;;  %6720 = vmatmul.bf16.vlgmr.msrb.gmra.mxu3 %v14156_v63  ;;  %v12466_v57 = vld [vmem:[%s13154_s17 + $0x1844] sm:$0xf0]  ;;  %v11261_v31 = vld [vmem:[%s13154_s17 + $0x19b0] sm:$0xf]  ;;  %v12568_v48 = vld [vmem:[%s13154_s17 + $0x1b74] sm:$0xf0] }
 0x2a0   : > { %6764 = vmatpush.bf16.msra.mxu3 %v11294_v21  ;;  %v11205_v21 = vld [vmem:[%s13154_s17 + $0x1940] sm:$0xf]  ;;  %v11485_v63 = vld [vmem:[%s13154_s17 + $0x1b70] sm:$0xf]  ;;  %v527_v47 = vld [vmem:[%s13148_s20 + $0x68] sm:$0xff] }
 0x2a1   : > { %6726 = vmatpush.bf16.msra.mxu0 %v11094_v54  ;;  %v11078_v54 = vor.u32 %v12466_v57, %v11077_v52  ;;  %v11206_v35 = vor.u32 %v12498_v22, %v11205_v21  ;;  %v11198_v52 = vor.u32 %v12496_v13, %v11197_v26  ;;  %v11061_v57 = vld [vmem:[%s13154_s17 + $0x1820] sm:$0xf]  ;;  %v6500_v21 = vpop.f32.mrf.mxu2  ;;  %v12478_v22 = vld [vmem:[%s13154_s17 + $0x18a4] sm:$0xf0]  ;;  %v11117_v26 = vld [vmem:[%s13154_s17 + $0x1890] sm:$0xf] }
 0x2a2   : > { %6739 = vmatpush.bf16.msra.mxu1 %v11158_v61  ;;  %v6487_v61 = vpop.f32.mrf.mxu1  ;;  %v12476_v13 = vld [vmem:[%s13154_s17 + $0x1894] sm:$0xf0]  ;;  %604 = vst [vmem:[#allocation1 + $0x20] ss:$4 sm:$0xff] %v527_v47  ;;  %v11349_v47 = vld [vmem:[%s13154_s17 + $0x1a60] sm:$0xf] }
 0x2a3   : > { %6752 = vmatpush.bf16.msra.mxu2 %v11222_v9  ;;  %v11142_v9 = vor.u32 %v12482_v39, %v11141_v27  ;;  %v6488_v25 = vadd.f32 %v6487_v61, %v6475_v42  ;;  %v12462_v27 = vld [vmem:[%s13154_s17 + $0x1824] sm:$0xf0]  ;;  %v6513_v42 = vpop.f32.mrf.mxu3 }
 0x2a4   : > { %6765 = vmatpush.bf16.msra.mxu3 %v11286_v14  ;;  %v11133_v14 = vld [vmem:[%s13154_s17 + $0x18b0] sm:$0xf]  ;;  %v12510_v61 = vld [vmem:[%s13154_s17 + $0x19a4] sm:$0xf0] }
 0x2a5   : > { %6727 = vmatpush.bf16.msra.mxu0 %v11086_v51  ;;  %v12512_v51 = vld [vmem:[%s13154_s17 + $0x19b4] sm:$0xf0]  ;;  %v6501_v41 = vadd.f32 %v6500_v21, %v6488_v25  ;;  %v11190_v25 = vor.u32 %v12494_v28, %v11189_v24  ;;  %v11109_v21 = vld [vmem:[%s13154_s17 + $0x1880] sm:$0xf]  ;;  %v11118_v28 = vor.u32 %v12476_v13, %v11117_v26 }
 0x2a6   : > { %6740 = vmatpush.bf16.msra.mxu1 %v11150_v60  ;;  %v11070_v60 = vor.u32 %v12464_v30, %v11069_v53  ;;  %v11262_v39 = vor.u32 %v12512_v51, %v11261_v31  ;;  %v11053_v53 = vld [vmem:[%s13154_s17 + $0x1810] sm:$0xf]  ;;  %v11173_v24 = vld [vmem:[%s13154_s17 + $0x1900] sm:$0xf]  ;;  %v12584_v26 = vld [vmem:[%s13154_s17 + $0x1bf4] sm:$0xf0] }
 0x2a7   : > { %6753 = vmatpush.bf16.msra.mxu2 %v11214_v29  ;;  %v11134_v29 = vor.u32 %v12480_v19, %v11133_v14  ;;  %v14196_v14 = vadd.f32 %v6513_v42, %v6501_v41  ;;  %v12460_v19 = vld [vmem:[%s13154_s17 + $0x1814] sm:$0xf0]  ;;  %v11181_v51 = vld [vmem:[%s13154_s17 + $0x1910] sm:$0xf]  ;;  %v11237_v42 = vld [vmem:[%s13154_s17 + $0x1980] sm:$0xf] }
 0x2a8   : > { %6766 = vmatpush.bf16.msra.mxu3 %v11278_v34  ;;  %v11125_v34 = vld [vmem:[%s13154_s17 + $0x18a0] sm:$0xf] }
 0x2a9   : > { %6728 = vmatpush.bf16.msra.mxu0 %v11078_v54  ;;  %v11253_v54 = vld [vmem:[%s13154_s17 + $0x19a0] sm:$0xf] }
 0x2aa   : > { %6741 = vmatpush.bf16.msra.mxu1 %v11142_v9  ;;  %v6476_v9 = vpop.f32.mrf.mxu0  ;;  %v6489_v30 = vpop.f32.mrf.mxu1  ;;  %v11254_v31 = vor.u32 %v12510_v61, %v11253_v54  ;;  %v12506_v54 = vld [vmem:[%s13154_s17 + $0x1984] sm:$0xf0]  ;;  %v11357_v61 = vld [vmem:[%s13154_s17 + $0x1a70] sm:$0xf] }
 0x2ab   : > { %6754 = vmatpush.bf16.msra.mxu2 %v11206_v35  ;;  %v11062_v35 = vor.u32 %v12462_v27, %v11061_v57  ;;  %v11245_v57 = vld [vmem:[%s13154_s17 + $0x1990] sm:$0xf]  ;;  %v12458_v27 = vld [vmem:[%s13154_s17 + $0x1804] sm:$0xf0]  ;;  %v12552_v30 = vld [vmem:[%s13154_s17 + $0x1af4] sm:$0xf0]  ;;  %v6515_v32 = vpop.f32.mrf.mxu3 }
 0x2ac   : > { %6767 = vmatpush.bf16.msra.mxu3 %v11270_v8  ;;  %v11126_v8 = vor.u32 %v12478_v22, %v11125_v34  ;;  %v11054_v34 = vor.u32 %v12460_v19, %v11053_v53  ;;  %v12474_v22 = vld [vmem:[%s13154_s17 + $0x1884] sm:$0xf0]  ;;  %v11421_v53 = vld [vmem:[%s13154_s17 + $0x1af0] sm:$0xf]  ;;  %v6502_v19 = vpop.f32.mrf.mxu2  ;;  %v11238_v32 = vor.u32 %v12506_v54, %v11237_v42 }
 0x2ad   : > { %6729 = vmatpush.bf16.msra.mxu0 %v11070_v60  ;;  %v12492_v60 = vld [vmem:[%s13154_s17 + $0x1914] sm:$0xf0]  ;;  %v11110_v13 = vor.u32 %v12474_v22, %v11109_v21  ;;  %v12534_v19 = vld [vmem:[%s13154_s17 + $0x1a64] sm:$0xf0] }
 0x2ae   : > { %6742 = vmatpush.bf16.msra.mxu1 %v11134_v29  ;;  %v12508_v29 = vld [vmem:[%s13154_s17 + $0x1994] sm:$0xf0]  ;;  %v11182_v41 = vor.u32 %v12492_v60, %v11181_v51  ;;  %v607_v60 = vld.sshfl [vmem:[#allocation1 + $0x10] sm:$0xff pattern:$0x73625140] }
 0x2af   : > { %6755 = vmatpush.bf16.msra.mxu2 %v11198_v52  ;;  %v11045_v52 = vld [vmem:[%s13154_s17 + $0x1800] sm:$0xf]  ;;  %v11246_v9 = vor.u32 %v12508_v29, %v11245_v57  ;;  %v605_v51 = vld.sshfl [vmem:[#allocation1] sm:$0xff pattern:$0x73625140]  ;;  %v14230_v42 = vpack.c.bf16 %v607_v60, %v607_v60 }
 0x2b0   : > { %6768 = vmatpush.bf16.msra.mxu3 %v11262_v39  ;;  %v12490_v39 = vld [vmem:[%s13154_s17 + $0x1904] sm:$0xf0]  ;;  %v606_v29 = vld.sshfl [vmem:[#allocation1 + $0x8] sm:$0xff pattern:$0x73625140]  ;;  %v14225_v22 = vpack.c.bf16 %v605_v51, %v605_v51 }
 0x2b1   : > { %6730 = vmatpush.bf16.msra.mxu0 %v11062_v35  ;;  %v12536_v35 = vld [vmem:[%s13154_s17 + $0x1a74] sm:$0xf0]  ;;  %15380 = vst [vmem:[#allocation35_spill] sm:$0xff] %v14230_v42  ;;  %v14232_v54 = vpack.c.bf16 %v606_v29, %v606_v29  ;;  %v11533_v60 = vld [vmem:[%s13154_s17 + $0x1bd0] sm:$0xf] }
 0x2b2   : > { %6743 = vmatpush.bf16.msra.mxu1 %v11126_v8  ;;  %v11046_v8 = vor.u32 %v12458_v27, %v11045_v52  ;;  %v11358_v57 = vor.u32 %v12536_v35, %v11357_v61  ;;  %v608_v52 = vld.sshfl [vmem:[#allocation1 + $0x18] sm:$0xff pattern:$0x73625140]  ;;  %v11422_v27 = vor.u32 %v12552_v30, %v11421_v53  ;;  %15379 = vst [vmem:[#allocation34_spill] sm:$0xff] %v14225_v22  ;;  %v12564_v51 = vld [vmem:[%s13154_s17 + $0x1b54] sm:$0xf0] }
 0x2b3   : > { %6756 = vmatpush.bf16.msra.mxu2 %v11190_v25  ;;  %v11549_v25 = vld [vmem:[%s13154_s17 + $0x1bf0] sm:$0xf]  ;;  %15381 = vst [vmem:[#allocation36_spill] sm:$0xff] %v14232_v54  ;;  %v14236_v61 = vpack.c.bf16 %v608_v52, %v608_v52 }
 0x2b4   : > { %6769 = vmatpush.bf16.msra.mxu3 %v11254_v31  ;;  %v11174_v31 = vor.u32 %v12490_v39, %v11173_v24  ;;  %v11550_v21 = vor.u32 %v12584_v26, %v11549_v25  ;;  %v12550_v24 = vld [vmem:[%s13154_s17 + $0x1ae4] sm:$0xf0]  ;;  %v11477_v39 = vld [vmem:[%s13154_s17 + $0x1b60] sm:$0xf]  ;;  %v11341_v30 = vld [vmem:[%s13154_s17 + $0x1a50] sm:$0xf] }
 0x2b5   : > { %6731 = vmatpush.bf16.msra.mxu0 %v11054_v34  ;;  %v11486_v34 = vor.u32 %v12568_v48, %v11485_v63  ;;  %v11541_v48 = vld [vmem:[%s13154_s17 + $0x1be0] sm:$0xf]  ;;  %v12582_v63 = vld [vmem:[%s13154_s17 + $0x1be4] sm:$0xf0]  ;;  %15382 = vst [vmem:[#allocation37_spill] sm:$0xff] %v14236_v61 }
 0x2b6   : > { %6744 = vmatpush.bf16.msra.mxu1 %v11118_v28  ;;  %v11413_v28 = vld [vmem:[%s13154_s17 + $0x1ae0] sm:$0xf]  ;;  %v11405_v25 = vld [vmem:[%s13154_s17 + $0x1ad0] sm:$0xf]  ;;  %v11542_v26 = vor.u32 %v12582_v63, %v11541_v48  ;;  %v12578_v48 = vld [vmem:[%s13154_s17 + $0x1bc4] sm:$0xf0] }
 0x2b7   : > { %6757 = vmatpush.bf16.msra.mxu2 %v11182_v41  ;;  %v12566_v41 = vld [vmem:[%s13154_s17 + $0x1b64] sm:$0xf0]  ;;  %v11414_v35 = vor.u32 %v12550_v24, %v11413_v28 }
 0x2b8   : > { %6770 = vmatpush.bf16.msra.mxu3 %v11246_v9  ;;  %v11350_v9 = vor.u32 %v12534_v19, %v11349_v47  ;;  %v11478_v53 = vor.u32 %v12566_v41, %v11477_v39  ;;  %v11397_v47 = vld [vmem:[%s13154_s17 + $0x1ac0] sm:$0xf]  ;;  %v12546_v28 = vld [vmem:[%s13154_s17 + $0x1ac4] sm:$0xf0] }
 0x2b9   : > { %6732 = vmatpush.bf16.msra.mxu0 %v11046_v8  ;;  %v12532_v8 = vld [vmem:[%s13154_s17 + $0x1a54] sm:$0xf0]  ;;  %v12562_v24 = vld [vmem:[%s13154_s17 + $0x1b44] sm:$0xf0]  ;;  %v6526_v39 = vpop.f32.mrf.mxu0  ;;  %v11525_v41 = vld [vmem:[%s13154_s17 + $0x1bc0] sm:$0xf] }
 0x2ba   : > { %6745 = vmatpush.bf16.msra.mxu1 %v11110_v13  ;;  %v12548_v13 = vld [vmem:[%s13154_s17 + $0x1ad4] sm:$0xf0]  ;;  %v6527_v63 = vadd.f32 %v6526_v39, %v14196_v14  ;;  %v11445_v39 = vld [vmem:[%s13154_s17 + $0x1b20] sm:$0xf] }
 0x2bb   : > { %6758 = vmatpush.bf16.msra.mxu2 %v11174_v31  ;;  %v11469_v31 = vld [vmem:[%s13154_s17 + $0x1b50] sm:$0xf]  ;;  %v11406_v29 = vor.u32 %v12548_v13, %v11405_v25  ;;  %v12528_v25 = vld [vmem:[%s13154_s17 + $0x1a34] sm:$0xf0]  ;;  %v11526_v13 = vor.u32 %v12578_v48, %v11525_v41  ;;  %v12558_v41 = vld [vmem:[%s13154_s17 + $0x1b24] sm:$0xf0] }
 0x2bc   : > { %6771 = vmatpush.bf16.msra.mxu3 %v11238_v32  ;;  %6733 = vmatmul.bf16.vlgmr.msra.gmra.mxu0 %v14225_v22  ;;  %v12580_v32 = vld [vmem:[%s13154_s17 + $0x1bd4] sm:$0xf0]  ;;  %v11470_v52 = vor.u32 %v12564_v51, %v11469_v31  ;;  %v8023_v22 = vld [vmem:[%s13154_s17 + $0x68] sm:$0xf0] }
 0x2bd   : > { %6777 = vmatpush.bf16.msrb.mxu0 %v11358_v57  ;;  %6746 = vmatmul.bf16.vlgmr.msra.gmra.mxu1 %v14232_v54  ;;  %v11342_v57 = vor.u32 %v12532_v8, %v11341_v30  ;;  %v11534_v19 = vor.u32 %v12580_v32, %v11533_v60  ;;  %v11325_v8 = vld [vmem:[%s13154_s17 + $0x1a30] sm:$0xf]  ;;  %v12544_v51 = vld [vmem:[%s13154_s17 + $0x1ab4] sm:$0xf0] }
 0x2be   : > { %6790 = vmatpush.bf16.msrb.mxu1 %v11422_v27  ;;  %6759 = vmatmul.bf16.vlgmr.msra.gmra.mxu2 %v14230_v42  ;;  %v11333_v27 = vld [vmem:[%s13154_s17 + $0x1a40] sm:$0xf]  ;;  %v11453_v60 = vld [vmem:[%s13154_s17 + $0x1b30] sm:$0xf]  ;;  %v12560_v14 = vld [vmem:[%s13154_s17 + $0x1b34] sm:$0xf0] }
 0x2bf   : > { %6803 = vmatpush.bf16.msrb.mxu2 %v11486_v34  ;;  %6772 = vmatmul.bf16.vlgmr.msra.gmra.mxu3 %v14236_v61  ;;  %v12530_v34 = vld [vmem:[%s13154_s17 + $0x1a44] sm:$0xf0]  ;;  %v11517_v32 = vld [vmem:[%s13154_s17 + $0x1bb0] sm:$0xf]  ;;  %v11735_v61 = vld [vmem:[%s13154_s17 + $0x174] sm:$0xf] }
 0x2c0   : > { %6816 = vmatpush.bf16.msrb.mxu3 %v11550_v21  ;;  %v11461_v21 = vld [vmem:[%s13154_s17 + $0x1b40] sm:$0xf]  ;;  %v11701_v42 = vld [vmem:[%s13154_s17 + $0x64] sm:$0xf] }
 0x2c1   : > { %6778 = vmatpush.bf16.msrb.mxu0 %v11350_v9  ;;  %v11334_v9 = vor.u32 %v12530_v34, %v11333_v27  ;;  %v11462_v30 = vor.u32 %v12562_v24, %v11461_v21  ;;  %v11454_v27 = vor.u32 %v12560_v14, %v11453_v60  ;;  %v11317_v34 = vld [vmem:[%s13154_s17 + $0x1a20] sm:$0xf]  ;;  %v6552_v21 = vpop.f32.mrf.mxu2  ;;  %v12542_v24 = vld [vmem:[%s13154_s17 + $0x1aa4] sm:$0xf0]  ;;  %v11373_v60 = vld [vmem:[%s13154_s17 + $0x1a90] sm:$0xf] }
 0x2c2   : > { %6791 = vmatpush.bf16.msrb.mxu1 %v11414_v35  ;;  %v6539_v35 = vpop.f32.mrf.mxu1 }
 0x2c3   : > { %6804 = vmatpush.bf16.msrb.mxu2 %v11478_v53  ;;  %v11398_v53 = vor.u32 %v12546_v28, %v11397_v47  ;;  %v6540_v31 = vadd.f32 %v6539_v35, %v6527_v63  ;;  %v12526_v47 = vld [vmem:[%s13154_s17 + $0x1a24] sm:$0xf0]  ;;  %v6565_v63 = vpop.f32.mrf.mxu3 }
 0x2c4   : > { %6817 = vmatpush.bf16.msrb.mxu3 %v11542_v26  ;;  %v11389_v26 = vld [vmem:[%s13154_s17 + $0x1ab0] sm:$0xf]  ;;  %v12574_v35 = vld [vmem:[%s13154_s17 + $0x1ba4] sm:$0xf0] }
 0x2c5   : > { %6779 = vmatpush.bf16.msrb.mxu0 %v11342_v57  ;;  %v12576_v57 = vld [vmem:[%s13154_s17 + $0x1bb4] sm:$0xf0]  ;;  %v6553_v48 = vadd.f32 %v6552_v21, %v6540_v31  ;;  %v11309_v31 = vld [vmem:[%s13154_s17 + $0x1a10] sm:$0xf]  ;;  %v11365_v21 = vld [vmem:[%s13154_s17 + $0x1a80] sm:$0xf] }
 0x2c6   : > { %6792 = vmatpush.bf16.msrb.mxu1 %v11406_v29  ;;  %v11326_v29 = vor.u32 %v12528_v25, %v11325_v8  ;;  %v11518_v28 = vor.u32 %v12576_v57, %v11517_v32  ;;  %v12540_v32 = vld [vmem:[%s13154_s17 + $0x1a94] sm:$0xf0]  ;;  %v11437_v57 = vld [vmem:[%s13154_s17 + $0x1b10] sm:$0xf] }
 0x2c7   : > { %6805 = vmatpush.bf16.msrb.mxu2 %v11470_v52  ;;  %v11390_v52 = vor.u32 %v12544_v51, %v11389_v26  ;;  %v14275_v25 = vadd.f32 %v6565_v63, %v6553_v48  ;;  %v12524_v51 = vld [vmem:[%s13154_s17 + $0x1a14] sm:$0xf0]  ;;  %v12554_v48 = vld [vmem:[%s13154_s17 + $0x1b04] sm:$0xf0]  ;;  %v11493_v63 = vld [vmem:[%s13154_s17 + $0x1b80] sm:$0xf] }
 0x2c8   : > { %6818 = vmatpush.bf16.msrb.mxu3 %v11534_v19  ;;  %v11381_v19 = vld [vmem:[%s13154_s17 + $0x1aa0] sm:$0xf] }
 0x2c9   : > { %6780 = vmatpush.bf16.msrb.mxu0 %v11334_v9  ;;  %v11509_v9 = vld [vmem:[%s13154_s17 + $0x1ba0] sm:$0xf]  ;;  %v11382_v26 = vor.u32 %v12542_v24, %v11381_v19  ;;  %v12522_v19 = vld [vmem:[%s13154_s17 + $0x1a04] sm:$0xf0]  ;;  %v11374_v24 = vor.u32 %v12540_v32, %v11373_v60  ;;  %v11751_v60 = vld [vmem:[%s13154_s17 + $0x1f4] sm:$0xf] }
 0x2ca   : > { %6793 = vmatpush.bf16.msrb.mxu1 %v11398_v53  ;;  %v6528_v53 = vpop.f32.mrf.mxu0  ;;  %v6541_v8 = vpop.f32.mrf.mxu1  ;;  %v11510_v14 = vor.u32 %v12574_v35, %v11509_v9  ;;  %v12570_v35 = vld [vmem:[%s13154_s17 + $0x1b84] sm:$0xf0]  ;;  %v8223_v32 = vld [vmem:[%s13154_s17 + $0x1f8] sm:$0xf0] }
 0x2cb   : > { %6806 = vmatpush.bf16.msrb.mxu2 %v11462_v30  ;;  %v11318_v30 = vor.u32 %v12526_v47, %v11317_v34  ;;  %v11301_v34 = vld [vmem:[%s13154_s17 + $0x1a00] sm:$0xf]  ;;  %v11310_v47 = vor.u32 %v12524_v51, %v11309_v31  ;;  %v11703_v53 = vld [vmem:[%s13154_s17 + $0x74] sm:$0xf]  ;;  %v6554_v8 = vpop.f32.mrf.mxu2  ;;  %v8095_v51 = vld [vmem:[%s13154_s17 + $0xf8] sm:$0xf0]  ;;  %v6567_v54 = vpop.f32.mrf.mxu3 }
 0x2cc   : > { %6819 = vmatpush.bf16.msrb.mxu3 %v11526_v13  ;;  %v11446_v13 = vor.u32 %v12558_v41, %v11445_v39  ;;  %v11429_v41 = vld [vmem:[%s13154_s17 + $0x1b00] sm:$0xf]  ;;  %v11719_v31 = vld [vmem:[%s13154_s17 + $0xf4] sm:$0xf] }
 0x2cd   : > { %6781 = vmatpush.bf16.msrb.mxu0 %v11326_v29  ;;  %v12556_v29 = vld [vmem:[%s13154_s17 + $0x1b14] sm:$0xf0] }
 0x2ce   : > { %6794 = vmatpush.bf16.msrb.mxu1 %v11390_v52  ;;  %v11501_v52 = vld [vmem:[%s13154_s17 + $0x1b90] sm:$0xf]  ;;  %v11438_v39 = vor.u32 %v12556_v29, %v11437_v57  ;;  %v11430_v57 = vor.u32 %v12554_v48, %v11429_v41  ;;  %v11733_v41 = vld [vmem:[%s13154_s17 + $0x164] sm:$0xf]  ;;  %v8151_v48 = vld [vmem:[%s13154_s17 + $0x168] sm:$0xf0] }
 0x2cf   : > { %6807 = vmatpush.bf16.msrb.mxu2 %v11454_v27  ;;  %v12572_v27 = vld [vmem:[%s13154_s17 + $0x1b94] sm:$0xf0] }
 0x2d0   : > { %6820 = vmatpush.bf16.msrb.mxu3 %v11518_v28  ;;  %v12538_v28 = vld [vmem:[%s13154_s17 + $0x1a84] sm:$0xf0]  ;;  %v11502_v9 = vor.u32 %v12572_v27, %v11501_v52  ;;  %v609_v29 = vld.sshfl [vmem:[#allocation1 + $0x20] sm:$0xff pattern:$0x73625140]  ;;  %v11494_v27 = vor.u32 %v12570_v35, %v11493_v63 }
 0x2d1   : > { %6782 = vmatpush.bf16.msrb.mxu0 %v11318_v30  ;;  %v8031_v30 = vld [vmem:[%s13154_s17 + $0x78] sm:$0xf0]  ;;  %v611_v52 = vld.sshfl [vmem:[#allocation1 + $0x30] sm:$0xff pattern:$0x73625140] }
 0x2d2   : > { %6795 = vmatpush.bf16.msrb.mxu1 %v11382_v26  ;;  %v11302_v26 = vor.u32 %v12522_v19, %v11301_v34  ;;  %v8034_v54 = vor.u32 %v11703_v53, %v8031_v30  ;;  %v612_v34 = vld.sshfl [vmem:[#allocation1 + $0x38] sm:$0xff pattern:$0x73625140]  ;;  %v8098_v19 = vor.u32 %v11719_v31, %v8095_v51  ;;  %v14309_v63 = vpack.c.bf16 %v611_v52, %v611_v52 }
 0x2d3   : > { %6808 = vmatpush.bf16.msrb.mxu2 %v11446_v13  ;;  %v8159_v13 = vld [vmem:[%s13154_s17 + $0x178] sm:$0xf0]  ;;  %v8215_v35 = vld [vmem:[%s13154_s17 + $0x1e8] sm:$0xf0]  ;;  %v14315_v53 = vpack.c.bf16 %v612_v34, %v612_v34  ;;  %v8026_v30 = vor.u32 %v11701_v42, %v8023_v22  ;;  %v8154_v51 = vor.u32 %v11733_v41, %v8151_v48  ;;  %v11747_v22 = vld [vmem:[%s13154_s17 + $0x1d4] sm:$0xf] }
 0x2d4   : > { %6821 = vmatpush.bf16.msrb.mxu3 %v11510_v14  ;;  %v11366_v14 = vor.u32 %v12538_v28, %v11365_v21  ;;  %v8162_v8 = vor.u32 %v11735_v61, %v8159_v13  ;;  %v8226_v21 = vor.u32 %v11751_v60, %v8223_v32  ;;  %v14304_v28 = vpack.c.bf16 %v609_v29, %v609_v29  ;;  %v11749_v61 = vld [vmem:[%s13154_s17 + $0x1e4] sm:$0xf]  ;;  %v8015_v13 = vld [vmem:[%s13154_s17 + $0x58] sm:$0xf0]  ;;  %v11715_v60 = vld [vmem:[%s13154_s17 + $0xd4] sm:$0xf] }
 0x2d5   : > { %6783 = vmatpush.bf16.msrb.mxu0 %v11310_v47  ;;  %v610_v47 = vld.sshfl [vmem:[#allocation1 + $0x28] sm:$0xff pattern:$0x73625140]  ;;  %15383 = vst [vmem:[#allocation38_spill] sm:$0xff] %v14315_v53  ;;  %v8218_v32 = vor.u32 %v11749_v61, %v8215_v35  ;;  %v8007_v34 = vld [vmem:[%s13154_s17 + $0x48] sm:$0xf0] }
 0x2d6   : > { %6796 = vmatpush.bf16.msrb.mxu1 %v11374_v24  ;;  %v11717_v24 = vld [vmem:[%s13154_s17 + $0xe4] sm:$0xf]  ;;  %v8143_v29 = vld [vmem:[%s13154_s17 + $0x158] sm:$0xf0]  ;;  %v8199_v61 = vld [vmem:[%s13154_s17 + $0x1c8] sm:$0xf0] }
 0x2d7   : > { %6809 = vmatpush.bf16.msrb.mxu2 %v11438_v39  ;;  %v8087_v39 = vld [vmem:[%s13154_s17 + $0xe8] sm:$0xf0]  ;;  %v8207_v42 = vld [vmem:[%s13154_s17 + $0x1d8] sm:$0xf0]  ;;  %v11745_v48 = vld [vmem:[%s13154_s17 + $0x1c4] sm:$0xf] }
 0x2d8   : > { %6822 = vmatpush.bf16.msrb.mxu3 %v11502_v9  ;;  %v14311_v9 = vpack.c.bf16 %v610_v47, %v610_v47  ;;  %v8090_v31 = vor.u32 %v11717_v24, %v8087_v39  ;;  %v11697_v47 = vld [vmem:[%s13154_s17 + $0x44] sm:$0xf]  ;;  %v8071_v24 = vld [vmem:[%s13154_s17 + $0xc8] sm:$0xf0] }
 0x2d9   : > { %6784 = vmatpush.bf16.msrb.mxu0 %v11302_v26  ;;  %v11699_v26 = vld [vmem:[%s13154_s17 + $0x54] sm:$0xf]  ;;  %v8135_v39 = vld [vmem:[%s13154_s17 + $0x148] sm:$0xf0]  ;;  %v6578_v41 = vpop.f32.mrf.mxu0 }
 0x2da   : > { %6797 = vmatpush.bf16.msrb.mxu1 %v11366_v14  ;;  %v8079_v14 = vld [vmem:[%s13154_s17 + $0xd8] sm:$0xf0]  ;;  %v8018_v52 = vor.u32 %v11699_v26, %v8015_v13  ;;  %v6579_v35 = vadd.f32 %v6578_v41, %v14275_v25  ;;  %v11695_v13 = vld [vmem:[%s13154_s17 + $0x34] sm:$0xf]  ;;  %v11725_v41 = vld [vmem:[%s13154_s17 + $0x124] sm:$0xf] }
 0x2db   : > { %6810 = vmatpush.bf16.msrb.mxu2 %v11430_v57  ;;  %v11731_v57 = vld [vmem:[%s13154_s17 + $0x154] sm:$0xf]  ;;  %v8127_v25 = vld [vmem:[%s13154_s17 + $0x138] sm:$0xf0] }
 0x2dc   : > { %6823 = vmatpush.bf16.msrb.mxu3 %v11494_v27  ;;  %6785 = vmatmul.bf16.vlgmr.msrb.gmra.mxu0 %v14304_v28  ;;  %v8082_v27 = vor.u32 %v11715_v60, %v8079_v14  ;;  %v7999_v60 = vld [vmem:[%s13154_s17 + $0x38] sm:$0xf0]  ;;  %v8202_v14 = vor.u32 %v11745_v48, %v8199_v61  ;;  %v8119_v48 = vld [vmem:[%s13154_s17 + $0x128] sm:$0xf0] }
 0x2dd   : > { %6829 = vmatpush.bf16.msra.mxu0 %v8034_v54  ;;  %6798 = vmatmul.bf16.vlgmr.msrb.gmra.mxu1 %v14311_v9  ;;  %v8146_v54 = vor.u32 %v11731_v57, %v8143_v29  ;;  %v8063_v29 = vld [vmem:[%s13154_s17 + $0xb8] sm:$0xf0] }
 0x2de   : > { %6842 = vmatpush.bf16.msra.mxu1 %v8098_v19  ;;  %6811 = vmatmul.bf16.vlgmr.msrb.gmra.mxu2 %v14309_v63  ;;  %v11713_v19 = vld [vmem:[%s13154_s17 + $0xc4] sm:$0xf] }
 0x2df   : > { %6855 = vmatpush.bf16.msra.mxu2 %v8162_v8  ;;  %6824 = vmatmul.bf16.vlgmr.msrb.gmra.mxu3 %v14315_v53  ;;  %v8210_v8 = vor.u32 %v11747_v22, %v8207_v42  ;;  %v11727_v22 = vld [vmem:[%s13154_s17 + $0x134] sm:$0xf]  ;;  %v11781_v53 = vld [vmem:[%s13154_s17 + $0x2e4] sm:$0xf] }
 0x2e0   : > { %6868 = vmatpush.bf16.msra.mxu3 %v8226_v21  ;;  %v11729_v21 = vld [vmem:[%s13154_s17 + $0x144] sm:$0xf]  ;;  %v11743_v42 = vld [vmem:[%s13154_s17 + $0x1b4] sm:$0xf] }
 0x2e1   : > { %6830 = vmatpush.bf16.msra.mxu0 %v8026_v30  ;;  %v8010_v30 = vor.u32 %v11697_v47, %v8007_v34  ;;  %v8138_v26 = vor.u32 %v11729_v21, %v8135_v39  ;;  %v8130_v47 = vor.u32 %v11727_v22, %v8127_v25  ;;  %v11693_v34 = vld [vmem:[%s13154_s17 + $0x24] sm:$0xf]  ;;  %v6604_v21 = vpop.f32.mrf.mxu2  ;;  %v8055_v39 = vld [vmem:[%s13154_s17 + $0xa8] sm:$0xf0]  ;;  %v11707_v22 = vld [vmem:[%s13154_s17 + $0x94] sm:$0xf] }
 0x2e2   : > { %6843 = vmatpush.bf16.msra.mxu1 %v8090_v31  ;;  %v6591_v31 = vpop.f32.mrf.mxu1 }
 0x2e3   : > { %6856 = vmatpush.bf16.msra.mxu2 %v8154_v51  ;;  %v8074_v51 = vor.u32 %v11713_v19, %v8071_v24  ;;  %v6592_v57 = vadd.f32 %v6591_v31, %v6579_v35  ;;  %v7991_v19 = vld [vmem:[%s13154_s17 + $0x28] sm:$0xf0]  ;;  %v6617_v35 = vpop.f32.mrf.mxu3 }
 0x2e4   : > { %6869 = vmatpush.bf16.msra.mxu3 %v8218_v32  ;;  %v11711_v32 = vld [vmem:[%s13154_s17 + $0xb4] sm:$0xf]  ;;  %v8183_v31 = vld [vmem:[%s13154_s17 + $0x1a8] sm:$0xf0] }
 0x2e5   : > { %6831 = vmatpush.bf16.msra.mxu0 %v8018_v52  ;;  %v8191_v52 = vld [vmem:[%s13154_s17 + $0x1b8] sm:$0xf0]  ;;  %v6605_v61 = vadd.f32 %v6604_v21, %v6592_v57  ;;  %v11691_v57 = vld [vmem:[%s13154_s17 + $0x14] sm:$0xf] }
 0x2e6   : > { %6844 = vmatpush.bf16.msra.mxu1 %v8082_v27  ;;  %v8002_v27 = vor.u32 %v11695_v13, %v7999_v60  ;;  %v8194_v24 = vor.u32 %v11743_v42, %v8191_v52  ;;  %v8047_v42 = vld [vmem:[%s13154_s17 + $0x98] sm:$0xf0]  ;;  %v11723_v52 = vld [vmem:[%s13154_s17 + $0x114] sm:$0xf] }
 0x2e7   : > { %6857 = vmatpush.bf16.msra.mxu2 %v8146_v54  ;;  %v8066_v54 = vor.u32 %v11711_v32, %v8063_v29  ;;  %v14354_v60 = vadd.f32 %v6617_v35, %v6605_v61  ;;  %v7983_v29 = vld [vmem:[%s13154_s17 + $0x18] sm:$0xf0]  ;;  %v8103_v35 = vld [vmem:[%s13154_s17 + $0x108] sm:$0xf0] }
 0x2e8   : > { %6870 = vmatpush.bf16.msra.mxu3 %v8210_v8  ;;  %v11709_v8 = vld [vmem:[%s13154_s17 + $0xa4] sm:$0xf] }
 0x2e9   : > { %6832 = vmatpush.bf16.msra.mxu0 %v8010_v30  ;;  %v11741_v30 = vld [vmem:[%s13154_s17 + $0x1a4] sm:$0xf]  ;;  %v8058_v32 = vor.u32 %v11709_v8, %v8055_v39  ;;  %v7975_v8 = vld [vmem:[%s13154_s17 + $0x8] sm:$0xf0] }
 0x2ea   : > { %6845 = vmatpush.bf16.msra.mxu1 %v8074_v51  ;;  %v6580_v51 = vpop.f32.mrf.mxu0  ;;  %v6593_v13 = vpop.f32.mrf.mxu1  ;;  %v8186_v25 = vor.u32 %v11741_v30, %v8183_v31  ;;  %v11705_v39 = vld [vmem:[%s13154_s17 + $0x84] sm:$0xf]  ;;  %v8167_v31 = vld [vmem:[%s13154_s17 + $0x188] sm:$0xf0] }
 0x2eb   : > { %6858 = vmatpush.bf16.msra.mxu2 %v8138_v26  ;;  %v7994_v26 = vor.u32 %v11693_v34, %v7991_v19  ;;  %v7986_v34 = vor.u32 %v11691_v57, %v7983_v29  ;;  %v11689_v19 = vld [vmem:[%s13154_s17 + $0x4] sm:$0xf]  ;;  %v6606_v51 = vpop.f32.mrf.mxu2  ;;  %v8287_v13 = vld [vmem:[%s13154_s17 + $0x278] sm:$0xf0] }
 0x2ec   : > { %6871 = vmatpush.bf16.msra.mxu3 %v8202_v14  ;;  %v8122_v14 = vor.u32 %v11725_v41, %v8119_v48  ;;  %v8039_v41 = vld [vmem:[%s13154_s17 + $0x88] sm:$0xf0]  ;;  %v11721_v48 = vld [vmem:[%s13154_s17 + $0x104] sm:$0xf]  ;;  %v7978_v57 = vor.u32 %v11689_v19, %v7975_v8  ;;  %v8351_v29 = vld [vmem:[%s13154_s17 + $0x2f8] sm:$0xf0] }
 0x2ed   : > { %6833 = vmatpush.bf16.msra.mxu0 %v8002_v27  ;;  %v8111_v27 = vld [vmem:[%s13154_s17 + $0x118] sm:$0xf0]  ;;  %v11737_v30 = vld [vmem:[%s13154_s17 + $0x184] sm:$0xf] }
 0x2ee   : > { %6846 = vmatpush.bf16.msra.mxu1 %v8066_v54  ;;  %v11739_v54 = vld [vmem:[%s13154_s17 + $0x194] sm:$0xf]  ;;  %v8114_v21 = vor.u32 %v11723_v52, %v8111_v27  ;;  %v8106_v52 = vor.u32 %v11721_v48, %v8103_v35  ;;  %v11765_v51 = vld [vmem:[%s13154_s17 + $0x264] sm:$0xf] }
 0x2ef   : > { %6859 = vmatpush.bf16.msra.mxu2 %v8130_v47  ;;  %v8175_v47 = vld [vmem:[%s13154_s17 + $0x198] sm:$0xf0]  ;;  %v11815_v27 = vld [vmem:[%s13154_s17 + $0x3f4] sm:$0xf]  ;;  %v11813_v48 = vld [vmem:[%s13154_s17 + $0x3e4] sm:$0xf] }
 0x2f0   : > { %6872 = vmatpush.bf16.msra.mxu3 %v8194_v24  ;;  %v8050_v24 = vor.u32 %v11707_v22, %v8047_v42  ;;  %v8178_v61 = vor.u32 %v11739_v54, %v8175_v47  ;;  %v11799_v22 = vld [vmem:[%s13154_s17 + $0x374] sm:$0xf]  ;;  %v8415_v42 = vld [vmem:[%s13154_s17 + $0x378] sm:$0xf0]  ;;  %v8170_v47 = vor.u32 %v11737_v30, %v8167_v31 }
 0x2f1   : > { %6834 = vmatpush.bf16.msra.mxu0 %v7994_v26  ;;  %v11767_v26 = vld [vmem:[%s13154_s17 + $0x274] sm:$0xf]  ;;  %v8479_v54 = vld [vmem:[%s13154_s17 + $0x3f8] sm:$0xf0]  ;;  %v8418_v8 = vor.u32 %v11799_v22, %v8415_v42 }
 0x2f2   : > { %6847 = vmatpush.bf16.msra.mxu1 %v8058_v32  ;;  %v11783_v32 = vld [vmem:[%s13154_s17 + $0x2f4] sm:$0xf]  ;;  %v8399_v42 = vld [vmem:[%s13154_s17 + $0x358] sm:$0xf0] }
 0x2f3   : > { %6860 = vmatpush.bf16.msra.mxu2 %v8122_v14  ;;  %v6619_v14 = vpop.f32.mrf.mxu3  ;;  %v8354_v19 = vor.u32 %v11783_v32, %v8351_v29  ;;  %v11779_v32 = vld [vmem:[%s13154_s17 + $0x2d4] sm:$0xf]  ;;  %v8335_v29 = vld [vmem:[%s13154_s17 + $0x2d8] sm:$0xf0] }
 0x2f4   : > { %6873 = vmatpush.bf16.msra.mxu3 %v8186_v25  ;;  %v8042_v25 = vor.u32 %v11705_v39, %v8039_v41  ;;  %v8279_v14 = vld [vmem:[%s13154_s17 + $0x268] sm:$0xf0]  ;;  %v11797_v39 = vld [vmem:[%s13154_s17 + $0x364] sm:$0xf]  ;;  %v11795_v22 = vld [vmem:[%s13154_s17 + $0x354] sm:$0xf] }
 0x2f5   : > { %6835 = vmatpush.bf16.msra.mxu0 %v7986_v34  ;;  %v8290_v34 = vor.u32 %v11767_v26, %v8287_v13  ;;  %v8407_v41 = vld [vmem:[%s13154_s17 + $0x368] sm:$0xf0]  ;;  %v8282_v35 = vor.u32 %v11765_v51, %v8279_v14  ;;  %v11763_v26 = vld [vmem:[%s13154_s17 + $0x254] sm:$0xf]  ;;  %v8271_v13 = vld [vmem:[%s13154_s17 + $0x258] sm:$0xf0] }
 0x2f6   : > { %6848 = vmatpush.bf16.msra.mxu1 %v8050_v24  ;;  %v8482_v24 = vor.u32 %v11815_v27, %v8479_v54  ;;  %v8410_v31 = vor.u32 %v11797_v39, %v8407_v41  ;;  %v8338_v27 = vor.u32 %v11779_v32, %v8335_v29  ;;  %v8402_v54 = vor.u32 %v11795_v22, %v8399_v42  ;;  %v11809_v14 = vld [vmem:[%s13154_s17 + $0x3c4] sm:$0xf]  ;;  %v11791_v32 = vld [vmem:[%s13154_s17 + $0x334] sm:$0xf]  ;;  %v8447_v29 = vld [vmem:[%s13154_s17 + $0x3b8] sm:$0xf0] }
 0x2f7   : > { %6861 = vmatpush.bf16.msra.mxu2 %v8114_v21  ;;  %v8343_v21 = vld [vmem:[%s13154_s17 + $0x2e8] sm:$0xf0] }
 0x2f8   : > { %6874 = vmatpush.bf16.msra.mxu3 %v8178_v61  ;;  %v8471_v61 = vld [vmem:[%s13154_s17 + $0x3e8] sm:$0xf0]  ;;  %v8346_v30 = vor.u32 %v11781_v53, %v8343_v21  ;;  %v8274_v53 = vor.u32 %v11763_v26, %v8271_v13  ;;  %v8319_v13 = vld [vmem:[%s13154_s17 + $0x2b8] sm:$0xf0] }
 0x2f9   : > { %6836 = vmatpush.bf16.msra.mxu0 %v7978_v57  ;;  %v8474_v57 = vor.u32 %v11813_v48, %v8471_v61  ;;  %v6630_v51 = vpop.f32.mrf.mxu0  ;;  %v11759_v61 = vld [vmem:[%s13154_s17 + $0x234] sm:$0xf] }
 0x2fa   : > { %6849 = vmatpush.bf16.msra.mxu1 %v8042_v25  ;;  %v11811_v25 = vld [vmem:[%s13154_s17 + $0x3d4] sm:$0xf]  ;;  %v6643_v39 = vpop.f32.mrf.mxu1 }
 0x2fb   : > { %6862 = vmatpush.bf16.msra.mxu2 %v8106_v52  ;;  %v8463_v52 = vld [vmem:[%s13154_s17 + $0x3d8] sm:$0xf0] }
 0x2fc   : > { %6875 = vmatpush.bf16.msra.mxu3 %v8170_v47  ;;  %6837 = vmatmul.bf16.vlgmr.msra.gmra.mxu0 %v13275_v1  ;;  %v8263_v47 = vld [vmem:[%s13154_s17 + $0x248] sm:$0xf0] }
 0x2fd   : > { %6881 = vmatpush.bf16.msrb.mxu0 %v8290_v34  ;;  %6850 = vmatmul.bf16.vlgmr.msra.gmra.mxu1 %v13281_v7  ;;  %v11777_v34 = vld [vmem:[%s13154_s17 + $0x2c4] sm:$0xf]  ;;  %v8327_v1 = vld [vmem:[%s13154_s17 + $0x2c8] sm:$0xf0]  ;;  %v6631_v7 = vadd.f32 %v6630_v51, %v14354_v60  ;;  %v8383_v60 = vld [vmem:[%s13154_s17 + $0x338] sm:$0xf0] }
 0x2fe   : > { %6894 = vmatpush.bf16.msrb.mxu1 %v8354_v19  ;;  %6863 = vmatmul.bf16.vlgmr.msra.gmra.mxu2 %v13273_v0  ;;  %v11761_v0 = vld [vmem:[%s13154_s17 + $0x244] sm:$0xf]  ;;  %v8466_v19 = vor.u32 %v11811_v25, %v8463_v52  ;;  %v8330_v41 = vor.u32 %v11777_v34, %v8327_v1  ;;  %v8386_v25 = vor.u32 %v11791_v32, %v8383_v60  ;;  %v8439_v51 = vld [vmem:[%s13154_s17 + $0x3a8] sm:$0xf0]  ;;  %v11803_v32 = vld [vmem:[%s13154_s17 + $0x394] sm:$0xf] }
 0x2ff   : > { %6907 = vmatpush.bf16.msrb.mxu2 %v8418_v8  ;;  %6876 = vmatmul.bf16.vlgmr.msra.gmra.mxu3 %v13279_v6  ;;  %v11793_v6 = vld [vmem:[%s13154_s17 + $0x344] sm:$0xf]  ;;  %v8391_v8 = vld [vmem:[%s13154_s17 + $0x348] sm:$0xf0]  ;;  %v8266_v21 = vor.u32 %v11761_v0, %v8263_v47  ;;  %v6644_v26 = vadd.f32 %v6643_v39, %v6631_v7  ;;  %v8431_v60 = vld [vmem:[%s13154_s17 + $0x398] sm:$0xf0] }
 0x300   : > { %6920 = vmatpush.bf16.msrb.mxu3 %v8482_v24  ;;  %v8455_v24 = vld [vmem:[%s13154_s17 + $0x3c8] sm:$0xf0]  ;;  %v8394_v48 = vor.u32 %v11793_v6, %v8391_v8  ;;  %v11757_v52 = vld [vmem:[%s13154_s17 + $0x224] sm:$0xf] }
 0x301   : > { %6882 = vmatpush.bf16.msrb.mxu0 %v8282_v35  ;;  %v8255_v35 = vld [vmem:[%s13154_s17 + $0x238] sm:$0xf0]  ;;  %v6656_v0 = vpop.f32.mrf.mxu2  ;;  %v8311_v47 = vld [vmem:[%s13154_s17 + $0x2a8] sm:$0xf0]  ;;  %v11789_v34 = vld [vmem:[%s13154_s17 + $0x324] sm:$0xf] }
 0x302   : > { %6895 = vmatpush.bf16.msrb.mxu1 %v8346_v30  ;;  %v11775_v30 = vld [vmem:[%s13154_s17 + $0x2b4] sm:$0xf]  ;;  %v8258_v22 = vor.u32 %v11759_v61, %v8255_v35  ;;  %v6657_v1 = vadd.f32 %v6656_v0, %v6644_v26  ;;  %v6669_v6 = vpop.f32.mrf.mxu3  ;;  %v11805_v8 = vld [vmem:[%s13154_s17 + $0x3a4] sm:$0xf]  ;;  %v6645_v7 = vpop.f32.mrf.mxu1  ;;  %v8239_v61 = vld [vmem:[%s13154_s17 + $0x218] sm:$0xf0] }
 0x303   : > { %6908 = vmatpush.bf16.msrb.mxu2 %v8410_v31  ;;  %v8458_v31 = vor.u32 %v11809_v14, %v8455_v24  ;;  %v8322_v42 = vor.u32 %v11775_v30, %v8319_v13  ;;  %v6632_v14 = vpop.f32.mrf.mxu0  ;;  %v11771_v35 = vld [vmem:[%s13154_s17 + $0x294] sm:$0xf]  ;;  %v8442_v30 = vor.u32 %v11805_v8, %v8439_v51  ;;  %v8367_v13 = vld [vmem:[%s13154_s17 + $0x318] sm:$0xf0]  ;;  %v8359_v0 = vld [vmem:[%s13154_s17 + $0x308] sm:$0xf0] }
 0x304   : > { %6921 = vmatpush.bf16.msrb.mxu3 %v8474_v57  ;;  %v11807_v57 = vld [vmem:[%s13154_s17 + $0x3b4] sm:$0xf] }
 0x305   : > { %6883 = vmatpush.bf16.msrb.mxu0 %v8274_v53  ;;  %v8247_v53 = vld [vmem:[%s13154_s17 + $0x228] sm:$0xf0]  ;;  %v11787_v26 = vld [vmem:[%s13154_s17 + $0x314] sm:$0xf] }
 0x306   : > { %6896 = vmatpush.bf16.msrb.mxu1 %v8338_v27  ;;  %v11773_v27 = vld [vmem:[%s13154_s17 + $0x2a4] sm:$0xf]  ;;  %v8250_v24 = vor.u32 %v11757_v52, %v8247_v53  ;;  %v8295_v53 = vld [vmem:[%s13154_s17 + $0x288] sm:$0xf0]  ;;  %v11847_v8 = vld [vmem:[%s13154_s17 + $0x4f4] sm:$0xf] }
 0x307   : > { %6909 = vmatpush.bf16.msrb.mxu2 %v8402_v54  ;;  %v8450_v54 = vor.u32 %v11807_v57, %v8447_v29  ;;  %v8314_v39 = vor.u32 %v11773_v27, %v8311_v47  ;;  %v11753_v29 = vld [vmem:[%s13154_s17 + $0x204] sm:$0xf]  ;;  %v11863_v7 = vld [vmem:[%s13154_s17 + $0x574] sm:$0xf] }
 0x308   : > { %6922 = vmatpush.bf16.msrb.mxu3 %v8466_v19  ;;  %v8375_v19 = vld [vmem:[%s13154_s17 + $0x328] sm:$0xf0]  ;;  %v11769_v52 = vld [vmem:[%s13154_s17 + $0x284] sm:$0xf] }
 0x309   : > { %6884 = vmatpush.bf16.msrb.mxu0 %v8266_v21  ;;  %v14425_v21 = vadd.f32 %v6669_v6, %v6657_v1  ;;  %v11785_v27 = vld [vmem:[%s13154_s17 + $0x304] sm:$0xf]  ;;  %v11831_v1 = vld [vmem:[%s13154_s17 + $0x474] sm:$0xf]  ;;  %v8543_v6 = vld [vmem:[%s13154_s17 + $0x478] sm:$0xf0] }
 0x30a   : > { %6897 = vmatpush.bf16.msrb.mxu1 %v8330_v41  ;;  %v8378_v41 = vor.u32 %v11789_v34, %v8375_v19  ;;  %v11801_v47 = vld [vmem:[%s13154_s17 + $0x384] sm:$0xf]  ;;  %v8423_v34 = vld [vmem:[%s13154_s17 + $0x388] sm:$0xf0]  ;;  %v6658_v19 = vpop.f32.mrf.mxu2  ;;  %v6671_v51 = vpop.f32.mrf.mxu3 }
 0x30b   : > { %6910 = vmatpush.bf16.msrb.mxu2 %v8394_v48  ;;  %v11755_v48 = vld [vmem:[%s13154_s17 + $0x214] sm:$0xf]  ;;  %v8655_v51 = vld [vmem:[%s13154_s17 + $0x558] sm:$0xf0] }
 0x30c   : > { %6923 = vmatpush.bf16.msrb.mxu3 %v8458_v31  ;;  %v8303_v31 = vld [vmem:[%s13154_s17 + $0x298] sm:$0xf0]  ;;  %v8242_v57 = vor.u32 %v11755_v48, %v8239_v61  ;;  %v8362_v48 = vor.u32 %v11785_v27, %v8359_v0  ;;  %v11879_v61 = vld [vmem:[%s13154_s17 + $0x5f4] sm:$0xf] }
 0x30d   : > { %6885 = vmatpush.bf16.msrb.mxu0 %v8258_v22  ;;  %v8231_v22 = vld [vmem:[%s13154_s17 + $0x208] sm:$0xf0]  ;;  %v11843_v19 = vld [vmem:[%s13154_s17 + $0x4d4] sm:$0xf] }
 0x30e   : > { %6898 = vmatpush.bf16.msrb.mxu1 %v8322_v42  ;;  %v8306_v42 = vor.u32 %v11771_v35, %v8303_v31  ;;  %v8234_v14 = vor.u32 %v11753_v29, %v8231_v22  ;;  %v8735_v35 = vld [vmem:[%s13154_s17 + $0x5f8] sm:$0xf0]  ;;  %v8546_v31 = vor.u32 %v11831_v1, %v8543_v6  ;;  %v8599_v22 = vld [vmem:[%s13154_s17 + $0x4e8] sm:$0xf0] }
 0x30f   : > { %6911 = vmatpush.bf16.msrb.mxu2 %v8386_v25  ;;  %v8370_v25 = vor.u32 %v11787_v26, %v8367_v13  ;;  %v8738_v29 = vor.u32 %v11879_v61, %v8735_v35  ;;  %v8591_v6 = vld [vmem:[%s13154_s17 + $0x4d8] sm:$0xf0]  ;;  %v8583_v61 = vld [vmem:[%s13154_s17 + $0x4c8] sm:$0xf0]  ;;  %v11857_v35 = vld [vmem:[%s13154_s17 + $0x544] sm:$0xf] }
 0x310   : > { %6924 = vmatpush.bf16.msrb.mxu3 %v8450_v54  ;;  %v8434_v54 = vor.u32 %v11803_v32, %v8431_v60  ;;  %v11829_v32 = vld [vmem:[%s13154_s17 + $0x464] sm:$0xf]  ;;  %v8535_v60 = vld [vmem:[%s13154_s17 + $0x468] sm:$0xf0] }
 0x311   : > { %6886 = vmatpush.bf16.msrb.mxu0 %v8250_v24  ;;  %v8607_v24 = vld [vmem:[%s13154_s17 + $0x4f8] sm:$0xf0]  ;;  %v8538_v27 = vor.u32 %v11829_v32, %v8535_v60 }
 0x312   : > { %6899 = vmatpush.bf16.msrb.mxu1 %v8314_v39  ;;  %v8671_v39 = vld [vmem:[%s13154_s17 + $0x578] sm:$0xf0]  ;;  %v8610_v26 = vor.u32 %v11847_v8, %v8607_v24  ;;  %v11859_v8 = vld [vmem:[%s13154_s17 + $0x554] sm:$0xf] }
 0x313   : > { %6912 = vmatpush.bf16.msrb.mxu2 %v8378_v41  ;;  %v8298_v41 = vor.u32 %v11769_v52, %v8295_v53  ;;  %v8674_v13 = vor.u32 %v11863_v7, %v8671_v39  ;;  %v11877_v52 = vld [vmem:[%s13154_s17 + $0x5e4] sm:$0xf]  ;;  %v8727_v53 = vld [vmem:[%s13154_s17 + $0x5e8] sm:$0xf0]  ;;  %v8719_v24 = vld [vmem:[%s13154_s17 + $0x5d8] sm:$0xf0]  ;;  %v8658_v39 = vor.u32 %v11859_v8, %v8655_v51 }
 0x314   : > { %6925 = vmatpush.bf16.msrb.mxu3 %v8442_v30  ;;  %v8426_v30 = vor.u32 %v11801_v47, %v8423_v34  ;;  %v11827_v47 = vld [vmem:[%s13154_s17 + $0x454] sm:$0xf]  ;;  %v8527_v34 = vld [vmem:[%s13154_s17 + $0x458] sm:$0xf0]  ;;  %v8730_v1 = vor.u32 %v11877_v52, %v8727_v53  ;;  %v8503_v8 = vld [vmem:[%s13154_s17 + $0x428] sm:$0xf0] }
 0x315   : > { %6887 = vmatpush.bf16.msrb.mxu0 %v8242_v57  ;;  %v11845_v57 = vld [vmem:[%s13154_s17 + $0x4e4] sm:$0xf]  ;;  %v8530_v7 = vor.u32 %v11827_v47, %v8527_v34  ;;  %v8703_v47 = vld [vmem:[%s13154_s17 + $0x5b8] sm:$0xf0] }
 0x316   : > { %6900 = vmatpush.bf16.msrb.mxu1 %v8306_v42  ;;  %v11861_v42 = vld [vmem:[%s13154_s17 + $0x564] sm:$0xf] }
 0x317   : > { %6913 = vmatpush.bf16.msrb.mxu2 %v8370_v25  ;;  %v8663_v25 = vld [vmem:[%s13154_s17 + $0x568] sm:$0xf0]  ;;  %v11837_v51 = vld [vmem:[%s13154_s17 + $0x4a4] sm:$0xf] }
 0x318   : > { %6926 = vmatpush.bf16.msrb.mxu3 %v8434_v54  ;;  %v8602_v54 = vor.u32 %v11845_v57, %v8599_v22  ;;  %v8666_v0 = vor.u32 %v11861_v42, %v8663_v25  ;;  %v11823_v22 = vld [vmem:[%s13154_s17 + $0x434] sm:$0xf]  ;;  %v8511_v42 = vld [vmem:[%s13154_s17 + $0x438] sm:$0xf0] }
 0x319   : > { %6888 = vmatpush.bf16.msrb.mxu0 %v8234_v14  ;;  %v11875_v14 = vld [vmem:[%s13154_s17 + $0x5d4] sm:$0xf]  ;;  %v8514_v34 = vor.u32 %v11823_v22, %v8511_v42  ;;  %v8623_v42 = vld [vmem:[%s13154_s17 + $0x518] sm:$0xf0] }
 0x31a   : > { %6901 = vmatpush.bf16.msrb.mxu1 %v8298_v41  ;;  %v11825_v41 = vld [vmem:[%s13154_s17 + $0x444] sm:$0xf]  ;;  %v6695_v60 = vpop.f32.mrf.mxu1  ;;  %v11839_v25 = vld [vmem:[%s13154_s17 + $0x4b4] sm:$0xf] }
 0x31b   : > { %6914 = vmatpush.bf16.msrb.mxu2 %v8362_v48  ;;  %v8519_v48 = vld [vmem:[%s13154_s17 + $0x448] sm:$0xf0]  ;;  %v11851_v22 = vld [vmem:[%s13154_s17 + $0x514] sm:$0xf] }
 0x31c   : > { %6927 = vmatpush.bf16.msrb.mxu3 %v8426_v30  ;;  %6889 = vmatmul.bf16.vlgmr.msrb.gmra.mxu0 %v13331_v15  ;;  %v11841_v15 = vld [vmem:[%s13154_s17 + $0x4c4] sm:$0xf]  ;;  %v8647_v30 = vld [vmem:[%s13154_s17 + $0x548] sm:$0xf0]  ;;  %v8522_v32 = vor.u32 %v11825_v41, %v8519_v48 }
 0x31d   : > { %6933 = vmatpush.bf16.msra.mxu0 %v8546_v31  ;;  %6902 = vmatmul.bf16.vlgmr.msrb.gmra.mxu1 %v13335_v18  ;;  %v6682_v31 = vpop.f32.mrf.mxu0  ;;  %v8586_v57 = vor.u32 %v11841_v15, %v8583_v61  ;;  %v11869_v15 = vld [vmem:[%s13154_s17 + $0x5a4] sm:$0xf] }
 0x31e   : > { %6946 = vmatpush.bf16.msra.mxu1 %v8610_v26  ;;  %6915 = vmatmul.bf16.vlgmr.msrb.gmra.mxu2 %v13327_v12  ;;  %v8594_v12 = vor.u32 %v11843_v19, %v8591_v6  ;;  %v11873_v26 = vld [vmem:[%s13154_s17 + $0x5c4] sm:$0xf]  ;;  %v6683_v18 = vadd.f32 %v6682_v31, %v14425_v21  ;;  %v8639_v21 = vld [vmem:[%s13154_s17 + $0x538] sm:$0xf0] }
 0x31f   : > { %6959 = vmatpush.bf16.msra.mxu2 %v8674_v13  ;;  %6928 = vmatmul.bf16.vlgmr.msrb.gmra.mxu3 %v13333_v16  ;;  %v8722_v16 = vor.u32 %v11875_v14, %v8719_v24  ;;  %v8711_v13 = vld [vmem:[%s13154_s17 + $0x5c8] sm:$0xf0]  ;;  %v11821_v6 = vld [vmem:[%s13154_s17 + $0x424] sm:$0xf] }
 0x320   : > { %6972 = vmatpush.bf16.msra.mxu3 %v8738_v29  ;;  %v8650_v29 = vor.u32 %v11857_v35, %v8647_v30  ;;  %v8714_v52 = vor.u32 %v11873_v26, %v8711_v13  ;;  %v6696_v53 = vadd.f32 %v6695_v60, %v6683_v18  ;;  %v8506_v35 = vor.u32 %v11821_v6, %v8503_v8  ;;  %v11819_v18 = vld [vmem:[%s13154_s17 + $0x414] sm:$0xf]  ;;  %v8615_v6 = vld [vmem:[%s13154_s17 + $0x508] sm:$0xf0]  ;;  %v11865_v8 = vld [vmem:[%s13154_s17 + $0x584] sm:$0xf] }
 0x321   : > { %6934 = vmatpush.bf16.msra.mxu0 %v8538_v27  ;;  %v8575_v27 = vld [vmem:[%s13154_s17 + $0x4b8] sm:$0xf0]  ;;  %v6708_v24 = vpop.f32.mrf.mxu2  ;;  %v11835_v60 = vld [vmem:[%s13154_s17 + $0x494] sm:$0xf] }
 0x322   : > { %6947 = vmatpush.bf16.msra.mxu1 %v8602_v54  ;;  %v11855_v54 = vld [vmem:[%s13154_s17 + $0x534] sm:$0xf]  ;;  %v8578_v19 = vor.u32 %v11839_v25, %v8575_v27  ;;  %v6709_v41 = vadd.f32 %v6708_v24, %v6696_v53  ;;  %v6721_v48 = vpop.f32.mrf.mxu3  ;;  %v6697_v30 = vpop.f32.mrf.mxu1  ;;  %v11817_v27 = vld [vmem:[%s13154_s17 + $0x404] sm:$0xf] }
 0x323   : > { %6960 = vmatpush.bf16.msra.mxu2 %v8666_v0  ;;  %v11871_v0 = vld [vmem:[%s13154_s17 + $0x5b4] sm:$0xf] }
 0x324   : > { %6973 = vmatpush.bf16.msra.mxu3 %v8730_v1  ;;  %v8642_v1 = vor.u32 %v11855_v54, %v8639_v21  ;;  %v8706_v14 = vor.u32 %v11871_v0, %v8703_v47  ;;  %v14496_v31 = vadd.f32 %v6721_v48, %v6709_v41  ;;  %v11867_v25 = vld [vmem:[%s13154_s17 + $0x594] sm:$0xf]  ;;  %v8487_v54 = vld [vmem:[%s13154_s17 + $0x408] sm:$0xf0]  ;;  %v8626_v0 = vor.u32 %v11851_v22, %v8623_v42  ;;  %v11833_v47 = vld [vmem:[%s13154_s17 + $0x484] sm:$0xf] }
 0x325   : > { %6935 = vmatpush.bf16.msra.mxu0 %v8530_v7  ;;  %v8567_v7 = vld [vmem:[%s13154_s17 + $0x4a8] sm:$0xf0]  ;;  %v6684_v61 = vpop.f32.mrf.mxu0  ;;  %v11895_v24 = vld [vmem:[%s13154_s17 + $0x674] sm:$0xf]  ;;  %v8490_v41 = vor.u32 %v11817_v27, %v8487_v54  ;;  %v8863_v48 = vld [vmem:[%s13154_s17 + $0x6f8] sm:$0xf0] }
 0x326   : > { %6948 = vmatpush.bf16.msra.mxu1 %v8594_v12  ;;  %v11853_v12 = vld [vmem:[%s13154_s17 + $0x524] sm:$0xf]  ;;  %v8570_v26 = vor.u32 %v11837_v51, %v8567_v7  ;;  %v8679_v51 = vld [vmem:[%s13154_s17 + $0x588] sm:$0xf0]  ;;  %v8799_v7 = vld [vmem:[%s13154_s17 + $0x678] sm:$0xf0] }
 0x327   : > { %6961 = vmatpush.bf16.msra.mxu2 %v8658_v39  ;;  %v8631_v39 = vld [vmem:[%s13154_s17 + $0x528] sm:$0xf0]  ;;  %v11943_v30 = vld [vmem:[%s13154_s17 + $0x7f4] sm:$0xf]  ;;  %v11909_v22 = vld [vmem:[%s13154_s17 + $0x6e4] sm:$0xf] }
 0x328   : > { %6974 = vmatpush.bf16.msra.mxu3 %v8722_v16  ;;  %v8695_v16 = vld [vmem:[%s13154_s17 + $0x5a8] sm:$0xf0]  ;;  %v8634_v13 = vor.u32 %v11853_v12, %v8631_v39  ;;  %v11911_v12 = vld [vmem:[%s13154_s17 + $0x6f4] sm:$0xf]  ;;  %v11941_v27 = vld [vmem:[%s13154_s17 + $0x7e4] sm:$0xf] }
 0x329   : > { %6936 = vmatpush.bf16.msra.mxu0 %v8522_v32  ;;  %v8495_v32 = vld [vmem:[%s13154_s17 + $0x418] sm:$0xf0]  ;;  %v8983_v54 = vld [vmem:[%s13154_s17 + $0x7e8] sm:$0xf0] }
 0x32a   : > { %6949 = vmatpush.bf16.msra.mxu1 %v8586_v57  ;;  %v8698_v57 = vor.u32 %v11869_v15, %v8695_v16  ;;  %v8498_v53 = vor.u32 %v11819_v18, %v8495_v32  ;;  %v6723_v39 = vpop.f32.mrf.mxu3  ;;  %v11927_v15 = vld [vmem:[%s13154_s17 + $0x774] sm:$0xf]  ;;  %v8927_v16 = vld [vmem:[%s13154_s17 + $0x778] sm:$0xf0]  ;;  %v8802_v18 = vor.u32 %v11895_v24, %v8799_v7  ;;  %v8866_v32 = vor.u32 %v11911_v12, %v8863_v48  ;;  %v8775_v48 = vld [vmem:[%s13154_s17 + $0x648] sm:$0xf0] }
 0x32b   : > { %6962 = vmatpush.bf16.msra.mxu2 %v8650_v29  ;;  %v8559_v29 = vld [vmem:[%s13154_s17 + $0x498] sm:$0xf0]  ;;  %v11939_v24 = vld [vmem:[%s13154_s17 + $0x7d4] sm:$0xf] }
 0x32c   : > { %6975 = vmatpush.bf16.msra.mxu3 %v8714_v52  ;;  %v8687_v52 = vld [vmem:[%s13154_s17 + $0x598] sm:$0xf0]  ;;  %v8562_v21 = vor.u32 %v11835_v60, %v8559_v29  ;;  %v8930_v60 = vor.u32 %v11927_v15, %v8927_v16  ;;  %v8791_v29 = vld [vmem:[%s13154_s17 + $0x668] sm:$0xf0]  ;;  %v11921_v16 = vld [vmem:[%s13154_s17 + $0x744] sm:$0xf] }
 0x32d   : > { %6937 = vmatpush.bf16.msra.mxu0 %v8514_v34  ;;  %v8551_v34 = vld [vmem:[%s13154_s17 + $0x488] sm:$0xf0]  ;;  %v8975_v7 = vld [vmem:[%s13154_s17 + $0x7d8] sm:$0xf0] }
 0x32e   : > { %6950 = vmatpush.bf16.msra.mxu1 %v8578_v19  ;;  %v11849_v19 = vld [vmem:[%s13154_s17 + $0x504] sm:$0xf]  ;;  %v8554_v61 = vor.u32 %v11833_v47, %v8551_v34  ;;  %v11891_v34 = vld [vmem:[%s13154_s17 + $0x654] sm:$0xf]  ;;  %v8839_v15 = vld [vmem:[%s13154_s17 + $0x6c8] sm:$0xf0] }
 0x32f   : > { %6963 = vmatpush.bf16.msra.mxu2 %v8642_v1  ;;  %v8690_v1 = vor.u32 %v11867_v25, %v8687_v52  ;;  %v8855_v25 = vld [vmem:[%s13154_s17 + $0x6e8] sm:$0xf0]  ;;  %v11925_v52 = vld [vmem:[%s13154_s17 + $0x764] sm:$0xf] }
 0x330   : > { %6976 = vmatpush.bf16.msra.mxu3 %v8706_v14  ;;  %v6710_v14 = vpop.f32.mrf.mxu2 }
 0x331   : > { %6938 = vmatpush.bf16.msra.mxu0 %v8506_v35  ;;  %v8618_v35 = vor.u32 %v11849_v19, %v8615_v6  ;;  %v8783_v19 = vld [vmem:[%s13154_s17 + $0x658] sm:$0xf0]  ;;  %v8986_v6 = vor.u32 %v11941_v27, %v8983_v54  ;;  %v11935_v27 = vld [vmem:[%s13154_s17 + $0x7b4] sm:$0xf] }
 0x332   : > { %6951 = vmatpush.bf16.msra.mxu1 %v8570_v26  ;;  %v8991_v26 = vld [vmem:[%s13154_s17 + $0x7f8] sm:$0xf0] }
 0x333   : > { %6964 = vmatpush.bf16.msra.mxu2 %v8634_v13  ;;  %v8682_v13 = vor.u32 %v11865_v8, %v8679_v51  ;;  %v8994_v42 = vor.u32 %v11943_v30, %v8991_v26  ;;  %v8847_v8 = vld [vmem:[%s13154_s17 + $0x6d8] sm:$0xf0]  ;;  %v11923_v51 = vld [vmem:[%s13154_s17 + $0x754] sm:$0xf]  ;;  %v8967_v30 = vld [vmem:[%s13154_s17 + $0x7c8] sm:$0xf0] }
 0x334   : > { %6977 = vmatpush.bf16.msra.mxu3 %v8698_v57  ;;  %v11893_v57 = vld [vmem:[%s13154_s17 + $0x664] sm:$0xf]  ;;  %v8911_v14 = vld [vmem:[%s13154_s17 + $0x758] sm:$0xf0] }
 0x335   : > { %6939 = vmatpush.bf16.msra.mxu0 %v8498_v53  ;;  %v8919_v53 = vld [vmem:[%s13154_s17 + $0x768] sm:$0xf0]  ;;  %v8914_v39 = vor.u32 %v11923_v51, %v8911_v14  ;;  %v8959_v54 = vld [vmem:[%s13154_s17 + $0x7b8] sm:$0xf0]  ;;  %v11917_v14 = vld [vmem:[%s13154_s17 + $0x724] sm:$0xf] }
 0x336   : > { %6952 = vmatpush.bf16.msra.mxu1 %v8562_v21  ;;  %v8794_v21 = vor.u32 %v11893_v57, %v8791_v29  ;;  %v8922_v47 = vor.u32 %v11925_v52, %v8919_v53  ;;  %v11887_v57 = vld [vmem:[%s13154_s17 + $0x634] sm:$0xf]  ;;  %v8767_v29 = vld [vmem:[%s13154_s17 + $0x638] sm:$0xf0]  ;;  %v8823_v51 = vld [vmem:[%s13154_s17 + $0x6a8] sm:$0xf0] }
 0x337   : > { %6965 = vmatpush.bf16.msra.mxu2 %v8626_v0  ;;  %v8858_v0 = vor.u32 %v11909_v22, %v8855_v25  ;;  %v11903_v22 = vld [vmem:[%s13154_s17 + $0x6b4] sm:$0xf]  ;;  %v8831_v52 = vld [vmem:[%s13154_s17 + $0x6b8] sm:$0xf0] }
 0x338   : > { %6978 = vmatpush.bf16.msra.mxu3 %v8690_v1  ;;  %v11907_v1 = vld [vmem:[%s13154_s17 + $0x6d4] sm:$0xf] }
 0x339   : > { %6940 = vmatpush.bf16.msra.mxu0 %v8490_v41  ;;  %v8850_v12 = vor.u32 %v11907_v1, %v8847_v8  ;;  %v11889_v41 = vld [vmem:[%s13154_s17 + $0x644] sm:$0xf]  ;;  %v11919_v53 = vld [vmem:[%s13154_s17 + $0x734] sm:$0xf] }
 0x33a   : > { %6953 = vmatpush.bf16.msra.mxu1 %v8554_v61  ;;  %v8903_v61 = vld [vmem:[%s13154_s17 + $0x748] sm:$0xf0]  ;;  %v11901_v1 = vld [vmem:[%s13154_s17 + $0x6a4] sm:$0xf] }
 0x33b   : > { %6966 = vmatpush.bf16.msra.mxu2 %v8618_v35  ;;  %v11937_v35 = vld [vmem:[%s13154_s17 + $0x7c4] sm:$0xf] }
 0x33c   : > { %6979 = vmatpush.bf16.msra.mxu3 %v8682_v13  ;;  %6941 = vmatmul.bf16.vlgmr.msra.gmra.mxu0 %v13411_v62  ;;  %v8786_v62 = vor.u32 %v11891_v34, %v8783_v19  ;;  %v8778_v13 = vor.u32 %v11889_v41, %v8775_v48  ;;  %v11885_v34 = vld [vmem:[%s13154_s17 + $0x624] sm:$0xf]  ;;  %v8759_v19 = vld [vmem:[%s13154_s17 + $0x628] sm:$0xf0] }
 0x33d   : > { %6985 = vmatpush.bf16.msrb.mxu0 %v8802_v18  ;;  %6954 = vmatmul.bf16.vlgmr.msra.gmra.mxu1 %v13422_v5  ;;  %v8978_v5 = vor.u32 %v11939_v24, %v8975_v7  ;;  %v6747_v18 = vpop.f32.mrf.mxu1  ;;  %v8887_v24 = vld [vmem:[%s13154_s17 + $0x728] sm:$0xf0]  ;;  %v8762_v48 = vor.u32 %v11885_v34, %v8759_v19  ;;  %v11959_v34 = vld [vmem:[%s13154_s17 + $0x874] sm:$0xf]  ;;  %v9055_v19 = vld [vmem:[%s13154_s17 + $0x878] sm:$0xf0] }
 0x33e   : > { %6998 = vmatpush.bf16.msrb.mxu1 %v8866_v32  ;;  %6967 = vmatmul.bf16.vlgmr.msra.gmra.mxu2 %v13418_v4  ;;  %v11905_v4 = vld [vmem:[%s13154_s17 + $0x6c4] sm:$0xf] }
 0x33f   : > { %7011 = vmatpush.bf16.msrb.mxu2 %v8930_v60  ;;  %6980 = vmatmul.bf16.vlgmr.msra.gmra.mxu3 %v13428_v56  ;;  %v6734_v56 = vpop.f32.mrf.mxu0  ;;  %v8842_v32 = vor.u32 %v11905_v4, %v8839_v15  ;;  %v8906_v60 = vor.u32 %v11921_v16, %v8903_v61  ;;  %v8826_v15 = vor.u32 %v11901_v1, %v8823_v51  ;;  %v11883_v61 = vld [vmem:[%s13154_s17 + $0x614] sm:$0xf]  ;;  %v9119_v51 = vld [vmem:[%s13154_s17 + $0x8f8] sm:$0xf0] }
 0x340   : > { %7024 = vmatpush.bf16.msrb.mxu3 %v8994_v42  ;;  %v6735_v26 = vadd.f32 %v6734_v56, %v14496_v31  ;;  %v8970_v42 = vor.u32 %v11937_v35, %v8967_v30  ;;  %v8895_v31 = vld [vmem:[%s13154_s17 + $0x738] sm:$0xf0]  ;;  %v8890_v16 = vor.u32 %v11917_v14, %v8887_v24  ;;  %v11899_v35 = vld [vmem:[%s13154_s17 + $0x694] sm:$0xf] }
 0x341   : > { %6986 = vmatpush.bf16.msrb.mxu0 %v8794_v21  ;;  %v8770_v21 = vor.u32 %v11887_v57, %v8767_v29  ;;  %v6760_v8 = vpop.f32.mrf.mxu2  ;;  %v8751_v56 = vld [vmem:[%s13154_s17 + $0x618] sm:$0xf0]  ;;  %v11881_v29 = vld [vmem:[%s13154_s17 + $0x604] sm:$0xf]  ;;  %v11975_v1 = vld [vmem:[%s13154_s17 + $0x8f4] sm:$0xf] }
 0x342   : > { %6999 = vmatpush.bf16.msrb.mxu1 %v8858_v0  ;;  %v6748_v25 = vadd.f32 %v6747_v18, %v6735_v26  ;;  %v8834_v0 = vor.u32 %v11903_v22, %v8831_v52  ;;  %v8815_v26 = vld [vmem:[%s13154_s17 + $0x698] sm:$0xf0]  ;;  %v8754_v57 = vor.u32 %v11883_v61, %v8751_v56  ;;  %v8743_v22 = vld [vmem:[%s13154_s17 + $0x608] sm:$0xf0]  ;;  %v11897_v52 = vld [vmem:[%s13154_s17 + $0x684] sm:$0xf] }
 0x343   : > { %7012 = vmatpush.bf16.msrb.mxu2 %v8922_v47  ;;  %v8898_v47 = vor.u32 %v11919_v53, %v8895_v31  ;;  %v8879_v18 = vld [vmem:[%s13154_s17 + $0x718] sm:$0xf0]  ;;  %v8807_v53 = vld [vmem:[%s13154_s17 + $0x688] sm:$0xf0]  ;;  %v11913_v31 = vld [vmem:[%s13154_s17 + $0x704] sm:$0xf] }
 0x344   : > { %7025 = vmatpush.bf16.msrb.mxu3 %v8986_v6  ;;  %v8962_v6 = vor.u32 %v11935_v27, %v8959_v54  ;;  %v6761_v7 = vadd.f32 %v6760_v8, %v6748_v25  ;;  %v8871_v54 = vld [vmem:[%s13154_s17 + $0x708] sm:$0xf0]  ;;  %v8746_v8 = vor.u32 %v11881_v29, %v8743_v22  ;;  %v11991_v14 = vld [vmem:[%s13154_s17 + $0x974] sm:$0xf]  ;;  %v9183_v24 = vld [vmem:[%s13154_s17 + $0x978] sm:$0xf0] }
 0x345   : > { %6987 = vmatpush.bf16.msrb.mxu0 %v8786_v62  ;;  %v6773_v62 = vpop.f32.mrf.mxu3  ;;  %v6749_v4 = vpop.f32.mrf.mxu1  ;;  %v9047_v61 = vld [vmem:[%s13154_s17 + $0x868] sm:$0xf0]  ;;  %v11973_v56 = vld [vmem:[%s13154_s17 + $0x8e4] sm:$0xf]  ;;  %v11955_v22 = vld [vmem:[%s13154_s17 + $0x854] sm:$0xf] }
 0x346   : > { %7000 = vmatpush.bf16.msrb.mxu1 %v8850_v12  ;;  %v11933_v12 = vld [vmem:[%s13154_s17 + $0x7a4] sm:$0xf]  ;;  %v9122_v4 = vor.u32 %v11975_v1, %v9119_v51  ;;  %v9095_v1 = vld [vmem:[%s13154_s17 + $0x8c8] sm:$0xf0] }
 0x347   : > { %7013 = vmatpush.bf16.msrb.mxu2 %v8914_v39  ;;  %v8951_v39 = vld [vmem:[%s13154_s17 + $0x7a8] sm:$0xf0]  ;;  %v6736_v41 = vpop.f32.mrf.mxu0  ;;  %v12001_v51 = vld [vmem:[%s13154_s17 + $0x9c4] sm:$0xf] }
 0x348   : > { %7026 = vmatpush.bf16.msrb.mxu3 %v8978_v5  ;;  %v14567_v5 = vadd.f32 %v6773_v62, %v6761_v7  ;;  %v8954_v30 = vor.u32 %v11933_v12, %v8951_v39  ;;  %v8810_v7 = vor.u32 %v11897_v52, %v8807_v53  ;;  %v8874_v62 = vor.u32 %v11913_v31, %v8871_v54  ;;  %v12007_v12 = vld [vmem:[%s13154_s17 + $0x9f4] sm:$0xf]  ;;  %v9247_v39 = vld [vmem:[%s13154_s17 + $0x9f8] sm:$0xf0] }
 0x349   : > { %6988 = vmatpush.bf16.msrb.mxu0 %v8778_v13  ;;  %v11915_v13 = vld [vmem:[%s13154_s17 + $0x714] sm:$0xf]  ;;  %v9103_v53 = vld [vmem:[%s13154_s17 + $0x8d8] sm:$0xf0] }
 0x34a   : > { %7001 = vmatpush.bf16.msrb.mxu1 %v8842_v32  ;;  %v11931_v32 = vld [vmem:[%s13154_s17 + $0x794] sm:$0xf]  ;;  %v8882_v25 = vor.u32 %v11915_v13, %v8879_v18  ;;  %v9175_v13 = vld [vmem:[%s13154_s17 + $0x968] sm:$0xf0]  ;;  %v12005_v18 = vld [vmem:[%s13154_s17 + $0x9e4] sm:$0xf] }
 0x34b   : > { %7014 = vmatpush.bf16.msrb.mxu2 %v8906_v60  ;;  %v8943_v60 = vld [vmem:[%s13154_s17 + $0x798] sm:$0xf0]  ;;  %v11987_v31 = vld [vmem:[%s13154_s17 + $0x954] sm:$0xf] }
 0x34c   : > { %7027 = vmatpush.bf16.msrb.mxu3 %v8970_v42  ;;  %v8818_v42 = vor.u32 %v11899_v35, %v8815_v26  ;;  %v8946_v27 = vor.u32 %v11931_v32, %v8943_v60  ;;  %v9250_v35 = vor.u32 %v12007_v12, %v9247_v39  ;;  %v11989_v26 = vld [vmem:[%s13154_s17 + $0x964] sm:$0xf]  ;;  %v9239_v32 = vld [vmem:[%s13154_s17 + $0x9e8] sm:$0xf0]  ;;  %v12003_v54 = vld [vmem:[%s13154_s17 + $0x9d4] sm:$0xf] }
 0x34d   : > { %6989 = vmatpush.bf16.msrb.mxu0 %v8770_v21  ;;  %v11929_v21 = vld [vmem:[%s13154_s17 + $0x784] sm:$0xf]  ;;  %v9178_v29 = vor.u32 %v11989_v26, %v9175_v13  ;;  %v9242_v52 = vor.u32 %v12005_v18, %v9239_v32 }
 0x34e   : > { %7002 = vmatpush.bf16.msrb.mxu1 %v8834_v0  ;;  %v8935_v0 = vld [vmem:[%s13154_s17 + $0x788] sm:$0xf0]  ;;  %v11949_v32 = vld [vmem:[%s13154_s17 + $0x824] sm:$0xf] }
 0x34f   : > { %7015 = vmatpush.bf16.msrb.mxu2 %v8898_v47  ;;  %v6762_v47 = vpop.f32.mrf.mxu2  ;;  %v8938_v41 = vor.u32 %v11929_v21, %v8935_v0  ;;  %v9231_v21 = vld [vmem:[%s13154_s17 + $0x9d8] sm:$0xf0] }
 0x350   : > { %7028 = vmatpush.bf16.msrb.mxu3 %v8962_v6  ;;  %v6775_v6 = vpop.f32.mrf.mxu3 }
 0x351   : > { %6990 = vmatpush.bf16.msrb.mxu0 %v8762_v48  ;;  %v9058_v48 = vor.u32 %v11959_v34, %v9055_v19  ;;  %v11953_v34 = vld [vmem:[%s13154_s17 + $0x844] sm:$0xf]  ;;  %v9031_v19 = vld [vmem:[%s13154_s17 + $0x848] sm:$0xf0] }
 0x352   : > { %7003 = vmatpush.bf16.msrb.mxu1 %v8826_v15  ;;  %v9186_v15 = vor.u32 %v11991_v14, %v9183_v24  ;;  %v11985_v6 = vld [vmem:[%s13154_s17 + $0x944] sm:$0xf]  ;;  %v9223_v14 = vld [vmem:[%s13154_s17 + $0x9c8] sm:$0xf0] }
 0x353   : > { %7016 = vmatpush.bf16.msrb.mxu2 %v8890_v16  ;;  %v11957_v16 = vld [vmem:[%s13154_s17 + $0x864] sm:$0xf] }
 0x354   : > { %7029 = vmatpush.bf16.msrb.mxu3 %v8954_v30  ;;  %v9111_v30 = vld [vmem:[%s13154_s17 + $0x8e8] sm:$0xf0]  ;;  %v9050_v60 = vor.u32 %v11957_v16, %v9047_v61  ;;  %v9087_v61 = vld [vmem:[%s13154_s17 + $0x8b8] sm:$0xf0] }
 0x355   : > { %6991 = vmatpush.bf16.msrb.mxu0 %v8754_v57  ;;  %v9114_v57 = vor.u32 %v11973_v56, %v9111_v30  ;;  %v11983_v56 = vld [vmem:[%s13154_s17 + $0x934] sm:$0xf]  ;;  %v9215_v30 = vld [vmem:[%s13154_s17 + $0x9b8] sm:$0xf0] }
 0x356   : > { %7004 = vmatpush.bf16.msrb.mxu1 %v8818_v42  ;;  %v9039_v42 = vld [vmem:[%s13154_s17 + $0x858] sm:$0xf0] }
 0x357   : > { %7017 = vmatpush.bf16.msrb.mxu2 %v8882_v25  ;;  %v11971_v25 = vld [vmem:[%s13154_s17 + $0x8d4] sm:$0xf] }
 0x358   : > { %7030 = vmatpush.bf16.msrb.mxu3 %v8946_v27  ;;  %v9167_v27 = vld [vmem:[%s13154_s17 + $0x958] sm:$0xf0]  ;;  %v9106_v0 = vor.u32 %v11971_v25, %v9103_v53  ;;  %v11981_v25 = vld [vmem:[%s13154_s17 + $0x924] sm:$0xf] }
 0x359   : > { %6992 = vmatpush.bf16.msrb.mxu0 %v8746_v8  ;;  %v9170_v47 = vor.u32 %v11987_v31, %v9167_v27  ;;  %v9159_v8 = vld [vmem:[%s13154_s17 + $0x948] sm:$0xf0]  ;;  %v11997_v27 = vld [vmem:[%s13154_s17 + $0x9a4] sm:$0xf] }
 0x35a   : > { %7005 = vmatpush.bf16.msrb.mxu1 %v8810_v7  ;;  %v9034_v7 = vor.u32 %v11953_v34, %v9031_v19  ;;  %v9162_v39 = vor.u32 %v11985_v6, %v9159_v8  ;;  %v9071_v8 = vld [vmem:[%s13154_s17 + $0x898] sm:$0xf0] }
 0x35b   : > { %7018 = vmatpush.bf16.msrb.mxu2 %v8874_v62  ;;  %v6799_v62 = vpop.f32.mrf.mxu1 }
 0x35c   : > { %7031 = vmatpush.bf16.msrb.mxu3 %v8938_v41  ;;  %6993 = vmatmul.bf16.vlgmr.msrb.gmra.mxu0 %v13504_v2  ;;  %v9042_v2 = vor.u32 %v11955_v22, %v9039_v42  ;;  %v11951_v41 = vld [vmem:[%s13154_s17 + $0x834] sm:$0xf]  ;;  %v9079_v42 = vld [vmem:[%s13154_s17 + $0x8a8] sm:$0xf0] }
 0x35d   : > { %7037 = vmatpush.bf16.msra.mxu0 %v9058_v48  ;;  %7006 = vmatmul.bf16.vlgmr.msrb.gmra.mxu1 %v13515_v11  ;;  %v9234_v11 = vor.u32 %v12003_v54, %v9231_v21  ;;  %v9023_v48 = vld [vmem:[%s13154_s17 + $0x838] sm:$0xf0]  ;;  %v9207_v54 = vld [vmem:[%s13154_s17 + $0x9a8] sm:$0xf0] }
 0x35e   : > { %7050 = vmatpush.bf16.msra.mxu1 %v9122_v4  ;;  %7019 = vmatmul.bf16.vlgmr.msrb.gmra.mxu2 %v13511_v10  ;;  %v11969_v10 = vld [vmem:[%s13154_s17 + $0x8c4] sm:$0xf]  ;;  %v11967_v4 = vld [vmem:[%s13154_s17 + $0x8b4] sm:$0xf]  ;;  %v9026_v26 = vor.u32 %v11951_v41, %v9023_v48  ;;  %v9210_v6 = vor.u32 %v11997_v27, %v9207_v54 }
 0x35f   : > { %7063 = vmatpush.bf16.msra.mxu2 %v9186_v15  ;;  %7032 = vmatmul.bf16.vlgmr.msrb.gmra.mxu3 %v13521_v59  ;;  %v6786_v59 = vpop.f32.mrf.mxu0  ;;  %v9098_v12 = vor.u32 %v11969_v10, %v9095_v1  ;;  %v9226_v15 = vor.u32 %v12001_v51, %v9223_v14  ;;  %v9090_v13 = vor.u32 %v11967_v4, %v9087_v61  ;;  %v11947_v10 = vld [vmem:[%s13154_s17 + $0x814] sm:$0xf]  ;;  %v9135_v51 = vld [vmem:[%s13154_s17 + $0x918] sm:$0xf0]  ;;  %v11961_v48 = vld [vmem:[%s13154_s17 + $0x884] sm:$0xf] }
 0x360   : > { %7076 = vmatpush.bf16.msra.mxu3 %v9250_v35  ;;  %v6787_v24 = vadd.f32 %v6786_v59, %v14567_v5  ;;  %v9151_v5 = vld [vmem:[%s13154_s17 + $0x938] sm:$0xf0]  ;;  %v11999_v35 = vld [vmem:[%s13154_s17 + $0x9b4] sm:$0xf]  ;;  %v9063_v4 = vld [vmem:[%s13154_s17 + $0x888] sm:$0xf0] }
 0x361   : > { %7038 = vmatpush.bf16.msra.mxu0 %v9050_v60  ;;  %v9154_v18 = vor.u32 %v11983_v56, %v9151_v5  ;;  %v9015_v60 = vld [vmem:[%s13154_s17 + $0x828] sm:$0xf0]  ;;  %v6812_v22 = vpop.f32.mrf.mxu2  ;;  %v11963_v1 = vld [vmem:[%s13154_s17 + $0x894] sm:$0xf]  ;;  %v11993_v56 = vld [vmem:[%s13154_s17 + $0x984] sm:$0xf] }
 0x362   : > { %7051 = vmatpush.bf16.msra.mxu1 %v9114_v57  ;;  %v6800_v16 = vadd.f32 %v6799_v62, %v6787_v24  ;;  %v11965_v57 = vld [vmem:[%s13154_s17 + $0x8a4] sm:$0xf]  ;;  %v6825_v31 = vpop.f32.mrf.mxu3  ;;  %v11979_v59 = vld [vmem:[%s13154_s17 + $0x914] sm:$0xf]  ;;  %v9199_v24 = vld [vmem:[%s13154_s17 + $0x998] sm:$0xf0] }
 0x363   : > { %7064 = vmatpush.bf16.msra.mxu2 %v9178_v29  ;;  %v9218_v29 = vor.u32 %v11999_v35, %v9215_v30  ;;  %v9082_v34 = vor.u32 %v11965_v57, %v9079_v42  ;;  %v11995_v14 = vld [vmem:[%s13154_s17 + $0x994] sm:$0xf]  ;;  %v11945_v62 = vld [vmem:[%s13154_s17 + $0x804] sm:$0xf]  ;;  %v9138_v41 = vor.u32 %v11979_v59, %v9135_v51  ;;  %v9127_v61 = vld [vmem:[%s13154_s17 + $0x908] sm:$0xf0] }
 0x364   : > { %7077 = vmatpush.bf16.msra.mxu3 %v9242_v52  ;;  %v9143_v52 = vld [vmem:[%s13154_s17 + $0x928] sm:$0xf0]  ;;  %v6813_v53 = vadd.f32 %v6812_v22, %v6800_v16  ;;  %v9202_v16 = vor.u32 %v11995_v14, %v9199_v24  ;;  %v12023_v30 = vld [vmem:[%s13154_s17 + $0xa74] sm:$0xf]  ;;  %v9066_v22 = vor.u32 %v11961_v48, %v9063_v4  ;;  %v9295_v24 = vld [vmem:[%s13154_s17 + $0xa58] sm:$0xf0] }
 0x365   : > { %7039 = vmatpush.bf16.msra.mxu0 %v9042_v2  ;;  %v9018_v2 = vor.u32 %v11949_v32, %v9015_v60  ;;  %v9146_v19 = vor.u32 %v11981_v25, %v9143_v52  ;;  %v9191_v5 = vld [vmem:[%s13154_s17 + $0x988] sm:$0xf0]  ;;  %v9375_v60 = vld [vmem:[%s13154_s17 + $0xaf8] sm:$0xf0]  ;;  %v12055_v57 = vld [vmem:[%s13154_s17 + $0xb74] sm:$0xf] }
 0x366   : > { %7052 = vmatpush.bf16.msra.mxu1 %v9106_v0  ;;  %v6801_v0 = vpop.f32.mrf.mxu1  ;;  %v12071_v25 = vld [vmem:[%s13154_s17 + $0xbf4] sm:$0xf]  ;;  %v9503_v52 = vld [vmem:[%s13154_s17 + $0xbf8] sm:$0xf0] }
 0x367   : > { %7065 = vmatpush.bf16.msra.mxu2 %v9170_v47  ;;  %v6788_v21 = vpop.f32.mrf.mxu0  ;;  %v14638_v47 = vadd.f32 %v6825_v31, %v6813_v53  ;;  %v9194_v53 = vor.u32 %v11993_v56, %v9191_v5  ;;  %v12037_v0 = vld [vmem:[%s13154_s17 + $0xae4] sm:$0xf]  ;;  %v12019_v14 = vld [vmem:[%s13154_s17 + $0xa54] sm:$0xf]  ;;  %v9487_v4 = vld [vmem:[%s13154_s17 + $0xbd8] sm:$0xf0] }
 0x368   : > { %7078 = vmatpush.bf16.msra.mxu3 %v9234_v11  ;;  %v9007_v11 = vld [vmem:[%s13154_s17 + $0x818] sm:$0xf0]  ;;  %v12021_v21 = vld [vmem:[%s13154_s17 + $0xa64] sm:$0xf]  ;;  %v12067_v48 = vld [vmem:[%s13154_s17 + $0xbd4] sm:$0xf] }
 0x369   : > { %7040 = vmatpush.bf16.msra.mxu0 %v9034_v7  ;;  %v9010_v7 = vor.u32 %v11947_v10, %v9007_v11  ;;  %v6814_v35 = vpop.f32.mrf.mxu2  ;;  %v12053_v10 = vld [vmem:[%s13154_s17 + $0xb64] sm:$0xf]  ;;  %v9431_v11 = vld [vmem:[%s13154_s17 + $0xb68] sm:$0xf0] }
 0x36a   : > { %7053 = vmatpush.bf16.msra.mxu1 %v9098_v12  ;;  %v8999_v12 = vld [vmem:[%s13154_s17 + $0x808] sm:$0xf0]  ;;  %v9434_v51 = vor.u32 %v12053_v10, %v9431_v11  ;;  %v12049_v35 = vld [vmem:[%s13154_s17 + $0xb44] sm:$0xf] }
 0x36b   : > { %7066 = vmatpush.bf16.msra.mxu2 %v9162_v39  ;;  %v9074_v39 = vor.u32 %v11963_v1, %v9071_v8  ;;  %v9002_v32 = vor.u32 %v11945_v62, %v8999_v12  ;;  %v12069_v1 = vld [vmem:[%s13154_s17 + $0xbe4] sm:$0xf]  ;;  %v9359_v12 = vld [vmem:[%s13154_s17 + $0xad8] sm:$0xf0]  ;;  %v9287_v56 = vld [vmem:[%s13154_s17 + $0xa48] sm:$0xf0] }
 0x36c   : > { %7079 = vmatpush.bf16.msra.mxu3 %v9226_v15  ;;  %v11977_v15 = vld [vmem:[%s13154_s17 + $0x904] sm:$0xf]  ;;  %v9351_v5 = vld [vmem:[%s13154_s17 + $0xac8] sm:$0xf0] }
 0x36d   : > { %7041 = vmatpush.bf16.msra.mxu0 %v9026_v26  ;;  %v9311_v26 = vld [vmem:[%s13154_s17 + $0xa78] sm:$0xf0]  ;;  %v9130_v42 = vor.u32 %v11977_v15, %v9127_v61  ;;  %v12017_v61 = vld [vmem:[%s13154_s17 + $0xa44] sm:$0xf]  ;;  %v9271_v10 = vld [vmem:[%s13154_s17 + $0xa28] sm:$0xf0] }
 0x36e   : > { %7054 = vmatpush.bf16.msra.mxu1 %v9090_v13  ;;  %v12039_v13 = vld [vmem:[%s13154_s17 + $0xaf4] sm:$0xf]  ;;  %v9314_v31 = vor.u32 %v12023_v30, %v9311_v26  ;;  %v9415_v30 = vld [vmem:[%s13154_s17 + $0xb48] sm:$0xf0]  ;;  %v12029_v11 = vld [vmem:[%s13154_s17 + $0xaa4] sm:$0xf] }
 0x36f   : > { %7067 = vmatpush.bf16.msra.mxu2 %v9154_v18  ;;  %v6827_v18 = vpop.f32.mrf.mxu3  ;;  %v9378_v27 = vor.u32 %v12039_v13, %v9375_v60  ;;  %v9479_v26 = vld [vmem:[%s13154_s17 + $0xbc8] sm:$0xf0]  ;;  %v9290_v13 = vor.u32 %v12017_v61, %v9287_v56  ;;  %v9418_v60 = vor.u32 %v12049_v35, %v9415_v30  ;;  %v12059_v35 = vld [vmem:[%s13154_s17 + $0xb94] sm:$0xf]  ;;  %v9455_v30 = vld [vmem:[%s13154_s17 + $0xb98] sm:$0xf0] }
 0x370   : > { %7080 = vmatpush.bf16.msra.mxu3 %v9218_v29  ;;  %v9439_v29 = vld [vmem:[%s13154_s17 + $0xb78] sm:$0xf0] }
 0x371   : > { %7042 = vmatpush.bf16.msra.mxu0 %v9018_v2  ;;  %v9442_v54 = vor.u32 %v12055_v57, %v9439_v29  ;;  %v9303_v2 = vld [vmem:[%s13154_s17 + $0xa68] sm:$0xf0]  ;;  %v12015_v57 = vld [vmem:[%s13154_s17 + $0xa34] sm:$0xf]  ;;  %v9279_v29 = vld [vmem:[%s13154_s17 + $0xa38] sm:$0xf0] }
 0x372   : > { %7055 = vmatpush.bf16.msra.mxu1 %v9082_v34  ;;  %v9506_v34 = vor.u32 %v12071_v25, %v9503_v52  ;;  %v9306_v8 = vor.u32 %v12021_v21, %v9303_v2  ;;  %v9343_v52 = vld [vmem:[%s13154_s17 + $0xab8] sm:$0xf0]  ;;  %v9282_v2 = vor.u32 %v12015_v57, %v9279_v29  ;;  %v9319_v57 = vld [vmem:[%s13154_s17 + $0xa88] sm:$0xf0]  ;;  %v12041_v29 = vld [vmem:[%s13154_s17 + $0xb04] sm:$0xf] }
 0x373   : > { %7068 = vmatpush.bf16.msra.mxu2 %v9146_v19  ;;  %v9367_v19 = vld [vmem:[%s13154_s17 + $0xae8] sm:$0xf0]  ;;  %v9471_v21 = vld [vmem:[%s13154_s17 + $0xbb8] sm:$0xf0] }
 0x374   : > { %7081 = vmatpush.bf16.msra.mxu3 %v9210_v6  ;;  %v9495_v6 = vld [vmem:[%s13154_s17 + $0xbe8] sm:$0xf0]  ;;  %v9370_v59 = vor.u32 %v12037_v0, %v9367_v19  ;;  %v12013_v19 = vld [vmem:[%s13154_s17 + $0xa24] sm:$0xf] }
 0x375   : > { %7043 = vmatpush.bf16.msra.mxu0 %v9010_v7  ;;  %v12035_v7 = vld [vmem:[%s13154_s17 + $0xad4] sm:$0xf]  ;;  %v9498_v62 = vor.u32 %v12069_v1, %v9495_v6 }
 0x376   : > { %7056 = vmatpush.bf16.msra.mxu1 %v9074_v39  ;;  %v12051_v39 = vld [vmem:[%s13154_s17 + $0xb54] sm:$0xf]  ;;  %v9362_v15 = vor.u32 %v12035_v7, %v9359_v12  ;;  %v12061_v7 = vld [vmem:[%s13154_s17 + $0xba4] sm:$0xf]  ;;  %v9274_v12 = vor.u32 %v12013_v19, %v9271_v10  ;;  %v9695_v19 = vld [vmem:[%s13154_s17 + $0xd78] sm:$0xf0] }
 0x377   : > { %7069 = vmatpush.bf16.msra.mxu2 %v9138_v41  ;;  %v9423_v41 = vld [vmem:[%s13154_s17 + $0xb58] sm:$0xf0] }
 0x378   : > { %7082 = vmatpush.bf16.msra.mxu3 %v9202_v16  ;;  %v9426_v16 = vor.u32 %v12051_v39, %v9423_v41 }
 0x379   : > { %7044 = vmatpush.bf16.msra.mxu0 %v9002_v32  ;;  %v6838_v18 = vpop.f32.mrf.mxu0 }
 0x37a   : > { %7057 = vmatpush.bf16.msra.mxu1 %v9066_v22  ;;  %v12031_v22 = vld [vmem:[%s13154_s17 + $0xab4] sm:$0xf] }
 0x37b   : > { %7070 = vmatpush.bf16.msra.mxu2 %v9130_v42  ;;  %v6851_v42 = vpop.f32.mrf.mxu1  ;;  %v9346_v0 = vor.u32 %v12031_v22, %v9343_v52  ;;  %v12057_v52 = vld [vmem:[%s13154_s17 + $0xb84] sm:$0xf] }
 0x37c   : > { %7083 = vmatpush.bf16.msra.mxu3 %v9194_v53  ;;  %7045 = vmatmul.bf16.vlgmr.msra.gmra.mxu0 %v13586_v33  ;;  %v9298_v33 = vor.u32 %v12019_v14, %v9295_v24  ;;  %v12047_v53 = vld [vmem:[%s13154_s17 + $0xb34] sm:$0xf] }
 0x37d   : > { %7089 = vmatpush.bf16.msrb.mxu0 %v9314_v31  ;;  %7058 = vmatmul.bf16.vlgmr.msra.gmra.mxu1 %v13593_v17  ;;  %v9490_v17 = vor.u32 %v12067_v48, %v9487_v4  ;;  %v9407_v31 = vld [vmem:[%s13154_s17 + $0xb38] sm:$0xf0] }
 0x37e   : > { %7102 = vmatpush.bf16.msrb.mxu1 %v9378_v27  ;;  %7071 = vmatmul.bf16.vlgmr.msra.gmra.mxu2 %v13591_v36  ;;  %v12033_v36 = vld [vmem:[%s13154_s17 + $0xac4] sm:$0xf]  ;;  %v6852_v27 = vadd.f32 %v6851_v42, %v6838_v18  ;;  %v9458_v42 = vor.u32 %v12059_v35, %v9455_v30  ;;  %v9615_v30 = vld [vmem:[%s13154_s17 + $0xcd8] sm:$0xf0] }
 0x37f   : > { %7115 = vmatpush.bf16.msrb.mxu2 %v9442_v54  ;;  %7084 = vmatmul.bf16.vlgmr.msra.gmra.mxu3 %v13597_v20  ;;  %v12065_v20 = vld [vmem:[%s13154_s17 + $0xbc4] sm:$0xf]  ;;  %v9354_v32 = vor.u32 %v12033_v36, %v9351_v5  ;;  %v12063_v54 = vld [vmem:[%s13154_s17 + $0xbb4] sm:$0xf]  ;;  %v9327_v36 = vld [vmem:[%s13154_s17 + $0xa98] sm:$0xf0] }
 0x380   : > { %7128 = vmatpush.bf16.msrb.mxu3 %v9506_v34  ;;  %v9482_v25 = vor.u32 %v12065_v20, %v9479_v26  ;;  %v9410_v34 = vor.u32 %v12047_v53, %v9407_v31  ;;  %v9474_v6 = vor.u32 %v12063_v54, %v9471_v21  ;;  %v9391_v5 = vld [vmem:[%s13154_s17 + $0xb18] sm:$0xf0]  ;;  %v12009_v26 = vld [vmem:[%s13154_s17 + $0xa04] sm:$0xf]  ;;  %v9447_v53 = vld [vmem:[%s13154_s17 + $0xb88] sm:$0xf0] }
 0x381   : > { %7090 = vmatpush.bf16.msrb.mxu0 %v9306_v8  ;;  %v6864_v1 = vpop.f32.mrf.mxu2  ;;  %v9335_v8 = vld [vmem:[%s13154_s17 + $0xaa8] sm:$0xf0]  ;;  %v6840_v41 = vpop.f32.mrf.mxu0  ;;  %v9567_v54 = vld [vmem:[%s13154_s17 + $0xc78] sm:$0xf0]  ;;  %v12103_v21 = vld [vmem:[%s13154_s17 + $0xcf4] sm:$0xf] }
 0x382   : > { %7103 = vmatpush.bf16.msrb.mxu1 %v9370_v59  ;;  %v12045_v59 = vld [vmem:[%s13154_s17 + $0xb24] sm:$0xf]  ;;  %v6865_v14 = vadd.f32 %v6864_v1, %v6852_v27  ;;  %v6877_v24 = vpop.f32.mrf.mxu3  ;;  %v9338_v48 = vor.u32 %v12029_v11, %v9335_v8  ;;  %v12087_v27 = vld [vmem:[%s13154_s17 + $0xc74] sm:$0xf]  ;;  %v9450_v8 = vor.u32 %v12057_v52, %v9447_v53  ;;  %v9623_v41 = vld [vmem:[%s13154_s17 + $0xce8] sm:$0xf0] }
 0x383   : > { %7116 = vmatpush.bf16.msrb.mxu2 %v9434_v51  ;;  %v9399_v51 = vld [vmem:[%s13154_s17 + $0xb28] sm:$0xf0]  ;;  %v6853_v61 = vpop.f32.mrf.mxu1  ;;  %v12135_v1 = vld [vmem:[%s13154_s17 + $0xdf4] sm:$0xf]  ;;  %v12129_v52 = vld [vmem:[%s13154_s17 + $0xdc4] sm:$0xf] }
 0x384   : > { %7129 = vmatpush.bf16.msrb.mxu3 %v9498_v62  ;;  %v9463_v62 = vld [vmem:[%s13154_s17 + $0xba8] sm:$0xf0]  ;;  %v14708_v39 = vadd.f32 %v6877_v24, %v6865_v14  ;;  %v9402_v4 = vor.u32 %v12045_v59, %v9399_v51  ;;  %v9570_v59 = vor.u32 %v12087_v27, %v9567_v54  ;;  %v12085_v24 = vld [vmem:[%s13154_s17 + $0xc64] sm:$0xf] }
 0x385   : > { %7091 = vmatpush.bf16.msrb.mxu0 %v9298_v33  ;;  %v12011_v33 = vld [vmem:[%s13154_s17 + $0xa14] sm:$0xf]  ;;  %v9466_v56 = vor.u32 %v12061_v7, %v9463_v62  ;;  %v9559_v7 = vld [vmem:[%s13154_s17 + $0xc68] sm:$0xf0]  ;;  %v12101_v62 = vld [vmem:[%s13154_s17 + $0xce4] sm:$0xf] }
 0x386   : > { %7104 = vmatpush.bf16.msrb.mxu1 %v9362_v15  ;;  %v9263_v15 = vld [vmem:[%s13154_s17 + $0xa18] sm:$0xf0]  ;;  %v9626_v61 = vor.u32 %v12101_v62, %v9623_v41  ;;  %v9527_v62 = vld [vmem:[%s13154_s17 + $0xc28] sm:$0xf0] }
 0x387   : > { %7117 = vmatpush.bf16.msrb.mxu2 %v9426_v16  ;;  %v12027_v16 = vld [vmem:[%s13154_s17 + $0xa94] sm:$0xf]  ;;  %v9266_v20 = vor.u32 %v12011_v33, %v9263_v15  ;;  %v12133_v33 = vld [vmem:[%s13154_s17 + $0xde4] sm:$0xf]  ;;  %v9751_v15 = vld [vmem:[%s13154_s17 + $0xde8] sm:$0xf0] }
 0x388   : > { %7130 = vmatpush.bf16.msrb.mxu3 %v9490_v17  ;;  %v12043_v17 = vld [vmem:[%s13154_s17 + $0xb14] sm:$0xf]  ;;  %v9330_v18 = vor.u32 %v12027_v16, %v9327_v36  ;;  %v9562_v16 = vor.u32 %v12085_v24, %v9559_v7  ;;  %v9754_v35 = vor.u32 %v12133_v33, %v9751_v15  ;;  %v12077_v7 = vld [vmem:[%s13154_s17 + $0xc24] sm:$0xf]  ;;  %v9655_v15 = vld [vmem:[%s13154_s17 + $0xd28] sm:$0xf0] }
 0x389   : > { %7092 = vmatpush.bf16.msrb.mxu0 %v9290_v13  ;;  %v9255_v13 = vld [vmem:[%s13154_s17 + $0xa08] sm:$0xf0]  ;;  %v6866_v22 = vpop.f32.mrf.mxu2  ;;  %v12083_v36 = vld [vmem:[%s13154_s17 + $0xc54] sm:$0xf]  ;;  %v12109_v33 = vld [vmem:[%s13154_s17 + $0xd24] sm:$0xf] }
 0x38a   : > { %7105 = vmatpush.bf16.msrb.mxu1 %v9354_v32  ;;  %v9394_v32 = vor.u32 %v12043_v17, %v9391_v5  ;;  %v6879_v31 = vpop.f32.mrf.mxu3  ;;  %v9551_v17 = vld [vmem:[%s13154_s17 + $0xc58] sm:$0xf0]  ;;  %v12099_v5 = vld [vmem:[%s13154_s17 + $0xcd4] sm:$0xf]  ;;  %v9607_v22 = vld [vmem:[%s13154_s17 + $0xcc8] sm:$0xf0] }
 0x38b   : > { %7118 = vmatpush.bf16.msrb.mxu2 %v9418_v60  ;;  %v12025_v60 = vld [vmem:[%s13154_s17 + $0xa84] sm:$0xf] }
 0x38c   : > { %7131 = vmatpush.bf16.msrb.mxu3 %v9482_v25  ;;  %v9383_v25 = vld [vmem:[%s13154_s17 + $0xb08] sm:$0xf0]  ;;  %v9322_v10 = vor.u32 %v12025_v60, %v9319_v57  ;;  %v12081_v57 = vld [vmem:[%s13154_s17 + $0xc44] sm:$0xf] }
 0x38d   : > { %7093 = vmatpush.bf16.msrb.mxu0 %v9282_v2  ;;  %v9258_v2 = vor.u32 %v12009_v26, %v9255_v13  ;;  %v9386_v11 = vor.u32 %v12041_v29, %v9383_v25  ;;  %v9679_v26 = vld [vmem:[%s13154_s17 + $0xd58] sm:$0xf0]  ;;  %v12131_v13 = vld [vmem:[%s13154_s17 + $0xdd4] sm:$0xf]  ;;  %v9543_v29 = vld [vmem:[%s13154_s17 + $0xc48] sm:$0xf0] }
 0x38e   : > { %7106 = vmatpush.bf16.msrb.mxu1 %v9346_v0  ;;  %v9631_v0 = vld [vmem:[%s13154_s17 + $0xcf8] sm:$0xf0]  ;;  %v9671_v25 = vld [vmem:[%s13154_s17 + $0xd48] sm:$0xf0]  ;;  %v9546_v53 = vor.u32 %v12081_v57, %v9543_v29  ;;  %v12107_v57 = vld [vmem:[%s13154_s17 + $0xd14] sm:$0xf] }
 0x38f   : > { %7119 = vmatpush.bf16.msrb.mxu2 %v9410_v34  ;;  %v12119_v34 = vld [vmem:[%s13154_s17 + $0xd74] sm:$0xf]  ;;  %v9634_v51 = vor.u32 %v12103_v21, %v9631_v0  ;;  %v9647_v29 = vld [vmem:[%s13154_s17 + $0xd18] sm:$0xf0] }
 0x390   : > { %7132 = vmatpush.bf16.msrb.mxu3 %v9474_v6  ;;  %v9759_v6 = vld [vmem:[%s13154_s17 + $0xdf8] sm:$0xf0]  ;;  %v9698_v14 = vor.u32 %v12119_v34, %v9695_v19  ;;  %v12079_v21 = vld [vmem:[%s13154_s17 + $0xc34] sm:$0xf] }
 0x391   : > { %7094 = vmatpush.bf16.msrb.mxu0 %v9274_v12  ;;  %v9762_v12 = vor.u32 %v12135_v1, %v9759_v6  ;;  %v12095_v0 = vld [vmem:[%s13154_s17 + $0xcb4] sm:$0xf]  ;;  %v9663_v6 = vld [vmem:[%s13154_s17 + $0xd38] sm:$0xf0] }
 0x392   : > { %7107 = vmatpush.bf16.msrb.mxu1 %v9338_v48  ;;  %v12117_v48 = vld [vmem:[%s13154_s17 + $0xd64] sm:$0xf]  ;;  %v12111_v1 = vld [vmem:[%s13154_s17 + $0xd34] sm:$0xf] }
 0x393   : > { %7120 = vmatpush.bf16.msrb.mxu2 %v9402_v4  ;;  %v9687_v4 = vld [vmem:[%s13154_s17 + $0xd68] sm:$0xf0]  ;;  %v9666_v24 = vor.u32 %v12111_v1, %v9663_v6  ;;  %v12167_v1 = vld [vmem:[%s13154_s17 + $0xef4] sm:$0xf] }
 0x394   : > { %7133 = vmatpush.bf16.msrb.mxu3 %v9466_v56  ;;  %v9690_v56 = vor.u32 %v12117_v48, %v9687_v4  ;;  %v9591_v4 = vld [vmem:[%s13154_s17 + $0xca8] sm:$0xf0] }
 0x395   : > { %7095 = vmatpush.bf16.msrb.mxu0 %v9266_v20  ;;  %v12115_v20 = vld [vmem:[%s13154_s17 + $0xd54] sm:$0xf] }
 0x396   : > { %7108 = vmatpush.bf16.msrb.mxu1 %v9330_v18  ;;  %v9743_v18 = vld [vmem:[%s13154_s17 + $0xdd8] sm:$0xf0]  ;;  %v9682_v60 = vor.u32 %v12115_v20, %v9679_v26  ;;  %v9658_v20 = vor.u32 %v12109_v33, %v9655_v15  ;;  %v12075_v26 = vld [vmem:[%s13154_s17 + $0xc14] sm:$0xf]  ;;  %v9815_v33 = vld [vmem:[%s13154_s17 + $0xe68] sm:$0xf0] }
 0x397   : > { %7121 = vmatpush.bf16.msrb.mxu2 %v9394_v32  ;;  %v9618_v32 = vor.u32 %v12099_v5, %v9615_v30  ;;  %v12165_v15 = vld [vmem:[%s13154_s17 + $0xee4] sm:$0xf] }
 0x398   : > { %7134 = vmatpush.bf16.msrb.mxu3 %v9458_v42  ;;  %v12113_v42 = vld [vmem:[%s13154_s17 + $0xd44] sm:$0xf] }
 0x399   : > { %7096 = vmatpush.bf16.msrb.mxu0 %v9258_v2  ;;  %v6890_v31 = vpop.f32.mrf.mxu0  ;;  %v9674_v54 = vor.u32 %v12113_v42, %v9671_v25  ;;  %v9535_v2 = vld [vmem:[%s13154_s17 + $0xc38] sm:$0xf0]  ;;  %v12073_v42 = vld [vmem:[%s13154_s17 + $0xc04] sm:$0xf]  ;;  %v9511_v25 = vld [vmem:[%s13154_s17 + $0xc08] sm:$0xf0] }
 0x39a   : > { %7109 = vmatpush.bf16.msrb.mxu1 %v9322_v10  ;;  %v6891_v34 = vadd.f32 %v6890_v31, %v14708_v39  ;;  %v6903_v19 = vpop.f32.mrf.mxu1  ;;  %v9575_v31 = vld [vmem:[%s13154_s17 + $0xc88] sm:$0xf0]  ;;  %v9514_v6 = vor.u32 %v12073_v42, %v9511_v25  ;;  %v12145_v25 = vld [vmem:[%s13154_s17 + $0xe44] sm:$0xf] }
 0x39b   : > { %7122 = vmatpush.bf16.msrb.mxu2 %v9386_v11  ;;  %v9599_v11 = vld [vmem:[%s13154_s17 + $0xcb8] sm:$0xf0] }
 0x39c   : > { %7135 = vmatpush.bf16.msrb.mxu3 %v9450_v8  ;;  %7097 = vmatmul.bf16.vlgmr.msrb.gmra.mxu0 %v13665_v40  ;;  %v9554_v40 = vor.u32 %v12083_v36, %v9551_v17  ;;  %v12127_v8 = vld [vmem:[%s13154_s17 + $0xdb4] sm:$0xf]  ;;  %v9602_v39 = vor.u32 %v12095_v0, %v9599_v11  ;;  %v9719_v36 = vld [vmem:[%s13154_s17 + $0xda8] sm:$0xf0]  ;;  %v9530_v17 = vor.u32 %v12077_v7, %v9527_v62  ;;  %v12121_v0 = vld [vmem:[%s13154_s17 + $0xd84] sm:$0xf] }
 0x39d   : > { %7141 = vmatpush.bf16.msra.mxu0 %v9570_v59  ;;  %7110 = vmatmul.bf16.vlgmr.msrb.gmra.mxu1 %v13672_v46  ;;  %v9746_v46 = vor.u32 %v12131_v13, %v9743_v18  ;;  %v9727_v59 = vld [vmem:[%s13154_s17 + $0xdb8] sm:$0xf0]  ;;  %v12091_v18 = vld [vmem:[%s13154_s17 + $0xc94] sm:$0xf] }
 0x39e   : > { %7154 = vmatpush.bf16.msra.mxu1 %v9634_v51  ;;  %7123 = vmatmul.bf16.vlgmr.msrb.gmra.mxu2 %v13670_v45  ;;  %v12097_v45 = vld [vmem:[%s13154_s17 + $0xcc4] sm:$0xf]  ;;  %v6904_v51 = vadd.f32 %v6903_v19, %v6891_v34  ;;  %v9730_v48 = vor.u32 %v12127_v8, %v9727_v59  ;;  %v9519_v13 = vld [vmem:[%s13154_s17 + $0xc18] sm:$0xf0]  ;;  %v9703_v34 = vld [vmem:[%s13154_s17 + $0xd88] sm:$0xf0] }
 0x39f   : > { %7167 = vmatpush.bf16.msra.mxu2 %v9698_v14  ;;  %7136 = vmatmul.bf16.vlgmr.msrb.gmra.mxu3 %v13676_v49  ;;  %v9735_v49 = vld [vmem:[%s13154_s17 + $0xdc8] sm:$0xf0]  ;;  %v9610_v27 = vor.u32 %v12097_v45, %v9607_v22  ;;  %v9538_v14 = vor.u32 %v12079_v21, %v9535_v2  ;;  %v12123_v45 = vld [vmem:[%s13154_s17 + $0xd94] sm:$0xf]  ;;  %v9522_v22 = vor.u32 %v12075_v26, %v9519_v13  ;;  %v9823_v11 = vld [vmem:[%s13154_s17 + $0xe78] sm:$0xf0] }
 0x3a0   : > { %7180 = vmatpush.bf16.msra.mxu3 %v9762_v12  ;;  %v9738_v10 = vor.u32 %v12129_v52, %v9735_v49  ;;  %v12093_v12 = vld [vmem:[%s13154_s17 + $0xca4] sm:$0xf]  ;;  %v9650_v49 = vor.u32 %v12107_v57, %v9647_v29  ;;  %v9639_v2 = vld [vmem:[%s13154_s17 + $0xd08] sm:$0xf0]  ;;  %v9887_v8 = vld [vmem:[%s13154_s17 + $0xef8] sm:$0xf0]  ;;  %v9706_v62 = vor.u32 %v12121_v0, %v9703_v34 }
 0x3a1   : > { %7142 = vmatpush.bf16.msra.mxu0 %v9562_v16  ;;  %v6916_v41 = vpop.f32.mrf.mxu2  ;;  %v9594_v30 = vor.u32 %v12093_v12, %v9591_v4  ;;  %v12183_v59 = vld [vmem:[%s13154_s17 + $0xf74] sm:$0xf]  ;;  %v10015_v7 = vld [vmem:[%s13154_s17 + $0xff8] sm:$0xf0]  ;;  %v12149_v4 = vld [vmem:[%s13154_s17 + $0xe64] sm:$0xf] }
 0x3a2   : > { %7155 = vmatpush.bf16.msra.mxu1 %v9626_v61  ;;  %v6917_v16 = vadd.f32 %v6916_v41, %v6904_v51  ;;  %v6929_v61 = vpop.f32.mrf.mxu3  ;;  %v9951_v51 = vld [vmem:[%s13154_s17 + $0xf78] sm:$0xf0]  ;;  %v9890_v41 = vor.u32 %v12167_v1, %v9887_v8  ;;  %v12147_v13 = vld [vmem:[%s13154_s17 + $0xe54] sm:$0xf] }
 0x3a3   : > { %7168 = vmatpush.bf16.msra.mxu2 %v9690_v56  ;;  %v12125_v56 = vld [vmem:[%s13154_s17 + $0xda4] sm:$0xf]  ;;  %v12179_v57 = vld [vmem:[%s13154_s17 + $0xf54] sm:$0xf]  ;;  %v9935_v29 = vld [vmem:[%s13154_s17 + $0xf58] sm:$0xf0] }
 0x3a4   : > { %7181 = vmatpush.bf16.msra.mxu3 %v9754_v35  ;;  %v14779_v5 = vadd.f32 %v6929_v61, %v6917_v16  ;;  %v6892_v35 = vpop.f32.mrf.mxu0  ;;  %v9879_v61 = vld [vmem:[%s13154_s17 + $0xee8] sm:$0xf0]  ;;  %v9938_v42 = vor.u32 %v12179_v57, %v9935_v29  ;;  %v12159_v1 = vld [vmem:[%s13154_s17 + $0xeb4] sm:$0xf] }
 0x3a5   : > { %7143 = vmatpush.bf16.msra.mxu0 %v9554_v40  ;;  %v6905_v40 = vpop.f32.mrf.mxu1  ;;  %v10007_v35 = vld [vmem:[%s13154_s17 + $0xfe8] sm:$0xf0]  ;;  %v12155_v57 = vld [vmem:[%s13154_s17 + $0xe94] sm:$0xf] }
 0x3a6   : > { %7156 = vmatpush.bf16.msra.mxu1 %v9618_v32  ;;  %v9722_v32 = vor.u32 %v12125_v56, %v9719_v36  ;;  %v12181_v56 = vld [vmem:[%s13154_s17 + $0xf64] sm:$0xf]  ;;  %v9943_v36 = vld [vmem:[%s13154_s17 + $0xf68] sm:$0xf0]  ;;  %v12163_v40 = vld [vmem:[%s13154_s17 + $0xed4] sm:$0xf] }
 0x3a7   : > { %7169 = vmatpush.bf16.msra.mxu2 %v9682_v60  ;;  %v9583_v60 = vld [vmem:[%s13154_s17 + $0xc98] sm:$0xf0]  ;;  %v9946_v26 = vor.u32 %v12181_v56, %v9943_v36 }
 0x3a8   : > { %7182 = vmatpush.bf16.msra.mxu3 %v9746_v46  ;;  %v9711_v46 = vld [vmem:[%s13154_s17 + $0xd98] sm:$0xf0]  ;;  %v9586_v52 = vor.u32 %v12091_v18, %v9583_v60 }
 0x3a9   : > { %7144 = vmatpush.bf16.msra.mxu0 %v9546_v53  ;;  %v12089_v53 = vld [vmem:[%s13154_s17 + $0xc84] sm:$0xf]  ;;  %v9714_v21 = vor.u32 %v12123_v45, %v9711_v46  ;;  %v9807_v18 = vld [vmem:[%s13154_s17 + $0xe58] sm:$0xf0]  ;;  %v12195_v45 = vld [vmem:[%s13154_s17 + $0xfd4] sm:$0xf] }
 0x3aa   : > { %7157 = vmatpush.bf16.msra.mxu1 %v9610_v27  ;;  %v12105_v27 = vld [vmem:[%s13154_s17 + $0xd04] sm:$0xf]  ;;  %v6931_v19 = vpop.f32.mrf.mxu3  ;;  %v9871_v60 = vld [vmem:[%s13154_s17 + $0xed8] sm:$0xf0] }
 0x3ab   : > { %7170 = vmatpush.bf16.msra.mxu2 %v9674_v54  ;;  %v6918_v54 = vpop.f32.mrf.mxu2  ;;  %v9999_v46 = vld [vmem:[%s13154_s17 + $0xfd8] sm:$0xf0] }
 0x3ac   : > { %7183 = vmatpush.bf16.msra.mxu3 %v9738_v10  ;;  %v12151_v10 = vld [vmem:[%s13154_s17 + $0xe74] sm:$0xf]  ;;  %v9991_v54 = vld [vmem:[%s13154_s17 + $0xfc8] sm:$0xf0] }
 0x3ad   : > { %7145 = vmatpush.bf16.msra.mxu0 %v9538_v14  ;;  %v9578_v14 = vor.u32 %v12089_v53, %v9575_v31  ;;  %v9826_v12 = vor.u32 %v12151_v10, %v9823_v11  ;;  %v12177_v53 = vld [vmem:[%s13154_s17 + $0xf44] sm:$0xf]  ;;  %v9927_v31 = vld [vmem:[%s13154_s17 + $0xf48] sm:$0xf0]  ;;  %v12143_v10 = vld [vmem:[%s13154_s17 + $0xe34] sm:$0xf] }
 0x3ae   : > { %7158 = vmatpush.bf16.msra.mxu1 %v9602_v39  ;;  %v9642_v39 = vor.u32 %v12105_v27, %v9639_v2  ;;  %v12193_v27 = vld [vmem:[%s13154_s17 + $0xfc4] sm:$0xf]  ;;  %v9930_v19 = vor.u32 %v12177_v53, %v9927_v31  ;;  %v9791_v11 = vld [vmem:[%s13154_s17 + $0xe38] sm:$0xf0]  ;;  %v9831_v31 = vld [vmem:[%s13154_s17 + $0xe88] sm:$0xf0] }
 0x3af   : > { %7171 = vmatpush.bf16.msra.mxu2 %v9666_v24  ;;  %v12199_v24 = vld [vmem:[%s13154_s17 + $0xff4] sm:$0xf]  ;;  %v12153_v53 = vld [vmem:[%s13154_s17 + $0xe84] sm:$0xf] }
 0x3b0   : > { %7184 = vmatpush.bf16.msra.mxu3 %v9730_v48  ;;  %v9954_v48 = vor.u32 %v12183_v59, %v9951_v51  ;;  %v10018_v16 = vor.u32 %v12199_v24, %v10015_v7  ;;  %v9855_v59 = vld [vmem:[%s13154_s17 + $0xeb8] sm:$0xf0]  ;;  %v12175_v51 = vld [vmem:[%s13154_s17 + $0xf34] sm:$0xf]  ;;  %v9794_v24 = vor.u32 %v12143_v10, %v9791_v11 }
 0x3b1   : > { %7146 = vmatpush.bf16.msra.mxu0 %v9530_v17  ;;  %v12197_v17 = vld [vmem:[%s13154_s17 + $0xfe4] sm:$0xf]  ;;  %v9858_v7 = vor.u32 %v12159_v1, %v9855_v59  ;;  %v12231_v10 = vld [vmem:[%s13154_s17 + $0x10f4] sm:$0xf]  ;;  %v10207_v59 = vld [vmem:[%s13154_s17 + $0x1178] sm:$0xf0] }
 0x3b2   : > { %7159 = vmatpush.bf16.msra.mxu1 %v9594_v30  ;;  %v9818_v30 = vor.u32 %v12149_v4, %v9815_v33 }
 0x3b3   : > { %7172 = vmatpush.bf16.msra.mxu2 %v9658_v20  ;;  %v9882_v20 = vor.u32 %v12165_v15, %v9879_v61  ;;  %v9847_v15 = vld [vmem:[%s13154_s17 + $0xea8] sm:$0xf0] }
 0x3b4   : > { %7185 = vmatpush.bf16.msra.mxu3 %v9722_v32  ;;  %v10010_v32 = vor.u32 %v12197_v17, %v10007_v35  ;;  %v9911_v61 = vld [vmem:[%s13154_s17 + $0xf28] sm:$0xf0]  ;;  %v12189_v17 = vld [vmem:[%s13154_s17 + $0xfa4] sm:$0xf] }
 0x3b5   : > { %7147 = vmatpush.bf16.msra.mxu0 %v9522_v22  ;;  %v9874_v22 = vor.u32 %v12163_v40, %v9871_v60  ;;  %v9975_v35 = vld [vmem:[%s13154_s17 + $0xfa8] sm:$0xf0]  ;;  %v9775_v60 = vld [vmem:[%s13154_s17 + $0xe18] sm:$0xf0] }
 0x3b6   : > { %7160 = vmatpush.bf16.msra.mxu1 %v9586_v52  ;;  %v9799_v52 = vld [vmem:[%s13154_s17 + $0xe48] sm:$0xf0]  ;;  %v9978_v29 = vor.u32 %v12189_v17, %v9975_v35 }
 0x3b7   : > { %7173 = vmatpush.bf16.msra.mxu2 %v9650_v49  ;;  %v9863_v49 = vld [vmem:[%s13154_s17 + $0xec8] sm:$0xf0]  ;;  %v9802_v2 = vor.u32 %v12145_v25, %v9799_v52  ;;  %v12137_v52 = vld [vmem:[%s13154_s17 + $0xe04] sm:$0xf] }
 0x3b8   : > { %7186 = vmatpush.bf16.msra.mxu3 %v9714_v21 }
 0x3b9   : > { %7148 = vmatpush.bf16.msra.mxu0 %v9514_v6  ;;  %v9994_v6 = vor.u32 %v12193_v27, %v9991_v54  ;;  %v9895_v54 = vld [vmem:[%s13154_s17 + $0xf08] sm:$0xf0] }
 0x3ba   : > { %7161 = vmatpush.bf16.msra.mxu1 %v9578_v14  ;;  %v6955_v0 = vpop.f32.mrf.mxu1  ;;  %v12191_v14 = vld [vmem:[%s13154_s17 + $0xfb4] sm:$0xf] }
 0x3bb   : > { %7174 = vmatpush.bf16.msra.mxu2 %v9642_v39  ;;  %v9983_v39 = vld [vmem:[%s13154_s17 + $0xfb8] sm:$0xf0] }
 0x3bc   : > { %7187 = vmatpush.bf16.msra.mxu3 %v9706_v62  ;;  %7149 = vmatmul.bf16.vlgmr.msra.gmra.mxu0 %v13745_v38  ;;  %v9810_v38 = vor.u32 %v12147_v13, %v9807_v18  ;;  %v9986_v4 = vor.u32 %v12191_v14, %v9983_v39  ;;  %v12263_v14 = vld [vmem:[%s13154_s17 + $0x11f4] sm:$0xf]  ;;  %v10271_v39 = vld [vmem:[%s13154_s17 + $0x11f8] sm:$0xf0] }
 0x3bd   : > { %7193 = vmatpush.bf16.msrb.mxu0 %v9826_v12  ;;  %7162 = vmatmul.bf16.vlgmr.msra.gmra.mxu1 %v13752_v44  ;;  %v10002_v44 = vor.u32 %v12195_v45, %v9999_v46  ;;  %v12141_v12 = vld [vmem:[%s13154_s17 + $0xe24] sm:$0xf]  ;;  %v9839_v45 = vld [vmem:[%s13154_s17 + $0xe98] sm:$0xf0]  ;;  %v12171_v46 = vld [vmem:[%s13154_s17 + $0xf14] sm:$0xf] }
 0x3be   : > { %7206 = vmatpush.bf16.msrb.mxu1 %v9890_v41  ;;  %7175 = vmatmul.bf16.vlgmr.msra.gmra.mxu2 %v13750_v43  ;;  %v12161_v43 = vld [vmem:[%s13154_s17 + $0xec4] sm:$0xf]  ;;  %v9783_v41 = vld [vmem:[%s13154_s17 + $0xe28] sm:$0xf0] }
 0x3bf   : > { %7219 = vmatpush.bf16.msrb.mxu2 %v9954_v48  ;;  %7188 = vmatmul.bf16.vlgmr.msra.gmra.mxu3 %v13756_v50  ;;  %v6942_v50 = vpop.f32.mrf.mxu0  ;;  %v9866_v34 = vor.u32 %v12161_v43, %v9863_v49  ;;  %v12157_v48 = vld [vmem:[%s13154_s17 + $0xea4] sm:$0xf]  ;;  %v9767_v43 = vld [vmem:[%s13154_s17 + $0xe08] sm:$0xf0] }
 0x3c0   : > { %7232 = vmatpush.bf16.msrb.mxu3 %v10018_v16  ;;  %v6943_v21 = vadd.f32 %v6942_v50, %v14779_v5  ;;  %v9919_v5 = vld [vmem:[%s13154_s17 + $0xf38] sm:$0xf0]  ;;  %v12173_v16 = vld [vmem:[%s13154_s17 + $0xf24] sm:$0xf]  ;;  %v9850_v18 = vor.u32 %v12157_v48, %v9847_v15  ;;  %v9770_v1 = vor.u32 %v12137_v52, %v9767_v43  ;;  %v10071_v48 = vld [vmem:[%s13154_s17 + $0x1068] sm:$0xf0] }
 0x3c1   : > { %7194 = vmatpush.bf16.msrb.mxu0 %v9818_v30  ;;  %v9922_v62 = vor.u32 %v12175_v51, %v9919_v5  ;;  %v6968_v33 = vpop.f32.mrf.mxu2  ;;  %v9914_v40 = vor.u32 %v12173_v16, %v9911_v61  ;;  %v12169_v50 = vld [vmem:[%s13154_s17 + $0xf04] sm:$0xf]  ;;  %v9834_v51 = vor.u32 %v12153_v53, %v9831_v31  ;;  %v10135_v15 = vld [vmem:[%s13154_s17 + $0x10e8] sm:$0xf0] }
 0x3c2   : > { %7207 = vmatpush.bf16.msrb.mxu1 %v9882_v20  ;;  %v6956_v8 = vadd.f32 %v6955_v0, %v6943_v21  ;;  %v6981_v36 = vpop.f32.mrf.mxu3  ;;  %v9786_v20 = vor.u32 %v12141_v12, %v9783_v41  ;;  %v12185_v21 = vld [vmem:[%s13154_s17 + $0xf84] sm:$0xf]  ;;  %v9898_v5 = vor.u32 %v12169_v50, %v9895_v54  ;;  %v10199_v61 = vld [vmem:[%s13154_s17 + $0x1168] sm:$0xf0] }
 0x3c3   : > { %7220 = vmatpush.bf16.msrb.mxu2 %v9946_v26  ;;  %v6957_v26 = vpop.f32.mrf.mxu1  ;;  %v12213_v41 = vld [vmem:[%s13154_s17 + $0x1064] sm:$0xf]  ;;  %v10183_v43 = vld [vmem:[%s13154_s17 + $0x1148] sm:$0xf0] }
 0x3c4   : > { %7233 = vmatpush.bf16.msrb.mxu3 %v10010_v32  ;;  %v6969_v56 = vadd.f32 %v6968_v33, %v6956_v8  ;;  %v12139_v32 = vld [vmem:[%s13154_s17 + $0xe14] sm:$0xf]  ;;  %v10274_v33 = vor.u32 %v12263_v14, %v10271_v39  ;;  %v12245_v16 = vld [vmem:[%s13154_s17 + $0x1164] sm:$0xf]  ;;  %v10074_v17 = vor.u32 %v12213_v41, %v10071_v48  ;;  %v10063_v26 = vld [vmem:[%s13154_s17 + $0x1058] sm:$0xf0] }
 0x3c5   : > { %7195 = vmatpush.bf16.msrb.mxu0 %v9810_v38  ;;  %v9903_v38 = vld [vmem:[%s13154_s17 + $0xf18] sm:$0xf0]  ;;  %v9778_v25 = vor.u32 %v12139_v32, %v9775_v60  ;;  %v12247_v8 = vld [vmem:[%s13154_s17 + $0x1174] sm:$0xf]  ;;  %v12241_v52 = vld [vmem:[%s13154_s17 + $0x1144] sm:$0xf] }
 0x3c6   : > { %7208 = vmatpush.bf16.msrb.mxu1 %v9874_v22  ;;  %v14850_v13 = vadd.f32 %v6981_v36, %v6969_v56  ;;  %v12187_v22 = vld [vmem:[%s13154_s17 + $0xf94] sm:$0xf]  ;;  %v9906_v49 = vor.u32 %v12171_v46, %v9903_v38  ;;  %v10210_v12 = vor.u32 %v12247_v8, %v10207_v59  ;;  %v12261_v56 = vld [vmem:[%s13154_s17 + $0x11e4] sm:$0xf]  ;;  %v10263_v36 = vld [vmem:[%s13154_s17 + $0x11e8] sm:$0xf0]  ;;  %v10186_v54 = vor.u32 %v12241_v52, %v10183_v43 }
 0x3c7   : > { %7221 = vmatpush.bf16.msrb.mxu2 %v9938_v42  ;;  %v6944_v30 = vpop.f32.mrf.mxu0  ;;  %v9967_v42 = vld [vmem:[%s13154_s17 + $0xf98] sm:$0xf0]  ;;  %v12243_v60 = vld [vmem:[%s13154_s17 + $0x1154] sm:$0xf]  ;;  %v10039_v14 = vld [vmem:[%s13154_s17 + $0x1028] sm:$0xf0] }
 0x3c8   : > { %7234 = vmatpush.bf16.msrb.mxu3 %v10002_v44  ;;  %v9842_v44 = vor.u32 %v12155_v57, %v9839_v45  ;;  %v9970_v27 = vor.u32 %v12187_v22, %v9967_v42  ;;  %v10202_v30 = vor.u32 %v12245_v16, %v10199_v61  ;;  %v10127_v32 = vld [vmem:[%s13154_s17 + $0x10d8] sm:$0xf0]  ;;  %v12209_v22 = vld [vmem:[%s13154_s17 + $0x1044] sm:$0xf]  ;;  %v10055_v42 = vld [vmem:[%s13154_s17 + $0x1048] sm:$0xf0] }
 0x3c9   : > { %7196 = vmatpush.bf16.msrb.mxu0 %v9802_v2  ;;  %v9959_v2 = vld [vmem:[%s13154_s17 + $0xf88] sm:$0xf0]  ;;  %v6970_v0 = vpop.f32.mrf.mxu2  ;;  %v10191_v57 = vld [vmem:[%s13154_s17 + $0x1158] sm:$0xf0]  ;;  %v10058_v31 = vor.u32 %v12209_v22, %v10055_v42  ;;  %v12221_v39 = vld [vmem:[%s13154_s17 + $0x10a4] sm:$0xf] }
 0x3ca   : > { %7209 = vmatpush.bf16.msrb.mxu1 %v9866_v34  ;;  %v12215_v34 = vld [vmem:[%s13154_s17 + $0x1074] sm:$0xf]  ;;  %v6983_v11 = vpop.f32.mrf.mxu3  ;;  %v10255_v45 = vld [vmem:[%s13154_s17 + $0x11d8] sm:$0xf0]  ;;  %v10194_v38 = vor.u32 %v12243_v60, %v10191_v57  ;;  %v10167_v41 = vld [vmem:[%s13154_s17 + $0x1128] sm:$0xf0] }
 0x3cb   : > { %7222 = vmatpush.bf16.msrb.mxu2 %v9930_v19  ;;  %v10079_v19 = vld [vmem:[%s13154_s17 + $0x1078] sm:$0xf0]  ;;  %v12223_v0 = vld [vmem:[%s13154_s17 + $0x10b4] sm:$0xf]  ;;  %v12217_v42 = vld [vmem:[%s13154_s17 + $0x1084] sm:$0xf] }
 0x3cc   : > { %7235 = vmatpush.bf16.msrb.mxu3 %v9994_v6  ;;  %v10143_v6 = vld [vmem:[%s13154_s17 + $0x10f8] sm:$0xf0]  ;;  %v12239_v11 = vld [vmem:[%s13154_s17 + $0x1134] sm:$0xf]  ;;  %v10151_v52 = vld [vmem:[%s13154_s17 + $0x1108] sm:$0xf0] }
 0x3cd   : > { %7197 = vmatpush.bf16.msrb.mxu0 %v9794_v24  ;;  %v9962_v24 = vor.u32 %v12185_v21, %v9959_v2  ;;  %v12207_v21 = vld [vmem:[%s13154_s17 + $0x1034] sm:$0xf]  ;;  %v10047_v2 = vld [vmem:[%s13154_s17 + $0x1038] sm:$0xf0]  ;;  %v12249_v43 = vld [vmem:[%s13154_s17 + $0x1184] sm:$0xf] }
 0x3ce   : > { %7210 = vmatpush.bf16.msrb.mxu1 %v9858_v7  ;;  %v10082_v7 = vor.u32 %v12215_v34, %v10079_v19  ;;  %v10050_v8 = vor.u32 %v12207_v21, %v10047_v2  ;;  %v10159_v60 = vld [vmem:[%s13154_s17 + $0x1118] sm:$0xf0]  ;;  %v12251_v57 = vld [vmem:[%s13154_s17 + $0x1194] sm:$0xf] }
 0x3cf   : > { %7223 = vmatpush.bf16.msrb.mxu2 %v9922_v62  ;;  %v10146_v62 = vor.u32 %v12231_v10, %v10143_v6  ;;  %v10111_v10 = vld [vmem:[%s13154_s17 + $0x10b8] sm:$0xf0]  ;;  %v12311_v21 = vld [vmem:[%s13154_s17 + $0x1374] sm:$0xf] }
 0x3d0   : > { %7236 = vmatpush.bf16.msrb.mxu3 %v9986_v4  ;;  %v12229_v4 = vld [vmem:[%s13154_s17 + $0x10e4] sm:$0xf]  ;;  %v10239_v6 = vld [vmem:[%s13154_s17 + $0x11b8] sm:$0xf0]  ;;  %v10114_v59 = vor.u32 %v12223_v0, %v10111_v10 }
 0x3d1   : > { %7198 = vmatpush.bf16.msrb.mxu0 %v9786_v20  ;;  %v10138_v35 = vor.u32 %v12229_v4, %v10135_v15  ;;  %v12211_v20 = vld [vmem:[%s13154_s17 + $0x1054] sm:$0xf]  ;;  %v10231_v15 = vld [vmem:[%s13154_s17 + $0x11a8] sm:$0xf0]  ;;  %v10463_v2 = vld [vmem:[%s13154_s17 + $0x1378] sm:$0xf0] }
 0x3d2   : > { %7211 = vmatpush.bf16.msrb.mxu1 %v9850_v18  ;;  %v12227_v18 = vld [vmem:[%s13154_s17 + $0x10d4] sm:$0xf]  ;;  %v10527_v10 = vld [vmem:[%s13154_s17 + $0x13f8] sm:$0xf0] }
 0x3d3   : > { %7224 = vmatpush.bf16.msrb.mxu2 %v9914_v40  ;;  %v10266_v40 = vor.u32 %v12261_v56, %v10263_v36  ;;  %v10130_v46 = vor.u32 %v12227_v18, %v10127_v32  ;;  %v12235_v32 = vld [vmem:[%s13154_s17 + $0x1114] sm:$0xf] }
 0x3d4   : > { %7237 = vmatpush.bf16.msrb.mxu3 %v9978_v29  ;;  %v12259_v29 = vld [vmem:[%s13154_s17 + $0x11d4] sm:$0xf]  ;;  %v10162_v22 = vor.u32 %v12235_v32, %v10159_v60  ;;  %v12273_v60 = vld [vmem:[%s13154_s17 + $0x1244] sm:$0xf] }
 0x3d5   : > { %7199 = vmatpush.bf16.msrb.mxu0 %v9778_v25  ;;  %v10119_v25 = vld [vmem:[%s13154_s17 + $0x10c8] sm:$0xf0] }
 0x3d6   : > { %7212 = vmatpush.bf16.msrb.mxu1 %v9842_v44  ;;  %v12257_v44 = vld [vmem:[%s13154_s17 + $0x11c4] sm:$0xf] }
 0x3d7   : > { %7225 = vmatpush.bf16.msrb.mxu2 %v9906_v49  ;;  %v10247_v49 = vld [vmem:[%s13154_s17 + $0x11c8] sm:$0xf0] }
 0x3d8   : > { %7238 = vmatpush.bf16.msrb.mxu3 %v9970_v27  ;;  %v10250_v34 = vor.u32 %v12257_v44, %v10247_v49  ;;  %v12279_v49 = vld [vmem:[%s13154_s17 + $0x1274] sm:$0xf] }
 0x3d9   : > { %7200 = vmatpush.bf16.msrb.mxu0 %v9770_v1  ;;  %v12255_v1 = vld [vmem:[%s13154_s17 + $0x11b4] sm:$0xf] }
 0x3da   : > { %7213 = vmatpush.bf16.msrb.mxu1 %v9834_v51  ;;  %v7007_v50 = vpop.f32.mrf.mxu1 }
 0x3db   : > { %7226 = vmatpush.bf16.msrb.mxu2 %v9898_v5  ;;  %v12205_v5 = vld [vmem:[%s13154_s17 + $0x1024] sm:$0xf] }
 0x3dc   : > { %7239 = vmatpush.bf16.msrb.mxu3 %v9962_v24  ;;  %7201 = vmatmul.bf16.vlgmr.msrb.gmra.mxu0 %v13825_v37  ;;  %v10066_v37 = vor.u32 %v12211_v20, %v10063_v26  ;;  %v10242_v24 = vor.u32 %v12255_v1, %v10239_v6  ;;  %v10042_v61 = vor.u32 %v12205_v5, %v10039_v14  ;;  %v10031_v20 = vld [vmem:[%s13154_s17 + $0x1018] sm:$0xf0]  ;;  %v12219_v26 = vld [vmem:[%s13154_s17 + $0x1094] sm:$0xf]  ;;  %v10391_v14 = vld [vmem:[%s13154_s17 + $0x12e8] sm:$0xf0] }
 0x3dd   : > { %7245 = vmatpush.bf16.msra.mxu0 %v10082_v7  ;;  %7214 = vmatmul.bf16.vlgmr.msrb.gmra.mxu1 %v13832_v58  ;;  %v10258_v58 = vor.u32 %v12259_v29, %v10255_v45  ;;  %v10223_v29 = vld [vmem:[%s13154_s17 + $0x1198] sm:$0xf0]  ;;  %v10466_v6 = vor.u32 %v12311_v21, %v10463_v2  ;;  %v12319_v21 = vld [vmem:[%s13154_s17 + $0x13b4] sm:$0xf] }
 0x3de   : > { %7258 = vmatpush.bf16.msra.mxu1 %v10146_v62  ;;  %7227 = vmatmul.bf16.vlgmr.msrb.gmra.mxu2 %v13830_v55  ;;  %v12225_v55 = vld [vmem:[%s13154_s17 + $0x10c4] sm:$0xf]  ;;  %v10103_v62 = vld [vmem:[%s13154_s17 + $0x10a8] sm:$0xf0]  ;;  %v10495_v2 = vld [vmem:[%s13154_s17 + $0x13b8] sm:$0xf0] }
 0x3df   : > { %7271 = vmatpush.bf16.msra.mxu2 %v10210_v12  ;;  %7240 = vmatmul.bf16.vlgmr.msrb.gmra.mxu3 %v13836_v3  ;;  %v6994_v3 = vpop.f32.mrf.mxu0  ;;  %v10122_v27 = vor.u32 %v12225_v55, %v10119_v25  ;;  %v12237_v12 = vld [vmem:[%s13154_s17 + $0x1124] sm:$0xf]  ;;  %v10087_v55 = vld [vmem:[%s13154_s17 + $0x1088] sm:$0xf0]  ;;  %v10226_v25 = vor.u32 %v12251_v57, %v10223_v29 }
 0x3e0   : > { %7284 = vmatpush.bf16.msra.mxu3 %v10274_v33  ;;  %v6995_v53 = vadd.f32 %v6994_v3, %v14850_v13  ;;  %v10175_v13 = vld [vmem:[%s13154_s17 + $0x1138] sm:$0xf0]  ;;  %v12253_v33 = vld [vmem:[%s13154_s17 + $0x11a4] sm:$0xf]  ;;  %v10215_v3 = vld [vmem:[%s13154_s17 + $0x1188] sm:$0xf0]  ;;  %v10090_v0 = vor.u32 %v12217_v42, %v10087_v55 }
 0x3e1   : > { %7246 = vmatpush.bf16.msra.mxu0 %v10074_v17  ;;  %v10178_v51 = vor.u32 %v12239_v11, %v10175_v13  ;;  %v7020_v7 = vpop.f32.mrf.mxu2  ;;  %v10106_v17 = vor.u32 %v12221_v39, %v10103_v62  ;;  %v10234_v18 = vor.u32 %v12253_v33, %v10231_v15  ;;  %v10218_v11 = vor.u32 %v12249_v43, %v10215_v3  ;;  %v12309_v39 = vld [vmem:[%s13154_s17 + $0x1364] sm:$0xf]  ;;  %v10519_v62 = vld [vmem:[%s13154_s17 + $0x13e8] sm:$0xf0]  ;;  %v10319_v33 = vld [vmem:[%s13154_s17 + $0x1258] sm:$0xf0] }
 0x3e2   : > { %7259 = vmatpush.bf16.msra.mxu1 %v10138_v35  ;;  %v7008_v19 = vadd.f32 %v7007_v50, %v6995_v53  ;;  %v7033_v4 = vpop.f32.mrf.mxu3  ;;  %v7009_v56 = vpop.f32.mrf.mxu1  ;;  %v10170_v35 = vor.u32 %v12237_v12, %v10167_v41  ;;  %v10335_v53 = vld [vmem:[%s13154_s17 + $0x1278] sm:$0xf0]  ;;  %v12291_v15 = vld [vmem:[%s13154_s17 + $0x12d4] sm:$0xf]  ;;  %v10311_v57 = vld [vmem:[%s13154_s17 + $0x1248] sm:$0xf0] }
 0x3e3   : > { %7272 = vmatpush.bf16.msra.mxu2 %v10202_v30  ;;  %v12203_v30 = vld [vmem:[%s13154_s17 + $0x1014] sm:$0xf]  ;;  %v10338_v13 = vor.u32 %v12279_v49, %v10335_v53  ;;  %v12289_v29 = vld [vmem:[%s13154_s17 + $0x12c4] sm:$0xf]  ;;  %v10503_v55 = vld [vmem:[%s13154_s17 + $0x13c8] sm:$0xf0] }
 0x3e4   : > { %7285 = vmatpush.bf16.msra.mxu3 %v10266_v40  ;;  %v7021_v48 = vadd.f32 %v7020_v7, %v7008_v19  ;;  %v10095_v40 = vld [vmem:[%s13154_s17 + $0x1098] sm:$0xf0]  ;;  %v10034_v45 = vor.u32 %v12203_v30, %v10031_v20  ;;  %v12327_v19 = vld [vmem:[%s13154_s17 + $0x13f4] sm:$0xf]  ;;  %v12325_v7 = vld [vmem:[%s13154_s17 + $0x13e4] sm:$0xf] }
 0x3e5   : > { %7247 = vmatpush.bf16.msra.mxu0 %v10066_v37  ;;  %v12201_v37 = vld [vmem:[%s13154_s17 + $0x1004] sm:$0xf]  ;;  %v10530_v5 = vor.u32 %v12327_v19, %v10527_v10  ;;  %v12307_v56 = vld [vmem:[%s13154_s17 + $0x1354] sm:$0xf]  ;;  %v15385_v30 = vld [vmem:[#allocation20_spill] sm:$0xff] }
 0x3e6   : > { %7260 = vmatpush.bf16.msra.mxu1 %v10130_v46  ;;  %v14921_v36 = vadd.f32 %v7033_v4, %v7021_v48  ;;  %v10023_v46 = vld [vmem:[%s13154_s17 + $0x1008] sm:$0xf0]  ;;  %v12275_v4 = vld [vmem:[%s13154_s17 + $0x1254] sm:$0xf]  ;;  %v12321_v42 = vld [vmem:[%s13154_s17 + $0x13c4] sm:$0xf] }
 0x3e7   : > { %7273 = vmatpush.bf16.msra.mxu2 %v10194_v38  ;;  %v6996_v16 = vpop.f32.mrf.mxu0  ;;  %v10098_v38 = vor.u32 %v12219_v26, %v10095_v40  ;;  %v12323_v20 = vld [vmem:[%s13154_s17 + $0x13d4] sm:$0xf]  ;;  %v10511_v26 = vld [vmem:[%s13154_s17 + $0x13d8] sm:$0xf0]  ;;  %v12269_v10 = vld [vmem:[%s13154_s17 + $0x1224] sm:$0xf] }
 0x3e8   : > { %7286 = vmatpush.bf16.msra.mxu3 %v10258_v58  ;;  %v12233_v58 = vld [vmem:[%s13154_s17 + $0x1104] sm:$0xf]  ;;  %v10522_v16 = vor.u32 %v12325_v7, %v10519_v62  ;;  %v10303_v49 = vld [vmem:[%s13154_s17 + $0x1238] sm:$0xf0]  ;;  %v12287_v53 = vld [vmem:[%s13154_s17 + $0x12b4] sm:$0xf] }
 0x3e9   : > { %7248 = vmatpush.bf16.msra.mxu0 %v10058_v31  ;;  %v7022_v44 = vpop.f32.mrf.mxu2  ;;  %v12295_v31 = vld [vmem:[%s13154_s17 + $0x12f4] sm:$0xf] }
 0x3ea   : > { %7261 = vmatpush.bf16.msra.mxu1 %v10122_v27  ;;  %v7035_v50 = vpop.f32.mrf.mxu3  ;;  %v10026_v27 = vor.u32 %v12201_v37, %v10023_v46  ;;  %v10375_v37 = vld [vmem:[%s13154_s17 + $0x12c8] sm:$0xf0]  ;;  %v12305_v46 = vld [vmem:[%s13154_s17 + $0x1344] sm:$0xf]  ;;  %v12271_v44 = vld [vmem:[%s13154_s17 + $0x1234] sm:$0xf] }
 0x3eb   : > { %7274 = vmatpush.bf16.msra.mxu2 %v10186_v54  ;;  %v10399_v54 = vld [vmem:[%s13154_s17 + $0x12f8] sm:$0xf0]  ;;  %v10378_v43 = vor.u32 %v12289_v29, %v10375_v37  ;;  %v12297_v29 = vld [vmem:[%s13154_s17 + $0x1304] sm:$0xf]  ;;  %v10407_v37 = vld [vmem:[%s13154_s17 + $0x1308] sm:$0xf0] }
 0x3ec   : > { %7287 = vmatpush.bf16.msra.mxu3 %v10250_v34  ;;  %v10154_v34 = vor.u32 %v12233_v58, %v10151_v52  ;;  %v10402_v1 = vor.u32 %v12295_v31, %v10399_v54  ;;  %v10506_v31 = vor.u32 %v12321_v42, %v10503_v55  ;;  %v12303_v54 = vld [vmem:[%s13154_s17 + $0x1334] sm:$0xf]  ;;  %v10591_v55 = vld [vmem:[%s13154_s17 + $0x1478] sm:$0xf0] }
 0x3ed   : > { %7249 = vmatpush.bf16.msra.mxu0 %v10050_v8  ;;  %v12277_v8 = vld [vmem:[%s13154_s17 + $0x1264] sm:$0xf]  ;;  %v12343_v42 = vld [vmem:[%s13154_s17 + $0x1474] sm:$0xf] }
 0x3ee   : > { %7262 = vmatpush.bf16.msra.mxu1 %v10114_v59  ;;  %v10327_v59 = vld [vmem:[%s13154_s17 + $0x1268] sm:$0xf0] }
 0x3ef   : > { %7275 = vmatpush.bf16.msra.mxu2 %v10178_v51  ;;  %v12293_v51 = vld [vmem:[%s13154_s17 + $0x12e4] sm:$0xf]  ;;  %v10330_v12 = vor.u32 %v12277_v8, %v10327_v59  ;;  %v10359_v8 = vld [vmem:[%s13154_s17 + $0x12a8] sm:$0xf0] }
 0x3f0   : > { %7288 = vmatpush.bf16.msra.mxu3 %v10242_v24  ;;  %v10455_v24 = vld [vmem:[%s13154_s17 + $0x1368] sm:$0xf0]  ;;  %v10394_v41 = vor.u32 %v12293_v51, %v10391_v14  ;;  %v12301_v59 = vld [vmem:[%s13154_s17 + $0x1324] sm:$0xf] }
 0x3f1   : > { %7250 = vmatpush.bf16.msra.mxu0 %v10042_v61  ;;  %v10458_v48 = vor.u32 %v12309_v39, %v10455_v24  ;;  %v10383_v61 = vld [vmem:[%s13154_s17 + $0x12d8] sm:$0xf0]  ;;  %v10423_v51 = vld [vmem:[%s13154_s17 + $0x1328] sm:$0xf0]  ;;  %v12317_v39 = vld [vmem:[%s13154_s17 + $0x13a4] sm:$0xf] }
 0x3f2   : > { %7263 = vmatpush.bf16.msra.mxu1 %v10106_v17  ;;  %v10447_v17 = vld [vmem:[%s13154_s17 + $0x1358] sm:$0xf0]  ;;  %v10386_v40 = vor.u32 %v12291_v15, %v10383_v61  ;;  %v10487_v24 = vld [vmem:[%s13154_s17 + $0x13a8] sm:$0xf0] }
 0x3f3   : > { %7276 = vmatpush.bf16.msra.mxu2 %v10170_v35  ;;  %v15384_v35 = vld [vmem:[#allocation19_spill] sm:$0xff]  ;;  %v10450_v32 = vor.u32 %v12307_v56, %v10447_v17  ;;  %v10287_v15 = vld [vmem:[%s13154_s17 + $0x1218] sm:$0xf0]  ;;  %v10490_v61 = vor.u32 %v12317_v39, %v10487_v24  ;;  %v12299_v17 = vld [vmem:[%s13154_s17 + $0x1314] sm:$0xf] }
 0x3f4   : > { %7289 = vmatpush.bf16.msra.mxu3 %v10234_v18  ;;  %v15386_v18 = vld [vmem:[#allocation21_spill] sm:$0xff]  ;;  %v10351_v56 = vld [vmem:[%s13154_s17 + $0x1298] sm:$0xf0] }
 0x3f5   : > { %7251 = vmatpush.bf16.msra.mxu0 %v10034_v45  ;;  %v10514_v45 = vor.u32 %v12323_v20, %v10511_v26  ;;  %v10479_v20 = vld [vmem:[%s13154_s17 + $0x1398] sm:$0xf0]  ;;  %v12355_v39 = vld [vmem:[%s13154_s17 + $0x14d4] sm:$0xf] }
 0x3f6   : > { %7264 = vmatpush.bf16.msra.mxu1 %v10098_v38  ;;  %v10439_v38 = vld [vmem:[%s13154_s17 + $0x1348] sm:$0xf0]  ;;  %v15387_v24 = vld [vmem:[#allocation22_spill] sm:$0xff] }
 0x3f7   : > { %7277 = vmatpush.bf16.msra.mxu2 %v10162_v22  ;;  %v10442_v3 = vor.u32 %v12305_v46, %v10439_v38  ;;  %v12313_v46 = vld [vmem:[%s13154_s17 + $0x1384] sm:$0xf]  ;;  %v10471_v38 = vld [vmem:[%s13154_s17 + $0x1388] sm:$0xf0] }
 0x3f8   : > { %7290 = vmatpush.bf16.msra.mxu3 %v10226_v25  ;;  %v10314_v25 = vor.u32 %v12273_v60, %v10311_v57  ;;  %v12281_v60 = vld [vmem:[%s13154_s17 + $0x1284] sm:$0xf]  ;;  %v10343_v57 = vld [vmem:[%s13154_s17 + $0x1288] sm:$0xf0] }
 0x3f9   : > { %7252 = vmatpush.bf16.msra.mxu0 %v10026_v27  ;;  %v7046_v22 = vpop.f32.mrf.mxu0  ;;  %v10367_v27 = vld [vmem:[%s13154_s17 + $0x12b8] sm:$0xf0] }
 0x3fa   : > { %7265 = vmatpush.bf16.msra.mxu1 %v10090_v0  ;;  %v7047_v58 = vadd.f32 %v7046_v22, %v14921_v36  ;;  %v7059_v52 = vpop.f32.mrf.mxu1  ;;  %v10431_v36 = vld [vmem:[%s13154_s17 + $0x1338] sm:$0xf0]  ;;  %v10306_v0 = vor.u32 %v12271_v44, %v10303_v49  ;;  %v10346_v49 = vor.u32 %v12281_v60, %v10343_v57  ;;  %v12385_v57 = vld [vmem:[%s13154_s17 + $0x15c4] sm:$0xf] }
 0x3fb   : > { %7278 = vmatpush.bf16.msra.mxu2 %v10154_v34  ;;  %v10370_v34 = vor.u32 %v12287_v53, %v10367_v27  ;;  %v10434_v19 = vor.u32 %v12303_v54, %v10431_v36  ;;  %v10719_v44 = vld [vmem:[%s13154_s17 + $0x1578] sm:$0xf0]  ;;  %v10410_v53 = vor.u32 %v12297_v29, %v10407_v37  ;;  %v10474_v27 = vor.u32 %v12313_v46, %v10471_v38  ;;  %v10759_v29 = vld [vmem:[%s13154_s17 + $0x15c8] sm:$0xf0] }
 0x3fc   : > { %7291 = vmatpush.bf16.msra.mxu3 %v10218_v11  ;;  %7253 = vmatmul.bf16.vlgmr.msra.gmra.mxu0 %v13905_v23  ;;  %v10322_v23 = vor.u32 %v12275_v4, %v10319_v33  ;;  %v7060_v50 = vadd.f32 %v7059_v52, %v7047_v58  ;;  %v10295_v11 = vld [vmem:[%s13154_s17 + $0x1228] sm:$0xf0]  ;;  %v10426_v4 = vor.u32 %v12301_v59, %v10423_v51  ;;  %v12267_v33 = vld [vmem:[%s13154_s17 + $0x1214] sm:$0xf] }
 0x3fd   : > { %7297 = vmatpush.bf16.msrb.mxu0 %v10338_v13  ;;  %7266 = vmatmul.bf16.vlgmr.msra.gmra.mxu1 %v15385_v30  ;;  %v12285_v13 = vld [vmem:[%s13154_s17 + $0x12a4] sm:$0xf]  ;;  %v10298_v62 = vor.u32 %v12269_v10, %v10295_v11  ;;  %v12315_v30 = vld [vmem:[%s13154_s17 + $0x1394] sm:$0xf]  ;;  %v10290_v26 = vor.u32 %v12267_v33, %v10287_v15  ;;  %v10594_v54 = vor.u32 %v12343_v42, %v10591_v55  ;;  %v10647_v10 = vld [vmem:[%s13154_s17 + $0x14e8] sm:$0xf0] }
 0x3fe   : > { %7310 = vmatpush.bf16.msrb.mxu1 %v10402_v1  ;;  %7279 = vmatmul.bf16.vlgmr.msra.gmra.mxu2 %v15384_v35  ;;  %v10498_v1 = vor.u32 %v12319_v21, %v10495_v2  ;;  %v10415_v35 = vld [vmem:[%s13154_s17 + $0x1318] sm:$0xf0]  ;;  %v12359_v58 = vld [vmem:[%s13154_s17 + $0x14f4] sm:$0xf]  ;;  %v12341_v2 = vld [vmem:[%s13154_s17 + $0x1464] sm:$0xf] }
 0x3ff   : > { %7323 = vmatpush.bf16.msrb.mxu2 %v10466_v6  ;;  %7292 = vmatmul.bf16.vlgmr.msra.gmra.mxu3 %v15386_v18  ;;  %v12265_v18 = vld [vmem:[%s13154_s17 + $0x1204] sm:$0xf]  ;;  %v15389_v33 = vld [vmem:[#allocation24_spill] sm:$0xff]  ;;  %v12387_v15 = vld [vmem:[%s13154_s17 + $0x15d4] sm:$0xf] }
 0x400   : > { %7336 = vmatpush.bf16.msrb.mxu3 %v10530_v5  ;;  %v12373_v11 = vld [vmem:[%s13154_s17 + $0x1564] sm:$0xf]  ;;  %v12335_v42 = vld [vmem:[%s13154_s17 + $0x1434] sm:$0xf]  ;;  %v10559_v55 = vld [vmem:[%s13154_s17 + $0x1438] sm:$0xf0] }
 0x401   : > { %7298 = vmatpush.bf16.msrb.mxu0 %v10330_v12  ;;  %v7072_v6 = vpop.f32.mrf.mxu2  ;;  %v7048_v7 = vpop.f32.mrf.mxu0 }
 0x402   : > { %7311 = vmatpush.bf16.msrb.mxu1 %v10394_v41  ;;  %v7073_v5 = vadd.f32 %v7072_v6, %v7060_v50  ;;  %v7085_v14 = vpop.f32.mrf.mxu3  ;;  %v7061_v12 = vpop.f32.mrf.mxu1  ;;  %v10783_v50 = vld [vmem:[%s13154_s17 + $0x15f8] sm:$0xf0]  ;;  %v10775_v6 = vld [vmem:[%s13154_s17 + $0x15e8] sm:$0xf0] }
 0x403   : > { %7324 = vmatpush.bf16.msrb.mxu2 %v10458_v48  ;;  %v10362_v48 = vor.u32 %v12285_v13, %v10359_v8  ;;  %v10711_v13 = vld [vmem:[%s13154_s17 + $0x1568] sm:$0xf0]  ;;  %v12371_v12 = vld [vmem:[%s13154_s17 + $0x1554] sm:$0xf] }
 0x404   : > { %7337 = vmatpush.bf16.msrb.mxu3 %v10522_v16  ;;  %v14992_v41 = vadd.f32 %v7085_v14, %v7073_v5  ;;  %v12283_v16 = vld [vmem:[%s13154_s17 + $0x1294] sm:$0xf]  ;;  %v10714_v51 = vor.u32 %v12373_v11, %v10711_v13  ;;  %v10575_v14 = vld [vmem:[%s13154_s17 + $0x1458] sm:$0xf0]  ;;  %v12381_v13 = vld [vmem:[%s13154_s17 + $0x15a4] sm:$0xf] }
 0x405   : > { %7299 = vmatpush.bf16.msrb.mxu0 %v10322_v23  ;;  %v10279_v23 = vld [vmem:[%s13154_s17 + $0x1208] sm:$0xf0]  ;;  %v12339_v5 = vld [vmem:[%s13154_s17 + $0x1454] sm:$0xf] }
 0x406   : > { %7312 = vmatpush.bf16.msrb.mxu1 %v10386_v40  ;;  %v10354_v40 = vor.u32 %v12283_v16, %v10351_v56  ;;  %v10282_v52 = vor.u32 %v12265_v18, %v10279_v23  ;;  %v10767_v16 = vld [vmem:[%s13154_s17 + $0x15d8] sm:$0xf0]  ;;  %v10578_v56 = vor.u32 %v12339_v5, %v10575_v14  ;;  %v10631_v23 = vld [vmem:[%s13154_s17 + $0x14c8] sm:$0xf0] }
 0x407   : > { %7325 = vmatpush.bf16.msrb.mxu2 %v10450_v32  ;;  %v10418_v32 = vor.u32 %v12299_v17, %v10415_v35  ;;  %v10770_v18 = vor.u32 %v12387_v15, %v10767_v16  ;;  %v10735_v15 = vld [vmem:[%s13154_s17 + $0x1598] sm:$0xf0] }
 0x408   : > { %7338 = vmatpush.bf16.msrb.mxu3 %v10514_v45  ;;  %v10482_v45 = vor.u32 %v12315_v30, %v10479_v20  ;;  %v12337_v30 = vld [vmem:[%s13154_s17 + $0x1444] sm:$0xf]  ;;  %v10567_v20 = vld [vmem:[%s13154_s17 + $0x1448] sm:$0xf0] }
 0x409   : > { %7300 = vmatpush.bf16.msrb.mxu0 %v10314_v25  ;;  %v7074_v22 = vpop.f32.mrf.mxu2  ;;  %v10570_v37 = vor.u32 %v12337_v30, %v10567_v20  ;;  %v12345_v30 = vld [vmem:[%s13154_s17 + $0x1484] sm:$0xf]  ;;  %v10599_v20 = vld [vmem:[%s13154_s17 + $0x1488] sm:$0xf0] }
 0x40a   : > { %7313 = vmatpush.bf16.msrb.mxu1 %v10378_v43  ;;  %v7087_v25 = vpop.f32.mrf.mxu3  ;;  %v10655_v43 = vld [vmem:[%s13154_s17 + $0x14f8] sm:$0xf0] }
 0x40b   : > { %7326 = vmatpush.bf16.msrb.mxu2 %v10442_v3  ;;  %v12375_v3 = vld [vmem:[%s13154_s17 + $0x1574] sm:$0xf]  ;;  %v10658_v36 = vor.u32 %v12359_v58, %v10655_v43  ;;  %v10762_v25 = vor.u32 %v12385_v57, %v10759_v29  ;;  %v10623_v43 = vld [vmem:[%s13154_s17 + $0x14b8] sm:$0xf0] }
 0x40c   : > { %7339 = vmatpush.bf16.msrb.mxu3 %v10506_v31  ;;  %v12391_v31 = vld [vmem:[%s13154_s17 + $0x15f4] sm:$0xf]  ;;  %v10722_v21 = vor.u32 %v12375_v3, %v10719_v44  ;;  %v10847_v29 = vld [vmem:[%s13154_s17 + $0x1678] sm:$0xf0] }
 0x40d   : > { %7301 = vmatpush.bf16.msrb.mxu0 %v10306_v0  ;;  %v10583_v0 = vld [vmem:[%s13154_s17 + $0x1468] sm:$0xf0]  ;;  %v12351_v58 = vld [vmem:[%s13154_s17 + $0x14b4] sm:$0xf] }
 0x40e   : > { %7314 = vmatpush.bf16.msrb.mxu1 %v10370_v34  ;;  %v12357_v34 = vld [vmem:[%s13154_s17 + $0x14e4] sm:$0xf]  ;;  %v10586_v8 = vor.u32 %v12341_v2, %v10583_v0  ;;  %v12367_v3 = vld [vmem:[%s13154_s17 + $0x1534] sm:$0xf]  ;;  %v10615_v0 = vld [vmem:[%s13154_s17 + $0x14a8] sm:$0xf0] }
 0x40f   : > { %7327 = vmatpush.bf16.msrb.mxu2 %v10434_v19  ;;  %v10786_v19 = vor.u32 %v12391_v31, %v10783_v50  ;;  %v10650_v59 = vor.u32 %v12357_v34, %v10647_v10  ;;  %v12383_v44 = vld [vmem:[%s13154_s17 + $0x15b4] sm:$0xf]  ;;  %v10626_v31 = vor.u32 %v12351_v58, %v10623_v43  ;;  %v12365_v34 = vld [vmem:[%s13154_s17 + $0x1524] sm:$0xf] }
 0x410   : > { %7340 = vmatpush.bf16.msrb.mxu3 %v10498_v1  ;;  %v12389_v1 = vld [vmem:[%s13154_s17 + $0x15e4] sm:$0xf]  ;;  %v12407_v57 = vld [vmem:[%s13154_s17 + $0x1674] sm:$0xf] }
 0x411   : > { %7302 = vmatpush.bf16.msrb.mxu0 %v10298_v62  ;;  %v10778_v7 = vor.u32 %v12389_v1, %v10775_v6  ;;  %v10639_v62 = vld [vmem:[%s13154_s17 + $0x14d8] sm:$0xf0]  ;;  %v10743_v1 = vld [vmem:[%s13154_s17 + $0x15a8] sm:$0xf0] }
 0x412   : > { %7315 = vmatpush.bf16.msrb.mxu1 %v10362_v48  ;;  %v10703_v48 = vld [vmem:[%s13154_s17 + $0x1558] sm:$0xf0]  ;;  %v10642_v17 = vor.u32 %v12355_v39, %v10639_v62  ;;  %v12331_v39 = vld [vmem:[%s13154_s17 + $0x1414] sm:$0xf]  ;;  %v10746_v62 = vor.u32 %v12381_v13, %v10743_v1 }
 0x413   : > { %7328 = vmatpush.bf16.msrb.mxu2 %v10426_v4  ;;  %v15388_v4 = vld [vmem:[#allocation23_spill] sm:$0xff]  ;;  %v10706_v35 = vor.u32 %v12371_v12, %v10703_v48  ;;  %v10607_v12 = vld [vmem:[%s13154_s17 + $0x1498] sm:$0xf0]  ;;  %v12363_v48 = vld [vmem:[%s13154_s17 + $0x1514] sm:$0xf] }
 0x414   : > { %7341 = vmatpush.bf16.msrb.mxu3 %v10490_v61  ;;  %v15390_v61 = vld [vmem:[#allocation25_spill] sm:$0xff]  ;;  %v15391_v1 = vld [vmem:[#allocation26_spill] sm:$0xff] }
 0x415   : > { %7303 = vmatpush.bf16.msrb.mxu0 %v10290_v26  ;;  %v12353_v26 = vld [vmem:[%s13154_s17 + $0x14c4] sm:$0xf]  ;;  %v12419_v13 = vld [vmem:[%s13154_s17 + $0x16d4] sm:$0xf] }
 0x416   : > { %7316 = vmatpush.bf16.msrb.mxu1 %v10354_v40  ;;  %v12369_v40 = vld [vmem:[%s13154_s17 + $0x1544] sm:$0xf]  ;;  %v10634_v38 = vor.u32 %v12353_v26, %v10631_v23  ;;  %v10663_v23 = vld [vmem:[%s13154_s17 + $0x1508] sm:$0xf0] }
 0x417   : > { %7329 = vmatpush.bf16.msrb.mxu2 %v10418_v32  ;;  %v10695_v32 = vld [vmem:[%s13154_s17 + $0x1548] sm:$0xf0]  ;;  %v12361_v26 = vld [vmem:[%s13154_s17 + $0x1504] sm:$0xf] }
 0x418   : > { %7342 = vmatpush.bf16.msrb.mxu3 %v10482_v45  ;;  %v10698_v22 = vor.u32 %v12369_v40, %v10695_v32  ;;  %v12377_v40 = vld [vmem:[%s13154_s17 + $0x1584] sm:$0xf]  ;;  %v10727_v32 = vld [vmem:[%s13154_s17 + $0x1588] sm:$0xf0]  ;;  %v10666_v58 = vor.u32 %v12361_v26, %v10663_v23 }
 0x419   : > { %7304 = vmatpush.bf16.msrb.mxu0 %v10282_v52  ;;  %v7098_v60 = vpop.f32.mrf.mxu0  ;;  %v10730_v43 = vor.u32 %v12377_v40, %v10727_v32  ;;  %v11015_v26 = vld [vmem:[%s13154_s17 + $0x17c8] sm:$0xf0] }
 0x41a   : > { %7317 = vmatpush.bf16.msrb.mxu1 %v10346_v49  ;;  %v7099_v45 = vadd.f32 %v7098_v60, %v14992_v41  ;;  %v7111_v46 = vpop.f32.mrf.mxu1  ;;  %v10687_v41 = vld [vmem:[%s13154_s17 + $0x1538] sm:$0xf0] }
 0x41b   : > { %7330 = vmatpush.bf16.msrb.mxu2 %v10410_v53  ;;  %v10751_v49 = vld [vmem:[%s13154_s17 + $0x15b8] sm:$0xf0]  ;;  %v10562_v53 = vor.u32 %v12335_v42, %v10559_v55  ;;  %v10690_v50 = vor.u32 %v12367_v3, %v10687_v41  ;;  %v10602_v55 = vor.u32 %v12345_v30, %v10599_v20  ;;  %v10850_v3 = vor.u32 %v12407_v57, %v10847_v29  ;;  %v12449_v20 = vld [vmem:[%s13154_s17 + $0x17c4] sm:$0xf]  ;;  %v12399_v57 = vld [vmem:[%s13154_s17 + $0x1634] sm:$0xf] }
 0x41c   : > { %7343 = vmatpush.bf16.msrb.mxu3 %v10474_v27  ;;  %7305 = vmatmul.bf16.vlgmr.msrb.gmra.mxu0 %v15387_v24  ;;  %v7112_v52 = vadd.f32 %v7111_v46, %v7099_v45  ;;  %v12333_v27 = vld [vmem:[%s13154_s17 + $0x1424] sm:$0xf]  ;;  %v10543_v24 = vld [vmem:[%s13154_s17 + $0x1418] sm:$0xf0]  ;;  %v12423_v45 = vld [vmem:[%s13154_s17 + $0x16f4] sm:$0xf] }
 0x41d   : > { %7349 = vmatpush.bf16.msra.mxu0 %v10594_v54  ;;  %7318 = vmatmul.bf16.vlgmr.msrb.gmra.mxu1 %v15389_v33  ;;  %v10551_v54 = vld [vmem:[%s13154_s17 + $0x1428] sm:$0xf0]  ;;  %v12379_v33 = vld [vmem:[%s13154_s17 + $0x1594] sm:$0xf]  ;;  %v10546_v16 = vor.u32 %v12331_v39, %v10543_v24  ;;  %v10975_v42 = vld [vmem:[%s13154_s17 + $0x1778] sm:$0xf0] }
 0x41e   : > { %7362 = vmatpush.bf16.msra.mxu1 %v10658_v36  ;;  %7331 = vmatmul.bf16.vlgmr.msrb.gmra.mxu2 %v15388_v4  ;;  %v12349_v36 = vld [vmem:[%s13154_s17 + $0x14a4] sm:$0xf]  ;;  %v10671_v4 = vld [vmem:[%s13154_s17 + $0x1518] sm:$0xf0]  ;;  %v15393_v39 = vld [vmem:[#allocation28_spill] sm:$0xff] }
 0x41f   : > { %7375 = vmatpush.bf16.msra.mxu2 %v10722_v21  ;;  %7344 = vmatmul.bf16.vlgmr.msrb.gmra.mxu3 %v15390_v61  ;;  %v10754_v21 = vor.u32 %v12383_v44, %v10751_v49  ;;  %v10618_v5 = vor.u32 %v12349_v36, %v10615_v0  ;;  %v12329_v61 = vld [vmem:[%s13154_s17 + $0x1404] sm:$0xf]  ;;  %v10967_v36 = vld [vmem:[%s13154_s17 + $0x1768] sm:$0xf0]  ;;  %v12451_v24 = vld [vmem:[%s13154_s17 + $0x17d4] sm:$0xf] }
 0x420   : > { %7388 = vmatpush.bf16.msra.mxu3 %v10786_v19  ;;  %v10679_v19 = vld [vmem:[%s13154_s17 + $0x1528] sm:$0xf0]  ;;  %v12405_v49 = vld [vmem:[%s13154_s17 + $0x1664] sm:$0xf]  ;;  %v10815_v29 = vld [vmem:[%s13154_s17 + $0x1638] sm:$0xf0] }
 0x421   : > { %7350 = vmatpush.bf16.msra.mxu0 %v10586_v8  ;;  %v7124_v2 = vpop.f32.mrf.mxu2  ;;  %v7100_v6 = vpop.f32.mrf.mxu0  ;;  %v10554_v8 = vor.u32 %v12333_v27, %v10551_v54  ;;  %v10682_v14 = vor.u32 %v12365_v34, %v10679_v19  ;;  %v10903_v27 = vld [vmem:[%s13154_s17 + $0x16e8] sm:$0xf0]  ;;  %v12437_v54 = vld [vmem:[%s13154_s17 + $0x1764] sm:$0xf] }
 0x422   : > { %7363 = vmatpush.bf16.msra.mxu1 %v10650_v59  ;;  %v7125_v10 = vadd.f32 %v7124_v2, %v7112_v52  ;;  %v7137_v11 = vpop.f32.mrf.mxu3  ;;  %v7113_v59 = vpop.f32.mrf.mxu1  ;;  %v11039_v52 = vld [vmem:[%s13154_s17 + $0x17f8] sm:$0xf0]  ;;  %v11031_v2 = vld [vmem:[%s13154_s17 + $0x17e8] sm:$0xf0]  ;;  %v10970_v19 = vor.u32 %v12437_v54, %v10967_v36  ;;  %v12445_v36 = vld [vmem:[%s13154_s17 + $0x17a4] sm:$0xf] }
 0x423   : > { %7376 = vmatpush.bf16.msra.mxu2 %v10714_v51  ;;  %v12435_v59 = vld [vmem:[%s13154_s17 + $0x1754] sm:$0xf] }
 0x424   : > { %7389 = vmatpush.bf16.msra.mxu3 %v10778_v7  ;;  %v15063_v51 = vadd.f32 %v7137_v11, %v7125_v10  ;;  %v12347_v7 = vld [vmem:[%s13154_s17 + $0x1494] sm:$0xf]  ;;  %v10831_v11 = vld [vmem:[%s13154_s17 + $0x1658] sm:$0xf0] }
 0x425   : > { %7351 = vmatpush.bf16.msra.mxu0 %v10578_v56  ;;  %v10535_v56 = vld [vmem:[%s13154_s17 + $0x1408] sm:$0xf0]  ;;  %v12403_v10 = vld [vmem:[%s13154_s17 + $0x1654] sm:$0xf] }
 0x426   : > { %7364 = vmatpush.bf16.msra.mxu1 %v10642_v17  ;;  %v10610_v17 = vor.u32 %v12347_v7, %v10607_v12  ;;  %v10538_v46 = vor.u32 %v12329_v61, %v10535_v56  ;;  %v11023_v7 = vld [vmem:[%s13154_s17 + $0x17d8] sm:$0xf0]  ;;  %v10834_v12 = vor.u32 %v12403_v10, %v10831_v11  ;;  %v10887_v56 = vld [vmem:[%s13154_s17 + $0x16c8] sm:$0xf0] }
 0x427   : > { %7377 = vmatpush.bf16.msra.mxu2 %v10706_v35  ;;  %v10674_v35 = vor.u32 %v12363_v48, %v10671_v4  ;;  %v11026_v61 = vor.u32 %v12451_v24, %v11023_v7  ;;  %v10991_v24 = vld [vmem:[%s13154_s17 + $0x1798] sm:$0xf0] }
 0x428   : > { %7390 = vmatpush.bf16.msra.mxu3 %v10770_v18  ;;  %v10738_v18 = vor.u32 %v12379_v33, %v10735_v15  ;;  %v12401_v33 = vld [vmem:[%s13154_s17 + $0x1644] sm:$0xf]  ;;  %v10823_v15 = vld [vmem:[%s13154_s17 + $0x1648] sm:$0xf0] }
 0x429   : > { %7352 = vmatpush.bf16.msra.mxu0 %v10570_v37  ;;  %v7126_v60 = vpop.f32.mrf.mxu2  ;;  %v10826_v23 = vor.u32 %v12401_v33, %v10823_v15  ;;  %v12409_v33 = vld [vmem:[%s13154_s17 + $0x1684] sm:$0xf]  ;;  %v10855_v15 = vld [vmem:[%s13154_s17 + $0x1688] sm:$0xf0] }
 0x42a   : > { %7365 = vmatpush.bf16.msra.mxu1 %v10634_v38  ;;  %v7139_v37 = vpop.f32.mrf.mxu3  ;;  %v10911_v38 = vld [vmem:[%s13154_s17 + $0x16f8] sm:$0xf0] }
 0x42b   : > { %7378 = vmatpush.bf16.msra.mxu2 %v10698_v22  ;;  %v12439_v22 = vld [vmem:[%s13154_s17 + $0x1774] sm:$0xf]  ;;  %v10914_v41 = vor.u32 %v12423_v45, %v10911_v38  ;;  %v11018_v37 = vor.u32 %v12449_v20, %v11015_v26  ;;  %v10879_v38 = vld [vmem:[%s13154_s17 + $0x16b8] sm:$0xf0] }
 0x42c   : > { %7391 = vmatpush.bf16.msra.mxu3 %v10762_v25  ;;  %v12455_v25 = vld [vmem:[%s13154_s17 + $0x17f4] sm:$0xf]  ;;  %v10978_v44 = vor.u32 %v12439_v22, %v10975_v42  ;;  %v11103_v26 = vld [vmem:[%s13154_s17 + $0x1878] sm:$0xf0] }
 0x42d   : > { %7353 = vmatpush.bf16.msra.mxu0 %v10562_v53  ;;  %v10839_v53 = vld [vmem:[%s13154_s17 + $0x1668] sm:$0xf0]  ;;  %v12415_v45 = vld [vmem:[%s13154_s17 + $0x16b4] sm:$0xf] }
 0x42e   : > { %7366 = vmatpush.bf16.msra.mxu1 %v10626_v31  ;;  %v12421_v31 = vld [vmem:[%s13154_s17 + $0x16e4] sm:$0xf]  ;;  %v10842_v0 = vor.u32 %v12405_v49, %v10839_v53  ;;  %v12431_v22 = vld [vmem:[%s13154_s17 + $0x1734] sm:$0xf]  ;;  %v10871_v53 = vld [vmem:[%s13154_s17 + $0x16a8] sm:$0xf0] }
 0x42f   : > { %7379 = vmatpush.bf16.msra.mxu2 %v10690_v50  ;;  %v11042_v50 = vor.u32 %v12455_v25, %v11039_v52  ;;  %v10906_v34 = vor.u32 %v12421_v31, %v10903_v27  ;;  %v12447_v42 = vld [vmem:[%s13154_s17 + $0x17b4] sm:$0xf]  ;;  %v10882_v25 = vor.u32 %v12415_v45, %v10879_v38  ;;  %v12429_v31 = vld [vmem:[%s13154_s17 + $0x1724] sm:$0xf] }
 0x430   : > { %7392 = vmatpush.bf16.msra.mxu3 %v10754_v21  ;;  %v12453_v21 = vld [vmem:[%s13154_s17 + $0x17e4] sm:$0xf]  ;;  %v12471_v20 = vld [vmem:[%s13154_s17 + $0x1874] sm:$0xf] }
 0x431   : > { %7354 = vmatpush.bf16.msra.mxu0 %v10554_v8  ;;  %v11034_v6 = vor.u32 %v12453_v21, %v11031_v2  ;;  %v10895_v8 = vld [vmem:[%s13154_s17 + $0x16d8] sm:$0xf0]  ;;  %v10999_v21 = vld [vmem:[%s13154_s17 + $0x17a8] sm:$0xf0] }
 0x432   : > { %7367 = vmatpush.bf16.msra.mxu1 %v10618_v5  ;;  %v10959_v5 = vld [vmem:[%s13154_s17 + $0x1758] sm:$0xf0]  ;;  %v10898_v48 = vor.u32 %v12419_v13, %v10895_v8  ;;  %v12395_v13 = vld [vmem:[%s13154_s17 + $0x1614] sm:$0xf]  ;;  %v11002_v8 = vor.u32 %v12445_v36, %v10999_v21 }
 0x433   : > { %7380 = vmatpush.bf16.msra.mxu2 %v10682_v14  ;;  %v15392_v14 = vld [vmem:[#allocation27_spill] sm:$0xff]  ;;  %v10962_v4 = vor.u32 %v12435_v59, %v10959_v5  ;;  %v10863_v59 = vld [vmem:[%s13154_s17 + $0x1698] sm:$0xf0]  ;;  %v12427_v5 = vld [vmem:[%s13154_s17 + $0x1714] sm:$0xf] }
 0x434   : > { %7393 = vmatpush.bf16.msra.mxu3 %v10746_v62  ;;  %v15394_v62 = vld [vmem:[#allocation29_spill] sm:$0xff]  ;;  %v15395_v21 = vld [vmem:[#allocation30_spill] sm:$0xff] }
 0x435   : > { %7355 = vmatpush.bf16.msra.mxu0 %v10546_v16  ;;  %v12417_v16 = vld [vmem:[%s13154_s17 + $0x16c4] sm:$0xf]  ;;  %v12483_v36 = vld [vmem:[%s13154_s17 + $0x18d4] sm:$0xf] }
 0x436   : > { %7368 = vmatpush.bf16.msra.mxu1 %v10610_v17  ;;  %v12433_v17 = vld [vmem:[%s13154_s17 + $0x1744] sm:$0xf]  ;;  %v10890_v32 = vor.u32 %v12417_v16, %v10887_v56  ;;  %v10919_v56 = vld [vmem:[%s13154_s17 + $0x1708] sm:$0xf0] }
 0x437   : > { %7381 = vmatpush.bf16.msra.mxu2 %v10674_v35  ;;  %v10951_v35 = vld [vmem:[%s13154_s17 + $0x1748] sm:$0xf0]  ;;  %v12425_v16 = vld [vmem:[%s13154_s17 + $0x1704] sm:$0xf] }
 0x438   : > { %7394 = vmatpush.bf16.msra.mxu3 %v10738_v18  ;;  %v10954_v60 = vor.u32 %v12433_v17, %v10951_v35  ;;  %v12441_v17 = vld [vmem:[%s13154_s17 + $0x1784] sm:$0xf]  ;;  %v10983_v35 = vld [vmem:[%s13154_s17 + $0x1788] sm:$0xf0]  ;;  %v10922_v45 = vor.u32 %v12425_v16, %v10919_v56 }
 0x439   : > { %7356 = vmatpush.bf16.msra.mxu0 %v10538_v46  ;;  %v7150_v30 = vpop.f32.mrf.mxu0  ;;  %v10986_v38 = vor.u32 %v12441_v17, %v10983_v35  ;;  %v11271_v16 = vld [vmem:[%s13154_s17 + $0x19c8] sm:$0xf0] }
 0x43a   : > { %7369 = vmatpush.bf16.msra.mxu1 %v10602_v55  ;;  %v7151_v18 = vadd.f32 %v7150_v30, %v15063_v51  ;;  %v7163_v40 = vpop.f32.mrf.mxu1  ;;  %v10943_v51 = vld [vmem:[%s13154_s17 + $0x1738] sm:$0xf0] }
 0x43b   : > { %7382 = vmatpush.bf16.msra.mxu2 %v10666_v58  ;;  %v11007_v55 = vld [vmem:[%s13154_s17 + $0x17b8] sm:$0xf0]  ;;  %v10818_v58 = vor.u32 %v12399_v57, %v10815_v29  ;;  %v10946_v52 = vor.u32 %v12431_v22, %v10943_v51  ;;  %v10858_v29 = vor.u32 %v12409_v33, %v10855_v15  ;;  %v11106_v22 = vor.u32 %v12471_v20, %v11103_v26  ;;  %v12513_v15 = vld [vmem:[%s13154_s17 + $0x19c4] sm:$0xf]  ;;  %v12463_v20 = vld [vmem:[%s13154_s17 + $0x1834] sm:$0xf] }
 0x43c   : > { %7395 = vmatpush.bf16.msra.mxu3 %v10730_v43  ;;  %7357 = vmatmul.bf16.vlgmr.msra.gmra.mxu0 %v15391_v1  ;;  %v7164_v46 = vadd.f32 %v7163_v40, %v7151_v18  ;;  %v12397_v43 = vld [vmem:[%s13154_s17 + $0x1624] sm:$0xf]  ;;  %v10799_v1 = vld [vmem:[%s13154_s17 + $0x1618] sm:$0xf0]  ;;  %v12487_v18 = vld [vmem:[%s13154_s17 + $0x18f4] sm:$0xf] }
 0x43d   : > { %7401 = vmatpush.bf16.msrb.mxu0 %v10850_v3  ;;  %7370 = vmatmul.bf16.vlgmr.msra.gmra.mxu1 %v15393_v39  ;;  %v10807_v3 = vld [vmem:[%s13154_s17 + $0x1628] sm:$0xf0]  ;;  %v12443_v39 = vld [vmem:[%s13154_s17 + $0x1794] sm:$0xf]  ;;  %v10802_v7 = vor.u32 %v12395_v13, %v10799_v1  ;;  %v11231_v57 = vld [vmem:[%s13154_s17 + $0x1978] sm:$0xf0] }
 0x43e   : > { %7414 = vmatpush.bf16.msrb.mxu1 %v10914_v41  ;;  %7383 = vmatmul.bf16.vlgmr.msra.gmra.mxu2 %v15392_v14  ;;  %v12413_v41 = vld [vmem:[%s13154_s17 + $0x16a4] sm:$0xf]  ;;  %v10927_v14 = vld [vmem:[%s13154_s17 + $0x1718] sm:$0xf0]  ;;  %v15397_v13 = vld [vmem:[#allocation32_spill] sm:$0xff] }
 0x43f   : > { %7427 = vmatpush.bf16.msrb.mxu2 %v10978_v44  ;;  %7396 = vmatmul.bf16.vlgmr.msra.gmra.mxu3 %v15394_v62  ;;  %v11010_v44 = vor.u32 %v12447_v42, %v11007_v55  ;;  %v10874_v10 = vor.u32 %v12413_v41, %v10871_v53  ;;  %v12393_v62 = vld [vmem:[%s13154_s17 + $0x1604] sm:$0xf]  ;;  %v11223_v41 = vld [vmem:[%s13154_s17 + $0x1968] sm:$0xf0]  ;;  %v12515_v1 = vld [vmem:[%s13154_s17 + $0x19d4] sm:$0xf] }
 0x440   : > { %7440 = vmatpush.bf16.msrb.mxu3 %v11042_v50  ;;  %v10935_v50 = vld [vmem:[%s13154_s17 + $0x1728] sm:$0xf0]  ;;  %v12469_v55 = vld [vmem:[%s13154_s17 + $0x1864] sm:$0xf]  ;;  %v11071_v26 = vld [vmem:[%s13154_s17 + $0x1838] sm:$0xf0] }
 0x441   : > { %7402 = vmatpush.bf16.msrb.mxu0 %v10842_v0  ;;  %v7176_v49 = vpop.f32.mrf.mxu2  ;;  %v7152_v2 = vpop.f32.mrf.mxu0  ;;  %v10810_v0 = vor.u32 %v12397_v43, %v10807_v3  ;;  %v10938_v11 = vor.u32 %v12429_v31, %v10935_v50  ;;  %v11159_v43 = vld [vmem:[%s13154_s17 + $0x18e8] sm:$0xf0]  ;;  %v12501_v3 = vld [vmem:[%s13154_s17 + $0x1964] sm:$0xf] }
 0x442   : > { %7415 = vmatpush.bf16.msrb.mxu1 %v10906_v34  ;;  %v7177_v27 = vadd.f32 %v7176_v49, %v7164_v46  ;;  %v7189_v54 = vpop.f32.mrf.mxu3  ;;  %v7165_v34 = vpop.f32.mrf.mxu1  ;;  %v11295_v46 = vld [vmem:[%s13154_s17 + $0x19f8] sm:$0xf0]  ;;  %v11287_v49 = vld [vmem:[%s13154_s17 + $0x19e8] sm:$0xf0]  ;;  %v11226_v50 = vor.u32 %v12501_v3, %v11223_v41  ;;  %v12509_v41 = vld [vmem:[%s13154_s17 + $0x19a4] sm:$0xf] }
 0x443   : > { %7428 = vmatpush.bf16.msrb.mxu2 %v10970_v19  ;;  %v12499_v34 = vld [vmem:[%s13154_s17 + $0x1954] sm:$0xf] }
 0x444   : > { %7441 = vmatpush.bf16.msrb.mxu3 %v11034_v6  ;;  %v15134_v19 = vadd.f32 %v7189_v54, %v7177_v27  ;;  %v12411_v6 = vld [vmem:[%s13154_s17 + $0x1694] sm:$0xf]  ;;  %v11087_v54 = vld [vmem:[%s13154_s17 + $0x1858] sm:$0xf0] }
 0x445   : > { %7403 = vmatpush.bf16.msrb.mxu0 %v10834_v12  ;;  %v10791_v12 = vld [vmem:[%s13154_s17 + $0x1608] sm:$0xf0]  ;;  %v12467_v27 = vld [vmem:[%s13154_s17 + $0x1854] sm:$0xf] }
 0x446   : > { %7416 = vmatpush.bf16.msrb.mxu1 %v10898_v48  ;;  %v10866_v48 = vor.u32 %v12411_v6, %v10863_v59  ;;  %v10794_v40 = vor.u32 %v12393_v62, %v10791_v12  ;;  %v11279_v6 = vld [vmem:[%s13154_s17 + $0x19d8] sm:$0xf0]  ;;  %v11090_v59 = vor.u32 %v12467_v27, %v11087_v54  ;;  %v11143_v12 = vld [vmem:[%s13154_s17 + $0x18c8] sm:$0xf0] }
 0x447   : > { %7429 = vmatpush.bf16.msrb.mxu2 %v10962_v4  ;;  %v10930_v4 = vor.u32 %v12427_v5, %v10927_v14  ;;  %v11282_v62 = vor.u32 %v12515_v1, %v11279_v6  ;;  %v11247_v1 = vld [vmem:[%s13154_s17 + $0x1998] sm:$0xf0] }
 0x448   : > { %7442 = vmatpush.bf16.msrb.mxu3 %v11026_v61  ;;  %v10994_v61 = vor.u32 %v12443_v39, %v10991_v24  ;;  %v12465_v39 = vld [vmem:[%s13154_s17 + $0x1844] sm:$0xf]  ;;  %v11079_v24 = vld [vmem:[%s13154_s17 + $0x1848] sm:$0xf0] }
 0x449   : > { %7404 = vmatpush.bf16.msrb.mxu0 %v10826_v23  ;;  %v7178_v30 = vpop.f32.mrf.mxu2  ;;  %v11082_v56 = vor.u32 %v12465_v39, %v11079_v24  ;;  %v12473_v39 = vld [vmem:[%s13154_s17 + $0x1884] sm:$0xf]  ;;  %v11111_v24 = vld [vmem:[%s13154_s17 + $0x1888] sm:$0xf0] }
 0x44a   : > { %7417 = vmatpush.bf16.msrb.mxu1 %v10890_v32  ;;  %v7191_v23 = vpop.f32.mrf.mxu3  ;;  %v11167_v32 = vld [vmem:[%s13154_s17 + $0x18f8] sm:$0xf0] }
 0x44b   : > { %7430 = vmatpush.bf16.msrb.mxu2 %v10954_v60  ;;  %v12503_v60 = vld [vmem:[%s13154_s17 + $0x1974] sm:$0xf]  ;;  %v11170_v51 = vor.u32 %v12487_v18, %v11167_v32  ;;  %v11274_v23 = vor.u32 %v12513_v15, %v11271_v16  ;;  %v11135_v32 = vld [vmem:[%s13154_s17 + $0x18b8] sm:$0xf0] }
 0x44c   : > { %7443 = vmatpush.bf16.msrb.mxu3 %v11018_v37  ;;  %v12519_v37 = vld [vmem:[%s13154_s17 + $0x19f4] sm:$0xf]  ;;  %v11234_v42 = vor.u32 %v12503_v60, %v11231_v57  ;;  %v11359_v16 = vld [vmem:[%s13154_s17 + $0x1a78] sm:$0xf0] }
 0x44d   : > { %7405 = vmatpush.bf16.msrb.mxu0 %v10818_v58  ;;  %v11095_v58 = vld [vmem:[%s13154_s17 + $0x1868] sm:$0xf0]  ;;  %v12479_v18 = vld [vmem:[%s13154_s17 + $0x18b4] sm:$0xf] }
 0x44e   : > { %7418 = vmatpush.bf16.msrb.mxu1 %v10882_v25  ;;  %v12485_v25 = vld [vmem:[%s13154_s17 + $0x18e4] sm:$0xf]  ;;  %v11098_v53 = vor.u32 %v12469_v55, %v11095_v58  ;;  %v12495_v60 = vld [vmem:[%s13154_s17 + $0x1934] sm:$0xf]  ;;  %v11127_v58 = vld [vmem:[%s13154_s17 + $0x18a8] sm:$0xf0] }
 0x44f   : > { %7431 = vmatpush.bf16.msrb.mxu2 %v10946_v52  ;;  %v11298_v52 = vor.u32 %v12519_v37, %v11295_v46  ;;  %v11162_v31 = vor.u32 %v12485_v25, %v11159_v43  ;;  %v12511_v57 = vld [vmem:[%s13154_s17 + $0x19b4] sm:$0xf]  ;;  %v11138_v37 = vor.u32 %v12479_v18, %v11135_v32  ;;  %v12493_v25 = vld [vmem:[%s13154_s17 + $0x1924] sm:$0xf] }
 0x450   : > { %7444 = vmatpush.bf16.msrb.mxu3 %v11010_v44  ;;  %v12517_v44 = vld [vmem:[%s13154_s17 + $0x19e4] sm:$0xf]  ;;  %v12535_v15 = vld [vmem:[%s13154_s17 + $0x1a74] sm:$0xf] }
 0x451   : > { %7406 = vmatpush.bf16.msrb.mxu0 %v10810_v0  ;;  %v11290_v2 = vor.u32 %v12517_v44, %v11287_v49  ;;  %v11151_v0 = vld [vmem:[%s13154_s17 + $0x18d8] sm:$0xf0]  ;;  %v11255_v44 = vld [vmem:[%s13154_s17 + $0x19a8] sm:$0xf0] }
 0x452   : > { %7419 = vmatpush.bf16.msrb.mxu1 %v10874_v10  ;;  %v11215_v10 = vld [vmem:[%s13154_s17 + $0x1958] sm:$0xf0]  ;;  %v11154_v5 = vor.u32 %v12483_v36, %v11151_v0  ;;  %v12459_v36 = vld [vmem:[%s13154_s17 + $0x1814] sm:$0xf]  ;;  %v11258_v0 = vor.u32 %v12509_v41, %v11255_v44 }
 0x453   : > { %7432 = vmatpush.bf16.msrb.mxu2 %v10938_v11  ;;  %v15396_v11 = vld [vmem:[#allocation31_spill] sm:$0xff]  ;;  %v11218_v14 = vor.u32 %v12499_v34, %v11215_v10  ;;  %v11119_v34 = vld [vmem:[%s13154_s17 + $0x1898] sm:$0xf0]  ;;  %v12491_v10 = vld [vmem:[%s13154_s17 + $0x1914] sm:$0xf] }
 0x454   : > { %7445 = vmatpush.bf16.msrb.mxu3 %v11002_v8  ;;  %v15398_v8 = vld [vmem:[#allocation33_spill] sm:$0xff]  ;;  %v15399_v44 = vld [vmem:[#allocation34_spill] sm:$0xff] }
 0x455   : > { %7407 = vmatpush.bf16.msrb.mxu0 %v10802_v7  ;;  %v12481_v7 = vld [vmem:[%s13154_s17 + $0x18c4] sm:$0xf]  ;;  %v12547_v41 = vld [vmem:[%s13154_s17 + $0x1ad4] sm:$0xf] }
 0x456   : > { %7420 = vmatpush.bf16.msrb.mxu1 %v10866_v48  ;;  %v12497_v48 = vld [vmem:[%s13154_s17 + $0x1944] sm:$0xf]  ;;  %v11146_v35 = vor.u32 %v12481_v7, %v11143_v12  ;;  %v11175_v12 = vld [vmem:[%s13154_s17 + $0x1908] sm:$0xf0] }
 0x457   : > { %7433 = vmatpush.bf16.msrb.mxu2 %v10930_v4  ;;  %v11207_v4 = vld [vmem:[%s13154_s17 + $0x1948] sm:$0xf0]  ;;  %v12489_v7 = vld [vmem:[%s13154_s17 + $0x1904] sm:$0xf] }
 0x458   : > { %7446 = vmatpush.bf16.msrb.mxu3 %v10994_v61  ;;  %v11210_v30 = vor.u32 %v12497_v48, %v11207_v4  ;;  %v12505_v48 = vld [vmem:[%s13154_s17 + $0x1984] sm:$0xf]  ;;  %v11239_v4 = vld [vmem:[%s13154_s17 + $0x1988] sm:$0xf0]  ;;  %v11178_v18 = vor.u32 %v12489_v7, %v11175_v12 }
 0x459   : > { %7408 = vmatpush.bf16.msrb.mxu0 %v10794_v40  ;;  %v7202_v33 = vpop.f32.mrf.mxu0  ;;  %v11242_v32 = vor.u32 %v12505_v48, %v11239_v4  ;;  %v11527_v7 = vld [vmem:[%s13154_s17 + $0x1bc8] sm:$0xf0] }
 0x45a   : > { %7421 = vmatpush.bf16.msrb.mxu1 %v10858_v29  ;;  %v7203_v61 = vadd.f32 %v7202_v33, %v15134_v19  ;;  %v7215_v17 = vpop.f32.mrf.mxu1  ;;  %v11199_v19 = vld [vmem:[%s13154_s17 + $0x1938] sm:$0xf0] }
 0x45b   : > { %7434 = vmatpush.bf16.msrb.mxu2 %v10922_v45  ;;  %v11263_v29 = vld [vmem:[%s13154_s17 + $0x19b8] sm:$0xf0]  ;;  %v11074_v45 = vor.u32 %v12463_v20, %v11071_v26  ;;  %v11202_v46 = vor.u32 %v12495_v60, %v11199_v19  ;;  %v11114_v26 = vor.u32 %v12473_v39, %v11111_v24  ;;  %v11362_v60 = vor.u32 %v12535_v15, %v11359_v16  ;;  %v12577_v24 = vld [vmem:[%s13154_s17 + $0x1bc4] sm:$0xf]  ;;  %v12527_v15 = vld [vmem:[%s13154_s17 + $0x1a34] sm:$0xf] }
 0x45c   : > { %7447 = vmatpush.bf16.msrb.mxu3 %v10986_v38  ;;  %7409 = vmatmul.bf16.vlgmr.msrb.gmra.mxu0 %v15395_v21  ;;  %v7216_v40 = vadd.f32 %v7215_v17, %v7203_v61  ;;  %v12461_v38 = vld [vmem:[%s13154_s17 + $0x1824] sm:$0xf]  ;;  %v11055_v21 = vld [vmem:[%s13154_s17 + $0x1818] sm:$0xf0]  ;;  %v12551_v61 = vld [vmem:[%s13154_s17 + $0x1af4] sm:$0xf] }
 0x45d   : > { %7453 = vmatpush.bf16.msra.mxu0 %v11106_v22  ;;  %7422 = vmatmul.bf16.vlgmr.msrb.gmra.mxu1 %v15397_v13  ;;  %v11063_v22 = vld [vmem:[%s13154_s17 + $0x1828] sm:$0xf0]  ;;  %v12507_v13 = vld [vmem:[%s13154_s17 + $0x1994] sm:$0xf]  ;;  %v11058_v6 = vor.u32 %v12459_v36, %v11055_v21  ;;  %v11487_v20 = vld [vmem:[%s13154_s17 + $0x1b78] sm:$0xf0] }
 0x45e   : > { %7466 = vmatpush.bf16.msra.mxu1 %v11170_v51  ;;  %7435 = vmatmul.bf16.vlgmr.msrb.gmra.mxu2 %v15396_v11  ;;  %v12477_v51 = vld [vmem:[%s13154_s17 + $0x18a4] sm:$0xf]  ;;  %v11183_v11 = vld [vmem:[%s13154_s17 + $0x1918] sm:$0xf0]  ;;  %v15401_v36 = vld [vmem:[#allocation36_spill] sm:$0xff] }
 0x45f   : > { %7479 = vmatpush.bf16.msra.mxu2 %v11234_v42  ;;  %7448 = vmatmul.bf16.vlgmr.msrb.gmra.mxu3 %v15398_v8  ;;  %v11266_v42 = vor.u32 %v12511_v57, %v11263_v29  ;;  %v11130_v27 = vor.u32 %v12477_v51, %v11127_v58  ;;  %v12457_v8 = vld [vmem:[%s13154_s17 + $0x1804] sm:$0xf]  ;;  %v11479_v51 = vld [vmem:[%s13154_s17 + $0x1b68] sm:$0xf0]  ;;  %v12579_v21 = vld [vmem:[%s13154_s17 + $0x1bd4] sm:$0xf] }
 0x460   : > { %7492 = vmatpush.bf16.msra.mxu3 %v11298_v52  ;;  %v11191_v52 = vld [vmem:[%s13154_s17 + $0x1928] sm:$0xf0]  ;;  %v12533_v29 = vld [vmem:[%s13154_s17 + $0x1a64] sm:$0xf]  ;;  %v11327_v16 = vld [vmem:[%s13154_s17 + $0x1a38] sm:$0xf0] }
 0x461   : > { %7454 = vmatpush.bf16.msra.mxu0 %v11098_v53  ;;  %v7228_v55 = vpop.f32.mrf.mxu2  ;;  %v7204_v49 = vpop.f32.mrf.mxu0  ;;  %v11066_v53 = vor.u32 %v12461_v38, %v11063_v22  ;;  %v11194_v54 = vor.u32 %v12493_v25, %v11191_v52  ;;  %v11415_v38 = vld [vmem:[%s13154_s17 + $0x1ae8] sm:$0xf0]  ;;  %v12565_v22 = vld [vmem:[%s13154_s17 + $0x1b64] sm:$0xf] }
 0x462   : > { %7467 = vmatpush.bf16.msra.mxu1 %v11162_v31  ;;  %v7229_v43 = vadd.f32 %v7228_v55, %v7216_v40  ;;  %v7241_v3 = vpop.f32.mrf.mxu3  ;;  %v7217_v31 = vpop.f32.mrf.mxu1  ;;  %v11551_v40 = vld [vmem:[%s13154_s17 + $0x1bf8] sm:$0xf0]  ;;  %v11543_v55 = vld [vmem:[%s13154_s17 + $0x1be8] sm:$0xf0]  ;;  %v11482_v52 = vor.u32 %v12565_v22, %v11479_v51  ;;  %v12573_v51 = vld [vmem:[%s13154_s17 + $0x1ba4] sm:$0xf] }
 0x463   : > { %7480 = vmatpush.bf16.msra.mxu2 %v11226_v50  ;;  %v12563_v31 = vld [vmem:[%s13154_s17 + $0x1b54] sm:$0xf] }
 0x464   : > { %7493 = vmatpush.bf16.msra.mxu3 %v11290_v2  ;;  %v15205_v50 = vadd.f32 %v7241_v3, %v7229_v43  ;;  %v12475_v2 = vld [vmem:[%s13154_s17 + $0x1894] sm:$0xf]  ;;  %v11343_v3 = vld [vmem:[%s13154_s17 + $0x1a58] sm:$0xf0] }
 0x465   : > { %7455 = vmatpush.bf16.msra.mxu0 %v11090_v59  ;;  %v11047_v59 = vld [vmem:[%s13154_s17 + $0x1808] sm:$0xf0]  ;;  %v12531_v43 = vld [vmem:[%s13154_s17 + $0x1a54] sm:$0xf] }
 0x466   : > { %7468 = vmatpush.bf16.msra.mxu1 %v11154_v5  ;;  %v11122_v5 = vor.u32 %v12475_v2, %v11119_v34  ;;  %v11050_v17 = vor.u32 %v12457_v8, %v11047_v59  ;;  %v11535_v2 = vld [vmem:[%s13154_s17 + $0x1bd8] sm:$0xf0]  ;;  %v11346_v34 = vor.u32 %v12531_v43, %v11343_v3  ;;  %v11399_v59 = vld [vmem:[%s13154_s17 + $0x1ac8] sm:$0xf0] }
 0x467   : > { %7481 = vmatpush.bf16.msra.mxu2 %v11218_v14  ;;  %v11186_v14 = vor.u32 %v12491_v10, %v11183_v11  ;;  %v11538_v8 = vor.u32 %v12579_v21, %v11535_v2  ;;  %v11503_v21 = vld [vmem:[%s13154_s17 + $0x1b98] sm:$0xf0] }
 0x468   : > { %7494 = vmatpush.bf16.msra.mxu3 %v11282_v62  ;;  %v11250_v62 = vor.u32 %v12507_v13, %v11247_v1  ;;  %v12529_v13 = vld [vmem:[%s13154_s17 + $0x1a44] sm:$0xf]  ;;  %v11335_v1 = vld [vmem:[%s13154_s17 + $0x1a48] sm:$0xf0] }
 0x469   : > { %7456 = vmatpush.bf16.msra.mxu0 %v11082_v56  ;;  %v7230_v33 = vpop.f32.mrf.mxu2  ;;  %v11338_v12 = vor.u32 %v12529_v13, %v11335_v1  ;;  %v12537_v13 = vld [vmem:[%s13154_s17 + $0x1a84] sm:$0xf] }
 0x46a   : > { %7469 = vmatpush.bf16.msra.mxu1 %v11146_v35  ;;  %v7243_v56 = vpop.f32.mrf.mxu3  ;;  %v11423_v35 = vld [vmem:[%s13154_s17 + $0x1af8] sm:$0xf0] }
 0x46b   : > { %7482 = vmatpush.bf16.msra.mxu2 %v11210_v30  ;;  %v12567_v30 = vld [vmem:[%s13154_s17 + $0x1b74] sm:$0xf]  ;;  %v11426_v19 = vor.u32 %v12551_v61, %v11423_v35  ;;  %v11530_v56 = vor.u32 %v12577_v24, %v11527_v7  ;;  %v11391_v35 = vld [vmem:[%s13154_s17 + $0x1ab8] sm:$0xf0] }
 0x46c   : > { %7495 = vmatpush.bf16.msra.mxu3 %v11274_v23  ;;  %v12583_v23 = vld [vmem:[%s13154_s17 + $0x1bf4] sm:$0xf]  ;;  %v11490_v57 = vor.u32 %v12567_v30, %v11487_v20 }
 0x46d   : > { %7457 = vmatpush.bf16.msra.mxu0 %v11074_v45  ;;  %v11351_v45 = vld [vmem:[%s13154_s17 + $0x1a68] sm:$0xf0]  ;;  %v12543_v61 = vld [vmem:[%s13154_s17 + $0x1ab4] sm:$0xf] }
 0x46e   : > { %7470 = vmatpush.bf16.msra.mxu1 %v11138_v37  ;;  %v12549_v37 = vld [vmem:[%s13154_s17 + $0x1ae4] sm:$0xf]  ;;  %v11354_v58 = vor.u32 %v12533_v29, %v11351_v45  ;;  %v12559_v30 = vld [vmem:[%s13154_s17 + $0x1b34] sm:$0xf]  ;;  %v11383_v45 = vld [vmem:[%s13154_s17 + $0x1aa8] sm:$0xf0] }
 0x46f   : > { %7483 = vmatpush.bf16.msra.mxu2 %v11202_v46  ;;  %v11554_v46 = vor.u32 %v12583_v23, %v11551_v40  ;;  %v11418_v25 = vor.u32 %v12549_v37, %v11415_v38  ;;  %v12575_v20 = vld [vmem:[%s13154_s17 + $0x1bb4] sm:$0xf]  ;;  %v11394_v23 = vor.u32 %v12543_v61, %v11391_v35  ;;  %v12557_v37 = vld [vmem:[%s13154_s17 + $0x1b24] sm:$0xf] }
 0x470   : > { %7496 = vmatpush.bf16.msra.mxu3 %v11266_v42  ;;  %v12581_v42 = vld [vmem:[%s13154_s17 + $0x1be4] sm:$0xf] }
 0x471   : > { %7458 = vmatpush.bf16.msra.mxu0 %v11066_v53  ;;  %v11546_v49 = vor.u32 %v12581_v42, %v11543_v55  ;;  %v11407_v53 = vld [vmem:[%s13154_s17 + $0x1ad8] sm:$0xf0]  ;;  %v11511_v42 = vld [vmem:[%s13154_s17 + $0x1ba8] sm:$0xf0] }
 0x472   : > { %7471 = vmatpush.bf16.msra.mxu1 %v11130_v27  ;;  %v11471_v27 = vld [vmem:[%s13154_s17 + $0x1b58] sm:$0xf0]  ;;  %v11410_v10 = vor.u32 %v12547_v41, %v11407_v53  ;;  %v12523_v41 = vld [vmem:[%s13154_s17 + $0x1a14] sm:$0xf]  ;;  %v11514_v53 = vor.u32 %v12573_v51, %v11511_v42 }
 0x473   : > { %7484 = vmatpush.bf16.msra.mxu2 %v11194_v54  ;;  %v15400_v54 = vld [vmem:[#allocation35_spill] sm:$0xff]  ;;  %v11474_v11 = vor.u32 %v12563_v31, %v11471_v27  ;;  %v11375_v31 = vld [vmem:[%s13154_s17 + $0x1a98] sm:$0xf0]  ;;  %v12555_v27 = vld [vmem:[%s13154_s17 + $0x1b14] sm:$0xf] }
 0x474   : > { %7497 = vmatpush.bf16.msra.mxu3 %v11258_v0  ;;  %v15402_v0 = vld [vmem:[#allocation37_spill] sm:$0xff] }
 0x475   : > { %7459 = vmatpush.bf16.msra.mxu0 %v11058_v6  ;;  %v12545_v6 = vld [vmem:[%s13154_s17 + $0x1ac4] sm:$0xf] }
 0x476   : > { %7472 = vmatpush.bf16.msra.mxu1 %v11122_v5  ;;  %v12561_v5 = vld [vmem:[%s13154_s17 + $0x1b44] sm:$0xf]  ;;  %v11402_v4 = vor.u32 %v12545_v6, %v11399_v59  ;;  %v11367_v6 = vld [vmem:[%s13154_s17 + $0x1a88] sm:$0xf0] }
 0x477   : > { %7485 = vmatpush.bf16.msra.mxu2 %v11186_v14  ;;  %v11463_v14 = vld [vmem:[%s13154_s17 + $0x1b48] sm:$0xf0] }
 0x478   : > { %7498 = vmatpush.bf16.msra.mxu3 %v11250_v62  ;;  %v11466_v33 = vor.u32 %v12561_v5, %v11463_v14  ;;  %v11431_v59 = vld [vmem:[%s13154_s17 + $0x1b08] sm:$0xf0]  ;;  %v12569_v14 = vld [vmem:[%s13154_s17 + $0x1b84] sm:$0xf] }
 0x479   : > { %7460 = vmatpush.bf16.msra.mxu0 %v11050_v17  ;;  %v7254_v39 = vpop.f32.mrf.mxu0 }
 0x47a   : > { %7473 = vmatpush.bf16.msra.mxu1 %v11114_v26  ;;  %v7255_v62 = vadd.f32 %v7254_v39, %v15205_v50  ;;  %v7267_v48 = vpop.f32.mrf.mxu1  ;;  %v11455_v50 = vld [vmem:[%s13154_s17 + $0x1b38] sm:$0xf0]  ;;  %v11495_v39 = vld [vmem:[%s13154_s17 + $0x1b88] sm:$0xf0] }
 0x47b   : > { %7486 = vmatpush.bf16.msra.mxu2 %v11178_v18  ;;  %v11519_v26 = vld [vmem:[%s13154_s17 + $0x1bb8] sm:$0xf0]  ;;  %v11330_v18 = vor.u32 %v12527_v15, %v11327_v16  ;;  %v11458_v40 = vor.u32 %v12559_v30, %v11455_v50 }
 0x47c   : > { %7499 = vmatpush.bf16.msra.mxu3 %v11242_v32  ;;  %7461 = vmatmul.bf16.vlgmr.msra.gmra.mxu0 %v15399_v44  ;;  %v7268_v17 = vadd.f32 %v7267_v48, %v7255_v62  ;;  %v12525_v32 = vld [vmem:[%s13154_s17 + $0x1a24] sm:$0xf]  ;;  %v11311_v44 = vld [vmem:[%s13154_s17 + $0x1a18] sm:$0xf0]  ;;  %v11370_v62 = vor.u32 %v12537_v13, %v11367_v6  ;;  %v11498_v48 = vor.u32 %v12569_v14, %v11495_v39 }
 0x47d   : > { %7505 = vmatpush.bf16.msrb.mxu0 %v11362_v60  ;;  %7474 = vmatmul.bf16.vlgmr.msra.gmra.mxu1 %v15401_v36  ;;  %v11319_v60 = vld [vmem:[%s13154_s17 + $0x1a28] sm:$0xf0]  ;;  %v12571_v36 = vld [vmem:[%s13154_s17 + $0x1b94] sm:$0xf]  ;;  %v11314_v2 = vor.u32 %v12523_v41, %v11311_v44 }
 0x47e   : > { %7518 = vmatpush.bf16.msrb.mxu1 %v11426_v19  ;;  %7487 = vmatmul.bf16.vlgmr.msra.gmra.mxu2 %v15400_v54  ;;  %v12541_v19 = vld [vmem:[%s13154_s17 + $0x1aa4] sm:$0xf]  ;;  %v11439_v54 = vld [vmem:[%s13154_s17 + $0x1b18] sm:$0xf0]  ;;  %v11506_v1 = vor.u32 %v12571_v36, %v11503_v21 }
 0x47f   : > { %7531 = vmatpush.bf16.msrb.mxu2 %v11490_v57  ;;  %7500 = vmatmul.bf16.vlgmr.msra.gmra.mxu3 %v15402_v0  ;;  %v11522_v57 = vor.u32 %v12575_v20, %v11519_v26  ;;  %v11386_v43 = vor.u32 %v12541_v19, %v11383_v45 }
 0x480   : > { %7544 = vmatpush.bf16.msrb.mxu3 %v11554_v46  ;;  %v11447_v46 = vld [vmem:[%s13154_s17 + $0x1b28] sm:$0xf0] }
 0x481   : > { %7506 = vmatpush.bf16.msrb.mxu0 %v11354_v58  ;;  %v7280_v29 = vpop.f32.mrf.mxu2  ;;  %v7256_v55 = vpop.f32.mrf.mxu0  ;;  %v11322_v58 = vor.u32 %v12525_v32, %v11319_v60  ;;  %v11450_v3 = vor.u32 %v12557_v37, %v11447_v46 }
 0x482   : > { %7519 = vmatpush.bf16.msrb.mxu1 %v11418_v25  ;;  %v7281_v38 = vadd.f32 %v7280_v29, %v7268_v17  ;;  %v7293_v22 = vpop.f32.mrf.mxu3  ;;  %v7269_v25 = vpop.f32.mrf.mxu1 }
 0x483   : > { %7532 = vmatpush.bf16.msrb.mxu2 %v11482_v52 }
 0x484   : > { %7545 = vmatpush.bf16.msrb.mxu3 %v11546_v49  ;;  %v7294_v52 = vadd.f32 %v7293_v22, %v7281_v38  ;;  %v12539_v49 = vld [vmem:[%s13154_s17 + $0x1a94] sm:$0xf] }
 0x485   : > { %7507 = vmatpush.bf16.msrb.mxu0 %v11346_v34  ;;  %v11378_v0 = vor.u32 %v12539_v49, %v11375_v31  ;;  %v11442_v34 = vor.u32 %v12555_v27, %v11439_v54 }
 0x486   : > { %7520 = vmatpush.bf16.msrb.mxu1 %v11410_v10  ;;  %v12521_v10 = vld [vmem:[%s13154_s17 + $0x1a04] sm:$0xf] }
 0x487   : > { %7533 = vmatpush.bf16.msrb.mxu2 %v11474_v11  ;;  %v11303_v11 = vld [vmem:[%s13154_s17 + $0x1a08] sm:$0xf0] }
 0x488   : > { %7546 = vmatpush.bf16.msrb.mxu3 %v11538_v8  ;;  %v12553_v8 = vld [vmem:[%s13154_s17 + $0x1b04] sm:$0xf]  ;;  %v11306_v7 = vor.u32 %v12521_v10, %v11303_v11 }
 0x489   : > { %7508 = vmatpush.bf16.msrb.mxu0 %v11338_v12  ;;  %v7282_v5 = vpop.f32.mrf.mxu2  ;;  %v11434_v12 = vor.u32 %v12553_v8, %v11431_v59 }
 0x48a   : > { %7521 = vmatpush.bf16.msrb.mxu1 %v11402_v4  ;;  %v7295_v24 = vpop.f32.mrf.mxu3  ;;  %v15403_v4 = vld [vmem:[#allocation38_spill] sm:$0xff] }
 0x48b   : > { %7534 = vmatpush.bf16.msrb.mxu2 %v11466_v33 }
 0x48c   : > { %7547 = vmatpush.bf16.msrb.mxu3 %v11530_v56 }
 0x48d   : > { %7509 = vmatpush.bf16.msrb.mxu0 %v11330_v18 }
 0x48e   : > { %7522 = vmatpush.bf16.msrb.mxu1 %v11394_v23 }
 0x48f   : > { %7535 = vmatpush.bf16.msrb.mxu2 %v11458_v40 }
 0x490   : > { %7548 = vmatpush.bf16.msrb.mxu3 %v11522_v57 }
 0x491   : > { %7510 = vmatpush.bf16.msrb.mxu0 %v11322_v58 }
 0x492   : > { %7523 = vmatpush.bf16.msrb.mxu1 %v11386_v43 }
 0x493   : > { %7536 = vmatpush.bf16.msrb.mxu2 %v11450_v3 }
 0x494   : > { %7549 = vmatpush.bf16.msrb.mxu3 %v11514_v53 }
 0x495   : > { %7511 = vmatpush.bf16.msrb.mxu0 %v11314_v2 }
 0x496   : > { %7524 = vmatpush.bf16.msrb.mxu1 %v11378_v0 }
 0x497   : > { %7537 = vmatpush.bf16.msrb.mxu2 %v11442_v34 }
 0x498   : > { %7550 = vmatpush.bf16.msrb.mxu3 %v11506_v1 }
 0x499   : > { %7512 = vmatpush.bf16.msrb.mxu0 %v11306_v7  ;;  %v7306_v33 = vpop.f32.mrf.mxu0  ;;  %v513_v7 = vld [vmem:[#allocation2] sm:$0xf] }
 0x49a   : > { %7525 = vmatpush.bf16.msrb.mxu1 %v11370_v62  ;;  %v7307_v15 = vadd.f32 %v7306_v33, %v7294_v52  ;;  %v7319_v16 = vpop.f32.mrf.mxu1 }
 0x49b   : > { %7538 = vmatpush.bf16.msrb.mxu2 %v11434_v12 }
 0x49c   : > { %7551 = vmatpush.bf16.msrb.mxu3 %v11498_v48  ;;  %7513 = vmatmul.bf16.vlgmr.msrb.gmra.mxu0 %v14304_v28  ;;  %v7320_v61 = vadd.f32 %v7319_v16, %v7307_v15 }
 0x49d   : > { %7526 = vmatmul.bf16.vlgmr.msrb.gmra.mxu1 %v14311_v9 }
 0x49e   : > { %7539 = vmatmul.bf16.vlgmr.msrb.gmra.mxu2 %v14309_v63 }
 0x49f   : > { %7552 = vmatmul.bf16.vlgmr.msrb.gmra.mxu3 %v15403_v4 }
 0x4a1   : > { %v7332_v56 = vpop.f32.mrf.mxu2  ;;  %v7308_v30 = vpop.f32.mrf.mxu0 }
 0x4a2   : > { %v7333_v17 = vadd.f32 %v7332_v56, %v7320_v61  ;;  %v7345_v35 = vpop.f32.mrf.mxu3  ;;  %v7321_v50 = vpop.f32.mrf.mxu1 }
 0x4a4   : > { %v7346_v20 = vadd.f32 %v7345_v35, %v7333_v17 }
 0x4a9   : > { %v7334_v26 = vpop.f32.mrf.mxu2 }
 0x4aa   : > { %v7347_v18 = vpop.f32.mrf.mxu3 }
 0x4b9   : > { %v7358_v23 = vpop.f32.mrf.mxu0 }
 0x4ba   : > { %v7359_v28 = vadd.f32 %v7358_v23, %v7346_v20  ;;  %v7371_v40 = vpop.f32.mrf.mxu1 }
 0x4bc   : > { %v7372_v9 = vadd.f32 %v7371_v40, %v7359_v28 }
 0x4c1   : > { %v7384_v32 = vpop.f32.mrf.mxu2  ;;  %v7360_v19 = vpop.f32.mrf.mxu0 }
 0x4c2   : > { %v7385_v63 = vadd.f32 %v7384_v32, %v7372_v9  ;;  %v7397_v60 = vpop.f32.mrf.mxu3  ;;  %v7373_v57 = vpop.f32.mrf.mxu1 }
 0x4c4   : > { %v7398_v29 = vadd.f32 %v7397_v60, %v7385_v63 }
 0x4c9   : > { %v7386_v45 = vpop.f32.mrf.mxu2 }
 0x4ca   : > { %v7399_v37 = vpop.f32.mrf.mxu3 }
 0x4d9   : > { %v7410_v46 = vpop.f32.mrf.mxu0 }
 0x4da   : > { %v7423_v38 = vpop.f32.mrf.mxu1  ;;  %v7411_v3 = vadd.f32 %v7410_v46, %v7398_v29 }
 0x4dc   : > { %v7424_v31 = vadd.f32 %v7423_v38, %v7411_v3 }
 0x4e1   : > { %v7436_v22 = vpop.f32.mrf.mxu2  ;;  %v7412_v42 = vpop.f32.mrf.mxu0 }
 0x4e2   : > { %v7449_v51 = vpop.f32.mrf.mxu3  ;;  %v7425_v55 = vpop.f32.mrf.mxu1  ;;  %v7437_v27 = vadd.f32 %v7436_v22, %v7424_v31 }
 0x4e4   : > { %v7450_v21 = vadd.f32 %v7449_v51, %v7437_v27 }
 0x4e9   : > { %v7438_v58 = vpop.f32.mrf.mxu2 }
 0x4ea   : > { %v7451_v25 = vpop.f32.mrf.mxu3 }
 0x4f9   : > { %v7462_v52 = vpop.f32.mrf.mxu0 }
 0x4fa   : > { %v7475_v43 = vpop.f32.mrf.mxu1  ;;  %v7463_v2 = vadd.f32 %v7462_v52, %v7450_v21 }
 0x4fc   : > { %v7476_v0 = vadd.f32 %v7475_v43, %v7463_v2 }
 0x501   : > { %v7488_v41 = vpop.f32.mrf.mxu2  ;;  %v7464_v49 = vpop.f32.mrf.mxu0 }
 0x502   : > { %v7501_v44 = vpop.f32.mrf.mxu3  ;;  %v7477_v53 = vpop.f32.mrf.mxu1  ;;  %v7489_v34 = vadd.f32 %v7488_v41, %v7476_v0 }
 0x504   : > { %v7502_v10 = vadd.f32 %v7501_v44, %v7489_v34 }
 0x509   : > { %v7490_v54 = vpop.f32.mrf.mxu2 }
 0x50a   : > { %v7503_v36 = vpop.f32.mrf.mxu3 }
 0x519   : > { %v7514_v11 = vpop.f32.mrf.mxu0 }
 0x51a   : > { %v7527_v13 = vpop.f32.mrf.mxu1  ;;  %v7515_v1 = vadd.f32 %v7514_v11, %v7502_v10 }
 0x51c   : > { %v7528_v6 = vadd.f32 %v7527_v13, %v7515_v1 }
 0x521   : > { %v7540_v8 = vpop.f32.mrf.mxu2  ;;  %v7516_v14 = vpop.f32.mrf.mxu0 }
 0x522   : > { %v7541_v59 = vadd.f32 %v7540_v8, %v7528_v6  ;;  %v7553_v5 = vpop.f32.mrf.mxu3  ;;  %v7529_v39 = vpop.f32.mrf.mxu1 }
 0x524   : > { %v7554_v24 = vadd.f32 %v7553_v5, %v7541_v59 }
 0x526   : > { %v7559_v62 = vrot.slane %v7554_v24, 6 }
 0x527   : > { %7568 = sbr.rel (%p11555_p8) target bundleno = 1621 (0x655), region = 84 }
 0x528   : > { %v7561_v12 = vsel %vm7560_vm1, %v14638_v47, %v7559_v62 }
 0x529   : > { %v7563_v48 = vadd.f32 %v7561_v12, %v513_v7  ;;  %v7542_v4 = vpop.f32.mrf.mxu2 }
 0x52a   : > { %v7555_v33 = vpop.f32.mrf.mxu3 }
 0x52b   : > { %7564 = vst [vmem:[#allocation2] sm:$0xf] %v7563_v48 }
 0x52c   : > { %v11614_v15 = vld [vmem:[#allocation9 + $0x70] sm:$0xf]  ;;  %v12600_v16 = vld [vmem:[#allocation9 + $0x74] sm:$0xf0]  ;;  %v12599_v35 = vld [vmem:[#allocation9 + $0x74] sm:$0xf] }
 0x52d   : > { %v11678_v61 = vld [vmem:[#allocation9 + $0xf0] sm:$0xf]  ;;  %v11615_v56 = vor.u32 %v12600_v16, %v11614_v15  ;;  %v12616_v17 = vld [vmem:[#allocation9 + $0xf4] sm:$0xf0]  ;;  %v11616_v30 = vld [vmem:[#allocation9 + $0x78] sm:$0xf0] }
 0x52e   : > { %v11679_v50 = vor.u32 %v12616_v17, %v11678_v61  ;;  %v11619_v20 = vor.u32 %v12599_v35, %v11616_v30  ;;  %v12615_v26 = vld [vmem:[#allocation9 + $0xf4] sm:$0xf]  ;;  %v11680_v18 = vld [vmem:[#allocation9 + $0xf8] sm:$0xf0]  ;;  %v11606_v23 = vld [vmem:[#allocation9 + $0x60] sm:$0xf] }
 0x52f   : > { %7777 = vmatpush.bf16.msra.mxu0 %v11615_v56  ;;  %v11683_v47 = vor.u32 %v12615_v26, %v11680_v18  ;;  %v12598_v28 = vld [vmem:[#allocation9 + $0x64] sm:$0xf0]  ;;  %v11670_v40 = vld [vmem:[#allocation9 + $0xe0] sm:$0xf]  ;;  %v12597_v60 = vld [vmem:[#allocation9 + $0x64] sm:$0xf] }
 0x530   : > { %v12614_v9 = vld [vmem:[#allocation9 + $0xe4] sm:$0xf0]  ;;  %7790 = vmatpush.bf16.msra.mxu1 %v11679_v50  ;;  %7803 = vmatpush.bf16.msra.mxu2 %v11619_v20  ;;  %v11607_v32 = vor.u32 %v12598_v28, %v11606_v23  ;;  %v11608_v19 = vld [vmem:[#allocation9 + $0x68] sm:$0xf0]  ;;  %v12613_v57 = vld [vmem:[#allocation9 + $0xe4] sm:$0xf] }
 0x531   : > { %v11671_v63 = vor.u32 %v12614_v9, %v11670_v40  ;;  %7816 = vmatpush.bf16.msra.mxu3 %v11683_v47  ;;  %v11611_v29 = vor.u32 %v12597_v60, %v11608_v19  ;;  %v11672_v45 = vld [vmem:[#allocation9 + $0xe8] sm:$0xf0]  ;;  %v11598_v37 = vld [vmem:[#allocation9 + $0x50] sm:$0xf]  ;;  %v12596_v46 = vld [vmem:[#allocation9 + $0x54] sm:$0xf0] }
 0x532   : > { %v11675_v38 = vor.u32 %v12613_v57, %v11672_v45  ;;  %v11662_v22 = vld [vmem:[#allocation9 + $0xd0] sm:$0xf]  ;;  %v12612_v51 = vld [vmem:[#allocation9 + $0xd4] sm:$0xf0]  ;;  %v12595_v42 = vld [vmem:[#allocation9 + $0x54] sm:$0xf]  ;;  %v11599_v55 = vor.u32 %v12596_v46, %v11598_v37 }
 0x533   : > { %7778 = vmatpush.bf16.msra.mxu0 %v11607_v32  ;;  %v11600_v58 = vld [vmem:[#allocation9 + $0x58] sm:$0xf0]  ;;  %v12611_v25 = vld [vmem:[#allocation9 + $0xd4] sm:$0xf]  ;;  %v11663_v43 = vor.u32 %v12612_v51, %v11662_v22  ;;  %v11590_v41 = vld [vmem:[#allocation9 + $0x40] sm:$0xf] }
 0x534   : > { %v11664_v52 = vld [vmem:[#allocation9 + $0xd8] sm:$0xf0]  ;;  %7791 = vmatpush.bf16.msra.mxu1 %v11671_v63  ;;  %7804 = vmatpush.bf16.msra.mxu2 %v11611_v29  ;;  %v11603_v3 = vor.u32 %v12595_v42, %v11600_v58  ;;  %v12594_v44 = vld [vmem:[#allocation9 + $0x44] sm:$0xf0]  ;;  %v11654_v49 = vld [vmem:[#allocation9 + $0xc0] sm:$0xf] }
 0x535   : > { %7817 = vmatpush.bf16.msra.mxu3 %v11675_v38  ;;  %v11667_v53 = vor.u32 %v12611_v25, %v11664_v52  ;;  %v12610_v31 = vld [vmem:[#allocation9 + $0xc4] sm:$0xf0]  ;;  %v12593_v27 = vld [vmem:[#allocation9 + $0x44] sm:$0xf]  ;;  %v11592_v54 = vld [vmem:[#allocation9 + $0x48] sm:$0xf0]  ;;  %v11591_v2 = vor.u32 %v12594_v44, %v11590_v41 }
 0x536   : > { %v12609_v36 = vld [vmem:[#allocation9 + $0xc4] sm:$0xf]  ;;  %v11656_v21 = vld [vmem:[#allocation9 + $0xc8] sm:$0xf0]  ;;  %v11655_v0 = vor.u32 %v12610_v31, %v11654_v49  ;;  %v11595_v34 = vor.u32 %v12593_v27, %v11592_v54  ;;  %v11582_v10 = vld [vmem:[#allocation9 + $0x30] sm:$0xf] }
 0x537   : > { %7779 = vmatpush.bf16.msra.mxu0 %v11599_v55  ;;  %v12592_v11 = vld [vmem:[#allocation9 + $0x34] sm:$0xf0]  ;;  %v11646_v13 = vld [vmem:[#allocation9 + $0xb0] sm:$0xf]  ;;  %v11659_v1 = vor.u32 %v12609_v36, %v11656_v21  ;;  %v12591_v8 = vld [vmem:[#allocation9 + $0x34] sm:$0xf] }
 0x538   : > { %7792 = vmatpush.bf16.msra.mxu1 %v11663_v43  ;;  %7805 = vmatpush.bf16.msra.mxu2 %v11603_v3  ;;  %v12608_v6 = vld [vmem:[#allocation9 + $0xb4] sm:$0xf0]  ;;  %v11584_v59 = vld [vmem:[#allocation9 + $0x38] sm:$0xf0]  ;;  %v12607_v5 = vld [vmem:[#allocation9 + $0xb4] sm:$0xf]  ;;  %v11583_v39 = vor.u32 %v12592_v11, %v11582_v10 }
 0x539   : > { %7818 = vmatpush.bf16.msra.mxu3 %v11667_v53  ;;  %v11648_v14 = vld [vmem:[#allocation9 + $0xb8] sm:$0xf0]  ;;  %v11647_v24 = vor.u32 %v12608_v6, %v11646_v13  ;;  %v11587_v7 = vor.u32 %v12591_v8, %v11584_v59  ;;  %v11574_v62 = vld [vmem:[#allocation9 + $0x20] sm:$0xf]  ;;  %v12590_v12 = vld [vmem:[#allocation9 + $0x24] sm:$0xf0] }
 0x53a   : > { %v11638_v48 = vld [vmem:[#allocation9 + $0xa0] sm:$0xf]  ;;  %v11651_v4 = vor.u32 %v12607_v5, %v11648_v14  ;;  %v12606_v33 = vld [vmem:[#allocation9 + $0xa4] sm:$0xf0]  ;;  %v12589_v15 = vld [vmem:[#allocation9 + $0x24] sm:$0xf]  ;;  %v11575_v17 = vor.u32 %v12590_v12, %v11574_v62 }
 0x53b   : > { %7780 = vmatpush.bf16.msra.mxu0 %v11591_v2  ;;  %v11576_v16 = vld [vmem:[#allocation9 + $0x28] sm:$0xf0]  ;;  %v12605_v61 = vld [vmem:[#allocation9 + $0xa4] sm:$0xf]  ;;  %v11566_v35 = vld [vmem:[#allocation9 + $0x10] sm:$0xf]  ;;  %v11639_v50 = vor.u32 %v12606_v33, %v11638_v48 }
 0x53c   : > { %7793 = vmatpush.bf16.msra.mxu1 %v11655_v0  ;;  %7806 = vmatpush.bf16.msra.mxu2 %v11595_v34  ;;  %v11640_v56 = vld [vmem:[#allocation9 + $0xa8] sm:$0xf0]  ;;  %v12588_v30 = vld [vmem:[#allocation9 + $0x14] sm:$0xf0]  ;;  %v11579_v20 = vor.u32 %v12589_v15, %v11576_v16  ;;  %v11630_v26 = vld [vmem:[#allocation9 + $0x90] sm:$0xf] }
 0x53d   : > { %7819 = vmatpush.bf16.msra.mxu3 %v11659_v1  ;;  %v12604_v18 = vld [vmem:[#allocation9 + $0x94] sm:$0xf0]  ;;  %v12587_v23 = vld [vmem:[#allocation9 + $0x14] sm:$0xf]  ;;  %v11643_v47 = vor.u32 %v12605_v61, %v11640_v56  ;;  %v11568_v28 = vld [vmem:[#allocation9 + $0x18] sm:$0xf0]  ;;  %v11567_v60 = vor.u32 %v12588_v30, %v11566_v35 }
 0x53e   : > { %v12603_v40 = vld [vmem:[#allocation9 + $0x94] sm:$0xf]  ;;  %v7569_v9 = vld [vmem:[#allocation2] sm:$0xf]  ;;  %v11558_v19 = vld [vmem:[#allocation9] sm:$0xf]  ;;  %v11631_v57 = vor.u32 %v12604_v18, %v11630_v26  ;;  %v11571_v29 = vor.u32 %v12587_v23, %v11568_v28 }
 0x53f   : > { %7781 = vmatpush.bf16.msra.mxu0 %v11583_v39  ;;  %v11632_v32 = vld [vmem:[#allocation9 + $0x98] sm:$0xf0]  ;;  %v7570_v63 = vmax.f32 %v7569_v9, 0.0  ;;  %v12586_v45 = vld [vmem:[#allocation9 + $0x4] sm:$0xf0]  ;;  %vm7849_vm2 = vcmask 1024  }
 0x540   : > { %7794 = vmatpush.bf16.msra.mxu1 %v11647_v24  ;;  %7807 = vmatpush.bf16.msra.mxu2 %v11587_v7  ;;  %v11622_v37 = vld [vmem:[#allocation9 + $0x80] sm:$0xf]  ;;  %v11635_v46 = vor.u32 %v12603_v40, %v11632_v32  ;;  %v12602_v38 = vld [vmem:[#allocation9 + $0x84] sm:$0xf0]  ;;  %v12585_v22 = vld [vmem:[#allocation9 + $0x4] sm:$0xf]  ;;  %v11559_v58 = vor.u32 %v12586_v45, %v11558_v19 }
 0x541   : > { %7820 = vmatpush.bf16.msra.mxu3 %v11651_v4  ;;  %7572 = vst [vmem:[#allocation1] ss:$4 sm:$0xff] %v7570_v63  ;;  %v11560_v51 = vld [vmem:[#allocation9 + $0x8] sm:$0xf0]  ;;  %v12601_v42 = vld [vmem:[#allocation9 + $0x84] sm:$0xf]  ;;  %v11623_v25 = vor.u32 %v12602_v38, %v11622_v37 }
 0x542   : > { %v11624_v55 = vld [vmem:[#allocation9 + $0x88] sm:$0xf0]  ;;  %v11563_v52 = vor.u32 %v12585_v22, %v11560_v51  ;;  %v7611_v53 = vld [vmem:[#allocation11] sm:$0x3]  ;;  %v7831_v2 = vld [vmem:[#allocation12] sm:$0x3] }
 0x543   : > { %7782 = vmatpush.bf16.msra.mxu0 %v11575_v17  ;;  %v11627_v43 = vor.u32 %v12601_v42, %v11624_v55  ;;  %v7613_v31 = vperm.slane %v7611_v53, 0  ;;  %v7614_v0 = vperm.slane %v7611_v53, 1  ;;  %v7833_v10 = vperm.slane %v7831_v2, 0  ;;  %v12704_v33 = vld [vmem:[#allocation3] ss:$0 sm:$0xff] }
 0x544   : > { %7795 = vmatpush.bf16.msra.mxu1 %v11639_v50  ;;  %7808 = vmatpush.bf16.msra.mxu2 %v11579_v20  ;;  %v7834_v5 = vperm.slane %v7831_v2, 1 }
 0x545   : > { %7821 = vmatpush.bf16.msra.mxu3 %v11643_v47 }
 0x547   : > { %7783 = vmatpush.bf16.msra.mxu0 %v11567_v60 }
 0x548   : > { %7796 = vmatpush.bf16.msra.mxu1 %v11631_v57  ;;  %7809 = vmatpush.bf16.msra.mxu2 %v11571_v29  ;;  %v7573_v3 = vld.sshfl [vmem:[#allocation1] sm:$0xff pattern:$0x73625140]  ;;  %v7574_v41 = vld.sshfl [vmem:[#allocation1 + $0x8] sm:$0xff pattern:$0x73625140] }
 0x549   : > { %7822 = vmatpush.bf16.msra.mxu3 %v11635_v46  ;;  %v7577_v44 = vpack.c.bf16 %v7573_v3, %v7573_v3  ;;  %v7578_v49 = vpack.c.bf16 %v7574_v41, %v7574_v41 }
 0x54b   : > { %7784 = vmatpush.bf16.msra.mxu0 %v11559_v58 }
 0x54c   : > { %7797 = vmatpush.bf16.msra.mxu1 %v11623_v25  ;;  %7810 = vmatpush.bf16.msra.mxu2 %v11563_v52 }
 0x54d   : > { %7823 = vmatpush.bf16.msra.mxu3 %v11627_v43 }
 0x54e   : > { %7785 = vmatmul.bf16.vlgmr.msra.gmra.mxu0 %v7577_v44 }
 0x54f   : > { %7798 = vmatmul.bf16.vlgmr.msra.gmra.mxu1 %v7578_v49  ;;  %7811 = vmatmul.bf16.vlgmr.msra.gmra.mxu2 %v7577_v44 }
 0x550   : > { %7824 = vmatmul.bf16.vlgmr.msra.gmra.mxu3 %v7578_v49 }
 0x5cb   : > { %v7786_v27 = vpop.f32.mrf.mxu0 }
 0x5cc   : > { %v7787_v54 = vadd.f32 %v7786_v27, %v7613_v31  ;;  %v7799_v36 = vpop.f32.mrf.mxu1 }
 0x5ce   : > { %v7800_v21 = vadd.f32 %v7799_v36, %v7787_v54 }
 0x5d0   : > { %v7829_v34 = vmax.f32 %v7800_v21, 0.0 }
 0x5d2   : > { %v7812_v11 = vpop.f32.mrf.mxu2  ;;  %v7837_v14 = vmul.f32 %v7833_v10, %v7829_v34 }
 0x5d3   : > { %v7813_v13 = vadd.f32 %v7812_v11, %v7614_v0  ;;  %v7825_v1 = vpop.f32.mrf.mxu3  ;;  %v7788_v6 = vpop.f32.mrf.mxu0 }
 0x5d4   : > { %v7801_v8 = vpop.f32.mrf.mxu1  ;;  %v7839_v7 = vsel %vm7560_vm1, %v7837_v14, 0.0 }
 0x5d5   : > { %v7826_v59 = vadd.f32 %v7825_v1, %v7813_v13 }
 0x5d7   : > { %v7830_v39 = vmax.f32 %v7826_v59, 0.0 }
 0x5d9   : > { %v7838_v24 = vmul.f32 %v7834_v5, %v7830_v39 }
 0x5da   : > { %v7814_v62 = vpop.f32.mrf.mxu2 }
 0x5db   : > { %v7827_v12 = vpop.f32.mrf.mxu3  ;;  %v7840_v48 = vsel %vm7560_vm1, %v7838_v24, 0.0 }
 0x5dc   : > { %v7841_v4 = vadd.f32 %v7840_v48, %v7839_v7 }
 0x5de   : > { %7842 = vadd.xlane.f32.xlu0 %v7841_v4 }
 0x651   : > { %v7843_v15 = vpop.xlane.xlu0 %7842 }
 0x652   : > { %v7848_v16 = vadd.f32 %v12704_v33, %v7843_v15 }
 0x654   : > { %7850 = vst.msk [vmem:[%s15325_s8] sm:$0x3] %vm7849_vm2, %v7848_v16 }
 0x655 PF: > { %s15404_s22 = sld [smem:[#allocation18_spill]]  ;;  %p23_p9 = scmp.ge.s32.totalorder %s13021_s11, 4  }
 0x656   : > { %s15405_s29 = smov %s12930_s30  ;;  %s15406_s30 = smov %s12934_s9 }
 0x657   : > { %s15408_s10 = smov %s13021_s11  ;;  %25 = sbr.rel (!%p23_p9) target bundleno = 9 (0x9), region = 125 }
 0x65b   : > { %s15407_s9 = smov %s15404_s22 }
 0x65c   :  { %7862 = vsyncpa [#allocation5], 1 }
 0x65d   :  { %7864 = vsyncpa [#allocation5 + $0x1], 1 }
 0x65e   :  { %7865 = vsyncpa [#allocation7], 1 }
 0x65f   :  { %7867 = vsyncpa [#allocation7 + $0x1], 1 }
 0x660   :  { %7868 = vsyncpa [#allocation10], 1 }
 0x661   :  { %7869 = vsyncpa [#allocation13], 1 }

</bundles_post_ra>
